<compile_context>
chip_gen: v7x
topology: tpu7x:2x2x1
jax: 0.10.0
libtpu: 0.0.40
codegen_flags: <defaults>
</compile_context>

<pallas_src>
import jax
import jax.numpy as jnp
import numpy as np
from jax.experimental import pallas as pl
from jax.experimental.pallas import tpu as pltpu

BN_EPS = 1e-5


def _rp8(n):
    return ((n + 7) // 8) * 8


# --------------------------------------------------------------------------
# Fused encoder kernel (factory closes over the static layer configuration).
# --------------------------------------------------------------------------
def _make_encoder_kernel(H, W, in_ch, channels, num_bits, num_blocks):
    Wp = W + 2                               # padded row width
    PWB = (H + 3) * Wp                       # padded+slack flattened spatial size
    N = H * Wp                               # flattened conv-output grid (junk at x>=W)
    INT0 = Wp + 1                            # flat index of interior pixel (0,0) -> padded (1,1)

    in_ch_p = _rp8(in_ch)
    ch_p = _rp8(channels)
    cin_cat_p = _rp8(num_bits + channels + in_ch)
    n_bn = num_blocks + 1                    # ConvBNReLU layers total

    def kernel(*refs):
        x_ref, m_ref, mask_ref = refs[0:3]
        wb = refs[3:3 + 2 * n_bn]
        wf_ref, bf_ref, o_ref, pad_ref = refs[3 + 2 * n_bn:]

        # Zero the whole activation buffer each step: halos / never-written
        # slack must read as zero.  (Cheap here; do NOT gate on program_id==0,
        # each megacore owns its own scratch.)
        pad_ref[...] = jnp.zeros_like(pad_ref)

        # Write mask over the conv-output grid: zero at the wrap columns
        # (x in {W, W+1}) so halo positions of pad_ref stay zero when stored.
        wmask = mask_ref[:, INT0:INT0 + N]                       # (1, N)

        def conv3x3(view, w_ref, b_ref):
            # Sum of 9 per-tap (Cout, Cin) @ (Cin, N) MXU dots; lane axis = N.
            acc = None
            for t in range(9):
                dy, dx = divmod(t, 3)
                off = dy * Wp + dx
                p = jnp.dot(w_ref[t], view(off),
                            precision=jax.lax.Precision.HIGHEST,
                            preferred_element_type=jnp.float32)
                acc = p if acc is None else acc + p
            return acc + b_ref[...]                              # (Cout,1) lane-broadcast

        def x_view(off):                                         # (in_ch_p, N)
            return x_ref[0, :, off:off + N]

        def pad_view(cin_p):
            def view(off):                                       # (cin_p, N)
                return pad_ref[0:cin_p, off:off + N]
            return view

        def store_act(pre, c0):
            act = jnp.maximum(pre, 0.0) * wmask                  # masked ReLU
            pad_ref[c0:c0 + pre.shape[0], INT0:INT0 + N] = act

        # ---- conv_bns trunk -------------------------------------------------
        for li in range(num_blocks):
            view = x_view if li == 0 else pad_view(ch_p)
            pre = conv3x3(view, wb[2 * li], wb[2 * li + 1])
            # last trunk layer writes straight into its concat slot
            c0 = 0 if li + 1 < num_blocks else num_bits
            store_act(pre, c0)

        # ---- concat([message, encoded, x], channel axis) ----------------------
        pad_ref[0:num_bits, :] = m_ref[0] * mask_ref[...]        # message map, zero halo
        pad_ref[num_bits + channels:num_bits + channels + in_ch_p, :] = x_ref[0]

        # ---- after_concat ConvBNReLU -----------------------------------------
        pre = conv3x3(pad_view(cin_cat_p), wb[2 * num_blocks], wb[2 * num_blocks + 1])
        y = jnp.maximum(pre, 0.0)                                # (channels, N)

        # ---- final 1x1 conv + tanh -------------------------------------------
        out = jnp.dot(wf_ref[...], y,
                      precision=jax.lax.Precision.HIGHEST,
                      preferred_element_type=jnp.float32) + bf_ref[...]
        o_ref[0] = jnp.tanh(out)                                 # (in_ch, N)

    return kernel


# --------------------------------------------------------------------------
# Wrapper: one pallas_call for the whole forward pass.  NCHW in, NCHW out.
# --------------------------------------------------------------------------
def hidden_encoder_forward(x_nchw, m, params):
    """x_nchw: (B, in_ch, H, W); m: (B, num_bits) -> watermarked image (B, in_ch, H, W)."""
    conv_bn_layers, (wf_t, bf) = params
    B, in_ch, H, W = x_nchw.shape
    num_bits = m.shape[1]
    channels = conv_bn_layers[0][0].shape[1]
    num_blocks = len(conv_bn_layers) - 1          # last entry is after_concat

    Wp = W + 2
    PWB = (H + 3) * Wp
    N = H * Wp
    in_ch_p = _rp8(in_ch)
    ch_p = _rp8(channels)
    cin_cat_p = _rp8(num_bits + channels + in_ch)
    c_buf = max(ch_p, num_bits + channels, num_bits + channels + in_ch_p, cin_cat_p)

    # Channels-first, spatially zero-padded, flattened (lane-dense) input.
    xpad = jnp.pad(x_nchw.astype(jnp.float32),
                   ((0, 0), (0, in_ch_p - in_ch), (1, 2), (1, 1)))
    x_flat = xpad.reshape(B, in_ch_p, PWB)
    m3 = m.astype(jnp.float32).reshape(B, num_bits, 1)

    # Interior mask over the padded flattened grid (1 inside the image).
    idx = np.arange(PWB)
    row, col = idx // Wp, idx % Wp
    interior = ((row >= 1) & (row <= H) & (col >= 1) & (col <= W)).astype(np.float32)
    mask = jnp.asarray(interior.reshape(1, PWB))

    kernel = _make_encoder_kernel(H, W, in_ch, channels, num_bits, num_blocks)

    operands = [x_flat, m3, mask]
    in_specs = [
        pl.BlockSpec((1, in_ch_p, PWB), lambda b: (b, 0, 0)),
        pl.BlockSpec((1, num_bits, 1), lambda b: (b, 0, 0)),
        pl.BlockSpec((1, PWB), lambda b: (0, 0)),
    ]
    for w_l, b_l in conv_bn_layers:
        operands += [w_l, b_l]
        in_specs += [pl.BlockSpec(w_l.shape, lambda b: (0, 0, 0)),
                     pl.BlockSpec(b_l.shape, lambda b: (0, 0))]
    operands += [wf_t, bf]
    in_specs += [pl.BlockSpec(wf_t.shape, lambda b: (0, 0)),
                 pl.BlockSpec(bf.shape, lambda b: (0, 0))]

    out_flat = pl.pallas_call(
        kernel,
        out_shape=jax.ShapeDtypeStruct((B, in_ch, N), jnp.float32),
        grid=(B,),
        in_specs=in_specs,
        out_specs=pl.BlockSpec((1, in_ch, N), lambda b: (b, 0, 0)),
        scratch_shapes=[pltpu.VMEM((c_buf, PWB), jnp.float32)],   # padded activations
        compiler_params=pltpu.CompilerParams(
            dimension_semantics=("parallel",)),
    )(*operands)

    # (B, in_ch, H*(W+2)) -> (B, in_ch, H, W): reshape + slice, no transpose.
    return out_flat.reshape(B, in_ch, H, Wp)[..., :W]


# --------------------------------------------------------------------------
# Parameter construction (deterministic, synthetic) with eval-mode BN folding.
# --------------------------------------------------------------------------
def _fold_conv_bn(w_hwio, b, gamma, beta, mean, var, cin_pad):
    """Fold BN(eval) into the conv; emit tap-major transposed weights
    (9, cout, cin_pad) (K zero-padded) plus a (cout, 1) bias."""
    s = gamma / jnp.sqrt(var + BN_EPS)                         # (cout,)
    w = w_hwio * s                                             # (3,3,cin,cout)
    bias = ((b - mean) * s + beta).reshape(-1, 1)              # (cout,1)
    kh, kw, cin, cout = w.shape
    w_t = jnp.transpose(w, (0, 1, 3, 2)).reshape(kh * kw, cout, cin)
    w_t = jnp.pad(w_t, ((0, 0), (0, 0), (0, cin_pad - cin)))
    return w_t, bias


def init_params(key, num_blocks, num_bits, channels, in_channels=3):
    cin_cat = channels + in_channels + num_bits
    cins = [in_channels] + [channels] * (num_blocks - 1) + [cin_cat]
    cpads = [_rp8(in_channels)] + [_rp8(channels)] * (num_blocks - 1) + [_rp8(cin_cat)]
    conv_bn_layers = []
    for li, (cin, cp) in enumerate(zip(cins, cpads)):
        k = jax.random.fold_in(key, li)
        k_w, k_b, k_g, k_be, k_m, k_v = jax.random.split(k, 6)
        w = 0.1 * jax.random.normal(k_w, (3, 3, cin, channels), jnp.float32)
        b = 0.1 * jax.random.normal(k_b, (channels,), jnp.float32)
        gamma = jax.random.uniform(k_g, (channels,), jnp.float32, 0.5, 1.5)
        beta = 0.1 * jax.random.normal(k_be, (channels,), jnp.float32)
        mean = 0.1 * jax.random.normal(k_m, (channels,), jnp.float32)
        var = jax.random.uniform(k_v, (channels,), jnp.float32, 0.5, 1.5)
        conv_bn_layers.append(_fold_conv_bn(w, b, gamma, beta, mean, var, cp))
    # final 1x1 conv: channels -> in_channels (bias, no BN, no ReLU), transposed.
    kf = jax.random.fold_in(key, 1000)
    k_fw, k_fb = jax.random.split(kf)
    wf_t = 0.1 * jax.random.normal(k_fw, (in_channels, channels), jnp.float32)
    bf = 0.1 * jax.random.normal(k_fb, (in_channels, 1), jnp.float32)
    return conv_bn_layers, (wf_t, bf)


# --------------------------------------------------------------------------
# Pure-JAX reference (same folded parameters) for a correctness check.
# --------------------------------------------------------------------------
def reference_forward(x_nchw, m, params):
    conv_bn_layers, (wf_t, bf) = params
    x = jnp.transpose(x_nchw, (0, 2, 3, 1)).astype(jnp.float32)   # NHWC
    B, H, W, _ = x.shape
    num_bits = m.shape[1]

    def conv_bn_relu(h, w_taps, bias):
        cin = h.shape[-1]
        cout = w_taps.shape[1]
        w = jnp.transpose(w_taps.reshape(3, 3, cout, -1)[..., :cin], (0, 1, 3, 2))  # HWIO
        y = jax.lax.conv_general_dilated(
            h, w, window_strides=(1, 1), padding="SAME",
            dimension_numbers=("NHWC", "HWIO", "NHWC"),
            precision=jax.lax.Precision.HIGHEST)
        return jnp.maximum(y + bias.reshape(1, 1, 1, -1), 0.0)

    h = x
    for w_taps, bias in conv_bn_layers[:-1]:
        h = conv_bn_relu(h, w_taps, bias)
    m_map = jnp.broadcast_to(m.astype(jnp.float32)[:, None, None, :],
                             (B, H, W, num_bits))
    cat = jnp.concatenate([m_map, h, x], axis=-1)
    h = conv_bn_relu(cat, conv_bn_layers[-1][0], conv_bn_layers[-1][1])
    out = jnp.einsum("bhwc,oc->bhwo", h, wf_t,
                     precision=jax.lax.Precision.HIGHEST) + bf.reshape(1, 1, 1, -1)
    return jnp.transpose(jnp.tanh(out), (0, 3, 1, 2))


if __name__ == "__main__":
    key = jax.random.PRNGKey(0)
    B, in_channels, H, W = 2, 3, 16, 16
    num_blocks, channels, num_bits = 3, 16, 16

    k_x, k_m, k_p = jax.random.split(key, 3)
    x = jax.random.normal(k_x, (B, in_channels, H, W), jnp.float32)        # NCHW image
    m = jax.random.bernoulli(k_m, 0.5, (B, num_bits)).astype(jnp.float32)  # message bits

    params = init_params(k_p, num_blocks=num_blocks, num_bits=num_bits,
                         channels=channels, in_channels=in_channels)

    fwd = jax.jit(hidden_encoder_forward)
    x_w = jax.block_until_ready(fwd(x, m, params))

    assert x_w.shape == (B, in_channels, H, W), x_w.shape
    assert bool(jnp.all(jnp.isfinite(x_w)))

    ref = reference_forward(x, m, params)
    max_err = float(jnp.max(jnp.abs(x_w - ref)))
    assert max_err < 1e-2, f"mismatch vs reference: {max_err}"

    print("KERNEL_OK")
</pallas_src>

<mosaic_0001>
module attributes {stable_mosaic.version = 11 : i64} {
  func.func @kernel(%arg0: i32, %arg1: memref<1x8x342xf32, #tpu.memory_space<vmem>>, %arg2: memref<1x16x1xf32, #tpu.memory_space<vmem>>, %arg3: memref<1x342xf32, #tpu.memory_space<vmem>>, %arg4: memref<9x16x8xf32, #tpu.memory_space<vmem>>, %arg5: memref<16x1xf32, #tpu.memory_space<vmem>>, %arg6: memref<9x16x16xf32, #tpu.memory_space<vmem>>, %arg7: memref<16x1xf32, #tpu.memory_space<vmem>>, %arg8: memref<9x16x16xf32, #tpu.memory_space<vmem>>, %arg9: memref<16x1xf32, #tpu.memory_space<vmem>>, %arg10: memref<9x16x40xf32, #tpu.memory_space<vmem>>, %arg11: memref<16x1xf32, #tpu.memory_space<vmem>>, %arg12: memref<3x16xf32, #tpu.memory_space<vmem>>, %arg13: memref<3x1xf32, #tpu.memory_space<vmem>>, %arg14: memref<1x3x288xf32, #tpu.memory_space<vmem>>, %arg15: memref<40x342xf32, #tpu.memory_space<vmem>>) attributes {dimension_semantics = [#tpu.dimension_semantics<parallel>], iteration_bounds = array<i64: 2>, scalar_prefetch = 0 : i64, scratch_operands = 1 : i64, tpu.core_type = #tpu.core_type<tc>, window_params = [{transform_indices = @transform_0, window_bounds = array<i64: 1, 8, 342>}, {transform_indices = @transform_1, window_bounds = array<i64: 1, 16, 1>}, {pipeline_mode = #tpu.pipeline_mode<synchronous>, transform_indices = @transform_2, window_bounds = array<i64: 1, 342>}, {pipeline_mode = #tpu.pipeline_mode<synchronous>, transform_indices = @transform_3, window_bounds = array<i64: 9, 16, 8>}, {pipeline_mode = #tpu.pipeline_mode<synchronous>, transform_indices = @transform_4, window_bounds = array<i64: 16, 1>}, {pipeline_mode = #tpu.pipeline_mode<synchronous>, transform_indices = @transform_5, window_bounds = array<i64: 9, 16, 16>}, {pipeline_mode = #tpu.pipeline_mode<synchronous>, transform_indices = @transform_6, window_bounds = array<i64: 16, 1>}, {pipeline_mode = #tpu.pipeline_mode<synchronous>, transform_indices = @transform_7, window_bounds = array<i64: 9, 16, 16>}, {pipeline_mode = #tpu.pipeline_mode<synchronous>, transform_indices = @transform_8, window_bounds = array<i64: 16, 1>}, {pipeline_mode = #tpu.pipeline_mode<synchronous>, transform_indices = @transform_9, window_bounds = array<i64: 9, 16, 40>}, {pipeline_mode = #tpu.pipeline_mode<synchronous>, transform_indices = @transform_10, window_bounds = array<i64: 16, 1>}, {pipeline_mode = #tpu.pipeline_mode<synchronous>, transform_indices = @transform_11, window_bounds = array<i64: 3, 16>}, {pipeline_mode = #tpu.pipeline_mode<synchronous>, transform_indices = @transform_12, window_bounds = array<i64: 3, 1>}, {transform_indices = @transform_13, window_bounds = array<i64: 1, 3, 288>}]} {
    %cst = arith.constant 0.000000e+00 : f32
    %0 = vector.broadcast %cst : f32 to vector<40x342xf32>
    %c0 = arith.constant 0 : index
    %c0_0 = arith.constant 0 : index
    %1 = vector.load %arg15[%c0, %c0_0] : memref<40x342xf32, #tpu.memory_space<vmem>>, vector<40x342xf32>
    tpu.vector_store %arg15[%c0, %c0_0], %0 {strides = array<i32>} : memref<40x342xf32, #tpu.memory_space<vmem>>, vector<40x342xf32>,
    %c0_1 = arith.constant 0 : index
    %c19 = arith.constant 19 : index
    %2 = vector.load %arg3[%c0_1, %c19] : memref<1x342xf32, #tpu.memory_space<vmem>>, vector<1x288xf32>
    %c0_2 = arith.constant 0 : index
    %c0_3 = arith.constant 0 : index
    %c0_4 = arith.constant 0 : index
    %3 = vector.load %arg4[%c0_2, %c0_3, %c0_4] : memref<9x16x8xf32, #tpu.memory_space<vmem>>, vector<1x16x8xf32>
    %4 = vector.shape_cast %3 : vector<1x16x8xf32> to vector<16x8xf32>
    %c0_5 = arith.constant 0 : index
    %c0_6 = arith.constant 0 : index
    %c0_7 = arith.constant 0 : index
    %5 = vector.load %arg1[%c0_5, %c0_6, %c0_7] : memref<1x8x342xf32, #tpu.memory_space<vmem>>, vector<1x8x288xf32>
    %6 = vector.shape_cast %5 : vector<1x8x288xf32> to vector<8x288xf32>
    %cst_8 = arith.constant dense<0.000000e+00> : vector<16x288xf32>
    %7 = tpu.matmul %4, %6, %cst_8 {dimension_numbers = #tpu.dot_dimension_numbers<[1], [0], [0], [1], [0, 0, 1, 1], [], []>, precision = #tpu.contract_precision<fp32>} : vector<16x8xf32>, vector<8x288xf32>, vector<16x288xf32> -> vector<16x288xf32>
    %c1 = arith.constant 1 : index
    %c0_9 = arith.constant 0 : index
    %c0_10 = arith.constant 0 : index
    %8 = vector.load %arg4[%c1, %c0_9, %c0_10] : memref<9x16x8xf32, #tpu.memory_space<vmem>>, vector<1x16x8xf32>
    %9 = vector.shape_cast %8 : vector<1x16x8xf32> to vector<16x8xf32>
    %c0_11 = arith.constant 0 : index
    %c0_12 = arith.constant 0 : index
    %c1_13 = arith.constant 1 : index
    %10 = vector.load %arg1[%c0_11, %c0_12, %c1_13] : memref<1x8x342xf32, #tpu.memory_space<vmem>>, vector<1x8x288xf32>
    %11 = vector.shape_cast %10 : vector<1x8x288xf32> to vector<8x288xf32>
    %cst_14 = arith.constant dense<0.000000e+00> : vector<16x288xf32>
    %12 = tpu.matmul %9, %11, %cst_14 {dimension_numbers = #tpu.dot_dimension_numbers<[1], [0], [0], [1], [0, 0, 1, 1], [], []>, precision = #tpu.contract_precision<fp32>} : vector<16x8xf32>, vector<8x288xf32>, vector<16x288xf32> -> vector<16x288xf32>
    %13 = arith.addf %7, %12 : vector<16x288xf32>
    %c2 = arith.constant 2 : index
    %c0_15 = arith.constant 0 : index
    %c0_16 = arith.constant 0 : index
    %14 = vector.load %arg4[%c2, %c0_15, %c0_16] : memref<9x16x8xf32, #tpu.memory_space<vmem>>, vector<1x16x8xf32>
    %15 = vector.shape_cast %14 : vector<1x16x8xf32> to vector<16x8xf32>
    %c0_17 = arith.constant 0 : index
    %c0_18 = arith.constant 0 : index
    %c2_19 = arith.constant 2 : index
    %16 = vector.load %arg1[%c0_17, %c0_18, %c2_19] : memref<1x8x342xf32, #tpu.memory_space<vmem>>, vector<1x8x288xf32>
    %17 = vector.shape_cast %16 : vector<1x8x288xf32> to vector<8x288xf32>
    %cst_20 = arith.constant dense<0.000000e+00> : vector<16x288xf32>
    %18 = tpu.matmul %15, %17, %cst_20 {dimension_numbers = #tpu.dot_dimension_numbers<[1], [0], [0], [1], [0, 0, 1, 1], [], []>, precision = #tpu.contract_precision<fp32>} : vector<16x8xf32>, vector<8x288xf32>, vector<16x288xf32> -> vector<16x288xf32>
    %19 = arith.addf %13, %18 : vector<16x288xf32>
    %c3 = arith.constant 3 : index
    %c0_21 = arith.constant 0 : index
    %c0_22 = arith.constant 0 : index
    %20 = vector.load %arg4[%c3, %c0_21, %c0_22] : memref<9x16x8xf32, #tpu.memory_space<vmem>>, vector<1x16x8xf32>
    %21 = vector.shape_cast %20 : vector<1x16x8xf32> to vector<16x8xf32>
    %c0_23 = arith.constant 0 : index
    %c0_24 = arith.constant 0 : index
    %c18 = arith.constant 18 : index
    %22 = vector.load %arg1[%c0_23, %c0_24, %c18] : memref<1x8x342xf32, #tpu.memory_space<vmem>>, vector<1x8x288xf32>
    %23 = vector.shape_cast %22 : vector<1x8x288xf32> to vector<8x288xf32>
    %cst_25 = arith.constant dense<0.000000e+00> : vector<16x288xf32>
    %24 = tpu.matmul %21, %23, %cst_25 {dimension_numbers = #tpu.dot_dimension_numbers<[1], [0], [0], [1], [0, 0, 1, 1], [], []>, precision = #tpu.contract_precision<fp32>} : vector<16x8xf32>, vector<8x288xf32>, vector<16x288xf32> -> vector<16x288xf32>
    %25 = arith.addf %19, %24 : vector<16x288xf32>
    %c4 = arith.constant 4 : index
    %c0_26 = arith.constant 0 : index
    %c0_27 = arith.constant 0 : index
    %26 = vector.load %arg4[%c4, %c0_26, %c0_27] : memref<9x16x8xf32, #tpu.memory_space<vmem>>, vector<1x16x8xf32>
    %27 = vector.shape_cast %26 : vector<1x16x8xf32> to vector<16x8xf32>
    %c0_28 = arith.constant 0 : index
    %c0_29 = arith.constant 0 : index
    %c19_30 = arith.constant 19 : index
    %28 = vector.load %arg1[%c0_28, %c0_29, %c19_30] : memref<1x8x342xf32, #tpu.memory_space<vmem>>, vector<1x8x288xf32>
    %29 = vector.shape_cast %28 : vector<1x8x288xf32> to vector<8x288xf32>
    %cst_31 = arith.constant dense<0.000000e+00> : vector<16x288xf32>
    %30 = tpu.matmul %27, %29, %cst_31 {dimension_numbers = #tpu.dot_dimension_numbers<[1], [0], [0], [1], [0, 0, 1, 1], [], []>, precision = #tpu.contract_precision<fp32>} : vector<16x8xf32>, vector<8x288xf32>, vector<16x288xf32> -> vector<16x288xf32>
    %31 = arith.addf %25, %30 : vector<16x288xf32>
    %c5 = arith.constant 5 : index
    %c0_32 = arith.constant 0 : index
    %c0_33 = arith.constant 0 : index
    %32 = vector.load %arg4[%c5, %c0_32, %c0_33] : memref<9x16x8xf32, #tpu.memory_space<vmem>>, vector<1x16x8xf32>
    %33 = vector.shape_cast %32 : vector<1x16x8xf32> to vector<16x8xf32>
    %c0_34 = arith.constant 0 : index
    %c0_35 = arith.constant 0 : index
    %c20 = arith.constant 20 : index
    %34 = vector.load %arg1[%c0_34, %c0_35, %c20] : memref<1x8x342xf32, #tpu.memory_space<vmem>>, vector<1x8x288xf32>
    %35 = vector.shape_cast %34 : vector<1x8x288xf32> to vector<8x288xf32>
    %cst_36 = arith.constant dense<0.000000e+00> : vector<16x288xf32>
    %36 = tpu.matmul %33, %35, %cst_36 {dimension_numbers = #tpu.dot_dimension_numbers<[1], [0], [0], [1], [0, 0, 1, 1], [], []>, precision = #tpu.contract_precision<fp32>} : vector<16x8xf32>, vector<8x288xf32>, vector<16x288xf32> -> vector<16x288xf32>
    %37 = arith.addf %31, %36 : vector<16x288xf32>
    %c6 = arith.constant 6 : index
    %c0_37 = arith.constant 0 : index
    %c0_38 = arith.constant 0 : index
    %38 = vector.load %arg4[%c6, %c0_37, %c0_38] : memref<9x16x8xf32, #tpu.memory_space<vmem>>, vector<1x16x8xf32>
    %39 = vector.shape_cast %38 : vector<1x16x8xf32> to vector<16x8xf32>
    %c0_39 = arith.constant 0 : index
    %c0_40 = arith.constant 0 : index
    %c36 = arith.constant 36 : index
    %40 = vector.load %arg1[%c0_39, %c0_40, %c36] : memref<1x8x342xf32, #tpu.memory_space<vmem>>, vector<1x8x288xf32>
    %41 = vector.shape_cast %40 : vector<1x8x288xf32> to vector<8x288xf32>
    %cst_41 = arith.constant dense<0.000000e+00> : vector<16x288xf32>
    %42 = tpu.matmul %39, %41, %cst_41 {dimension_numbers = #tpu.dot_dimension_numbers<[1], [0], [0], [1], [0, 0, 1, 1], [], []>, precision = #tpu.contract_precision<fp32>} : vector<16x8xf32>, vector<8x288xf32>, vector<16x288xf32> -> vector<16x288xf32>
    %43 = arith.addf %37, %42 : vector<16x288xf32>
    %c7 = arith.constant 7 : index
    %c0_42 = arith.constant 0 : index
    %c0_43 = arith.constant 0 : index
    %44 = vector.load %arg4[%c7, %c0_42, %c0_43] : memref<9x16x8xf32, #tpu.memory_space<vmem>>, vector<1x16x8xf32>
    %45 = vector.shape_cast %44 : vector<1x16x8xf32> to vector<16x8xf32>
    %c0_44 = arith.constant 0 : index
    %c0_45 = arith.constant 0 : index
    %c37 = arith.constant 37 : index
    %46 = vector.load %arg1[%c0_44, %c0_45, %c37] : memref<1x8x342xf32, #tpu.memory_space<vmem>>, vector<1x8x288xf32>
    %47 = vector.shape_cast %46 : vector<1x8x288xf32> to vector<8x288xf32>
    %cst_46 = arith.constant dense<0.000000e+00> : vector<16x288xf32>
    %48 = tpu.matmul %45, %47, %cst_46 {dimension_numbers = #tpu.dot_dimension_numbers<[1], [0], [0], [1], [0, 0, 1, 1], [], []>, precision = #tpu.contract_precision<fp32>} : vector<16x8xf32>, vector<8x288xf32>, vector<16x288xf32> -> vector<16x288xf32>
    %49 = arith.addf %43, %48 : vector<16x288xf32>
    %c8 = arith.constant 8 : index
    %c0_47 = arith.constant 0 : index
    %c0_48 = arith.constant 0 : index
    %50 = vector.load %arg4[%c8, %c0_47, %c0_48] : memref<9x16x8xf32, #tpu.memory_space<vmem>>, vector<1x16x8xf32>
    %51 = vector.shape_cast %50 : vector<1x16x8xf32> to vector<16x8xf32>
    %c0_49 = arith.constant 0 : index
    %c0_50 = arith.constant 0 : index
    %c38 = arith.constant 38 : index
    %52 = vector.load %arg1[%c0_49, %c0_50, %c38] : memref<1x8x342xf32, #tpu.memory_space<vmem>>, vector<1x8x288xf32>
    %53 = vector.shape_cast %52 : vector<1x8x288xf32> to vector<8x288xf32>
    %cst_51 = arith.constant dense<0.000000e+00> : vector<16x288xf32>
    %54 = tpu.matmul %51, %53, %cst_51 {dimension_numbers = #tpu.dot_dimension_numbers<[1], [0], [0], [1], [0, 0, 1, 1], [], []>, precision = #tpu.contract_precision<fp32>} : vector<16x8xf32>, vector<8x288xf32>, vector<16x288xf32> -> vector<16x288xf32>
    %55 = arith.addf %49, %54 : vector<16x288xf32>
    %c0_52 = arith.constant 0 : index
    %c0_53 = arith.constant 0 : index
    %56 = vector.load %arg5[%c0_52, %c0_53] : memref<16x1xf32, #tpu.memory_space<vmem>>, vector<16x1xf32>
    %57 = vector.broadcast %56 : vector<16x1xf32> to vector<16x288xf32>
    %58 = arith.addf %55, %57 : vector<16x288xf32>
    %cst_54 = arith.constant 0.000000e+00 : f32
    %59 = vector.broadcast %cst_54 : f32 to vector<16x288xf32>
    %60 = arith.maximumf %58, %59 : vector<16x288xf32>
    %61 = vector.broadcast %2 : vector<1x288xf32> to vector<16x288xf32>
    %62 = arith.mulf %60, %61 : vector<16x288xf32>
    %c0_55 = arith.constant 0 : index
    %c19_56 = arith.constant 19 : index
    %63 = vector.load %arg15[%c0_55, %c19_56] : memref<40x342xf32, #tpu.memory_space<vmem>>, vector<16x288xf32>
    tpu.vector_store %arg15[%c0_55, %c19_56], %62 {strides = array<i32>} : memref<40x342xf32, #tpu.memory_space<vmem>>, vector<16x288xf32>,
    %c0_57 = arith.constant 0 : index
    %c0_58 = arith.constant 0 : index
    %c0_59 = arith.constant 0 : index
    %64 = vector.load %arg6[%c0_57, %c0_58, %c0_59] : memref<9x16x16xf32, #tpu.memory_space<vmem>>, vector<1x16x16xf32>
    %65 = vector.shape_cast %64 : vector<1x16x16xf32> to vector<16x16xf32>
    %c0_60 = arith.constant 0 : index
    %c0_61 = arith.constant 0 : index
    %66 = vector.load %arg15[%c0_60, %c0_61] : memref<40x342xf32, #tpu.memory_space<vmem>>, vector<16x288xf32>
    %cst_62 = arith.constant dense<0.000000e+00> : vector<16x288xf32>
    %67 = tpu.matmul %65, %66, %cst_62 {dimension_numbers = #tpu.dot_dimension_numbers<[1], [0], [0], [1], [0, 0, 1, 1], [], []>, precision = #tpu.contract_precision<fp32>} : vector<16x16xf32>, vector<16x288xf32>, vector<16x288xf32> -> vector<16x288xf32>
    %c1_63 = arith.constant 1 : index
    %c0_64 = arith.constant 0 : index
    %c0_65 = arith.constant 0 : index
    %68 = vector.load %arg6[%c1_63, %c0_64, %c0_65] : memref<9x16x16xf32, #tpu.memory_space<vmem>>, vector<1x16x16xf32>
    %69 = vector.shape_cast %68 : vector<1x16x16xf32> to vector<16x16xf32>
    %c0_66 = arith.constant 0 : index
    %c1_67 = arith.constant 1 : index
    %70 = vector.load %arg15[%c0_66, %c1_67] : memref<40x342xf32, #tpu.memory_space<vmem>>, vector<16x288xf32>
    %cst_68 = arith.constant dense<0.000000e+00> : vector<16x288xf32>
    %71 = tpu.matmul %69, %70, %cst_68 {dimension_numbers = #tpu.dot_dimension_numbers<[1], [0], [0], [1], [0, 0, 1, 1], [], []>, precision = #tpu.contract_precision<fp32>} : vector<16x16xf32>, vector<16x288xf32>, vector<16x288xf32> -> vector<16x288xf32>
    %72 = arith.addf %67, %71 : vector<16x288xf32>
    %c2_69 = arith.constant 2 : index
    %c0_70 = arith.constant 0 : index
    %c0_71 = arith.constant 0 : index
    %73 = vector.load %arg6[%c2_69, %c0_70, %c0_71] : memref<9x16x16xf32, #tpu.memory_space<vmem>>, vector<1x16x16xf32>
    %74 = vector.shape_cast %73 : vector<1x16x16xf32> to vector<16x16xf32>
    %c0_72 = arith.constant 0 : index
    %c2_73 = arith.constant 2 : index
    %75 = vector.load %arg15[%c0_72, %c2_73] : memref<40x342xf32, #tpu.memory_space<vmem>>, vector<16x288xf32>
    %cst_74 = arith.constant dense<0.000000e+00> : vector<16x288xf32>
    %76 = tpu.matmul %74, %75, %cst_74 {dimension_numbers = #tpu.dot_dimension_numbers<[1], [0], [0], [1], [0, 0, 1, 1], [], []>, precision = #tpu.contract_precision<fp32>} : vector<16x16xf32>, vector<16x288xf32>, vector<16x288xf32> -> vector<16x288xf32>
    %77 = arith.addf %72, %76 : vector<16x288xf32>
    %c3_75 = arith.constant 3 : index
    %c0_76 = arith.constant 0 : index
    %c0_77 = arith.constant 0 : index
    %78 = vector.load %arg6[%c3_75, %c0_76, %c0_77] : memref<9x16x16xf32, #tpu.memory_space<vmem>>, vector<1x16x16xf32>
    %79 = vector.shape_cast %78 : vector<1x16x16xf32> to vector<16x16xf32>
    %c0_78 = arith.constant 0 : index
    %c18_79 = arith.constant 18 : index
    %80 = vector.load %arg15[%c0_78, %c18_79] : memref<40x342xf32, #tpu.memory_space<vmem>>, vector<16x288xf32>
    %cst_80 = arith.constant dense<0.000000e+00> : vector<16x288xf32>
    %81 = tpu.matmul %79, %80, %cst_80 {dimension_numbers = #tpu.dot_dimension_numbers<[1], [0], [0], [1], [0, 0, 1, 1], [], []>, precision = #tpu.contract_precision<fp32>} : vector<16x16xf32>, vector<16x288xf32>, vector<16x288xf32> -> vector<16x288xf32>
    %82 = arith.addf %77, %81 : vector<16x288xf32>
    %c4_81 = arith.constant 4 : index
    %c0_82 = arith.constant 0 : index
    %c0_83 = arith.constant 0 : index
    %83 = vector.load %arg6[%c4_81, %c0_82, %c0_83] : memref<9x16x16xf32, #tpu.memory_space<vmem>>, vector<1x16x16xf32>
    %84 = vector.shape_cast %83 : vector<1x16x16xf32> to vector<16x16xf32>
    %c0_84 = arith.constant 0 : index
    %c19_85 = arith.constant 19 : index
    %85 = vector.load %arg15[%c0_84, %c19_85] : memref<40x342xf32, #tpu.memory_space<vmem>>, vector<16x288xf32>
    %cst_86 = arith.constant dense<0.000000e+00> : vector<16x288xf32>
    %86 = tpu.matmul %84, %85, %cst_86 {dimension_numbers = #tpu.dot_dimension_numbers<[1], [0], [0], [1], [0, 0, 1, 1], [], []>, precision = #tpu.contract_precision<fp32>} : vector<16x16xf32>, vector<16x288xf32>, vector<16x288xf32> -> vector<16x288xf32>
    %87 = arith.addf %82, %86 : vector<16x288xf32>
    %c5_87 = arith.constant 5 : index
    %c0_88 = arith.constant 0 : index
    %c0_89 = arith.constant 0 : index
    %88 = vector.load %arg6[%c5_87, %c0_88, %c0_89] : memref<9x16x16xf32, #tpu.memory_space<vmem>>, vector<1x16x16xf32>
    %89 = vector.shape_cast %88 : vector<1x16x16xf32> to vector<16x16xf32>
    %c0_90 = arith.constant 0 : index
    %c20_91 = arith.constant 20 : index
    %90 = vector.load %arg15[%c0_90, %c20_91] : memref<40x342xf32, #tpu.memory_space<vmem>>, vector<16x288xf32>
    %cst_92 = arith.constant dense<0.000000e+00> : vector<16x288xf32>
    %91 = tpu.matmul %89, %90, %cst_92 {dimension_numbers = #tpu.dot_dimension_numbers<[1], [0], [0], [1], [0, 0, 1, 1], [], []>, precision = #tpu.contract_precision<fp32>} : vector<16x16xf32>, vector<16x288xf32>, vector<16x288xf32> -> vector<16x288xf32>
    %92 = arith.addf %87, %91 : vector<16x288xf32>
    %c6_93 = arith.constant 6 : index
    %c0_94 = arith.constant 0 : index
    %c0_95 = arith.constant 0 : index
    %93 = vector.load %arg6[%c6_93, %c0_94, %c0_95] : memref<9x16x16xf32, #tpu.memory_space<vmem>>, vector<1x16x16xf32>
    %94 = vector.shape_cast %93 : vector<1x16x16xf32> to vector<16x16xf32>
    %c0_96 = arith.constant 0 : index
    %c36_97 = arith.constant 36 : index
    %95 = vector.load %arg15[%c0_96, %c36_97] : memref<40x342xf32, #tpu.memory_space<vmem>>, vector<16x288xf32>
    %cst_98 = arith.constant dense<0.000000e+00> : vector<16x288xf32>
    %96 = tpu.matmul %94, %95, %cst_98 {dimension_numbers = #tpu.dot_dimension_numbers<[1], [0], [0], [1], [0, 0, 1, 1], [], []>, precision = #tpu.contract_precision<fp32>} : vector<16x16xf32>, vector<16x288xf32>, vector<16x288xf32> -> vector<16x288xf32>
    %97 = arith.addf %92, %96 : vector<16x288xf32>
    %c7_99 = arith.constant 7 : index
    %c0_100 = arith.constant 0 : index
    %c0_101 = arith.constant 0 : index
    %98 = vector.load %arg6[%c7_99, %c0_100, %c0_101] : memref<9x16x16xf32, #tpu.memory_space<vmem>>, vector<1x16x16xf32>
    %99 = vector.shape_cast %98 : vector<1x16x16xf32> to vector<16x16xf32>
    %c0_102 = arith.constant 0 : index
    %c37_103 = arith.constant 37 : index
    %100 = vector.load %arg15[%c0_102, %c37_103] : memref<40x342xf32, #tpu.memory_space<vmem>>, vector<16x288xf32>
    %cst_104 = arith.constant dense<0.000000e+00> : vector<16x288xf32>
    %101 = tpu.matmul %99, %100, %cst_104 {dimension_numbers = #tpu.dot_dimension_numbers<[1], [0], [0], [1], [0, 0, 1, 1], [], []>, precision = #tpu.contract_precision<fp32>} : vector<16x16xf32>, vector<16x288xf32>, vector<16x288xf32> -> vector<16x288xf32>
    %102 = arith.addf %97, %101 : vector<16x288xf32>
    %c8_105 = arith.constant 8 : index
    %c0_106 = arith.constant 0 : index
    %c0_107 = arith.constant 0 : index
    %103 = vector.load %arg6[%c8_105, %c0_106, %c0_107] : memref<9x16x16xf32, #tpu.memory_space<vmem>>, vector<1x16x16xf32>
    %104 = vector.shape_cast %103 : vector<1x16x16xf32> to vector<16x16xf32>
    %c0_108 = arith.constant 0 : index
    %c38_109 = arith.constant 38 : index
    %105 = vector.load %arg15[%c0_108, %c38_109] : memref<40x342xf32, #tpu.memory_space<vmem>>, vector<16x288xf32>
    %cst_110 = arith.constant dense<0.000000e+00> : vector<16x288xf32>
    %106 = tpu.matmul %104, %105, %cst_110 {dimension_numbers = #tpu.dot_dimension_numbers<[1], [0], [0], [1], [0, 0, 1, 1], [], []>, precision = #tpu.contract_precision<fp32>} : vector<16x16xf32>, vector<16x288xf32>, vector<16x288xf32> -> vector<16x288xf32>
    %107 = arith.addf %102, %106 : vector<16x288xf32>
    %c0_111 = arith.constant 0 : index
    %c0_112 = arith.constant 0 : index
    %108 = vector.load %arg7[%c0_111, %c0_112] : memref<16x1xf32, #tpu.memory_space<vmem>>, vector<16x1xf32>
    %109 = vector.broadcast %108 : vector<16x1xf32> to vector<16x288xf32>
    %110 = arith.addf %107, %109 : vector<16x288xf32>
    %cst_113 = arith.constant 0.000000e+00 : f32
    %111 = vector.broadcast %cst_113 : f32 to vector<16x288xf32>
    %112 = arith.maximumf %110, %111 : vector<16x288xf32>
    %113 = vector.broadcast %2 : vector<1x288xf32> to vector<16x288xf32>
    %114 = arith.mulf %112, %113 : vector<16x288xf32>
    %c0_114 = arith.constant 0 : index
    %c19_115 = arith.constant 19 : index
    %115 = vector.load %arg15[%c0_114, %c19_115] : memref<40x342xf32, #tpu.memory_space<vmem>>, vector<16x288xf32>
    tpu.vector_store %arg15[%c0_114, %c19_115], %114 {strides = array<i32>} : memref<40x342xf32, #tpu.memory_space<vmem>>, vector<16x288xf32>,
    %c0_116 = arith.constant 0 : index
    %c0_117 = arith.constant 0 : index
    %c0_118 = arith.constant 0 : index
    %116 = vector.load %arg8[%c0_116, %c0_117, %c0_118] : memref<9x16x16xf32, #tpu.memory_space<vmem>>, vector<1x16x16xf32>
    %117 = vector.shape_cast %116 : vector<1x16x16xf32> to vector<16x16xf32>
    %c0_119 = arith.constant 0 : index
    %c0_120 = arith.constant 0 : index
    %118 = vector.load %arg15[%c0_119, %c0_120] : memref<40x342xf32, #tpu.memory_space<vmem>>, vector<16x288xf32>
    %cst_121 = arith.constant dense<0.000000e+00> : vector<16x288xf32>
    %119 = tpu.matmul %117, %118, %cst_121 {dimension_numbers = #tpu.dot_dimension_numbers<[1], [0], [0], [1], [0, 0, 1, 1], [], []>, precision = #tpu.contract_precision<fp32>} : vector<16x16xf32>, vector<16x288xf32>, vector<16x288xf32> -> vector<16x288xf32>
    %c1_122 = arith.constant 1 : index
    %c0_123 = arith.constant 0 : index
    %c0_124 = arith.constant 0 : index
    %120 = vector.load %arg8[%c1_122, %c0_123, %c0_124] : memref<9x16x16xf32, #tpu.memory_space<vmem>>, vector<1x16x16xf32>
    %121 = vector.shape_cast %120 : vector<1x16x16xf32> to vector<16x16xf32>
    %c0_125 = arith.constant 0 : index
    %c1_126 = arith.constant 1 : index
    %122 = vector.load %arg15[%c0_125, %c1_126] : memref<40x342xf32, #tpu.memory_space<vmem>>, vector<16x288xf32>
    %cst_127 = arith.constant dense<0.000000e+00> : vector<16x288xf32>
    %123 = tpu.matmul %121, %122, %cst_127 {dimension_numbers = #tpu.dot_dimension_numbers<[1], [0], [0], [1], [0, 0, 1, 1], [], []>, precision = #tpu.contract_precision<fp32>} : vector<16x16xf32>, vector<16x288xf32>, vector<16x288xf32> -> vector<16x288xf32>
    %124 = arith.addf %119, %123 : vector<16x288xf32>
    %c2_128 = arith.constant 2 : index
    %c0_129 = arith.constant 0 : index
    %c0_130 = arith.constant 0 : index
    %125 = vector.load %arg8[%c2_128, %c0_129, %c0_130] : memref<9x16x16xf32, #tpu.memory_space<vmem>>, vector<1x16x16xf32>
    %126 = vector.shape_cast %125 : vector<1x16x16xf32> to vector<16x16xf32>
    %c0_131 = arith.constant 0 : index
    %c2_132 = arith.constant 2 : index
    %127 = vector.load %arg15[%c0_131, %c2_132] : memref<40x342xf32, #tpu.memory_space<vmem>>, vector<16x288xf32>
    %cst_133 = arith.constant dense<0.000000e+00> : vector<16x288xf32>
    %128 = tpu.matmul %126, %127, %cst_133 {dimension_numbers = #tpu.dot_dimension_numbers<[1], [0], [0], [1], [0, 0, 1, 1], [], []>, precision = #tpu.contract_precision<fp32>} : vector<16x16xf32>, vector<16x288xf32>, vector<16x288xf32> -> vector<16x288xf32>
    %129 = arith.addf %124, %128 : vector<16x288xf32>
    %c3_134 = arith.constant 3 : index
    %c0_135 = arith.constant 0 : index
    %c0_136 = arith.constant 0 : index
    %130 = vector.load %arg8[%c3_134, %c0_135, %c0_136] : memref<9x16x16xf32, #tpu.memory_space<vmem>>, vector<1x16x16xf32>
    %131 = vector.shape_cast %130 : vector<1x16x16xf32> to vector<16x16xf32>
    %c0_137 = arith.constant 0 : index
    %c18_138 = arith.constant 18 : index
    %132 = vector.load %arg15[%c0_137, %c18_138] : memref<40x342xf32, #tpu.memory_space<vmem>>, vector<16x288xf32>
    %cst_139 = arith.constant dense<0.000000e+00> : vector<16x288xf32>
    %133 = tpu.matmul %131, %132, %cst_139 {dimension_numbers = #tpu.dot_dimension_numbers<[1], [0], [0], [1], [0, 0, 1, 1], [], []>, precision = #tpu.contract_precision<fp32>} : vector<16x16xf32>, vector<16x288xf32>, vector<16x288xf32> -> vector<16x288xf32>
    %134 = arith.addf %129, %133 : vector<16x288xf32>
    %c4_140 = arith.constant 4 : index
    %c0_141 = arith.constant 0 : index
    %c0_142 = arith.constant 0 : index
    %135 = vector.load %arg8[%c4_140, %c0_141, %c0_142] : memref<9x16x16xf32, #tpu.memory_space<vmem>>, vector<1x16x16xf32>
    %136 = vector.shape_cast %135 : vector<1x16x16xf32> to vector<16x16xf32>
    %c0_143 = arith.constant 0 : index
    %c19_144 = arith.constant 19 : index
    %137 = vector.load %arg15[%c0_143, %c19_144] : memref<40x342xf32, #tpu.memory_space<vmem>>, vector<16x288xf32>
    %cst_145 = arith.constant dense<0.000000e+00> : vector<16x288xf32>
    %138 = tpu.matmul %136, %137, %cst_145 {dimension_numbers = #tpu.dot_dimension_numbers<[1], [0], [0], [1], [0, 0, 1, 1], [], []>, precision = #tpu.contract_precision<fp32>} : vector<16x16xf32>, vector<16x288xf32>, vector<16x288xf32> -> vector<16x288xf32>
    %139 = arith.addf %134, %138 : vector<16x288xf32>
    %c5_146 = arith.constant 5 : index
    %c0_147 = arith.constant 0 : index
    %c0_148 = arith.constant 0 : index
    %140 = vector.load %arg8[%c5_146, %c0_147, %c0_148] : memref<9x16x16xf32, #tpu.memory_space<vmem>>, vector<1x16x16xf32>
    %141 = vector.shape_cast %140 : vector<1x16x16xf32> to vector<16x16xf32>
    %c0_149 = arith.constant 0 : index
    %c20_150 = arith.constant 20 : index
    %142 = vector.load %arg15[%c0_149, %c20_150] : memref<40x342xf32, #tpu.memory_space<vmem>>, vector<16x288xf32>
    %cst_151 = arith.constant dense<0.000000e+00> : vector<16x288xf32>
    %143 = tpu.matmul %141, %142, %cst_151 {dimension_numbers = #tpu.dot_dimension_numbers<[1], [0], [0], [1], [0, 0, 1, 1], [], []>, precision = #tpu.contract_precision<fp32>} : vector<16x16xf32>, vector<16x288xf32>, vector<16x288xf32> -> vector<16x288xf32>
    %144 = arith.addf %139, %143 : vector<16x288xf32>
    %c6_152 = arith.constant 6 : index
    %c0_153 = arith.constant 0 : index
    %c0_154 = arith.constant 0 : index
    %145 = vector.load %arg8[%c6_152, %c0_153, %c0_154] : memref<9x16x16xf32, #tpu.memory_space<vmem>>, vector<1x16x16xf32>
    %146 = vector.shape_cast %145 : vector<1x16x16xf32> to vector<16x16xf32>
    %c0_155 = arith.constant 0 : index
    %c36_156 = arith.constant 36 : index
    %147 = vector.load %arg15[%c0_155, %c36_156] : memref<40x342xf32, #tpu.memory_space<vmem>>, vector<16x288xf32>
    %cst_157 = arith.constant dense<0.000000e+00> : vector<16x288xf32>
    %148 = tpu.matmul %146, %147, %cst_157 {dimension_numbers = #tpu.dot_dimension_numbers<[1], [0], [0], [1], [0, 0, 1, 1], [], []>, precision = #tpu.contract_precision<fp32>} : vector<16x16xf32>, vector<16x288xf32>, vector<16x288xf32> -> vector<16x288xf32>
    %149 = arith.addf %144, %148 : vector<16x288xf32>
    %c7_158 = arith.constant 7 : index
    %c0_159 = arith.constant 0 : index
    %c0_160 = arith.constant 0 : index
    %150 = vector.load %arg8[%c7_158, %c0_159, %c0_160] : memref<9x16x16xf32, #tpu.memory_space<vmem>>, vector<1x16x16xf32>
    %151 = vector.shape_cast %150 : vector<1x16x16xf32> to vector<16x16xf32>
    %c0_161 = arith.constant 0 : index
    %c37_162 = arith.constant 37 : index
    %152 = vector.load %arg15[%c0_161, %c37_162] : memref<40x342xf32, #tpu.memory_space<vmem>>, vector<16x288xf32>
    %cst_163 = arith.constant dense<0.000000e+00> : vector<16x288xf32>
    %153 = tpu.matmul %151, %152, %cst_163 {dimension_numbers = #tpu.dot_dimension_numbers<[1], [0], [0], [1], [0, 0, 1, 1], [], []>, precision = #tpu.contract_precision<fp32>} : vector<16x16xf32>, vector<16x288xf32>, vector<16x288xf32> -> vector<16x288xf32>
    %154 = arith.addf %149, %153 : vector<16x288xf32>
    %c8_164 = arith.constant 8 : index
    %c0_165 = arith.constant 0 : index
    %c0_166 = arith.constant 0 : index
    %155 = vector.load %arg8[%c8_164, %c0_165, %c0_166] : memref<9x16x16xf32, #tpu.memory_space<vmem>>, vector<1x16x16xf32>
    %156 = vector.shape_cast %155 : vector<1x16x16xf32> to vector<16x16xf32>
    %c0_167 = arith.constant 0 : index
    %c38_168 = arith.constant 38 : index
    %157 = vector.load %arg15[%c0_167, %c38_168] : memref<40x342xf32, #tpu.memory_space<vmem>>, vector<16x288xf32>
    %cst_169 = arith.constant dense<0.000000e+00> : vector<16x288xf32>
    %158 = tpu.matmul %156, %157, %cst_169 {dimension_numbers = #tpu.dot_dimension_numbers<[1], [0], [0], [1], [0, 0, 1, 1], [], []>, precision = #tpu.contract_precision<fp32>} : vector<16x16xf32>, vector<16x288xf32>, vector<16x288xf32> -> vector<16x288xf32>
    %159 = arith.addf %154, %158 : vector<16x288xf32>
    %c0_170 = arith.constant 0 : index
    %c0_171 = arith.constant 0 : index
    %160 = vector.load %arg9[%c0_170, %c0_171] : memref<16x1xf32, #tpu.memory_space<vmem>>, vector<16x1xf32>
    %161 = vector.broadcast %160 : vector<16x1xf32> to vector<16x288xf32>
    %162 = arith.addf %159, %161 : vector<16x288xf32>
    %cst_172 = arith.constant 0.000000e+00 : f32
    %163 = vector.broadcast %cst_172 : f32 to vector<16x288xf32>
    %164 = arith.maximumf %162, %163 : vector<16x288xf32>
    %165 = vector.broadcast %2 : vector<1x288xf32> to vector<16x288xf32>
    %166 = arith.mulf %164, %165 : vector<16x288xf32>
    %c16 = arith.constant 16 : index
    %c19_173 = arith.constant 19 : index
    %167 = vector.load %arg15[%c16, %c19_173] : memref<40x342xf32, #tpu.memory_space<vmem>>, vector<16x288xf32>
    tpu.vector_store %arg15[%c16, %c19_173], %166 {strides = array<i32>} : memref<40x342xf32, #tpu.memory_space<vmem>>, vector<16x288xf32>,
    %c0_174 = arith.constant 0 : index
    %c0_175 = arith.constant 0 : index
    %c0_176 = arith.constant 0 : index
    %168 = vector.load %arg2[%c0_174, %c0_175, %c0_176] : memref<1x16x1xf32, #tpu.memory_space<vmem>>, vector<1x16x1xf32>
    %169 = vector.shape_cast %168 : vector<1x16x1xf32> to vector<16x1xf32>
    %c0_177 = arith.constant 0 : index
    %c0_178 = arith.constant 0 : index
    %170 = vector.load %arg3[%c0_177, %c0_178] : memref<1x342xf32, #tpu.memory_space<vmem>>, vector<1x342xf32>
    %171 = vector.broadcast %169 : vector<16x1xf32> to vector<16x342xf32>
    %172 = vector.broadcast %170 : vector<1x342xf32> to vector<16x342xf32>
    %173 = arith.mulf %171, %172 : vector<16x342xf32>
    %c0_179 = arith.constant 0 : index
    %c0_180 = arith.constant 0 : index
    %174 = vector.load %arg15[%c0_179, %c0_180] : memref<40x342xf32, #tpu.memory_space<vmem>>, vector<16x342xf32>
    tpu.vector_store %arg15[%c0_179, %c0_180], %173 {strides = array<i32>} : memref<40x342xf32, #tpu.memory_space<vmem>>, vector<16x342xf32>,
    %c0_181 = arith.constant 0 : index
    %c0_182 = arith.constant 0 : index
    %c0_183 = arith.constant 0 : index
    %175 = vector.load %arg1[%c0_181, %c0_182, %c0_183] : memref<1x8x342xf32, #tpu.memory_space<vmem>>, vector<1x8x342xf32>
    %176 = vector.shape_cast %175 : vector<1x8x342xf32> to vector<8x342xf32>
    %c32 = arith.constant 32 : index
    %c0_184 = arith.constant 0 : index
    %177 = vector.load %arg15[%c32, %c0_184] : memref<40x342xf32, #tpu.memory_space<vmem>>, vector<8x342xf32>
    tpu.vector_store %arg15[%c32, %c0_184], %176 {strides = array<i32>} : memref<40x342xf32, #tpu.memory_space<vmem>>, vector<8x342xf32>,
    %c0_185 = arith.constant 0 : index
    %c0_186 = arith.constant 0 : index
    %c0_187 = arith.constant 0 : index
    %178 = vector.load %arg10[%c0_185, %c0_186, %c0_187] : memref<9x16x40xf32, #tpu.memory_space<vmem>>, vector<1x16x40xf32>
    %179 = vector.shape_cast %178 : vector<1x16x40xf32> to vector<16x40xf32>
    %c0_188 = arith.constant 0 : index
    %c0_189 = arith.constant 0 : index
    %180 = vector.load %arg15[%c0_188, %c0_189] : memref<40x342xf32, #tpu.memory_space<vmem>>, vector<40x288xf32>
    %cst_190 = arith.constant dense<0.000000e+00> : vector<16x288xf32>
    %181 = tpu.matmul %179, %180, %cst_190 {dimension_numbers = #tpu.dot_dimension_numbers<[1], [0], [0], [1], [0, 0, 1, 1], [], []>, precision = #tpu.contract_precision<fp32>} : vector<16x40xf32>, vector<40x288xf32>, vector<16x288xf32> -> vector<16x288xf32>
    %c1_191 = arith.constant 1 : index
    %c0_192 = arith.constant 0 : index
    %c0_193 = arith.constant 0 : index
    %182 = vector.load %arg10[%c1_191, %c0_192, %c0_193] : memref<9x16x40xf32, #tpu.memory_space<vmem>>, vector<1x16x40xf32>
    %183 = vector.shape_cast %182 : vector<1x16x40xf32> to vector<16x40xf32>
    %c0_194 = arith.constant 0 : index
    %c1_195 = arith.constant 1 : index
    %184 = vector.load %arg15[%c0_194, %c1_195] : memref<40x342xf32, #tpu.memory_space<vmem>>, vector<40x288xf32>
    %cst_196 = arith.constant dense<0.000000e+00> : vector<16x288xf32>
    %185 = tpu.matmul %183, %184, %cst_196 {dimension_numbers = #tpu.dot_dimension_numbers<[1], [0], [0], [1], [0, 0, 1, 1], [], []>, precision = #tpu.contract_precision<fp32>} : vector<16x40xf32>, vector<40x288xf32>, vector<16x288xf32> -> vector<16x288xf32>
    %186 = arith.addf %181, %185 : vector<16x288xf32>
    %c2_197 = arith.constant 2 : index
    %c0_198 = arith.constant 0 : index
    %c0_199 = arith.constant 0 : index
    %187 = vector.load %arg10[%c2_197, %c0_198, %c0_199] : memref<9x16x40xf32, #tpu.memory_space<vmem>>, vector<1x16x40xf32>
    %188 = vector.shape_cast %187 : vector<1x16x40xf32> to vector<16x40xf32>
    %c0_200 = arith.constant 0 : index
    %c2_201 = arith.constant 2 : index
    %189 = vector.load %arg15[%c0_200, %c2_201] : memref<40x342xf32, #tpu.memory_space<vmem>>, vector<40x288xf32>
    %cst_202 = arith.constant dense<0.000000e+00> : vector<16x288xf32>
    %190 = tpu.matmul %188, %189, %cst_202 {dimension_numbers = #tpu.dot_dimension_numbers<[1], [0], [0], [1], [0, 0, 1, 1], [], []>, precision = #tpu.contract_precision<fp32>} : vector<16x40xf32>, vector<40x288xf32>, vector<16x288xf32> -> vector<16x288xf32>
    %191 = arith.addf %186, %190 : vector<16x288xf32>
    %c3_203 = arith.constant 3 : index
    %c0_204 = arith.constant 0 : index
    %c0_205 = arith.constant 0 : index
    %192 = vector.load %arg10[%c3_203, %c0_204, %c0_205] : memref<9x16x40xf32, #tpu.memory_space<vmem>>, vector<1x16x40xf32>
    %193 = vector.shape_cast %192 : vector<1x16x40xf32> to vector<16x40xf32>
    %c0_206 = arith.constant 0 : index
    %c18_207 = arith.constant 18 : index
    %194 = vector.load %arg15[%c0_206, %c18_207] : memref<40x342xf32, #tpu.memory_space<vmem>>, vector<40x288xf32>
    %cst_208 = arith.constant dense<0.000000e+00> : vector<16x288xf32>
    %195 = tpu.matmul %193, %194, %cst_208 {dimension_numbers = #tpu.dot_dimension_numbers<[1], [0], [0], [1], [0, 0, 1, 1], [], []>, precision = #tpu.contract_precision<fp32>} : vector<16x40xf32>, vector<40x288xf32>, vector<16x288xf32> -> vector<16x288xf32>
    %196 = arith.addf %191, %195 : vector<16x288xf32>
    %c4_209 = arith.constant 4 : index
    %c0_210 = arith.constant 0 : index
    %c0_211 = arith.constant 0 : index
    %197 = vector.load %arg10[%c4_209, %c0_210, %c0_211] : memref<9x16x40xf32, #tpu.memory_space<vmem>>, vector<1x16x40xf32>
    %198 = vector.shape_cast %197 : vector<1x16x40xf32> to vector<16x40xf32>
    %c0_212 = arith.constant 0 : index
    %c19_213 = arith.constant 19 : index
    %199 = vector.load %arg15[%c0_212, %c19_213] : memref<40x342xf32, #tpu.memory_space<vmem>>, vector<40x288xf32>
    %cst_214 = arith.constant dense<0.000000e+00> : vector<16x288xf32>
    %200 = tpu.matmul %198, %199, %cst_214 {dimension_numbers = #tpu.dot_dimension_numbers<[1], [0], [0], [1], [0, 0, 1, 1], [], []>, precision = #tpu.contract_precision<fp32>} : vector<16x40xf32>, vector<40x288xf32>, vector<16x288xf32> -> vector<16x288xf32>
    %201 = arith.addf %196, %200 : vector<16x288xf32>
    %c5_215 = arith.constant 5 : index
    %c0_216 = arith.constant 0 : index
    %c0_217 = arith.constant 0 : index
    %202 = vector.load %arg10[%c5_215, %c0_216, %c0_217] : memref<9x16x40xf32, #tpu.memory_space<vmem>>, vector<1x16x40xf32>
    %203 = vector.shape_cast %202 : vector<1x16x40xf32> to vector<16x40xf32>
    %c0_218 = arith.constant 0 : index
    %c20_219 = arith.constant 20 : index
    %204 = vector.load %arg15[%c0_218, %c20_219] : memref<40x342xf32, #tpu.memory_space<vmem>>, vector<40x288xf32>
    %cst_220 = arith.constant dense<0.000000e+00> : vector<16x288xf32>
    %205 = tpu.matmul %203, %204, %cst_220 {dimension_numbers = #tpu.dot_dimension_numbers<[1], [0], [0], [1], [0, 0, 1, 1], [], []>, precision = #tpu.contract_precision<fp32>} : vector<16x40xf32>, vector<40x288xf32>, vector<16x288xf32> -> vector<16x288xf32>
    %206 = arith.addf %201, %205 : vector<16x288xf32>
    %c6_221 = arith.constant 6 : index
    %c0_222 = arith.constant 0 : index
    %c0_223 = arith.constant 0 : index
    %207 = vector.load %arg10[%c6_221, %c0_222, %c0_223] : memref<9x16x40xf32, #tpu.memory_space<vmem>>, vector<1x16x40xf32>
    %208 = vector.shape_cast %207 : vector<1x16x40xf32> to vector<16x40xf32>
    %c0_224 = arith.constant 0 : index
    %c36_225 = arith.constant 36 : index
    %209 = vector.load %arg15[%c0_224, %c36_225] : memref<40x342xf32, #tpu.memory_space<vmem>>, vector<40x288xf32>
    %cst_226 = arith.constant dense<0.000000e+00> : vector<16x288xf32>
    %210 = tpu.matmul %208, %209, %cst_226 {dimension_numbers = #tpu.dot_dimension_numbers<[1], [0], [0], [1], [0, 0, 1, 1], [], []>, precision = #tpu.contract_precision<fp32>} : vector<16x40xf32>, vector<40x288xf32>, vector<16x288xf32> -> vector<16x288xf32>
    %211 = arith.addf %206, %210 : vector<16x288xf32>
    %c7_227 = arith.constant 7 : index
    %c0_228 = arith.constant 0 : index
    %c0_229 = arith.constant 0 : index
    %212 = vector.load %arg10[%c7_227, %c0_228, %c0_229] : memref<9x16x40xf32, #tpu.memory_space<vmem>>, vector<1x16x40xf32>
    %213 = vector.shape_cast %212 : vector<1x16x40xf32> to vector<16x40xf32>
    %c0_230 = arith.constant 0 : index
    %c37_231 = arith.constant 37 : index
    %214 = vector.load %arg15[%c0_230, %c37_231] : memref<40x342xf32, #tpu.memory_space<vmem>>, vector<40x288xf32>
    %cst_232 = arith.constant dense<0.000000e+00> : vector<16x288xf32>
    %215 = tpu.matmul %213, %214, %cst_232 {dimension_numbers = #tpu.dot_dimension_numbers<[1], [0], [0], [1], [0, 0, 1, 1], [], []>, precision = #tpu.contract_precision<fp32>} : vector<16x40xf32>, vector<40x288xf32>, vector<16x288xf32> -> vector<16x288xf32>
    %216 = arith.addf %211, %215 : vector<16x288xf32>
    %c8_233 = arith.constant 8 : index
    %c0_234 = arith.constant 0 : index
    %c0_235 = arith.constant 0 : index
    %217 = vector.load %arg10[%c8_233, %c0_234, %c0_235] : memref<9x16x40xf32, #tpu.memory_space<vmem>>, vector<1x16x40xf32>
    %218 = vector.shape_cast %217 : vector<1x16x40xf32> to vector<16x40xf32>
    %c0_236 = arith.constant 0 : index
    %c38_237 = arith.constant 38 : index
    %219 = vector.load %arg15[%c0_236, %c38_237] : memref<40x342xf32, #tpu.memory_space<vmem>>, vector<40x288xf32>
    %cst_238 = arith.constant dense<0.000000e+00> : vector<16x288xf32>
    %220 = tpu.matmul %218, %219, %cst_238 {dimension_numbers = #tpu.dot_dimension_numbers<[1], [0], [0], [1], [0, 0, 1, 1], [], []>, precision = #tpu.contract_precision<fp32>} : vector<16x40xf32>, vector<40x288xf32>, vector<16x288xf32> -> vector<16x288xf32>
    %221 = arith.addf %216, %220 : vector<16x288xf32>
    %c0_239 = arith.constant 0 : index
    %c0_240 = arith.constant 0 : index
    %222 = vector.load %arg11[%c0_239, %c0_240] : memref<16x1xf32, #tpu.memory_space<vmem>>, vector<16x1xf32>
    %223 = vector.broadcast %222 : vector<16x1xf32> to vector<16x288xf32>
    %224 = arith.addf %221, %223 : vector<16x288xf32>
    %cst_241 = arith.constant 0.000000e+00 : f32
    %225 = vector.broadcast %cst_241 : f32 to vector<16x288xf32>
    %226 = arith.maximumf %224, %225 : vector<16x288xf32>
    %c0_242 = arith.constant 0 : index
    %c0_243 = arith.constant 0 : index
    %227 = vector.load %arg12[%c0_242, %c0_243] : memref<3x16xf32, #tpu.memory_space<vmem>>, vector<3x16xf32>
    %cst_244 = arith.constant dense<0.000000e+00> : vector<3x288xf32>
    %228 = tpu.matmul %227, %226, %cst_244 {dimension_numbers = #tpu.dot_dimension_numbers<[1], [0], [0], [1], [0, 0, 1, 1], [], []>, precision = #tpu.contract_precision<fp32>} : vector<3x16xf32>, vector<16x288xf32>, vector<3x288xf32> -> vector<3x288xf32>
    %c0_245 = arith.constant 0 : index
    %c0_246 = arith.constant 0 : index
    %229 = vector.load %arg13[%c0_245, %c0_246] : memref<3x1xf32, #tpu.memory_space<vmem>>, vector<3x1xf32>
    %230 = vector.broadcast %229 : vector<3x1xf32> to vector<3x288xf32>
    %231 = arith.addf %228, %230 : vector<3x288xf32>
    %232 = math.tanh %231 : vector<3x288xf32>
    %c0_247 = arith.constant 0 : index
    %c0_248 = arith.constant 0 : index
    %c0_249 = arith.constant 0 : index
    %233 = vector.load %arg14[%c0_247, %c0_248, %c0_249] : memref<1x3x288xf32, #tpu.memory_space<vmem>>, vector<1x3x288xf32>
    %234 = vector.shape_cast %233 : vector<1x3x288xf32> to vector<3x288xf32>
    %235 = vector.shape_cast %232 : vector<3x288xf32> to vector<1x3x288xf32>
    tpu.vector_store %arg14[%c0_247, %c0_248, %c0_249], %235 {strides = array<i32>} : memref<1x3x288xf32, #tpu.memory_space<vmem>>, vector<1x3x288xf32>,
    return
  }
  func.func @transform_0(%arg0: i32) -> (i32, i32, i32) {
    %c0_i32 = arith.constant 0 : i32
    %c0_i32_0 = arith.constant 0 : i32
    %c0_i32_1 = arith.constant 0 : i32
    return %arg0, %c0_i32, %c0_i32_0 : i32, i32, i32
  }
  func.func @transform_1(%arg0: i32) -> (i32, i32, i32) {
    %c0_i32 = arith.constant 0 : i32
    %c0_i32_0 = arith.constant 0 : i32
    %c0_i32_1 = arith.constant 0 : i32
    return %arg0, %c0_i32, %c0_i32_0 : i32, i32, i32
  }
  func.func @transform_2(%arg0: i32) -> (i32, i32) {
    %c0_i32 = arith.constant 0 : i32
    %c0_i32_0 = arith.constant 0 : i32
    %c0_i32_1 = arith.constant 0 : i32
    return %c0_i32, %c0_i32_0 : i32, i32
  }
  func.func @transform_3(%arg0: i32) -> (i32, i32, i32) {
    %c0_i32 = arith.constant 0 : i32
    %c0_i32_0 = arith.constant 0 : i32
    %c0_i32_1 = arith.constant 0 : i32
    %c0_i32_2 = arith.constant 0 : i32
    return %c0_i32, %c0_i32_0, %c0_i32_1 : i32, i32, i32
  }
  func.func @transform_4(%arg0: i32) -> (i32, i32) {
    %c0_i32 = arith.constant 0 : i32
    %c0_i32_0 = arith.constant 0 : i32
    %c0_i32_1 = arith.constant 0 : i32
    return %c0_i32, %c0_i32_0 : i32, i32
  }
  func.func @transform_5(%arg0: i32) -> (i32, i32, i32) {
    %c0_i32 = arith.constant 0 : i32
    %c0_i32_0 = arith.constant 0 : i32
    %c0_i32_1 = arith.constant 0 : i32
    %c0_i32_2 = arith.constant 0 : i32
    return %c0_i32, %c0_i32_0, %c0_i32_1 : i32, i32, i32
  }
  func.func @transform_6(%arg0: i32) -> (i32, i32) {
    %c0_i32 = arith.constant 0 : i32
    %c0_i32_0 = arith.constant 0 : i32
    %c0_i32_1 = arith.constant 0 : i32
    return %c0_i32, %c0_i32_0 : i32, i32
  }
  func.func @transform_7(%arg0: i32) -> (i32, i32, i32) {
    %c0_i32 = arith.constant 0 : i32
    %c0_i32_0 = arith.constant 0 : i32
    %c0_i32_1 = arith.constant 0 : i32
    %c0_i32_2 = arith.constant 0 : i32
    return %c0_i32, %c0_i32_0, %c0_i32_1 : i32, i32, i32
  }
  func.func @transform_8(%arg0: i32) -> (i32, i32) {
    %c0_i32 = arith.constant 0 : i32
    %c0_i32_0 = arith.constant 0 : i32
    %c0_i32_1 = arith.constant 0 : i32
    return %c0_i32, %c0_i32_0 : i32, i32
  }
  func.func @transform_9(%arg0: i32) -> (i32, i32, i32) {
    %c0_i32 = arith.constant 0 : i32
    %c0_i32_0 = arith.constant 0 : i32
    %c0_i32_1 = arith.constant 0 : i32
    %c0_i32_2 = arith.constant 0 : i32
    return %c0_i32, %c0_i32_0, %c0_i32_1 : i32, i32, i32
  }
  func.func @transform_10(%arg0: i32) -> (i32, i32) {
    %c0_i32 = arith.constant 0 : i32
    %c0_i32_0 = arith.constant 0 : i32
    %c0_i32_1 = arith.constant 0 : i32
    return %c0_i32, %c0_i32_0 : i32, i32
  }
  func.func @transform_11(%arg0: i32) -> (i32, i32) {
    %c0_i32 = arith.constant 0 : i32
    %c0_i32_0 = arith.constant 0 : i32
    %c0_i32_1 = arith.constant 0 : i32
    return %c0_i32, %c0_i32_0 : i32, i32
  }
  func.func @transform_12(%arg0: i32) -> (i32, i32) {
    %c0_i32 = arith.constant 0 : i32
    %c0_i32_0 = arith.constant 0 : i32
    %c0_i32_1 = arith.constant 0 : i32
    return %c0_i32, %c0_i32_0 : i32, i32
  }
  func.func @transform_13(%arg0: i32) -> (i32, i32, i32) {
    %c0_i32 = arith.constant 0 : i32
    %c0_i32_0 = arith.constant 0 : i32
    %c0_i32_1 = arith.constant 0 : i32
    return %arg0, %c0_i32, %c0_i32_0 : i32, i32, i32
  }
}

</mosaic_0001>

<bundles_post_ra>
// kernel: hidden_encoder_forward.1
= control target key start
LH: loop header
LB: loop body
LE: loop exit
PB: predicated region body
PF: predicated region fallthrough
CT: control target
= control target key end

     0   :  { %s47516_s25 = smov 0   ;;  %s53916_s0 = inlined_call_operand.vmem [shape: f32[2,8,342], index: 0, kind: input, shape index: {}]   ;;  %s53917_s1 = inlined_call_operand.vmem [shape: f32[2,16,1], index: 1, kind: input, shape index: {}]   ;;  %s53918_s2 = inlined_call_operand.vmem [shape: f32[1,342], index: 2, kind: input, shape index: {}]   ;;  %s53919_s3 = inlined_call_operand.vmem [shape: f32[9,16,8], index: 3, kind: input, shape index: {}]   ;;  %s53920_s4 = inlined_call_operand.vmem [shape: f32[16,1], index: 4, kind: input, shape index: {}]   ;;  %s53921_s5 = inlined_call_operand.vmem [shape: f32[9,16,16], index: 5, kind: input, shape index: {}]   ;;  %s53922_s6 = inlined_call_operand.vmem [shape: f32[16,1], index: 6, kind: input, shape index: {}]   ;;  %s53923_s7 = inlined_call_operand.vmem [shape: f32[9,16,16], index: 7, kind: input, shape index: {}]   ;;  %s53924_s8 = inlined_call_operand.vmem [shape: f32[16,1], index: 8, kind: input, shape index: {}]   ;;  %s53925_s9 = inlined_call_operand.vmem [shape: f32[9,16,40], index: 9, kind: input, shape index: {}]   ;;  %s53926_s10 = inlined_call_operand.vmem [shape: f32[16,1], index: 10, kind: input, shape index: {}]   ;;  %s53927_s11 = inlined_call_operand.vmem [shape: f32[3,16], index: 11, kind: input, shape index: {}]   ;;  %s53928_s12 = inlined_call_operand.vmem [shape: f32[3,1], index: 12, kind: input, shape index: {}]   ;;  %s53929_s13 = inlined_call_operand.vmem [shape: f32[2,3,288], index: 13, kind: output, shape index: {}]  }
   0x1 LB: > { %s41458_s26 = sadd.s32 4294967295, %s47431_s25   ;;  %p41462_p0 = scmp.ge.s32.totalorder %s47431_s25, 1  ;;  %s47431_s25 = sphi %s47516_s25, %s23_s25  }
   0x2   : > { %p397_p1 = scmp.lt.s32.totalorder %s47431_s25, 3 }
   0x4   : > { %p398_p2 = pnand %p41462_p0, %p397_p1 }
   0x6   : > { %401 = sbr.rel (%p398_p2) target bundleno = 4829 (0x12dd), region = 72 }
   0xd   : > { %p446_p3 = scmp.lt.s32.totalorder %s41458_s26, 1  ;;  %v41467_v0 = vld [vmem:[%s53919_s3 + $0x10] sm:$0xff]  ;;  %vm501_vm0 = vcmask 64512   ;;  %v47433_v1 = vmov 0.0   ;;  %s47434_s16 = smov 127   ;;  %v41468_v11 = vld [vmem:[%s53919_s3 + $0x18] sm:$0xff] }
   0xe   : > { %461 = vst [vmem:[#allocation2] sm:$0xff] %v47433_v1  ;;  %465 = vst [vmem:[#allocation2 + $0x18] sm:$0xff] %v47433_v1  ;;  %v503_v2 = vsel %vm501_vm0, %v41467_v0, 0  ;;  %574 = vmatprep.mubr.f32.mxu0 %v47433_v1  ;;  %s53930_s17 = smov 126   ;;  %s47436_s18 = smov 110   ;;  %v506_v12 = vsel %vm501_vm0, %v41468_v11, 0 }
   0xf   : > { %468 = vst [vmem:[#allocation2 + $0x30] sm:$0xff] %v47433_v1  ;;  %471 = vst [vmem:[#allocation2 + $0x48] sm:$0xff] %v47433_v1  ;;  %s54773_s26 = smov (!%p446_p3, %s41458_s26), 1  ;;  %v47535_v3 = vand.u32 4294901760, %v503_v2  ;;  %s47437_s19 = smov 109   ;;  %v47590_v13 = vand.u32 4294901760, %v506_v12 }
  0x10   : > { %s47359_s29 = smul.u32 24, %s54773_s26  ;;  %s47438_s22 = smov 108   ;;  %vm495_vm1 = vcmask 1039360   ;;  %v478_v38 = vld [vmem:[%s53919_s3] sm:$0xff]  ;;  %v479_v41 = vld [vmem:[%s53919_s3 + $0x8] sm:$0xff]  ;;  %vm2529_vm2 = vcmask 1031168  }
  0x11   : > { %v47539_v4 = vsub.f32 %v503_v2, %v47535_v3  ;;  %v587_v14 = vsub.f32 %v506_v12, %v47590_v13  ;;  %v1512_v39 = vsel %vm501_vm0, %v478_v38, 0  ;;  %v1515_v44 = vsel %vm501_vm0, %v479_v41, 0  ;;  %v41470_v12 = vld [vmem:[%s53919_s3 + $0x28] sm:$0xff]  ;;  %s53932_s23 = smov 91   ;;  %s47441_s14 = smov 90  }
  0x12   : > { %s47544_s15 = scalar_lea.vmem %s53916_s0, %s47359_s29  ;;  %v47638_v40 = vand.u32 4294901760, %v1512_v39  ;;  %v47660_v47 = vand.u32 4294901760, %v1515_v44  ;;  %s47439_s29 = smov 92   ;;  %vm3559_vm3 = vcmask 900096   ;;  %vm4589_vm4 = vcmask 891904  }
  0x13   : > { %v47547_v5 = vand.u32 4294901760, %v47539_v4  ;;  %v47550_v6 = vld [vmem:[%s47544_s15 + $0x8] sm:$0xff]  ;;  %v47553_v7 = vld [vmem:[%s47544_s15] sm:$0xff]  ;;  %v47564_v9 = vld [vmem:[%s47544_s15 + $0x10] sm:$0xff]  ;;  %v47599_v15 = vand.u32 4294901760, %v587_v14  ;;  %vm5619_vm5 = vcmask 883712  }
  0x14   : > { %29370 = vst [vmem:[#allocation2 + $0x60] sm:$0xff] %v47553_v7  ;;  %29371 = vst [vmem:[#allocation2 + $0x68] sm:$0xff] %v47550_v6  ;;  %491 = vrot.lane.b32.xlu0 %v47550_v6, %s47434_s16  ;;  %489 = vrot.lane.b32.xlu1 %v47553_v7, %s47434_s16  ;;  %v47644_v42 = vand.u32 4294901760, %v47564_v9  ;;  %v47648_v43 = vand.u32 4294901760, %v47550_v6  ;;  %v47654_v45 = vsub.f32 %v1512_v39, %v47638_v40  ;;  %v47674_v50 = vand.u32 4294901760, %v47553_v7  ;;  %s41533_s20 = sshll.u32 %s54773_s26, 4 }
  0x15   : > { %v578_v8 = vsub.f32 %v47539_v4, %v47547_v5  ;;  %v589_v19 = vsub.f32 %v587_v14, %v47599_v15  ;;  %v47682_v52 = vsub.f32 %v1515_v44, %v47660_v47  ;;  %vm6649_vm6 = vcmask 752640   ;;  %s455_s30 = scalar_lea.vmem %s53917_s1, %s41533_s20  ;;  %s54277_s27 = smov 126  }
  0x16   : > { %v2119_v46 = vsub.f32 %v47564_v9, %v47644_v42  ;;  %v47664_v48 = vsub.f32 %v47550_v6, %v47648_v43  ;;  %v47669_v49 = vand.u32 4294901760, %v47654_v45  ;;  %v47696_v56 = vsub.f32 %v47553_v7, %v47674_v50 }
  0x17   : > { %v579_v10 = vand.u32 4294901760, %v578_v8  ;;  %v590_v25 = vand.u32 4294901760, %v589_v19  ;;  %v47700_v57 = vand.u32 4294901760, %v47682_v52  ;;  %vm7679_vm7 = vcmask 744448  }
  0x18   : > { %493 = vrot.lane.b32.xlu0 %v47564_v9, %s47434_s16  ;;  %2525 = vrot.lane.b32.xlu1 %v47550_v6, %s53930_s17  ;;  %v47676_v51 = vand.u32 4294901760, %v2119_v46  ;;  %v1608_v53 = vand.u32 4294901760, %v47664_v48  ;;  %v1587_v54 = vsub.f32 %v47654_v45, %v47669_v49  ;;  %v1614_v61 = vand.u32 4294901760, %v47696_v56 }
  0x19   : > { %42526 = vmatprep.mubr.f32.mxu1 %v579_v10  ;;  %v1598_v62 = vsub.f32 %v47682_v52, %v47700_v57  ;;  %vm8709_vm8 = vcmask 736256   ;;  %vm463_vm9 = vcmask 703488   ;;  %vm9813_vm10 = vcmask 1047704  }
  0x1a   : > { %v2121_v55 = vsub.f32 %v2119_v46, %v47676_v51  ;;  %v1609_v58 = vsub.f32 %v47664_v48, %v1608_v53  ;;  %v1588_v59 = vand.u32 4294901760, %v1587_v54  ;;  %v1615_v0 = vsub.f32 %v47696_v56, %v1614_v61 }
  0x1b   : > { %v1599_v2 = vand.u32 4294901760, %v1598_v62  ;;  %vm9802_vm11 = vcmask 154624   ;;  %vm9816_vm12 = vcmask 416768   ;;  %vm9860_vm13 = vcmask 130048  }
  0x1c   : > { %2527 = vrot.lane.b32.xlu0 %v47564_v9, %s53930_s17  ;;  %2523 = vrot.lane.b32.xlu1 %v47553_v7, %s53930_s17  ;;  %v2122_v60 = vand.u32 4294901760, %v2121_v55  ;;  %v1610_v63 = vand.u32 4294901760, %v1609_v58  ;;  %vm29463_vm14 = vcmask 326656   ;;  %vm47445_vm15 = vmmov 0  }
  0x20   : > { %3555 = vrot.lane.b32.xlu0 %v47550_v6, %s47436_s18  ;;  %3557 = vrot.lane.b32.xlu1 %v47564_v9, %s47436_s18 }
  0x24   : > { %3553 = vrot.lane.b32.xlu0 %v47553_v7, %s47436_s18  ;;  %4585 = vrot.lane.b32.xlu1 %v47550_v6, %s47437_s19 }
  0x28   : > { %4587 = vrot.lane.b32.xlu0 %v47564_v9, %s47437_s19  ;;  %4583 = vrot.lane.b32.xlu1 %v47553_v7, %s47437_s19 }
  0x2c   : > { %5615 = vrot.lane.b32.xlu0 %v47550_v6, %s47438_s22  ;;  %5617 = vrot.lane.b32.xlu1 %v47564_v9, %s47438_s22 }
  0x30   : > { %5613 = vrot.lane.b32.xlu0 %v47553_v7, %s47438_s22  ;;  %6645 = vrot.lane.b32.xlu1 %v47550_v6, %s47439_s29 }
  0x34   : > { %6647 = vrot.lane.b32.xlu0 %v47564_v9, %s47439_s29  ;;  %6643 = vrot.lane.b32.xlu1 %v47553_v7, %s47439_s29 }
  0x38   : > { %7675 = vrot.lane.b32.xlu0 %v47550_v6, %s53932_s23  ;;  %7677 = vrot.lane.b32.xlu1 %v47564_v9, %s53932_s23 }
  0x3c   : > { %7673 = vrot.lane.b32.xlu0 %v47553_v7, %s53932_s23  ;;  %8705 = vrot.lane.b32.xlu1 %v47550_v6, %s47441_s14 }
  0x40   : > { %8707 = vrot.lane.b32.xlu0 %v47564_v9, %s47441_s14  ;;  %8703 = vrot.lane.b32.xlu1 %v47553_v7, %s47441_s14 }
  0x86   : > { %v492_v16 = vpop.permute.xlu0 %491  ;;  %v490_v17 = vpop.permute.xlu1 %489 }
  0x87   : > { %v496_v18 = vsel %vm495_vm1, %v490_v17, %v492_v16  ;;  %v2539_v17 = vsel %vm501_vm0, %v41470_v12, 0  ;;  %v41473_v12 = vld [vmem:[%s53919_s3 + $0x40] sm:$0xff] }
  0x88   : > { %v47603_v20 = vand.u32 4294901760, %v496_v18 }
  0x8a   : > { %v47606_v21 = vsub.f32 %v496_v18, %v47603_v20  ;;  %v494_v22 = vpop.permute.xlu0 %493 }
  0x8b   : > { %v497_v23 = vsel %vm495_vm1, %v492_v16, %v494_v22  ;;  %v47609_v24 = vand.u32 4294901760, %v494_v22 }
  0x8c   : > { %v508_v26 = vand.u32 4294901760, %v497_v23  ;;  %v605_v27 = vand.u32 4294901760, %v47606_v21 }
  0x8d   : > { %v1110_v28 = vsub.f32 %v494_v22, %v47609_v24  ;;  %42524 = vmatprep.subr.mxu1 %v47609_v24  ;;  %v47774_v22 = vand.u32 4294901760, %v2539_v17 }
  0x8e   : > { %v598_v29 = vsub.f32 %v497_v23, %v508_v26  ;;  %509 = vmatprep.subr.mxu0 %v508_v26  ;;  %42525 = vmatpush3.msra.mxu1 %v47609_v24  ;;  %v606_v32 = vsub.f32 %v47606_v21, %v605_v27  ;;  %v2528_v8 = vpop.permute.xlu0 %2527 }
  0x8f   : > { %511 = vmatpush1.msra.mxu0 %v47603_v20  ;;  %42527 = vmatmul.mubr.f32.vlgmr.msra.gmra.mrb[0].mxu1 %v590_v25  ;;  %v1111_v30 = vand.u32 4294901760, %v1110_v28 }
  0x90   : > { %580 = vmatmul.mubr.f32.vlgmr.msra.gmra.mrb[0].mxu0 %v579_v10  ;;  %v599_v31 = vand.u32 4294901760, %v598_v29  ;;  %42531 = vmatprep.mubr.f32.mxu1 %v47535_v3  ;;  %v607_v37 = vand.u32 4294901760, %v606_v32 }
  0x91   : > { %585 = vmatprep.mubr.f32.mxu0 %v47433_v1  ;;  %v1112_v33 = vsub.f32 %v1110_v28, %v1111_v30 }
  0x92   : > { %v600_v34 = vsub.f32 %v598_v29, %v599_v31 }
  0x93   : > { %v1113_v35 = vand.u32 4294901760, %v1112_v33 }
  0x94   : > { %591 = vmatmul.mubr.f32.gmra.mrb[2].mxu0 %v590_v25  ;;  %v601_v36 = vand.u32 4294901760, %v600_v34 }
  0x95   : > { %42529 = vmatprep.subr.mxu1 %v1113_v35  ;;  %671 = vmatprep.mubr.f32.mxu0 %v47433_v1 }
  0x96   : > { %602 = vmatprep.subr.mxu0 %v601_v36  ;;  %42530 = vmatpush3.msra.mxu1 %v1113_v35 }
  0x97   : > { %608 = vmatpush1.msra.mxu0 %v607_v37  ;;  %42532 = vmatmul.mubr.f32.vlgmr.msra.gmra.mrb[0].mxu1 %v47590_v13 }
  0x98   : > { %42534 = vmatprep.subr.mxu1 %v1110_v28  ;;  %673 = vmatmul.mubr.f32.vlgmr.msra.gmra.mrb[0].mxu0 %v47535_v3 }
  0x99   : > { %688 = vmatprep.subr.mxu0 %v598_v29  ;;  %42535 = vmatpush3.msra.mxu1 %v1110_v28 }
  0x9a   : > { %691 = vmatpush1.msra.mxu0 %v47606_v21  ;;  %42539 = vmatprep.subr.mxu1 %v47609_v24 }
  0x9b   : > { %772 = vmatprep.subr.mxu0 %v508_v26  ;;  %678 = vmatprep.mubr.f32.mxu0 %v47433_v1 }
  0x9c   : > { %680 = vmatmul.mubr.f32.gmra.mrb[2].mxu0 %v47590_v13  ;;  %42536 = vmatprep.mubr.f32.mxu1 %v47539_v4 }
  0x9d   : > { %754 = vmatprep.mubr.f32.mxu0 %v47433_v1 }
  0x9f   : > { %42537 = vmatmul.mubr.f32.vlgmr.msra.gmra.mrb[0].mxu1 %v587_v14 }
  0xa0   : > { %42540 = vmatpush3.msra.mxu1 %v47609_v24  ;;  %757 = vmatmul.mubr.f32.vlgmr.msra.gmra.mrb[0].mxu0 %v47539_v4  ;;  %v1616_v4 = vand.u32 4294901760, %v1615_v0 }
  0xa1   : > { %774 = vmatpush1.msra.mxu0 %v47603_v20  ;;  %42544 = vmatprep.subr.mxu1 %v1111_v30 }
  0xa2   : > { %859 = vmatprep.subr.mxu0 %v599_v31  ;;  %762 = vmatprep.mubr.f32.mxu0 %v47433_v1 }
  0xa3   : > { %42541 = vmatprep.mubr.f32.mxu1 %v47547_v5 }
  0xa4   : > { %765 = vmatmul.mubr.f32.gmra.mrb[2].mxu0 %v587_v14 }
  0xa5   : > { %837 = vmatprep.mubr.f32.mxu0 %v47433_v1 }
  0xa7   : > { %42542 = vmatmul.mubr.f32.vlgmr.msra.gmra.mrb[0].mxu1 %v47599_v15 }
  0xa8   : > { %42545 = vmatpush3.msra.mxu1 %v1111_v30  ;;  %841 = vmatmul.mubr.f32.vlgmr.msra.gmra.mrb[0].mxu0 %v47547_v5  ;;  %v2526_v5 = vpop.permute.xlu1 %2525 }
  0xa9   : > { %863 = vmatpush1.msra.mxu0 %v605_v27  ;;  %42549 = vmatprep.subr.mxu1 %v47609_v24  ;;  %v2531_v11 = vsel %vm2529_vm2, %v2526_v5, %v2528_v8  ;;  %v47792_v27 = vsub.f32 %v2539_v17, %v47774_v22  ;;  %v41474_v17 = vld [vmem:[%s53919_s3 + $0x48] sm:$0xff] }
  0xaa   : > { %942 = vmatprep.subr.mxu0 %v508_v26  ;;  %846 = vmatprep.mubr.f32.mxu0 %v47433_v1 }
  0xab   : > { %42546 = vmatprep.mubr.f32.mxu1 %v47535_v3  ;;  %v47811_v32 = vand.u32 4294901760, %v47792_v27 }
  0xac   : > { %850 = vmatmul.mubr.f32.gmra.mrb[2].mxu0 %v47599_v15  ;;  %v47757_v15 = vand.u32 4294901760, %v2531_v11  ;;  %v2524_v16 = vpop.permute.xlu1 %2523 }
  0xad   : > { %926 = vmatprep.mubr.f32.mxu0 %v47433_v1  ;;  %v2530_v19 = vsel %vm2529_vm2, %v2524_v16, %v2526_v5  ;;  %v2622_v37 = vsub.f32 %v47792_v27, %v47811_v32 }
  0xae   : > { %v47771_v21 = vsub.f32 %v2531_v11, %v47757_v15  ;;  %v47778_v23 = vand.u32 4294901760, %v2530_v19 }
  0xaf   : > { %42547 = vmatmul.mubr.f32.vlgmr.msra.gmra.mrb[0].mxu1 %v47590_v13  ;;  %v2623_v39 = vand.u32 4294901760, %v2622_v37 }
  0xb0   : > { %42550 = vmatpush3.msra.mxu1 %v47609_v24  ;;  %928 = vmatmul.mubr.f32.vlgmr.msra.gmra.mrb[0].mxu0 %v47535_v3  ;;  %v2632_v26 = vand.u32 4294901760, %v47771_v21  ;;  %v47797_v28 = vsub.f32 %v2530_v19, %v47778_v23 }
  0xb1   : > { %944 = vmatpush1.msra.mxu0 %v47603_v20  ;;  %933 = vmatprep.mubr.f32.mxu0 %v47433_v1 }
  0xb2   : > { %42551 = vmatprep.mubr.f32.mxu1 %v47535_v3  ;;  %42554 = vmatprep.subr.mxu1 %v47644_v42  ;;  %v2633_v31 = vsub.f32 %v47771_v21, %v2632_v26  ;;  %v2638_v33 = vand.u32 4294901760, %v47797_v28 }
  0xb3   : > { %1518 = vmatprep.subr.mxu0 %v47648_v43 }
  0xb4   : > { %935 = vmatmul.mubr.f32.gmra.mrb[2].mxu0 %v47590_v13  ;;  %v2634_v36 = vand.u32 4294901760, %v2633_v31  ;;  %v2639_v38 = vsub.f32 %v47797_v28, %v2638_v33 }
  0xb5   : > { %1007 = vmatprep.mubr.f32.mxu0 %v47433_v1 }
  0xb6   : > { %v2640_v41 = vand.u32 4294901760, %v2639_v38 }
  0xb7   : > { %42552 = vmatmul.mubr.f32.vlgmr.msra.gmra.mrb[0].mxu1 %v47590_v13 }
  0xb8   : > { %1009 = vmatmul.mubr.f32.vlgmr.msra.gmra.mrb[0].mxu0 %v47535_v3  ;;  %42555 = vmatpush3.msra.mxu1 %v47644_v42  ;;  %v41469_v3 = vld [vmem:[%s53919_s3 + $0x20] sm:$0xff] }
  0xb9   : > { %1014 = vmatprep.mubr.f32.mxu0 %v47433_v1  ;;  %42556 = vmatprep.mubr.f32.mxu1 %v1588_v59  ;;  %v2536_v10 = vsel %vm501_vm0, %v41469_v3, 0 }
  0xba   : > { %1520 = vmatpush1.msra.mxu0 %v47674_v50  ;;  %42559 = vmatprep.subr.mxu1 %v2122_v60  ;;  %v47754_v14 = vand.u32 4294901760, %v2536_v10 }
  0xbb   : > { %1611 = vmatprep.subr.mxu0 %v1610_v63 }
  0xbc   : > { %1016 = vmatmul.mubr.f32.gmra.mrb[2].mxu0 %v47590_v13  ;;  %v47752_v13 = vand.u32 4294901760, %v2528_v8  ;;  %v47768_v20 = vsub.f32 %v2536_v10, %v47754_v14 }
  0xbd   : > { %1583 = vmatprep.mubr.f32.mxu0 %v47433_v1 }
  0xbe   : > { %v3143_v18 = vsub.f32 %v2528_v8, %v47752_v13  ;;  %v47783_v24 = vand.u32 4294901760, %v47768_v20 }
  0xbf   : > { %42557 = vmatmul.mubr.f32.vlgmr.msra.gmra.mrb[0].mxu1 %v1599_v2 }
  0xc0   : > { %1589 = vmatmul.mubr.f32.vlgmr.msra.gmra.mrb[0].mxu0 %v1588_v59  ;;  %42560 = vmatpush3.msra.mxu1 %v2122_v60  ;;  %v47785_v25 = vand.u32 4294901760, %v3143_v18  ;;  %v2611_v29 = vsub.f32 %v47768_v20, %v47783_v24 }
  0xc1   : > { %1594 = vmatprep.mubr.f32.mxu0 %v47433_v1  ;;  %42561 = vmatprep.mubr.f32.mxu1 %v47638_v40 }
  0xc2   : > { %1617 = vmatpush1.msra.mxu0 %v1616_v4  ;;  %42564 = vmatprep.subr.mxu1 %v2119_v46  ;;  %v3145_v30 = vsub.f32 %v3143_v18, %v47785_v25  ;;  %v2612_v34 = vand.u32 4294901760, %v2611_v29 }
  0xc3   : > { %1697 = vmatprep.subr.mxu0 %v47664_v48 }
  0xc4   : > { %1600 = vmatmul.mubr.f32.gmra.mrb[2].mxu0 %v1599_v2  ;;  %v3146_v35 = vand.u32 4294901760, %v3145_v30 }
  0xc5   : > { %1680 = vmatprep.mubr.f32.mxu0 %v47433_v1 }
  0xc7   : > { %42562 = vmatmul.mubr.f32.vlgmr.msra.gmra.mrb[0].mxu1 %v47660_v47 }
  0xc8   : > { %1682 = vmatmul.mubr.f32.vlgmr.msra.gmra.mrb[0].mxu0 %v47638_v40  ;;  %42565 = vmatpush3.msra.mxu1 %v2119_v46  ;;  %v41472_v46 = vld [vmem:[%s53919_s3 + $0x38] sm:$0xff] }
  0xc9   : > { %1687 = vmatprep.mubr.f32.mxu0 %v47433_v1  ;;  %42566 = vmatprep.mubr.f32.mxu1 %v47654_v45 }
  0xca   : > { %1700 = vmatpush1.msra.mxu0 %v47696_v56  ;;  %42569 = vmatprep.subr.mxu1 %v47644_v42 }
  0xcb   : > { %1781 = vmatprep.subr.mxu0 %v47648_v43 }
  0xcc   : > { %1689 = vmatmul.mubr.f32.gmra.mrb[2].mxu0 %v47660_v47 }
  0xcd   : > { %1763 = vmatprep.mubr.f32.mxu0 %v47433_v1 }
  0xcf   : > { %42567 = vmatmul.mubr.f32.vlgmr.msra.gmra.mrb[0].mxu1 %v47682_v52 }
  0xd0   : > { %1766 = vmatmul.mubr.f32.vlgmr.msra.gmra.mrb[0].mxu0 %v47654_v45  ;;  %42570 = vmatpush3.msra.mxu1 %v47644_v42 }
  0xd1   : > { %1771 = vmatprep.mubr.f32.mxu0 %v47433_v1  ;;  %42571 = vmatprep.mubr.f32.mxu1 %v47669_v49 }
  0xd2   : > { %1783 = vmatpush1.msra.mxu0 %v47674_v50  ;;  %42574 = vmatprep.subr.mxu1 %v47676_v51 }
  0xd3   : > { %1868 = vmatprep.subr.mxu0 %v1608_v53 }
  0xd4   : > { %1774 = vmatmul.mubr.f32.gmra.mrb[2].mxu0 %v47682_v52 }
  0xd5   : > { %1846 = vmatprep.mubr.f32.mxu0 %v47433_v1 }
  0xd7   : > { %42572 = vmatmul.mubr.f32.vlgmr.msra.gmra.mrb[0].mxu1 %v47700_v57 }
  0xd8   : > { %1850 = vmatmul.mubr.f32.vlgmr.msra.gmra.mrb[0].mxu0 %v47669_v49  ;;  %42575 = vmatpush3.msra.mxu1 %v47676_v51  ;;  %v3569_v51 = vsel %vm501_vm0, %v41472_v46, 0  ;;  %v41475_v46 = vld [vmem:[%s53919_s3 + $0x50] sm:$0xff] }
  0xd9   : > { %1855 = vmatprep.mubr.f32.mxu0 %v47433_v1  ;;  %42576 = vmatprep.mubr.f32.mxu1 %v47638_v40  ;;  %v47886_v56 = vand.u32 4294901760, %v3569_v51 }
  0xda   : > { %1872 = vmatpush1.msra.mxu0 %v1614_v61  ;;  %42579 = vmatprep.subr.mxu1 %v47644_v42 }
  0xdb   : > { %1951 = vmatprep.subr.mxu0 %v47648_v43  ;;  %v3558_v43 = vpop.permute.xlu1 %3557  ;;  %v47904_v61 = vsub.f32 %v3569_v51, %v47886_v56  ;;  %v41476_v51 = vld [vmem:[%s53919_s3 + $0x58] sm:$0xff] }
  0xdc   : > { %1859 = vmatmul.mubr.f32.gmra.mrb[2].mxu0 %v47700_v57 }
  0xdd   : > { %1935 = vmatprep.mubr.f32.mxu0 %v47433_v1  ;;  %v47923_v0 = vand.u32 4294901760, %v47904_v61 }
  0xdf   : > { %42577 = vmatmul.mubr.f32.vlgmr.msra.gmra.mrb[0].mxu1 %v47660_v47  ;;  %v3652_v8 = vsub.f32 %v47904_v61, %v47923_v0 }
  0xe0   : > { %1937 = vmatmul.mubr.f32.vlgmr.msra.gmra.mrb[0].mxu0 %v47638_v40  ;;  %42580 = vmatpush3.msra.mxu1 %v47644_v42  ;;  %v3556_v42 = vpop.permute.xlu0 %3555 }
  0xe1   : > { %1942 = vmatprep.mubr.f32.mxu0 %v47433_v1  ;;  %42581 = vmatprep.mubr.f32.mxu1 %v47638_v40  ;;  %v3561_v45 = vsel %vm3559_vm3, %v3556_v42, %v3558_v43  ;;  %v3653_v10 = vand.u32 4294901760, %v3652_v8 }
  0xe2   : > { %1953 = vmatpush1.msra.mxu0 %v47674_v50  ;;  %42584 = vmatprep.subr.mxu1 %v47752_v13  ;;  %v47867_v50 = vand.u32 4294901760, %v3561_v45 }
  0xe3   : > { %2542 = vmatprep.subr.mxu0 %v47757_v15 }
  0xe4   : > { %1944 = vmatmul.mubr.f32.gmra.mrb[2].mxu0 %v47660_v47  ;;  %v3554_v49 = vpop.permute.xlu0 %3553  ;;  %v47884_v55 = vsub.f32 %v3561_v45, %v47867_v50 }
  0xe5   : > { %2016 = vmatprep.mubr.f32.mxu0 %v47433_v1  ;;  %v3560_v52 = vsel %vm3559_vm3, %v3554_v49, %v3556_v42  ;;  %v5626_v49 = vsel %vm501_vm0, %v41475_v46, 0 }
  0xe6   : > { %v47890_v57 = vand.u32 4294901760, %v3560_v52  ;;  %v3662_v60 = vand.u32 4294901760, %v47884_v55 }
  0xe7   : > { %42582 = vmatmul.mubr.f32.vlgmr.msra.gmra.mrb[0].mxu1 %v47660_v47 }
  0xe8   : > { %2018 = vmatmul.mubr.f32.vlgmr.msra.gmra.mrb[0].mxu0 %v47638_v40  ;;  %42585 = vmatpush3.msra.mxu1 %v47752_v13  ;;  %v41471_v40 = vld [vmem:[%s53919_s3 + $0x30] sm:$0xff]  ;;  %v47910_v6 = vsub.f32 %v3560_v52, %v47890_v57  ;;  %v3663_v63 = vsub.f32 %v47884_v55, %v3662_v60 }
  0xe9   : > { %2023 = vmatprep.mubr.f32.mxu0 %v47433_v1  ;;  %2544 = vmatpush1.msra.mxu0 %v47778_v23  ;;  %v3566_v44 = vsel %vm501_vm0, %v41471_v40, 0 }
  0xea   : > { %42586 = vmatprep.mubr.f32.mxu1 %v2612_v34  ;;  %42589 = vmatprep.subr.mxu1 %v3146_v35  ;;  %v47864_v48 = vand.u32 4294901760, %v3566_v44  ;;  %v3668_v2 = vand.u32 4294901760, %v47910_v6  ;;  %v3664_v5 = vand.u32 4294901760, %v3663_v63 }
  0xeb   : > { %2635 = vmatprep.subr.mxu0 %v2634_v36 }
  0xec   : > { %2025 = vmatmul.mubr.f32.gmra.mrb[2].mxu0 %v47660_v47  ;;  %v47862_v47 = vand.u32 4294901760, %v3558_v43  ;;  %v47880_v54 = vsub.f32 %v3566_v44, %v47864_v48  ;;  %v3669_v7 = vsub.f32 %v47910_v6, %v3668_v2 }
  0xed   : > { %2607 = vmatprep.mubr.f32.mxu0 %v47433_v1 }
  0xee   : > { %v4173_v53 = vsub.f32 %v3558_v43, %v47862_v47  ;;  %v47895_v58 = vand.u32 4294901760, %v47880_v54  ;;  %v3670_v11 = vand.u32 4294901760, %v3669_v7 }
  0xef   : > { %42587 = vmatmul.mubr.f32.vlgmr.msra.gmra.mrb[0].mxu1 %v2623_v39 }
  0xf0   : > { %42590 = vmatpush3.msra.mxu1 %v3146_v35  ;;  %2613 = vmatmul.mubr.f32.vlgmr.msra.gmra.mrb[0].mxu0 %v2612_v34  ;;  %v47897_v59 = vand.u32 4294901760, %v4173_v53  ;;  %v3641_v9 = vsub.f32 %v47880_v54, %v47895_v58 }
  0xf1   : > { %2641 = vmatpush1.msra.mxu0 %v2640_v41  ;;  %42594 = vmatprep.subr.mxu1 %v3143_v18 }
  0xf2   : > { %2721 = vmatprep.subr.mxu0 %v47771_v21  ;;  %2618 = vmatprep.mubr.f32.mxu0 %v47433_v1  ;;  %v4175_v62 = vsub.f32 %v4173_v53, %v47897_v59  ;;  %v3642_v4 = vand.u32 4294901760, %v3641_v9 }
  0xf3   : > { %42591 = vmatprep.mubr.f32.mxu1 %v47754_v14 }
  0xf4   : > { %2624 = vmatmul.mubr.f32.gmra.mrb[2].mxu0 %v2623_v39  ;;  %v4176_v3 = vand.u32 4294901760, %v4175_v62 }
  0xf5   : > { %2704 = vmatprep.mubr.f32.mxu0 %v47433_v1 }
  0xf7   : > { %42592 = vmatmul.mubr.f32.vlgmr.msra.gmra.mrb[0].mxu1 %v47774_v22 }
  0xf8   : > { %42595 = vmatpush3.msra.mxu1 %v3143_v18  ;;  %2706 = vmatmul.mubr.f32.vlgmr.msra.gmra.mrb[0].mxu0 %v47754_v14 }
  0xf9   : > { %2724 = vmatpush1.msra.mxu0 %v47797_v28  ;;  %42599 = vmatprep.subr.mxu1 %v47752_v13 }
  0xfa   : > { %2805 = vmatprep.subr.mxu0 %v47757_v15  ;;  %2711 = vmatprep.mubr.f32.mxu0 %v47433_v1 }
  0xfb   : > { %42596 = vmatprep.mubr.f32.mxu1 %v47768_v20 }
  0xfc   : > { %2713 = vmatmul.mubr.f32.gmra.mrb[2].mxu0 %v47774_v22 }
  0xfd   : > { %2787 = vmatprep.mubr.f32.mxu0 %v47433_v1 }
  0xff   : > { %42597 = vmatmul.mubr.f32.vlgmr.msra.gmra.mrb[0].mxu1 %v47792_v27 }
 0x100   : > { %42600 = vmatpush3.msra.mxu1 %v47752_v13  ;;  %2790 = vmatmul.mubr.f32.vlgmr.msra.gmra.mrb[0].mxu0 %v47768_v20 }
 0x101   : > { %2807 = vmatpush1.msra.mxu0 %v47778_v23  ;;  %42604 = vmatprep.subr.mxu1 %v47785_v25 }
 0x102   : > { %2892 = vmatprep.subr.mxu0 %v2632_v26  ;;  %2795 = vmatprep.mubr.f32.mxu0 %v47433_v1 }
 0x103   : > { %42601 = vmatprep.mubr.f32.mxu1 %v47783_v24 }
 0x104   : > { %2798 = vmatmul.mubr.f32.gmra.mrb[2].mxu0 %v47792_v27 }
 0x105   : > { %2870 = vmatprep.mubr.f32.mxu0 %v47433_v1 }
 0x107   : > { %42602 = vmatmul.mubr.f32.vlgmr.msra.gmra.mrb[0].mxu1 %v47811_v32 }
 0x108   : > { %42605 = vmatpush3.msra.mxu1 %v47785_v25  ;;  %2874 = vmatmul.mubr.f32.vlgmr.msra.gmra.mrb[0].mxu0 %v47783_v24 }
 0x109   : > { %2896 = vmatpush1.msra.mxu0 %v2638_v33  ;;  %42609 = vmatprep.subr.mxu1 %v47752_v13 }
 0x10a   : > { %2975 = vmatprep.subr.mxu0 %v47757_v15  ;;  %2879 = vmatprep.mubr.f32.mxu0 %v47433_v1  ;;  %v4596_v15 = vsel %vm501_vm0, %v41473_v12, 0 }
 0x10b   : > { %42606 = vmatprep.mubr.f32.mxu1 %v47754_v14  ;;  %v47976_v19 = vand.u32 4294901760, %v4596_v15 }
 0x10c   : > { %2883 = vmatmul.mubr.f32.gmra.mrb[2].mxu0 %v47811_v32 }
 0x10d   : > { %2959 = vmatprep.mubr.f32.mxu0 %v47433_v1  ;;  %v47992_v25 = vsub.f32 %v4596_v15, %v47976_v19 }
 0x10f   : > { %42607 = vmatmul.mubr.f32.vlgmr.msra.gmra.mrb[0].mxu1 %v47774_v22  ;;  %v48005_v29 = vand.u32 4294901760, %v47992_v25 }
 0x110   : > { %42610 = vmatpush3.msra.mxu1 %v47752_v13  ;;  %2961 = vmatmul.mubr.f32.vlgmr.msra.gmra.mrb[0].mxu0 %v47754_v14  ;;  %v4586_v13 = vpop.permute.xlu1 %4585 }
 0x111   : > { %2977 = vmatpush1.msra.mxu0 %v47778_v23  ;;  %2966 = vmatprep.mubr.f32.mxu0 %v47433_v1  ;;  %v4671_v34 = vsub.f32 %v47992_v25, %v48005_v29 }
 0x112   : > { %42611 = vmatprep.mubr.f32.mxu1 %v47754_v14  ;;  %3572 = vmatprep.subr.mxu0 %v47867_v50 }
 0x113   : > { %42614 = vmatprep.subr.mxu1 %v47862_v47  ;;  %v4672_v39 = vand.u32 4294901760, %v4671_v34 }
 0x114   : > { %2968 = vmatmul.mubr.f32.gmra.mrb[2].mxu0 %v47774_v22  ;;  %v4584_v21 = vpop.permute.xlu1 %4583 }
 0x115   : > { %3040 = vmatprep.mubr.f32.mxu0 %v47433_v1  ;;  %v4590_v24 = vsel %vm4589_vm4, %v4584_v21, %v4586_v13 }
 0x116   : > { %v48002_v28 = vand.u32 4294901760, %v4590_v24 }
 0x117   : > { %42612 = vmatmul.mubr.f32.vlgmr.msra.gmra.mrb[0].mxu1 %v47774_v22 }
 0x118   : > { %3042 = vmatmul.mubr.f32.vlgmr.msra.gmra.mrb[0].mxu0 %v47754_v14  ;;  %42615 = vmatpush3.msra.mxu1 %v47862_v47  ;;  %v4588_v14 = vpop.permute.xlu0 %4587  ;;  %v48018_v33 = vsub.f32 %v4590_v24, %v48002_v28 }
 0x119   : > { %3047 = vmatprep.mubr.f32.mxu0 %v47433_v1  ;;  %3574 = vmatpush1.msra.mxu0 %v47890_v57  ;;  %v4591_v16 = vsel %vm4589_vm4, %v4586_v13, %v4588_v14  ;;  %v47974_v18 = vand.u32 4294901760, %v4588_v14 }
 0x11a   : > { %42616 = vmatprep.mubr.f32.mxu1 %v3642_v4  ;;  %42619 = vmatprep.subr.mxu1 %v4176_v3  ;;  %v47979_v20 = vand.u32 4294901760, %v4591_v16  ;;  %v4698_v38 = vand.u32 4294901760, %v48018_v33 }
 0x11b   : > { %3665 = vmatprep.subr.mxu0 %v3664_v5  ;;  %v5203_v23 = vsub.f32 %v4588_v14, %v47974_v18 }
 0x11c   : > { %3049 = vmatmul.mubr.f32.gmra.mrb[2].mxu0 %v47774_v22  ;;  %v4599_v22 = vsel %vm501_vm0, %v41474_v17, 0  ;;  %v47996_v26 = vsub.f32 %v4591_v16, %v47979_v20  ;;  %v4699_v43 = vsub.f32 %v48018_v33, %v4698_v38  ;;  %v41477_v17 = vld [vmem:[%s53919_s3 + $0x60] sm:$0xff] }
 0x11d   : > { %3637 = vmatprep.mubr.f32.mxu0 %v47433_v1  ;;  %v47998_v27 = vand.u32 4294901760, %v4599_v22  ;;  %v48007_v30 = vand.u32 4294901760, %v5203_v23 }
 0x11e   : > { %v4692_v31 = vand.u32 4294901760, %v47996_v26  ;;  %v4700_v45 = vand.u32 4294901760, %v4699_v43 }
 0x11f   : > { %42617 = vmatmul.mubr.f32.vlgmr.msra.gmra.mrb[0].mxu1 %v3653_v10  ;;  %v48012_v32 = vsub.f32 %v4599_v22, %v47998_v27  ;;  %v5205_v35 = vsub.f32 %v5203_v23, %v48007_v30  ;;  %v41478_v22 = vld [vmem:[%s53919_s3 + $0x68] sm:$0xff] }
 0x120   : > { %42620 = vmatpush3.msra.mxu1 %v4176_v3  ;;  %3643 = vmatmul.mubr.f32.vlgmr.msra.gmra.mrb[0].mxu0 %v3642_v4  ;;  %v4693_v36 = vsub.f32 %v47996_v26, %v4692_v31 }
 0x121   : > { %3671 = vmatpush1.msra.mxu0 %v3670_v11  ;;  %42624 = vmatprep.subr.mxu1 %v4173_v53  ;;  %v48029_v37 = vand.u32 4294901760, %v48012_v32  ;;  %v5206_v41 = vand.u32 4294901760, %v5205_v35 }
 0x122   : > { %3751 = vmatprep.subr.mxu0 %v47884_v55  ;;  %3648 = vmatprep.mubr.f32.mxu0 %v47433_v1  ;;  %v4694_v40 = vand.u32 4294901760, %v4693_v36 }
 0x123   : > { %42621 = vmatprep.mubr.f32.mxu1 %v47864_v48  ;;  %v4682_v42 = vsub.f32 %v48012_v32, %v48029_v37 }
 0x124   : > { %3654 = vmatmul.mubr.f32.gmra.mrb[2].mxu0 %v3653_v10 }
 0x125   : > { %3734 = vmatprep.mubr.f32.mxu0 %v47433_v1  ;;  %v4683_v44 = vand.u32 4294901760, %v4682_v42 }
 0x127   : > { %42622 = vmatmul.mubr.f32.vlgmr.msra.gmra.mrb[0].mxu1 %v47886_v56 }
 0x128   : > { %42625 = vmatpush3.msra.mxu1 %v4173_v53  ;;  %3736 = vmatmul.mubr.f32.vlgmr.msra.gmra.mrb[0].mxu0 %v47864_v48  ;;  %v48078_v53 = vand.u32 4294901760, %v5626_v49 }
 0x129   : > { %3754 = vmatpush1.msra.mxu0 %v47910_v6  ;;  %42629 = vmatprep.subr.mxu1 %v47862_v47  ;;  %v48103_v6 = vld [vmem:[#allocation2] sm:$0xff] }
 0x12a   : > { %3835 = vmatprep.subr.mxu0 %v47867_v50  ;;  %3741 = vmatprep.mubr.f32.mxu0 %v47433_v1  ;;  %464 = vst.msk [vmem:[#allocation2 + $0x10] sm:$0xff] %vm463_vm9, %v48103_v6  ;;  %476 = vst.msk [vmem:[#allocation2 + $0x70] sm:$0xff] %vm463_vm9, %v48103_v6 }
 0x12b   : > { %42626 = vmatprep.mubr.f32.mxu1 %v47880_v54  ;;  %467 = vst.msk [vmem:[#allocation2 + $0x28] sm:$0xff] %vm463_vm9, %v48103_v6  ;;  %470 = vst.msk [vmem:[#allocation2 + $0x40] sm:$0xff] %vm463_vm9, %v48103_v6 }
 0x12c   : > { %3743 = vmatmul.mubr.f32.gmra.mrb[2].mxu0 %v47886_v56  ;;  %473 = vst.msk [vmem:[#allocation2 + $0x58] sm:$0xff] %vm463_vm9, %v48103_v6 }
 0x12d   : > { %3817 = vmatprep.mubr.f32.mxu0 %v47433_v1 }
 0x12f   : > { %42627 = vmatmul.mubr.f32.vlgmr.msra.gmra.mrb[0].mxu1 %v47904_v61 }
 0x130   : > { %42630 = vmatpush3.msra.mxu1 %v47862_v47  ;;  %3820 = vmatmul.mubr.f32.vlgmr.msra.gmra.mrb[0].mxu0 %v47880_v54 }
 0x131   : > { %3837 = vmatpush1.msra.mxu0 %v47890_v57  ;;  %42634 = vmatprep.subr.mxu1 %v47897_v59 }
 0x132   : > { %3922 = vmatprep.subr.mxu0 %v3662_v60  ;;  %3825 = vmatprep.mubr.f32.mxu0 %v47433_v1 }
 0x133   : > { %42631 = vmatprep.mubr.f32.mxu1 %v47895_v58 }
 0x134   : > { %3828 = vmatmul.mubr.f32.gmra.mrb[2].mxu0 %v47904_v61 }
 0x135   : > { %3900 = vmatprep.mubr.f32.mxu0 %v47433_v1 }
 0x137   : > { %42632 = vmatmul.mubr.f32.vlgmr.msra.gmra.mrb[0].mxu1 %v47923_v0 }
 0x138   : > { %42635 = vmatpush3.msra.mxu1 %v47897_v59  ;;  %3904 = vmatmul.mubr.f32.vlgmr.msra.gmra.mrb[0].mxu0 %v47895_v58  ;;  %v48094_v59 = vsub.f32 %v5626_v49, %v48078_v53 }
 0x139   : > { %3926 = vmatpush1.msra.mxu0 %v3668_v2  ;;  %42639 = vmatprep.subr.mxu1 %v47862_v47 }
 0x13a   : > { %4005 = vmatprep.subr.mxu0 %v47867_v50  ;;  %3909 = vmatprep.mubr.f32.mxu0 %v47433_v1  ;;  %v48109_v9 = vand.u32 4294901760, %v48094_v59 }
 0x13b   : > { %42636 = vmatprep.mubr.f32.mxu1 %v47864_v48 }
 0x13c   : > { %3913 = vmatmul.mubr.f32.gmra.mrb[2].mxu0 %v47923_v0  ;;  %v5701_v4 = vsub.f32 %v48094_v59, %v48109_v9 }
 0x13d   : > { %3989 = vmatprep.mubr.f32.mxu0 %v47433_v1 }
 0x13e   : > { %v5702_v10 = vand.u32 4294901760, %v5701_v4 }
 0x13f   : > { %42637 = vmatmul.mubr.f32.vlgmr.msra.gmra.mrb[0].mxu1 %v47886_v56 }
 0x140   : > { %42640 = vmatpush3.msra.mxu1 %v47862_v47  ;;  %3991 = vmatmul.mubr.f32.vlgmr.msra.gmra.mrb[0].mxu0 %v47864_v48  ;;  %v5616_v47 = vpop.permute.xlu0 %5615 }
 0x141   : > { %4007 = vmatpush1.msra.mxu0 %v47890_v57  ;;  %3996 = vmatprep.mubr.f32.mxu0 %v47433_v1 }
 0x142   : > { %42641 = vmatprep.mubr.f32.mxu1 %v47864_v48  ;;  %4602 = vmatprep.subr.mxu0 %v47979_v20 }
 0x143   : > { %42644 = vmatprep.subr.mxu1 %v47974_v18 }
 0x144   : > { %3998 = vmatmul.mubr.f32.gmra.mrb[2].mxu0 %v47886_v56  ;;  %v5614_v54 = vpop.permute.xlu0 %5613 }
 0x145   : > { %4070 = vmatprep.mubr.f32.mxu0 %v47433_v1  ;;  %v5620_v57 = vsel %vm5619_vm5, %v5614_v54, %v5616_v47  ;;  %v47442_v54 = vmov 0  }
 0x146   : > { %47383 = vset.pattern.permute.xlu1 %v47442_v54  ;;  %47382 = vset.pattern.permute.xlu0 %v47442_v54 }
 0x147   : > { %42642 = vmatmul.mubr.f32.vlgmr.msra.gmra.mrb[0].mxu1 %v47886_v56 }
 0x148   : > { %4072 = vmatmul.mubr.f32.vlgmr.msra.gmra.mrb[0].mxu0 %v47864_v48  ;;  %42645 = vmatpush3.msra.mxu1 %v47974_v18  ;;  %v5618_v48 = vpop.permute.xlu1 %5617 }
 0x149   : > { %4077 = vmatprep.mubr.f32.mxu0 %v47433_v1  ;;  %4604 = vmatpush1.msra.mxu0 %v48002_v28  ;;  %v5621_v50 = vsel %vm5619_vm5, %v5616_v47, %v5618_v48  ;;  %v48076_v52 = vand.u32 4294901760, %v5618_v48 }
 0x14a   : > { %42646 = vmatprep.mubr.f32.mxu1 %v4672_v39  ;;  %42649 = vmatprep.subr.mxu1 %v5206_v41  ;;  %v48081_v55 = vand.u32 4294901760, %v5621_v50 }
 0x14b   : > { %4695 = vmatprep.subr.mxu0 %v4694_v40  ;;  %v6233_v58 = vsub.f32 %v5618_v48, %v48076_v52 }
 0x14c   : > { %4079 = vmatmul.mubr.f32.gmra.mrb[2].mxu0 %v47886_v56  ;;  %v5629_v56 = vsel %vm501_vm0, %v41476_v51, 0  ;;  %v48098_v60 = vsub.f32 %v5621_v50, %v48081_v55  ;;  %v9731_v51 = vld [vmem:[%s53920_s4 + $0x8] sm:$0xff] }
 0x14d   : > { %4667 = vmatprep.mubr.f32.mxu0 %v47433_v1  ;;  %v48100_v61 = vand.u32 4294901760, %v5629_v56  ;;  %v48111_v62 = vand.u32 4294901760, %v6233_v58  ;;  %9739 = vperm.xlu1 %47383, %v9731_v51  }
 0x14e   : > { %v5722_v63 = vand.u32 4294901760, %v48098_v60 }
 0x14f   : > { %42647 = vmatmul.mubr.f32.vlgmr.msra.gmra.mrb[0].mxu1 %v4683_v44  ;;  %v48116_v0 = vsub.f32 %v5629_v56, %v48100_v61  ;;  %v6235_v3 = vsub.f32 %v6233_v58, %v48111_v62  ;;  %v477_v56 = vld [vmem:[%s53918_s2] sm:$0x7] }
 0x150   : > { %42650 = vmatpush3.msra.mxu1 %v5206_v41  ;;  %4673 = vmatmul.mubr.f32.vlgmr.msra.gmra.mrb[0].mxu0 %v4672_v39  ;;  %v5723_v5 = vsub.f32 %v48098_v60, %v5722_v63 }
 0x151   : > { %4701 = vmatpush1.msra.mxu0 %v4700_v45  ;;  %42654 = vmatprep.subr.mxu1 %v5203_v23  ;;  %v48133_v8 = vand.u32 4294901760, %v48116_v0  ;;  %v6236_v11 = vand.u32 4294901760, %v6235_v3 }
 0x152   : > { %4781 = vmatprep.subr.mxu0 %v47996_v26  ;;  %4678 = vmatprep.mubr.f32.mxu0 %v47433_v1  ;;  %v5724_v12 = vand.u32 4294901760, %v5723_v5 }
 0x153   : > { %42651 = vmatprep.mubr.f32.mxu1 %v47976_v19  ;;  %v5712_v13 = vsub.f32 %v48116_v0, %v48133_v8 }
 0x154   : > { %4684 = vmatmul.mubr.f32.gmra.mrb[2].mxu0 %v4683_v44 }
 0x155   : > { %4764 = vmatprep.mubr.f32.mxu0 %v47433_v1  ;;  %v5713_v15 = vand.u32 4294901760, %v5712_v13 }
 0x157   : > { %42652 = vmatmul.mubr.f32.vlgmr.msra.gmra.mrb[0].mxu1 %v47998_v27 }
 0x158   : > { %42655 = vmatpush3.msra.mxu1 %v5203_v23  ;;  %4766 = vmatmul.mubr.f32.vlgmr.msra.gmra.mrb[0].mxu0 %v47976_v19 }
 0x159   : > { %4784 = vmatpush1.msra.mxu0 %v48018_v33  ;;  %42659 = vmatprep.subr.mxu1 %v47974_v18 }
 0x15a   : > { %4865 = vmatprep.subr.mxu0 %v47979_v20  ;;  %4771 = vmatprep.mubr.f32.mxu0 %v47433_v1 }
 0x15b   : > { %42656 = vmatprep.mubr.f32.mxu1 %v47992_v25 }
 0x15c   : > { %4773 = vmatmul.mubr.f32.gmra.mrb[2].mxu0 %v47998_v27 }
 0x15d   : > { %4847 = vmatprep.mubr.f32.mxu0 %v47433_v1 }
 0x15f   : > { %42657 = vmatmul.mubr.f32.vlgmr.msra.gmra.mrb[0].mxu1 %v48012_v32 }
 0x160   : > { %42660 = vmatpush3.msra.mxu1 %v47974_v18  ;;  %4850 = vmatmul.mubr.f32.vlgmr.msra.gmra.mrb[0].mxu0 %v47992_v25 }
 0x161   : > { %4867 = vmatpush1.msra.mxu0 %v48002_v28  ;;  %42664 = vmatprep.subr.mxu1 %v48007_v30 }
 0x162   : > { %4952 = vmatprep.subr.mxu0 %v4692_v31  ;;  %4855 = vmatprep.mubr.f32.mxu0 %v47433_v1 }
 0x163   : > { %42661 = vmatprep.mubr.f32.mxu1 %v48005_v29 }
 0x164   : > { %4858 = vmatmul.mubr.f32.gmra.mrb[2].mxu0 %v48012_v32 }
 0x165   : > { %4930 = vmatprep.mubr.f32.mxu0 %v47433_v1 }
 0x167   : > { %42662 = vmatmul.mubr.f32.vlgmr.msra.gmra.mrb[0].mxu1 %v48029_v37 }
 0x168   : > { %42665 = vmatpush3.msra.mxu1 %v48007_v30  ;;  %4934 = vmatmul.mubr.f32.vlgmr.msra.gmra.mrb[0].mxu0 %v48005_v29 }
 0x169   : > { %4956 = vmatpush1.msra.mxu0 %v4698_v38  ;;  %42669 = vmatprep.subr.mxu1 %v47974_v18 }
 0x16a   : > { %5035 = vmatprep.subr.mxu0 %v47979_v20  ;;  %4939 = vmatprep.mubr.f32.mxu0 %v47433_v1  ;;  %v48106_v1 = vand.u32 4294901760, %v5620_v57  ;;  %v6656_v20 = vsel %vm501_vm0, %v41477_v17, 0 }
 0x16b   : > { %42666 = vmatprep.mubr.f32.mxu1 %v47976_v19  ;;  %v48182_v24 = vand.u32 4294901760, %v6656_v20 }
 0x16c   : > { %4943 = vmatmul.mubr.f32.gmra.mrb[2].mxu0 %v48029_v37  ;;  %v48122_v2 = vsub.f32 %v5620_v57, %v48106_v1  ;;  %v41479_v57 = vld [vmem:[%s53919_s3 + $0x70] sm:$0xff] }
 0x16d   : > { %5019 = vmatprep.mubr.f32.mxu0 %v48103_v6  ;;  %v48198_v30 = vsub.f32 %v6656_v20, %v48182_v24 }
 0x16e   : > { %v5728_v7 = vand.u32 4294901760, %v48122_v2 }
 0x16f   : > { %42667 = vmatmul.mubr.f32.vlgmr.msra.gmra.mrb[0].mxu1 %v47998_v27  ;;  %v48211_v34 = vand.u32 4294901760, %v48198_v30 }
 0x170   : > { %42670 = vmatpush3.msra.mxu1 %v47974_v18  ;;  %5021 = vmatmul.mubr.f32.vlgmr.msra.gmra.mrb[0].mxu0 %v47976_v19  ;;  %v5729_v14 = vsub.f32 %v48122_v2, %v5728_v7  ;;  %v6646_v18 = vpop.permute.xlu1 %6645 }
 0x171   : > { %5037 = vmatpush1.msra.mxu0 %v48002_v28  ;;  %5026 = vmatprep.mubr.f32.mxu0 %v48103_v6  ;;  %v6731_v39 = vsub.f32 %v48198_v30, %v48211_v34 }
 0x172   : > { %42671 = vmatprep.mubr.f32.mxu1 %v47976_v19  ;;  %5632 = vmatprep.subr.mxu0 %v48081_v55  ;;  %v5730_v16 = vand.u32 4294901760, %v5729_v14 }
 0x173   : > { %42674 = vmatprep.subr.mxu1 %v48076_v52  ;;  %v6732_v44 = vand.u32 4294901760, %v6731_v39  ;;  %v41482_v39 = vld [vmem:[%s53919_s3 + $0x88] sm:$0xff] }
 0x174   : > { %5028 = vmatmul.mubr.f32.gmra.mrb[2].mxu0 %v47998_v27  ;;  %v6644_v26 = vpop.permute.xlu1 %6643 }
 0x175   : > { %5100 = vmatprep.mubr.f32.mxu0 %v48103_v6  ;;  %v6650_v29 = vsel %vm6649_vm6, %v6644_v26, %v6646_v18 }
 0x176   : > { %v48208_v33 = vand.u32 4294901760, %v6650_v29 }
 0x177   : > { %42672 = vmatmul.mubr.f32.vlgmr.msra.gmra.mrb[0].mxu1 %v47998_v27 }
 0x178   : > { %5102 = vmatmul.mubr.f32.vlgmr.msra.gmra.mrb[0].mxu0 %v47976_v19  ;;  %42675 = vmatpush3.msra.mxu1 %v48076_v52  ;;  %v6648_v19 = vpop.permute.xlu0 %6647  ;;  %v48224_v38 = vsub.f32 %v6650_v29, %v48208_v33 }
 0x179   : > { %5107 = vmatprep.mubr.f32.mxu0 %v48103_v6  ;;  %5634 = vmatpush1.msra.mxu0 %v48106_v1  ;;  %v6651_v21 = vsel %vm6649_vm6, %v6646_v18, %v6648_v19  ;;  %v48180_v23 = vand.u32 4294901760, %v6648_v19 }
 0x17a   : > { %42676 = vmatprep.mubr.f32.mxu1 %v5702_v10  ;;  %42679 = vmatprep.subr.mxu1 %v6236_v11  ;;  %v48185_v25 = vand.u32 4294901760, %v6651_v21  ;;  %v6758_v43 = vand.u32 4294901760, %v48224_v38 }
 0x17b   : > { %5725 = vmatprep.subr.mxu0 %v5724_v12  ;;  %v7263_v28 = vsub.f32 %v6648_v19, %v48180_v23 }
 0x17c   : > { %5109 = vmatmul.mubr.f32.gmra.mrb[2].mxu0 %v47998_v27  ;;  %v6659_v27 = vsel %vm501_vm0, %v41478_v22, 0  ;;  %v48202_v31 = vsub.f32 %v6651_v21, %v48185_v25  ;;  %v6759_v48 = vsub.f32 %v48224_v38, %v6758_v43 }
 0x17d   : > { %5697 = vmatprep.mubr.f32.mxu0 %v48103_v6  ;;  %v48204_v32 = vand.u32 4294901760, %v6659_v27  ;;  %v48213_v35 = vand.u32 4294901760, %v7263_v28 }
 0x17e   : > { %v6752_v36 = vand.u32 4294901760, %v48202_v31  ;;  %v6760_v50 = vand.u32 4294901760, %v6759_v48 }
 0x17f   : > { %42677 = vmatmul.mubr.f32.vlgmr.msra.gmra.mrb[0].mxu1 %v5713_v15  ;;  %v48218_v37 = vsub.f32 %v6659_v27, %v48204_v32  ;;  %v7265_v41 = vsub.f32 %v7263_v28, %v48213_v35 }
 0x180   : > { %42680 = vmatpush3.msra.mxu1 %v6236_v11  ;;  %5703 = vmatmul.mubr.f32.vlgmr.msra.gmra.mrb[0].mxu0 %v5702_v10  ;;  %v6753_v40 = vsub.f32 %v48202_v31, %v6752_v36 }
 0x181   : > { %5731 = vmatpush1.msra.mxu0 %v5730_v16  ;;  %42684 = vmatprep.subr.mxu1 %v6233_v58  ;;  %v48237_v42 = vand.u32 4294901760, %v48218_v37  ;;  %v7266_v45 = vand.u32 4294901760, %v7265_v41 }
 0x182   : > { %5811 = vmatprep.subr.mxu0 %v48098_v60  ;;  %5708 = vmatprep.mubr.f32.mxu0 %v48103_v6  ;;  %v6754_v46 = vand.u32 4294901760, %v6753_v40  ;;  %v7676_v60 = vpop.permute.xlu0 %7675 }
 0x183   : > { %42681 = vmatprep.mubr.f32.mxu1 %v48078_v53  ;;  %v6742_v47 = vsub.f32 %v48218_v37, %v48237_v42 }
 0x184   : > { %5714 = vmatmul.mubr.f32.gmra.mrb[2].mxu0 %v5713_v15 }
 0x185   : > { %5794 = vmatprep.mubr.f32.mxu0 %v48103_v6  ;;  %v6743_v49 = vand.u32 4294901760, %v6742_v47 }
 0x186   : > { %v7674_v5 = vpop.permute.xlu0 %7673 }
 0x187   : > { %42682 = vmatmul.mubr.f32.vlgmr.msra.gmra.mrb[0].mxu1 %v48100_v61  ;;  %v7680_v11 = vsel %vm7679_vm7, %v7674_v5, %v7676_v60 }
 0x188   : > { %42685 = vmatpush3.msra.mxu1 %v6233_v58  ;;  %5796 = vmatmul.mubr.f32.vlgmr.msra.gmra.mrb[0].mxu0 %v48078_v53  ;;  %v48337_v16 = vand.u32 4294901760, %v7680_v11 }
 0x189   : > { %5814 = vmatpush1.msra.mxu0 %v48122_v2  ;;  %42689 = vmatprep.subr.mxu1 %v48076_v52  ;;  %v41480_v2 = vld [vmem:[%s53919_s3 + $0x78] sm:$0xff] }
 0x18a   : > { %5895 = vmatprep.subr.mxu0 %v48081_v55  ;;  %5801 = vmatprep.mubr.f32.mxu0 %v48103_v6  ;;  %v7689_v10 = vsel %vm501_vm0, %v41480_v2, 0  ;;  %v48353_v21 = vsub.f32 %v7680_v11, %v48337_v16 }
 0x18b   : > { %42686 = vmatprep.mubr.f32.mxu1 %v48094_v59  ;;  %v48332_v15 = vand.u32 4294901760, %v7689_v10 }
 0x18c   : > { %5803 = vmatmul.mubr.f32.gmra.mrb[2].mxu0 %v48100_v61  ;;  %v7788_v27 = vand.u32 4294901760, %v48353_v21 }
 0x18d   : > { %5877 = vmatprep.mubr.f32.mxu0 %v48103_v6  ;;  %v48347_v20 = vsub.f32 %v7689_v10, %v48332_v15 }
 0x18f   : > { %42687 = vmatmul.mubr.f32.vlgmr.msra.gmra.mrb[0].mxu1 %v48116_v0  ;;  %v48364_v26 = vand.u32 4294901760, %v48347_v20 }
 0x190   : > { %42690 = vmatpush3.msra.mxu1 %v48076_v52  ;;  %5880 = vmatmul.mubr.f32.vlgmr.msra.gmra.mrb[0].mxu0 %v48094_v59 }
 0x191   : > { %5897 = vmatpush1.msra.mxu0 %v48106_v1  ;;  %42694 = vmatprep.subr.mxu1 %v48111_v62 }
 0x192   : > { %5982 = vmatprep.subr.mxu0 %v5722_v63  ;;  %5885 = vmatprep.mubr.f32.mxu0 %v48103_v6 }
 0x193   : > { %42691 = vmatprep.mubr.f32.mxu1 %v48109_v9 }
 0x194   : > { %5888 = vmatmul.mubr.f32.gmra.mrb[2].mxu0 %v48116_v0 }
 0x195   : > { %5960 = vmatprep.mubr.f32.mxu0 %v48103_v6 }
 0x197   : > { %42692 = vmatmul.mubr.f32.vlgmr.msra.gmra.mrb[0].mxu1 %v48133_v8 }
 0x198   : > { %42695 = vmatpush3.msra.mxu1 %v48111_v62  ;;  %5964 = vmatmul.mubr.f32.vlgmr.msra.gmra.mrb[0].mxu0 %v48109_v9  ;;  %v7686_v62 = vsel %vm501_vm0, %v41479_v57, 0 }
 0x199   : > { %5986 = vmatpush1.msra.mxu0 %v5728_v7  ;;  %42699 = vmatprep.subr.mxu1 %v48076_v52  ;;  %v48308_v3 = vand.u32 4294901760, %v7686_v62 }
 0x19a   : > { %6065 = vmatprep.subr.mxu0 %v48081_v55  ;;  %5969 = vmatprep.mubr.f32.mxu0 %v48103_v6 }
 0x19b   : > { %42696 = vmatprep.mubr.f32.mxu1 %v48078_v53  ;;  %v48326_v13 = vsub.f32 %v7686_v62, %v48308_v3 }
 0x19c   : > { %5973 = vmatmul.mubr.f32.gmra.mrb[2].mxu0 %v48133_v8 }
 0x19d   : > { %6049 = vmatprep.mubr.f32.mxu0 %v48103_v6  ;;  %v48340_v17 = vand.u32 4294901760, %v48326_v13 }
 0x19f   : > { %42697 = vmatmul.mubr.f32.vlgmr.msra.gmra.mrb[0].mxu1 %v48100_v61  ;;  %v7761_v22 = vsub.f32 %v48326_v13, %v48340_v17 }
 0x1a0   : > { %42700 = vmatpush3.msra.mxu1 %v48076_v52  ;;  %6051 = vmatmul.mubr.f32.vlgmr.msra.gmra.mrb[0].mxu0 %v48078_v53  ;;  %v9730_v52 = vld [vmem:[%s53920_s4] sm:$0xff] }
 0x1a1   : > { %6067 = vmatpush1.msra.mxu0 %v48106_v1  ;;  %6056 = vmatprep.mubr.f32.mxu0 %v48103_v6 }
 0x1a2   : > { %42701 = vmatprep.mubr.f32.mxu1 %v48078_v53  ;;  %6662 = vmatprep.subr.mxu0 %v48185_v25 }
 0x1a3   : > { %42704 = vmatprep.subr.mxu1 %v48180_v23  ;;  %9734 = vperm.xlu0 %47382, %v9730_v52  }
 0x1a4   : > { %6058 = vmatmul.mubr.f32.gmra.mrb[2].mxu0 %v48100_v61 }
 0x1a5   : > { %6130 = vmatprep.mubr.f32.mxu0 %v48103_v6 }
 0x1a7   : > { %42702 = vmatmul.mubr.f32.vlgmr.msra.gmra.mrb[0].mxu1 %v48100_v61 }
 0x1a8   : > { %6132 = vmatmul.mubr.f32.vlgmr.msra.gmra.mrb[0].mxu0 %v48078_v53  ;;  %42705 = vmatpush3.msra.mxu1 %v48180_v23  ;;  %v9755_v53 = vlaneseq }
 0x1a9   : > { %6137 = vmatprep.mubr.f32.mxu0 %v48103_v6  ;;  %6664 = vmatpush1.msra.mxu0 %v48208_v33 }
 0x1aa   : > { %42706 = vmatprep.mubr.f32.mxu1 %v6732_v44  ;;  %42709 = vmatprep.subr.mxu1 %v7266_v45  ;;  %v48273_v55 = vshrl.u32 %v9755_v53, 7 }
 0x1ab   : > { %6755 = vmatprep.subr.mxu0 %v6754_v46 }
 0x1ac   : > { %6139 = vmatmul.mubr.f32.gmra.mrb[2].mxu0 %v48100_v61  ;;  %v53936_v58 = vsub.s32 0, %v48273_v55  ;;  %v53935_v59 = vsub.s32 1, %v48273_v55  ;;  %v7678_v61 = vpop.permute.xlu1 %7677  ;;  %v53934_v63 = vsub.s32 2, %v48273_v55 }
 0x1ad   : > { %6727 = vmatprep.mubr.f32.mxu0 %v48103_v6  ;;  %v7681_v0 = vsel %vm7679_vm7, %v7676_v60, %v7678_v61  ;;  %v48306_v4 = vand.u32 4294901760, %v7678_v61 }
 0x1ae   : > { %v9758_v1 = vrot.slane %v477_v56, %v53936_v58  ;;  %v9762_v9 = vrot.slane %v477_v56, %v53935_v59  ;;  %v48311_v8 = vand.u32 4294901760, %v7681_v0  ;;  %v9766_v7 = vrot.slane %v477_v56, %v53934_v63 }
 0x1af   : > { %42707 = vmatmul.mubr.f32.vlgmr.msra.gmra.mrb[0].mxu1 %v6743_v49  ;;  %v8293_v12 = vsub.f32 %v7678_v61, %v48306_v4 }
 0x1b0   : > { %42710 = vmatpush3.msra.mxu1 %v7266_v45  ;;  %6733 = vmatmul.mubr.f32.vlgmr.msra.gmra.mrb[0].mxu0 %v6732_v44  ;;  %v48330_v14 = vsub.f32 %v7681_v0, %v48311_v8  ;;  %v8719_v44 = vsel %vm501_vm0, %v41482_v39, 0 }
 0x1b1   : > { %6761 = vmatpush1.msra.mxu0 %v6760_v50  ;;  %42714 = vmatprep.subr.mxu1 %v7263_v28  ;;  %v48342_v18 = vand.u32 4294901760, %v8293_v12 }
 0x1b2   : > { %6841 = vmatprep.subr.mxu0 %v48202_v31  ;;  %6738 = vmatprep.mubr.f32.mxu0 %v48103_v6  ;;  %v7782_v19 = vand.u32 4294901760, %v48330_v14  ;;  %v7772_v31 = vsub.f32 %v48347_v20, %v48364_v26 }
 0x1b3   : > { %42711 = vmatprep.mubr.f32.mxu1 %v48182_v24  ;;  %9767 = vrot.lane.b32.xlu1 %v9758_v1, %s47437_s19 }
 0x1b4   : > { %6744 = vmatmul.mubr.f32.gmra.mrb[2].mxu0 %v6743_v49  ;;  %9769 = vrot.lane.b32.xlu0 %v9762_v9, %s47437_s19  ;;  %v48435_v49 = vand.u32 4294901760, %v8719_v44 }
 0x1b5   : > { %6824 = vmatprep.mubr.f32.mxu0 %v48103_v6 }
 0x1b6   : > { %v8800_v54 = vsub.f32 %v8719_v44, %v48435_v49 }
 0x1b7   : > { %42712 = vmatmul.mubr.f32.vlgmr.msra.gmra.mrb[0].mxu1 %v48204_v32  ;;  %9771 = vrot.lane.b32.xlu1 %v9766_v7, %s47437_s19 }
 0x1b8   : > { %42715 = vmatpush3.msra.mxu1 %v7263_v28  ;;  %6826 = vmatmul.mubr.f32.vlgmr.msra.gmra.mrb[0].mxu0 %v48182_v24  ;;  %v7762_v28 = vand.u32 4294901760, %v7761_v22  ;;  %v8801_v1 = vand.u32 4294901760, %v8800_v54 }
 0x1b9   : > { %6844 = vmatpush1.msra.mxu0 %v48224_v38  ;;  %42719 = vmatprep.subr.mxu1 %v48180_v23 }
 0x1ba   : > { %6925 = vmatprep.subr.mxu0 %v48185_v25  ;;  %6831 = vmatprep.mubr.f32.mxu0 %v48103_v6 }
 0x1bb   : > { %42716 = vmatprep.mubr.f32.mxu1 %v48198_v30 }
 0x1bc   : > { %6833 = vmatmul.mubr.f32.gmra.mrb[2].mxu0 %v48204_v32 }
 0x1bd   : > { %6907 = vmatprep.mubr.f32.mxu0 %v48103_v6 }
 0x1bf   : > { %42717 = vmatmul.mubr.f32.vlgmr.msra.gmra.mrb[0].mxu1 %v48218_v37 }
 0x1c0   : > { %42720 = vmatpush3.msra.mxu1 %v48180_v23  ;;  %6910 = vmatmul.mubr.f32.vlgmr.msra.gmra.mrb[0].mxu0 %v48198_v30 }
 0x1c1   : > { %6927 = vmatpush1.msra.mxu0 %v48208_v33  ;;  %42724 = vmatprep.subr.mxu1 %v48213_v35 }
 0x1c2   : > { %7012 = vmatprep.subr.mxu0 %v6752_v36  ;;  %6915 = vmatprep.mubr.f32.mxu0 %v48103_v6  ;;  %v8708_v36 = vpop.permute.xlu0 %8707 }
 0x1c3   : > { %42721 = vmatprep.mubr.f32.mxu1 %v48211_v34  ;;  %v48411_v41 = vand.u32 4294901760, %v8708_v36 }
 0x1c4   : > { %6918 = vmatmul.mubr.f32.gmra.mrb[2].mxu0 %v48218_v37 }
 0x1c5   : > { %6990 = vmatprep.mubr.f32.mxu0 %v48103_v6  ;;  %v9323_v45 = vsub.f32 %v8708_v36, %v48411_v41 }
 0x1c7   : > { %42722 = vmatmul.mubr.f32.vlgmr.msra.gmra.mrb[0].mxu1 %v48237_v42  ;;  %v48444_v52 = vand.u32 4294901760, %v9323_v45 }
 0x1c8   : > { %42725 = vmatpush3.msra.mxu1 %v48213_v35  ;;  %6994 = vmatmul.mubr.f32.vlgmr.msra.gmra.mrb[0].mxu0 %v48211_v34  ;;  %v7773_v34 = vand.u32 4294901760, %v7772_v31 }
 0x1c9   : > { %7016 = vmatpush1.msra.mxu0 %v6758_v43  ;;  %42729 = vmatprep.subr.mxu1 %v48180_v23  ;;  %v9325_v60 = vsub.f32 %v9323_v45, %v48444_v52 }
 0x1ca   : > { %7095 = vmatprep.subr.mxu0 %v48185_v25  ;;  %6999 = vmatprep.mubr.f32.mxu0 %v48103_v6  ;;  %v8295_v25 = vsub.f32 %v8293_v12, %v48342_v18 }
 0x1cb   : > { %42726 = vmatprep.mubr.f32.mxu1 %v48182_v24  ;;  %v9326_v0 = vand.u32 4294901760, %v9325_v60  ;;  %v41483_v60 = vld [vmem:[%s53921_s5 + $0x10] sm:$0xff] }
 0x1cc   : > { %7003 = vmatmul.mubr.f32.gmra.mrb[2].mxu0 %v48237_v42  ;;  %v8296_v29 = vand.u32 4294901760, %v8295_v25 }
 0x1cd   : > { %7079 = vmatprep.mubr.f32.mxu0 %v48103_v6 }
 0x1cf   : > { %42727 = vmatmul.mubr.f32.vlgmr.msra.gmra.mrb[0].mxu1 %v48204_v32 }
 0x1d0   : > { %42730 = vmatpush3.msra.mxu1 %v48180_v23  ;;  %7081 = vmatmul.mubr.f32.vlgmr.msra.gmra.mrb[0].mxu0 %v48182_v24  ;;  %v7783_v23 = vsub.f32 %v48330_v14, %v7782_v19 }
 0x1d1   : > { %7097 = vmatpush1.msra.mxu0 %v48208_v33  ;;  %7086 = vmatprep.mubr.f32.mxu0 %v48103_v6  ;;  %v7789_v33 = vsub.f32 %v48353_v21, %v7788_v27 }
 0x1d2   : > { %42731 = vmatprep.mubr.f32.mxu1 %v48182_v24  ;;  %7692 = vmatprep.subr.mxu0 %v48311_v8  ;;  %v7784_v30 = vand.u32 4294901760, %v7783_v23 }
 0x1d3   : > { %42734 = vmatprep.subr.mxu1 %v48306_v4  ;;  %v7790_v35 = vand.u32 4294901760, %v7789_v33 }
 0x1d4   : > { %7088 = vmatmul.mubr.f32.gmra.mrb[2].mxu0 %v48204_v32 }
 0x1d5   : > { %7160 = vmatprep.mubr.f32.mxu0 %v48103_v6 }
 0x1d7   : > { %42732 = vmatmul.mubr.f32.vlgmr.msra.gmra.mrb[0].mxu1 %v48204_v32 }
 0x1d8   : > { %7162 = vmatmul.mubr.f32.vlgmr.msra.gmra.mrb[0].mxu0 %v48182_v24  ;;  %42735 = vmatpush3.msra.mxu1 %v48306_v4  ;;  %v41481_v24 = vld [vmem:[%s53919_s3 + $0x80] sm:$0xff] }
 0x1d9   : > { %7167 = vmatprep.mubr.f32.mxu0 %v48103_v6  ;;  %7694 = vmatpush1.msra.mxu0 %v48337_v16  ;;  %v8716_v37 = vsel %vm501_vm0, %v41481_v24, 0  ;;  %vm41389_vm0 = vcmask 256000  }
 0x1da   : > { %42736 = vmatprep.mubr.f32.mxu1 %v7762_v28  ;;  %42739 = vmatprep.subr.mxu1 %v8296_v29  ;;  %v48413_v40 = vand.u32 4294901760, %v8716_v37 }
 0x1db   : > { %7785 = vmatprep.subr.mxu0 %v7784_v30 }
 0x1dc   : > { %7169 = vmatmul.mubr.f32.gmra.mrb[2].mxu0 %v48204_v32  ;;  %v8706_v32 = vpop.permute.xlu1 %8705  ;;  %v48429_v47 = vsub.f32 %v8716_v37, %v48413_v40 }
 0x1dd   : > { %7757 = vmatprep.mubr.f32.mxu0 %v48103_v6  ;;  %v8711_v38 = vsel %vm8709_vm8, %v8706_v32, %v8708_v36 }
 0x1de   : > { %v48416_v42 = vand.u32 4294901760, %v8711_v38  ;;  %v48442_v51 = vand.u32 4294901760, %v48429_v47 }
 0x1df   : > { %42737 = vmatmul.mubr.f32.vlgmr.msra.gmra.mrb[0].mxu1 %v7773_v34 }
 0x1e0   : > { %42740 = vmatpush3.msra.mxu1 %v8296_v29  ;;  %7763 = vmatmul.mubr.f32.vlgmr.msra.gmra.mrb[0].mxu0 %v7762_v28  ;;  %v8704_v43 = vpop.permute.xlu1 %8703  ;;  %v48433_v48 = vsub.f32 %v8711_v38, %v48416_v42  ;;  %v8791_v57 = vsub.f32 %v48429_v47, %v48442_v51 }
 0x1e1   : > { %7791 = vmatpush1.msra.mxu0 %v7790_v35  ;;  %42744 = vmatprep.subr.mxu1 %v8293_v12  ;;  %v8710_v46 = vsel %vm8709_vm8, %v8704_v43, %v8706_v32 }
 0x1e2   : > { %7871 = vmatprep.subr.mxu0 %v48330_v14  ;;  %7768 = vmatprep.mubr.f32.mxu0 %v48103_v6  ;;  %v48439_v50 = vand.u32 4294901760, %v8710_v46  ;;  %v8812_v53 = vand.u32 4294901760, %v48433_v48  ;;  %v8792_v62 = vand.u32 4294901760, %v8791_v57 }
 0x1e3   : > { %42741 = vmatprep.mubr.f32.mxu1 %v48308_v3 }
 0x1e4   : > { %7774 = vmatmul.mubr.f32.gmra.mrb[2].mxu0 %v7773_v34  ;;  %v8817_v56 = vsub.f32 %v8710_v46, %v48439_v50  ;;  %v8813_v61 = vsub.f32 %v48433_v48, %v8812_v53 }
 0x1e5   : > { %7854 = vmatprep.mubr.f32.mxu0 %v48103_v6 }
 0x1e6   : > { %v8818_v9 = vand.u32 4294901760, %v8817_v56  ;;  %v8814_v2 = vand.u32 4294901760, %v8813_v61  ;;  %v9862_v61 = vsel %vm9860_vm13, %v41483_v60, 0 }
 0x1e7   : > { %42742 = vmatmul.mubr.f32.vlgmr.msra.gmra.mrb[0].mxu1 %v48332_v15 }
 0x1e8   : > { %42745 = vmatpush3.msra.mxu1 %v8293_v12  ;;  %7856 = vmatmul.mubr.f32.vlgmr.msra.gmra.mrb[0].mxu0 %v48308_v3  ;;  %v8819_v5 = vsub.f32 %v8817_v56, %v8818_v9  ;;  %v29369_v12 = vld [vmem:[%s47544_s15 + $0x10] sm:$0xff]  ;;  %s47443_s15 = smov 19  }
 0x1e9   : > { %7874 = vmatpush1.msra.mxu0 %v48353_v21  ;;  %42749 = vmatprep.subr.mxu1 %v48306_v4  ;;  %29372 = vst.msk [vmem:[#allocation2 + $0x70] sm:$0xff] %vm463_vm9, %v29369_v12 }
 0x1ea   : > { %7955 = vmatprep.subr.mxu0 %v48311_v8  ;;  %7861 = vmatprep.mubr.f32.mxu0 %v48103_v6  ;;  %v8820_v7 = vand.u32 4294901760, %v8819_v5 }
 0x1eb   : > { %42746 = vmatprep.mubr.f32.mxu1 %v48326_v13 }
 0x1ec   : > { %7863 = vmatmul.mubr.f32.gmra.mrb[2].mxu0 %v48332_v15 }
 0x1ed   : > { %7937 = vmatprep.mubr.f32.mxu0 %v48103_v6 }
 0x1ef   : > { %42747 = vmatmul.mubr.f32.vlgmr.msra.gmra.mrb[0].mxu1 %v48347_v20 }
 0x1f0   : > { %42750 = vmatpush3.msra.mxu1 %v48306_v4  ;;  %7940 = vmatmul.mubr.f32.vlgmr.msra.gmra.mrb[0].mxu0 %v48326_v13 }
 0x1f1   : > { %7957 = vmatpush1.msra.mxu0 %v48337_v16  ;;  %42754 = vmatprep.subr.mxu1 %v48342_v18 }
 0x1f2   : > { %8042 = vmatprep.subr.mxu0 %v7782_v19  ;;  %7945 = vmatprep.mubr.f32.mxu0 %v48103_v6 }
 0x1f3   : > { %42751 = vmatprep.mubr.f32.mxu1 %v48340_v17 }
 0x1f4   : > { %7948 = vmatmul.mubr.f32.gmra.mrb[2].mxu0 %v48347_v20 }
 0x1f5   : > { %8020 = vmatprep.mubr.f32.mxu0 %v48103_v6 }
 0x1f7   : > { %42752 = vmatmul.mubr.f32.vlgmr.msra.gmra.mrb[0].mxu1 %v48364_v26 }
 0x1f8   : > { %42755 = vmatpush3.msra.mxu1 %v48342_v18  ;;  %8024 = vmatmul.mubr.f32.vlgmr.msra.gmra.mrb[0].mxu0 %v48340_v17 }
 0x1f9   : > { %8046 = vmatpush1.msra.mxu0 %v7788_v27  ;;  %42759 = vmatprep.subr.mxu1 %v48306_v4 }
 0x1fa   : > { %8125 = vmatprep.subr.mxu0 %v48311_v8  ;;  %8029 = vmatprep.mubr.f32.mxu0 %v48103_v6 }
 0x1fb   : > { %42756 = vmatprep.mubr.f32.mxu1 %v48308_v3 }
 0x1fc   : > { %8033 = vmatmul.mubr.f32.gmra.mrb[2].mxu0 %v48364_v26 }
 0x1fd   : > { %8109 = vmatprep.mubr.f32.mxu0 %v48103_v6 }
 0x1ff   : > { %42757 = vmatmul.mubr.f32.vlgmr.msra.gmra.mrb[0].mxu1 %v48332_v15 }
 0x200   : > { %42760 = vmatpush3.msra.mxu1 %v48306_v4  ;;  %8111 = vmatmul.mubr.f32.vlgmr.msra.gmra.mrb[0].mxu0 %v48308_v3  ;;  %v8802_v4 = vsub.f32 %v8800_v54, %v8801_v1 }
 0x201   : > { %8127 = vmatpush1.msra.mxu0 %v48337_v16  ;;  %8116 = vmatprep.mubr.f32.mxu0 %v48103_v6 }
 0x202   : > { %42761 = vmatprep.mubr.f32.mxu1 %v48308_v3  ;;  %8722 = vmatprep.subr.mxu0 %v48416_v42  ;;  %v8803_v8 = vand.u32 4294901760, %v8802_v4 }
 0x203   : > { %42764 = vmatprep.subr.mxu1 %v48411_v41 }
 0x204   : > { %8118 = vmatmul.mubr.f32.gmra.mrb[2].mxu0 %v48332_v15 }
 0x205   : > { %8190 = vmatprep.mubr.f32.mxu0 %v48103_v6 }
 0x207   : > { %42762 = vmatmul.mubr.f32.vlgmr.msra.gmra.mrb[0].mxu1 %v48332_v15 }
 0x208   : > { %8192 = vmatmul.mubr.f32.vlgmr.msra.gmra.mrb[0].mxu0 %v48308_v3  ;;  %42765 = vmatpush3.msra.mxu1 %v48411_v41  ;;  %v9740_v3 = vpop.permute.xlu1 %9739 }
 0x209   : > { %8197 = vmatprep.mubr.f32.mxu0 %v48103_v6  ;;  %8724 = vmatpush1.msra.mxu0 %v48439_v50 }
 0x20a   : > { %42766 = vmatprep.mubr.f32.mxu1 %v8792_v62  ;;  %42769 = vmatprep.subr.mxu1 %v9326_v0 }
 0x20b   : > { %8815 = vmatprep.subr.mxu0 %v8814_v2 }
 0x20c   : > { %8199 = vmatmul.mubr.f32.gmra.mrb[2].mxu0 %v48332_v15 }
 0x20d   : > { %8787 = vmatprep.mubr.f32.mxu0 %v48103_v6 }
 0x20f   : > { %42767 = vmatmul.mubr.f32.vlgmr.msra.gmra.mrb[0].mxu1 %v8803_v8 }
 0x210   : > { %42770 = vmatpush3.msra.mxu1 %v9326_v0  ;;  %8793 = vmatmul.mubr.f32.vlgmr.msra.gmra.mrb[0].mxu0 %v8792_v62  ;;  %v48672_v62 = vand.u32 4294901760, %v9862_v61 }
 0x211   : > { %8821 = vmatpush1.msra.mxu0 %v8820_v7  ;;  %42774 = vmatprep.subr.mxu1 %v9323_v45 }
 0x212   : > { %8901 = vmatprep.subr.mxu0 %v48433_v48  ;;  %8798 = vmatprep.mubr.f32.mxu0 %v48103_v6 }
 0x213   : > { %42771 = vmatprep.mubr.f32.mxu1 %v48413_v40 }
 0x214   : > { %8804 = vmatmul.mubr.f32.gmra.mrb[2].mxu0 %v8803_v8 }
 0x215   : > { %8884 = vmatprep.mubr.f32.mxu0 %v48103_v6 }
 0x217   : > { %42772 = vmatmul.mubr.f32.vlgmr.msra.gmra.mrb[0].mxu1 %v48435_v49 }
 0x218   : > { %42775 = vmatpush3.msra.mxu1 %v9323_v45  ;;  %8886 = vmatmul.mubr.f32.vlgmr.msra.gmra.mrb[0].mxu0 %v48413_v40 }
 0x219   : > { %8904 = vmatpush1.msra.mxu0 %v8817_v56  ;;  %42779 = vmatprep.subr.mxu1 %v48411_v41  ;;  %v19511_v56 = vld [vmem:[%s53922_s6 + $0x8] sm:$0xff] }
 0x21a   : > { %8985 = vmatprep.subr.mxu0 %v48416_v42  ;;  %8891 = vmatprep.mubr.f32.mxu0 %v48103_v6 }
 0x21b   : > { %42776 = vmatprep.mubr.f32.mxu1 %v48429_v47 }
 0x21c   : > { %8893 = vmatmul.mubr.f32.gmra.mrb[2].mxu0 %v48435_v49 }
 0x21d   : > { %8967 = vmatprep.mubr.f32.mxu0 %v48103_v6 }
 0x21f   : > { %42777 = vmatmul.mubr.f32.vlgmr.msra.gmra.mrb[0].mxu1 %v8800_v54 }
 0x220   : > { %42780 = vmatpush3.msra.mxu1 %v48411_v41  ;;  %8970 = vmatmul.mubr.f32.vlgmr.msra.gmra.mrb[0].mxu0 %v48429_v47 }
 0x221   : > { %8987 = vmatpush1.msra.mxu0 %v48439_v50  ;;  %42784 = vmatprep.subr.mxu1 %v48444_v52 }
 0x222   : > { %9072 = vmatprep.subr.mxu0 %v8812_v53  ;;  %8975 = vmatprep.mubr.f32.mxu0 %v48103_v6  ;;  %v9735_v11 = vpop.permute.xlu0 %9734 }
 0x223   : > { %42781 = vmatprep.mubr.f32.mxu1 %v48442_v51 }
 0x224   : > { %8978 = vmatmul.mubr.f32.gmra.mrb[2].mxu0 %v8800_v54  ;;  %v19510_v54 = vld [vmem:[%s53922_s6] sm:$0xff] }
 0x225   : > { %9050 = vmatprep.mubr.f32.mxu0 %v48103_v6  ;;  %v9768_v10 = vpop.permute.xlu1 %9767 }
 0x226   : > { %v9770_v20 = vpop.permute.xlu0 %9769 }
 0x227   : > { %42782 = vmatmul.mubr.f32.vlgmr.msra.gmra.mrb[0].mxu1 %v8801_v1 }
 0x228   : > { %42785 = vmatpush3.msra.mxu1 %v48444_v52  ;;  %9054 = vmatmul.mubr.f32.vlgmr.msra.gmra.mrb[0].mxu0 %v48442_v51 }
 0x229   : > { %9076 = vmatpush1.msra.mxu0 %v8818_v9  ;;  %42789 = vmatprep.subr.mxu1 %v48411_v41  ;;  %v48522_v14 = vpop.permute.xlu1 %9771  ;;  %v41484_v9 = vld [vmem:[%s53921_s5 + $0x18] sm:$0xff] }
 0x22a   : > { %9155 = vmatprep.subr.mxu0 %v48416_v42  ;;  %9059 = vmatprep.mubr.f32.mxu0 %v48103_v6  ;;  %54183 = vst [vmem:[#allocation3_spill] sm:$0xff] %v48522_v14  ;;  %v48526_v25 = vsel %vm4589_vm4, %v9770_v20, %v48522_v14  ;;  %v9865_v0 = vsel %vm9860_vm13, %v41484_v9, 0 }
 0x22b   : > { %42786 = vmatprep.mubr.f32.mxu1 %v48413_v40  ;;  %54184 = vst [vmem:[#allocation4_spill] sm:$0xff] %v48526_v25 }
 0x22c   : > { %9063 = vmatmul.mubr.f32.gmra.mrb[2].mxu0 %v8801_v1 }
 0x22d   : > { %9139 = vmatprep.mubr.f32.mxu0 %v48103_v6 }
 0x22f   : > { %42787 = vmatmul.mubr.f32.vlgmr.msra.gmra.mrb[0].mxu1 %v48435_v49 }
 0x230   : > { %42790 = vmatpush3.msra.mxu1 %v48411_v41  ;;  %9141 = vmatmul.mubr.f32.vlgmr.msra.gmra.mrb[0].mxu0 %v48413_v40 }
 0x231   : > { %9157 = vmatpush1.msra.mxu0 %v48439_v50  ;;  %9146 = vmatprep.mubr.f32.mxu0 %v48103_v6 }
 0x232   : > { %42791 = vmatprep.mubr.f32.mxu1 %v48413_v40 }
 0x234   : > { %9148 = vmatmul.mubr.f32.gmra.mrb[2].mxu0 %v48435_v49 }
 0x235   : > { %9220 = vmatprep.mubr.f32.mxu0 %v48103_v6 }
 0x237   : > { %42792 = vmatmul.mubr.f32.vlgmr.msra.gmra.mrb[0].mxu1 %v48435_v49 }
 0x238   : > { %9222 = vmatmul.mubr.f32.vlgmr.msra.gmra.mrb[0].mxu0 %v48413_v40  ;;  %9935 = vmatprep.mubr.f32.mxu1 %v48103_v6 }
 0x239   : > { %9227 = vmatprep.mubr.f32.mxu0 %v48103_v6 }
 0x23c   : > { %9229 = vmatmul.mubr.f32.gmra.mrb[2].mxu0 %v48435_v49 }
 0x23d   : > { %19687 = vmatprep.mubr.f32.mxu0 %v48103_v6  ;;  %v48529_v6 = vsel %vm4589_vm4, %v9768_v10, %v9770_v20  ;;  %v48683_v10 = vand.u32 4294901760, %v9865_v0 }
 0x23e   : > { %54185 = vst [vmem:[#allocation5_spill] sm:$0xff] %v48529_v6 }
 0x30a   : > { %v42793_v13 = vpop.f32.mrb[0].mxu1 }
 0x30b   : > { %v9223_v15 = vpop.f32.mrb[0].mxu0  ;;  %v9714_v16 = vpop.f32.mrb[1].mxu1  ;;  %v9747_v31 = vadd.f32 %v42793_v13, %v9740_v3 }
 0x30c   : > { %v9742_v17 = vadd.f32 %v9735_v11, %v9223_v15  ;;  %v9744_v18 = vadd.f32 %v9735_v11, %v9714_v16  ;;  %v9225_v19 = vpop.f32.mrb[1].mxu0 }
 0x30d   : > { %v9743_v21 = vadd.f32 %v9735_v11, %v9225_v19  ;;  %v9753_v37 = vmax.f32 %v9747_v31, 0.0 }
 0x30e   : > { %v9748_v22 = vmax.f32 %v9742_v17, 0.0  ;;  %v9750_v27 = vmax.f32 %v9744_v18, 0.0  ;;  %v48693_v17 = vsub.f32 %v9865_v0, %v48683_v10 }
 0x30f   : > { %v9749_v23 = vmax.f32 %v9743_v21, 0.0  ;;  %v9230_v26 = vpop.f32.mrb[2].mxu0  ;;  %v9783_v39 = vmul.f32 %v48522_v14, %v9753_v37 }
 0x310   : > { %v9745_v28 = vadd.f32 %v9740_v3, %v9230_v26  ;;  %v9232_v29 = vpop.f32.mrb[3].mxu0  ;;  %v9778_v30 = vmul.f32 %v48529_v6, %v9748_v22  ;;  %v9780_v36 = vmul.f32 %v48522_v14, %v9750_v27 }
 0x311   : > { %v9746_v33 = vadd.f32 %v9740_v3, %v9232_v29  ;;  %v9779_v34 = vmul.f32 %v48526_v25, %v9749_v23  ;;  %v48681_v3 = vsub.f32 %v9862_v61, %v48672_v62 }
 0x312   : > { %v9751_v35 = vmax.f32 %v9745_v28, 0.0  ;;  %9790 = vrot.lane.b32.xlu0 %v9778_v30, %s47443_s15  ;;  %v48699_v28 = vand.u32 4294901760, %v48693_v17 }
 0x313   : > { %9792 = vrot.lane.b32.xlu1 %v9779_v34, %s47443_s15  ;;  %v9752_v32 = vmax.f32 %v9746_v33, 0.0  ;;  %v48690_v16 = vand.u32 4294901760, %v48681_v3 }
 0x314   : > { %v9781_v24 = vmul.f32 %v48529_v6, %v9751_v35 }
 0x315   : > { %v9782_v38 = vmul.f32 %v48526_v25, %v9752_v32  ;;  %v9939_v27 = vsub.f32 %v48681_v3, %v48690_v16 }
 0x316   : > { %9794 = vrot.lane.b32.xlu0 %v9780_v36, %s47443_s15  ;;  %v9950_v36 = vsub.f32 %v48693_v17, %v48699_v28 }
 0x317   : > { %9796 = vrot.lane.b32.xlu1 %v9781_v24, %s47443_s15  ;;  %v48701_v32 = vand.u32 4294901760, %v9939_v27 }
 0x31a   : > { %9798 = vrot.lane.b32.xlu0 %v9782_v38, %s47443_s15 }
 0x31b   : > { %9800 = vrot.lane.b32.xlu1 %v9783_v39, %s47443_s15 }
 0x384   : > { %v9791_v41 = vpop.permute.xlu0 %9790 }
 0x385   : > { %9814 = vst.msk [vmem:[#allocation2] sm:$0xff] %vm9813_vm10, %v9791_v41  ;;  %v9793_v40 = vpop.permute.xlu1 %9792 }
 0x386   : > { %v48545_v42 = vsel %vm9802_vm11, %v9791_v41, %v9793_v40 }
 0x387   : > { %9840 = vrot.lane.b32.xlu0 %v48545_v42, %s47434_s16 }
 0x388   : > { %v9795_v43 = vpop.permute.xlu0 %9794 }
 0x389   : > { %v9804_v44 = vsel %vm9802_vm11, %v9793_v40, %v9795_v43  ;;  %v9797_v45 = vpop.permute.xlu1 %9796 }
 0x38a   : > { %9817 = vst.msk [vmem:[#allocation2 + $0x10] sm:$0xff] %vm9816_vm12, %v9804_v44  ;;  %v9951_v44 = vand.u32 4294901760, %v9950_v36 }
 0x38b   : > { %9818 = vst.msk [vmem:[#allocation2 + $0x18] sm:$0xff] %vm9813_vm10, %v9797_v45 }
 0x38c   : > { %v9799_v46 = vpop.permute.xlu0 %9798  ;;  %v48561_v51 = vld [vmem:[#allocation2] sm:$0xff] }
 0x38d   : > { %v48553_v47 = vsel %vm9802_vm11, %v9797_v45, %v9799_v46  ;;  %v9801_v48 = vpop.permute.xlu1 %9800 }
 0x38e   : > { %v9806_v49 = vsel %vm9802_vm11, %v9799_v46, %v9801_v48  ;;  %9846 = vrot.lane.b32.xlu0 %v48553_v47, %s47434_s16  ;;  %v48706_v48 = vld [vmem:[#allocation2 + $0x30] sm:$0xff] }
 0x38f   : > { %9820 = vst.msk [vmem:[#allocation2 + $0x28] sm:$0xff] %vm9816_vm12, %v9806_v49 }
 0x391   : > { %v48559_v50 = vld [vmem:[#allocation2 + $0x10] sm:$0xff] }
 0x392   : > { %9842 = vrot.lane.b32.xlu1 %v48559_v50, %s47434_s16  ;;  %9838 = vrot.lane.b32.xlu0 %v48561_v51, %s47434_s16  ;;  %v48573_v53 = vld [vmem:[#allocation2 + $0x18] sm:$0xff] }
 0x396   : > { %v48567_v52 = vld [vmem:[#allocation2 + $0x28] sm:$0xff]  ;;  %11962 = vrot.lane.b32.xlu0 %v48545_v42, %s53930_s17 }
 0x397   : > { %9848 = vrot.lane.b32.xlu1 %v48567_v52, %s47434_s16 }
 0x39a   : > { %11968 = vrot.lane.b32.xlu0 %v48553_v47, %s53930_s17 }
 0x39b   : > { %9844 = vrot.lane.b32.xlu1 %v48573_v53, %s47434_s16 }
 0x39e   : > { %11960 = vrot.lane.b32.xlu0 %v48561_v51, %s53930_s17 }
 0x39f   : > { %11964 = vrot.lane.b32.xlu1 %v48559_v50, %s53930_s17 }
 0x3a2   : > { %13041 = vrot.lane.b32.xlu0 %v48545_v42, %s47436_s18 }
 0x3a3   : > { %11970 = vrot.lane.b32.xlu1 %v48567_v52, %s53930_s17 }
 0x3a6   : > { %13047 = vrot.lane.b32.xlu0 %v48553_v47, %s47436_s18 }
 0x3a7   : > { %11966 = vrot.lane.b32.xlu1 %v48573_v53, %s53930_s17 }
 0x3aa   : > { %13039 = vrot.lane.b32.xlu0 %v48561_v51, %s47436_s18 }
 0x3ab   : > { %13043 = vrot.lane.b32.xlu1 %v48559_v50, %s47436_s18 }
 0x3ae   : > { %14120 = vrot.lane.b32.xlu0 %v48545_v42, %s47437_s19 }
 0x3af   : > { %13049 = vrot.lane.b32.xlu1 %v48567_v52, %s47436_s18 }
 0x3b2   : > { %14126 = vrot.lane.b32.xlu0 %v48553_v47, %s47437_s19 }
 0x3b3   : > { %13045 = vrot.lane.b32.xlu1 %v48573_v53, %s47436_s18 }
 0x3b6   : > { %14118 = vrot.lane.b32.xlu0 %v48561_v51, %s47437_s19 }
 0x3b7   : > { %14122 = vrot.lane.b32.xlu1 %v48559_v50, %s47437_s19 }
 0x3ba   : > { %15199 = vrot.lane.b32.xlu0 %v48545_v42, %s47438_s22 }
 0x3bb   : > { %14128 = vrot.lane.b32.xlu1 %v48567_v52, %s47437_s19 }
 0x3be   : > { %15205 = vrot.lane.b32.xlu0 %v48553_v47, %s47438_s22 }
 0x3bf   : > { %14124 = vrot.lane.b32.xlu1 %v48573_v53, %s47437_s19 }
 0x3c2   : > { %15197 = vrot.lane.b32.xlu0 %v48561_v51, %s47438_s22 }
 0x3c3   : > { %15201 = vrot.lane.b32.xlu1 %v48559_v50, %s47438_s22 }
 0x3c6   : > { %16278 = vrot.lane.b32.xlu0 %v48545_v42, %s47439_s29 }
 0x3c7   : > { %15207 = vrot.lane.b32.xlu1 %v48567_v52, %s47438_s22 }
 0x3ca   : > { %16284 = vrot.lane.b32.xlu0 %v48553_v47, %s47439_s29 }
 0x3cb   : > { %15203 = vrot.lane.b32.xlu1 %v48573_v53, %s47438_s22 }
 0x3ce   : > { %16276 = vrot.lane.b32.xlu0 %v48561_v51, %s47439_s29 }
 0x3cf   : > { %16280 = vrot.lane.b32.xlu1 %v48559_v50, %s47439_s29 }
 0x3d2   : > { %17357 = vrot.lane.b32.xlu0 %v48545_v42, %s53932_s23 }
 0x3d3   : > { %16286 = vrot.lane.b32.xlu1 %v48567_v52, %s47439_s29 }
 0x3d6   : > { %17363 = vrot.lane.b32.xlu0 %v48553_v47, %s53932_s23 }
 0x3d7   : > { %16282 = vrot.lane.b32.xlu1 %v48573_v53, %s47439_s29 }
 0x3da   : > { %17355 = vrot.lane.b32.xlu0 %v48561_v51, %s53932_s23 }
 0x3db   : > { %17359 = vrot.lane.b32.xlu1 %v48559_v50, %s53932_s23 }
 0x3de   : > { %18436 = vrot.lane.b32.xlu0 %v48545_v42, %s47441_s14 }
 0x3df   : > { %17365 = vrot.lane.b32.xlu1 %v48567_v52, %s53932_s23 }
 0x3e2   : > { %18442 = vrot.lane.b32.xlu0 %v48553_v47, %s47441_s14 }
 0x3e3   : > { %17361 = vrot.lane.b32.xlu1 %v48573_v53, %s53932_s23 }
 0x3e6   : > { %18434 = vrot.lane.b32.xlu0 %v48561_v51, %s47441_s14 }
 0x3e7   : > { %18438 = vrot.lane.b32.xlu1 %v48559_v50, %s47441_s14 }
 0x3ea   : > { %19514 = vperm.xlu0 %47382, %v19510_v54  }
 0x3eb   : > { %18444 = vrot.lane.b32.xlu1 %v48567_v52, %s47441_s14 }
 0x3ef   : > { %18440 = vrot.lane.b32.xlu1 %v48573_v53, %s47441_s14 }
 0x3f3   : > { %19519 = vperm.xlu1 %47383, %v19511_v56  }
 0x3f9   : > { %v9841_v57 = vpop.permute.xlu0 %9840 }
 0x400   : > { %v9847_v1 = vpop.permute.xlu0 %9846 }
 0x404   : > { %v48675_v2 = vpop.permute.xlu1 %9842  ;;  %v9839_v4 = vpop.permute.xlu0 %9838 }
 0x405   : > { %v9851_v5 = vsel %vm495_vm1, %v9841_v57, %v48675_v2  ;;  %v9850_v8 = vsel %vm495_vm1, %v9839_v4, %v9841_v57  ;;  %v10408_v61 = vand.u32 4294901760, %v48675_v2 }
 0x406   : > { %v9867_v7 = vand.u32 4294901760, %v9851_v5  ;;  %v9869_v11 = vand.u32 4294901760, %v9850_v8 }
 0x407   : > { %v10496_v0 = vsub.f32 %v48675_v2, %v10408_v61 }
 0x408   : > { %v9959_v12 = vsub.f32 %v9851_v5, %v9867_v7  ;;  %v9965_v18 = vsub.f32 %v9850_v8, %v9869_v11 }
 0x409   : > { %v48685_v13 = vpop.permute.xlu1 %9848  ;;  %v10497_v5 = vand.u32 4294901760, %v10496_v0 }
 0x40a   : > { %v9853_v15 = vsel %vm495_vm1, %v9847_v1, %v48685_v13  ;;  %v9960_v20 = vand.u32 4294901760, %v9959_v12  ;;  %v9966_v29 = vand.u32 4294901760, %v9965_v18  ;;  %v10411_v60 = vand.u32 4294901760, %v48685_v13 }
 0x40b   : > { %v9871_v19 = vand.u32 4294901760, %v9853_v15 }
 0x40c   : > { %v9961_v31 = vsub.f32 %v9959_v12, %v9960_v20  ;;  %v9967_v37 = vsub.f32 %v9965_v18, %v9966_v29  ;;  %v10503_v9 = vsub.f32 %v48685_v13, %v10411_v60  ;;  %v44318_v8 = vpack.c.bf16 %v10411_v60, %v10408_v61 }
 0x40d   : > { %v9845_v21 = vpop.permute.xlu1 %9844  ;;  %v44294_v22 = vpack.c.bf16 %v9871_v19, %v9867_v7  ;;  %v9971_v23 = vsub.f32 %v9853_v15, %v9871_v19  ;;  %v9821_v19 = vld [vmem:[%s53921_s5] sm:$0xff] }
 0x40e   : > { %v9852_v26 = vsel %vm495_vm1, %v9845_v21, %v9847_v1  ;;  %v9962_v39 = vand.u32 4294901760, %v9961_v31  ;;  %v9968_v45 = vand.u32 4294901760, %v9967_v37  ;;  %v10504_v4 = vand.u32 4294901760, %v10503_v9 }
 0x40f   : > { %v9873_v30 = vand.u32 4294901760, %v9852_v26  ;;  %44295 = vmatprep.subr.bf16.mxu1 %v44294_v22  ;;  %v9972_v33 = vand.u32 4294901760, %v9971_v23  ;;  %v44302_v54 = vpack.c.bf16 %v9971_v23, %v9959_v12  ;;  %v44326_v15 = vpack.c.bf16 %v10503_v9, %v10496_v0 }
 0x410   : > { %v10505_v7 = vsub.f32 %v10503_v9, %v10504_v4  ;;  %v10910_v21 = vsel %vm9860_vm13, %v9821_v19, 0  ;;  %v11456_v9 = vand.u32 4294901760, %v48559_v50  ;;  %v11963_v19 = vpop.permute.xlu0 %11962 }
 0x411   : > { %v44296_v34 = vpack.c.bf16 %v9873_v30, %v9869_v11  ;;  %v9977_v35 = vsub.f32 %v9852_v26, %v9873_v30  ;;  %v9973_v24 = vsub.f32 %v9971_v23, %v9972_v33  ;;  %v44310_v57 = vpack.c.bf16 %v9972_v33, %v9960_v20 }
 0x412   : > { %v10498_v11 = vsub.f32 %v10496_v0, %v10497_v5  ;;  %v10506_v12 = vand.u32 4294901760, %v10505_v7  ;;  %v10919_v20 = vand.u32 4294901760, %v48553_v47  ;;  %v48751_v23 = vand.u32 4294901760, %v10910_v21 }
 0x413   : > { %v9978_v38 = vand.u32 4294901760, %v9977_v35  ;;  %44297 = vmatpush1.bf16.msra.mxu1 %v44296_v34  ;;  %v9974_v41 = vand.u32 4294901760, %v9973_v24  ;;  %v44304_v56 = vpack.c.bf16 %v9977_v35, %v9965_v18  ;;  %v44334_v18 = vpack.c.bf16 %v10504_v4, %v10497_v5 }
 0x414   : > { %v10499_v2 = vand.u32 4294901760, %v10498_v11  ;;  %v10917_v26 = vand.u32 4294901760, %v48561_v51  ;;  %v48759_v33 = vsub.f32 %v10910_v21, %v48751_v23  ;;  %v11544_v5 = vsub.f32 %v48559_v50, %v11456_v9  ;;  %v11969_v21 = vpop.permute.xlu0 %11968 }
 0x415   : > { %v9979_v40 = vsub.f32 %v9977_v35, %v9978_v38  ;;  %v44298_v43 = vpack.c.bf16 %v9974_v41, %v9962_v39  ;;  %v44312_v1 = vpack.c.bf16 %v9978_v38, %v9966_v29 }
 0x416   : > { %9941 = vmatmul.mubr.f32.vlgmr.msra.gmra.mrb[2].mxu1 %v48701_v32  ;;  %v44322_v13 = vpack.c.bf16 %v10506_v12, %v10499_v2  ;;  %v48766_v36 = vand.u32 4294901760, %v48759_v33  ;;  %v11545_v7 = vand.u32 4294901760, %v11544_v5 }
 0x417   : > { %v9980_v46 = vand.u32 4294901760, %v9979_v40  ;;  %44299 = vmatprep.subr.bf16.mxu1 %v44298_v43  ;;  %9946 = vmatprep.mubr.f32.mxu1 %v48706_v48 }
 0x418   : > { %v10987_v39 = vsub.f32 %v48759_v33, %v48766_v36 }
 0x419   : > { %v44300_v49 = vpack.c.bf16 %v9980_v46, %v9968_v45 }
 0x41a   : > { %9952 = vmatmul.mubr.f32.gmra.mrb[4].mxu1 %v9951_v44 }
 0x41b   : > { %44301 = vmatpush1.bf16.msra.mxu1 %v44300_v49  ;;  %10042 = vmatprep.mubr.f32.mxu1 %v48706_v48  ;;  %v10988_v49 = vand.u32 4294901760, %v10987_v39 }
 0x41c   : > { %44303 = vmatprep.subr.bf16.mxu1 %v44302_v54 }
 0x41e   : > { %10044 = vmatmul.mubr.f32.vlgmr.msra.gmra.mrb[2].mxu1 %v48672_v62 }
 0x41f   : > { %44305 = vmatpush1.bf16.msra.mxu1 %v44304_v56  ;;  %10049 = vmatprep.mubr.f32.mxu1 %v48706_v48 }
 0x420   : > { %44307 = vmatprep.subr.bf16.mxu1 %v44294_v22 }
 0x422   : > { %10051 = vmatmul.mubr.f32.gmra.mrb[4].mxu1 %v48683_v10 }
 0x423   : > { %10129 = vmatprep.mubr.f32.mxu1 %v48706_v48 }
 0x426   : > { %10132 = vmatmul.mubr.f32.vlgmr.msra.gmra.mrb[2].mxu1 %v48681_v3 }
 0x427   : > { %44309 = vmatpush1.bf16.msra.mxu1 %v44296_v34  ;;  %10137 = vmatprep.mubr.f32.mxu1 %v48706_v48 }
 0x428   : > { %44311 = vmatprep.subr.bf16.mxu1 %v44310_v57 }
 0x42a   : > { %10140 = vmatmul.mubr.f32.gmra.mrb[4].mxu1 %v48693_v17 }
 0x42b   : > { %10214 = vmatprep.mubr.f32.mxu1 %v48706_v48 }
 0x42e   : > { %10218 = vmatmul.mubr.f32.vlgmr.msra.gmra.mrb[2].mxu1 %v48690_v16 }
 0x42f   : > { %44313 = vmatpush1.bf16.msra.mxu1 %v44312_v1  ;;  %10223 = vmatprep.mubr.f32.mxu1 %v48706_v48  ;;  %v11459_v1 = vand.u32 4294901760, %v48567_v52 }
 0x430   : > { %44315 = vmatprep.subr.bf16.mxu1 %v44294_v22  ;;  %v10915_v22 = vand.u32 4294901760, %v48545_v42 }
 0x431   : > { %v11551_v4 = vsub.f32 %v48567_v52, %v11459_v1  ;;  %v48800_v11 = vpack.c.bf16 %v11459_v1, %v11456_v9  ;;  %v11546_v52 = vsub.f32 %v11544_v5, %v11545_v7 }
 0x432   : > { %10227 = vmatmul.mubr.f32.gmra.mrb[4].mxu1 %v48699_v28  ;;  %v11007_v29 = vsub.f32 %v48545_v42, %v10915_v22  ;;  %v44342_v24 = vpack.c.bf16 %v10919_v20, %v10915_v22 }
 0x433   : > { %10309 = vmatprep.mubr.f32.mxu1 %v48706_v48  ;;  %v11547_v2 = vand.u32 4294901760, %v11546_v52 }
 0x436   : > { %10311 = vmatmul.mubr.f32.vlgmr.msra.gmra.mrb[2].mxu1 %v48672_v62 }
 0x437   : > { %44317 = vmatpush1.bf16.msra.mxu1 %v44296_v34  ;;  %10316 = vmatprep.mubr.f32.mxu1 %v48706_v48  ;;  %v11008_v34 = vand.u32 4294901760, %v11007_v29 }
 0x438   : > { %44319 = vmatprep.subr.bf16.mxu1 %v44318_v8 }
 0x439   : > { %v11009_v37 = vsub.f32 %v11007_v29, %v11008_v34 }
 0x43a   : > { %10318 = vmatmul.mubr.f32.gmra.mrb[4].mxu1 %v48683_v10 }
 0x43b   : > { %10392 = vmatprep.mubr.f32.mxu1 %v48706_v48  ;;  %v11010_v43 = vand.u32 4294901760, %v11009_v37 }
 0x43e   : > { %10394 = vmatmul.mubr.f32.vlgmr.msra.gmra.mrb[2].mxu1 %v48672_v62 }
 0x43f   : > { %44321 = vmatpush3.bf16.msra.mxu1 %v44318_v8  ;;  %10399 = vmatprep.mubr.f32.mxu1 %v48706_v48 }
 0x440   : > { %44323 = vmatprep.subr.bf16.mxu1 %v44322_v13 }
 0x442   : > { %10401 = vmatmul.mubr.f32.gmra.mrb[4].mxu1 %v48683_v10 }
 0x443   : > { %42798 = vmatprep.mubr.f32.mxu1 %v48701_v32 }
 0x446   : > { %42799 = vmatmul.mubr.f32.vlgmr.msra.gmra.mrb[6].mxu1 %v9951_v44 }
 0x447   : > { %44325 = vmatpush3.bf16.msra.mxu1 %v44322_v13  ;;  %42805 = vmatprep.mubr.f32.mxu1 %v48672_v62 }
 0x448   : > { %44327 = vmatprep.subr.bf16.mxu1 %v44326_v15 }
 0x44e   : > { %42806 = vmatmul.mubr.f32.vlgmr.msra.gmra.mrb[6].mxu1 %v48683_v10 }
 0x44f   : > { %44329 = vmatpush3.bf16.msra.mxu1 %v44326_v15  ;;  %42812 = vmatprep.mubr.f32.mxu1 %v48681_v3  ;;  %v9822_v3 = vld [vmem:[%s53921_s5 + $0x8] sm:$0xff]  ;;  %v44374_v15 = vpack.c.bf16 %v11551_v4, %v11544_v5 }
 0x450   : > { %44331 = vmatprep.subr.bf16.mxu1 %v44318_v8  ;;  %v10913_v27 = vsel %vm9860_vm13, %v9822_v3, 0 }
 0x456   : > { %42813 = vmatmul.mubr.f32.vlgmr.msra.gmra.mrb[6].mxu1 %v48693_v17  ;;  %v10921_v17 = vand.u32 4294901760, %v48573_v53 }
 0x457   : > { %44333 = vmatpush3.bf16.msra.mxu1 %v44318_v8  ;;  %42819 = vmatprep.mubr.f32.mxu1 %v48690_v16  ;;  %v11019_v16 = vsub.f32 %v48553_v47, %v10919_v20  ;;  %v11013_v47 = vsub.f32 %v48561_v51, %v10917_v26 }
 0x458   : > { %44335 = vmatprep.subr.bf16.mxu1 %v44334_v18  ;;  %v11025_v30 = vsub.f32 %v48573_v53, %v10921_v17  ;;  %v44344_v44 = vpack.c.bf16 %v10921_v17, %v10917_v26 }
 0x459   : > { %v11020_v31 = vand.u32 4294901760, %v11019_v16  ;;  %v11014_v53 = vand.u32 4294901760, %v11013_v47  ;;  %v44350_v57 = vpack.c.bf16 %v11019_v16, %v11007_v29 }
 0x45a   : > { %v11026_v35 = vand.u32 4294901760, %v11025_v30 }
 0x45b   : > { %v11021_v32 = vsub.f32 %v11019_v16, %v11020_v31  ;;  %v11015_v40 = vsub.f32 %v11013_v47, %v11014_v53  ;;  %v44358_v61 = vpack.c.bf16 %v11020_v31, %v11008_v34  ;;  %v41485_v16 = vld [vmem:[%s53921_s5 + $0x20] sm:$0xff]  ;;  %v41486_v34 = vld [vmem:[%s53921_s5 + $0x28] sm:$0xff] }
 0x45c   : > { %v11027_v38 = vsub.f32 %v11025_v30, %v11026_v35  ;;  %v44360_v0 = vpack.c.bf16 %v11026_v35, %v11014_v53  ;;  %v11983_v31 = vsel %vm9860_vm13, %v41485_v16, 0 }
 0x45d   : > { %v11022_v51 = vand.u32 4294901760, %v11021_v32  ;;  %v11016_v54 = vand.u32 4294901760, %v11015_v40  ;;  %v48835_v32 = vand.u32 4294901760, %v11983_v31 }
 0x45e   : > { %42820 = vmatmul.mubr.f32.vlgmr.msra.gmra.mrb[6].mxu1 %v48699_v28  ;;  %v48761_v28 = vand.u32 4294901760, %v10913_v27  ;;  %v11028_v45 = vand.u32 4294901760, %v11027_v38 }
 0x45f   : > { %44337 = vmatpush3.bf16.msra.mxu1 %v44334_v18  ;;  %42826 = vmatprep.mubr.f32.mxu1 %v48672_v62  ;;  %v44346_v46 = vpack.c.bf16 %v11022_v51, %v11010_v43  ;;  %v48811_v18 = vpop.permute.xlu1 %11964  ;;  %v48841_v51 = vsub.f32 %v11983_v31, %v48835_v32 }
 0x460   : > { %44339 = vmatprep.subr.bf16.mxu1 %v44318_v8  ;;  %v48769_v42 = vsub.f32 %v10913_v27, %v48761_v28  ;;  %v44348_v56 = vpack.c.bf16 %v11028_v45, %v11016_v54  ;;  %v11973_v26 = vsel %vm2529_vm2, %v11963_v19, %v48811_v18  ;;  %v11961_v27 = vpop.permute.xlu0 %11960 }
 0x462   : > { %v48775_v41 = vand.u32 4294901760, %v48769_v42 }
 0x463   : > { %v48816_v20 = vpop.permute.xlu1 %11970 }
 0x464   : > { %v11975_v3 = vsel %vm2529_vm2, %v11969_v21, %v48816_v20 }
 0x466   : > { %42827 = vmatmul.mubr.f32.vlgmr.msra.gmra.mrb[6].mxu1 %v48683_v10 }
 0x467   : > { %44341 = vmatpush3.bf16.msra.mxu1 %v44318_v8  ;;  %42833 = vmatprep.mubr.f32.mxu1 %v48672_v62  ;;  %v10998_v62 = vsub.f32 %v48769_v42, %v48775_v41  ;;  %v11552_v8 = vand.u32 4294901760, %v11551_v4  ;;  %v11967_v17 = vpop.permute.xlu1 %11966 }
 0x468   : > { %44343 = vmatprep.subr.bf16.mxu1 %v44342_v24  ;;  %v11974_v29 = vsel %vm2529_vm2, %v11967_v17, %v11969_v21 }
 0x469   : > { %v10999_v60 = vand.u32 4294901760, %v10998_v62  ;;  %v11553_v12 = vsub.f32 %v11551_v4, %v11552_v8  ;;  %v44382_v22 = vpack.c.bf16 %v11552_v8, %v11545_v7  ;;  %v11994_v35 = vand.u32 4294901760, %v11974_v29 }
 0x46b   : > { %v11554_v50 = vand.u32 4294901760, %v11553_v12  ;;  %v12098_v37 = vsub.f32 %v11974_v29, %v11994_v35  ;;  %v48893_v29 = vpop.permute.xlu1 %13043 }
 0x46d   : > { %v44370_v13 = vpack.c.bf16 %v11554_v50, %v11547_v2  ;;  %v12099_v43 = vand.u32 4294901760, %v12098_v37  ;;  %v12532_v50 = vand.u32 4294901760, %v48816_v20  ;;  %v12529_v2 = vand.u32 4294901760, %v48811_v18 }
 0x46e   : > { %42834 = vmatmul.mubr.f32.vlgmr.msra.gmra.mrb[6].mxu1 %v48683_v10  ;;  %v44352_v10 = vpack.c.bf16 %v11025_v30, %v11013_v47  ;;  %v11992_v30 = vand.u32 4294901760, %v11975_v3  ;;  %v11988_v47 = vand.u32 4294901760, %v11973_v26 }
 0x46f   : > { %44345 = vmatpush1.bf16.msra.mxu1 %v44344_v44  ;;  %10983 = vmatprep.mubr.f32.mxu1 %v48706_v48  ;;  %v48898_v31 = vpop.permute.xlu1 %13049 }
 0x470   : > { %44347 = vmatprep.subr.bf16.mxu1 %v44346_v46  ;;  %v12080_v53 = vsub.f32 %v11973_v26, %v11988_v47  ;;  %v48847_v46 = vand.u32 4294901760, %v48841_v51 }
 0x472   : > { %10989 = vmatmul.mubr.f32.vlgmr.msra.gmra.mrb[2].mxu1 %v10988_v49  ;;  %v12081_v40 = vand.u32 4294901760, %v12080_v53 }
 0x473   : > { %44349 = vmatpush1.bf16.msra.mxu1 %v44348_v56  ;;  %10994 = vmatprep.mubr.f32.mxu1 %v48706_v48  ;;  %v12100_v56 = vsub.f32 %v12098_v37, %v12099_v43 }
 0x474   : > { %44351 = vmatprep.subr.bf16.mxu1 %v44350_v57  ;;  %v12082_v54 = vsub.f32 %v12080_v53, %v12081_v40 }
 0x476   : > { %11000 = vmatmul.mubr.f32.gmra.mrb[4].mxu1 %v10999_v60  ;;  %v12083_v1 = vand.u32 4294901760, %v12082_v54 }
 0x477   : > { %11090 = vmatprep.mubr.f32.mxu1 %v48706_v48 }
 0x47a   : > { %11092 = vmatmul.mubr.f32.vlgmr.msra.gmra.mrb[2].mxu1 %v48751_v23 }
 0x47b   : > { %44353 = vmatpush1.bf16.msra.mxu1 %v44352_v10  ;;  %11097 = vmatprep.mubr.f32.mxu1 %v48706_v48 }
 0x47c   : > { %44355 = vmatprep.subr.bf16.mxu1 %v44342_v24 }
 0x47e   : > { %11099 = vmatmul.mubr.f32.gmra.mrb[4].mxu1 %v48761_v28 }
 0x47f   : > { %11177 = vmatprep.mubr.f32.mxu1 %v48706_v48 }
 0x482   : > { %11180 = vmatmul.mubr.f32.vlgmr.msra.gmra.mrb[2].mxu1 %v48759_v33 }
 0x483   : > { %44357 = vmatpush1.bf16.msra.mxu1 %v44344_v44  ;;  %11185 = vmatprep.mubr.f32.mxu1 %v48706_v48 }
 0x484   : > { %44359 = vmatprep.subr.bf16.mxu1 %v44358_v61 }
 0x486   : > { %11188 = vmatmul.mubr.f32.gmra.mrb[4].mxu1 %v48769_v42 }
 0x487   : > { %11262 = vmatprep.mubr.f32.mxu1 %v48706_v48 }
 0x48a   : > { %11266 = vmatmul.mubr.f32.vlgmr.msra.gmra.mrb[2].mxu1 %v48766_v36 }
 0x48b   : > { %44361 = vmatpush1.bf16.msra.mxu1 %v44360_v0  ;;  %11271 = vmatprep.mubr.f32.mxu1 %v48706_v48  ;;  %v12101_v0 = vand.u32 4294901760, %v12100_v56 }
 0x48c   : > { %44363 = vmatprep.subr.bf16.mxu1 %v44342_v24  ;;  %v12092_v24 = vsub.f32 %v11975_v3, %v11992_v30  ;;  %v48881_v3 = vpack.c.bf16 %v12532_v50, %v12529_v2 }
 0x48e   : > { %11275 = vmatmul.mubr.f32.gmra.mrb[4].mxu1 %v48775_v41  ;;  %v12093_v38 = vand.u32 4294901760, %v12092_v24 }
 0x48f   : > { %11357 = vmatprep.mubr.f32.mxu1 %v48706_v48 }
 0x490   : > { %v12094_v45 = vsub.f32 %v12092_v24, %v12093_v38  ;;  %v44406_v52 = vpack.c.bf16 %v12093_v38, %v12081_v40  ;;  %v41488_v40 = vld [vmem:[%s53921_s5 + $0x38] sm:$0xff] }
 0x492   : > { %11359 = vmatmul.mubr.f32.vlgmr.msra.gmra.mrb[2].mxu1 %v48751_v23  ;;  %v12095_v57 = vand.u32 4294901760, %v12094_v45 }
 0x493   : > { %44365 = vmatpush1.bf16.msra.mxu1 %v44344_v44  ;;  %11364 = vmatprep.mubr.f32.mxu1 %v48706_v48  ;;  %v44390_v44 = vpack.c.bf16 %v11992_v30, %v11988_v47  ;;  %v13042_v30 = vpop.permute.xlu0 %13041 }
 0x494   : > { %44367 = vmatprep.subr.bf16.mxu1 %v48800_v11  ;;  %v44394_v4 = vpack.c.bf16 %v12095_v57, %v12083_v1 }
 0x496   : > { %11366 = vmatmul.mubr.f32.gmra.mrb[4].mxu1 %v48761_v28 }
 0x497   : > { %11440 = vmatprep.mubr.f32.mxu1 %v48706_v48 }
 0x49a   : > { %11442 = vmatmul.mubr.f32.vlgmr.msra.gmra.mrb[2].mxu1 %v48751_v23 }
 0x49b   : > { %44369 = vmatpush3.bf16.msra.mxu1 %v48800_v11  ;;  %11447 = vmatprep.mubr.f32.mxu1 %v48706_v48 }
 0x49c   : > { %44371 = vmatprep.subr.bf16.mxu1 %v44370_v13 }
 0x49e   : > { %11449 = vmatmul.mubr.f32.gmra.mrb[4].mxu1 %v48761_v28 }
 0x49f   : > { %42840 = vmatprep.mubr.f32.mxu1 %v10988_v49 }
 0x4a2   : > { %42841 = vmatmul.mubr.f32.vlgmr.msra.gmra.mrb[6].mxu1 %v10999_v60  ;;  %v12060_v60 = vsub.f32 %v48841_v51, %v48847_v46 }
 0x4a3   : > { %44373 = vmatpush3.bf16.msra.mxu1 %v44370_v13  ;;  %42847 = vmatprep.mubr.f32.mxu1 %v48751_v23 }
 0x4a4   : > { %44375 = vmatprep.subr.bf16.mxu1 %v44374_v15  ;;  %v12061_v5 = vand.u32 4294901760, %v12060_v60 }
 0x4aa   : > { %42848 = vmatmul.mubr.f32.vlgmr.msra.gmra.mrb[6].mxu1 %v48761_v28 }
 0x4ab   : > { %44377 = vmatpush3.bf16.msra.mxu1 %v44374_v15  ;;  %42854 = vmatprep.mubr.f32.mxu1 %v48759_v33  ;;  %v11972_v33 = vsel %vm2529_vm2, %v11961_v27, %v11963_v19  ;;  %v12624_v15 = vsub.f32 %v48816_v20, %v12532_v50  ;;  %v12617_v19 = vsub.f32 %v48811_v18, %v12529_v2 }
 0x4ac   : > { %44379 = vmatprep.subr.bf16.mxu1 %v48800_v11 }
 0x4ad   : > { %v12625_v21 = vand.u32 4294901760, %v12624_v15  ;;  %v44422_v27 = vpack.c.bf16 %v12624_v15, %v12617_v19 }
 0x4af   : > { %v12626_v17 = vsub.f32 %v12624_v15, %v12625_v21 }
 0x4b1   : > { %v12627_v18 = vand.u32 4294901760, %v12626_v17 }
 0x4b2   : > { %42855 = vmatmul.mubr.f32.vlgmr.msra.gmra.mrb[6].mxu1 %v48769_v42  ;;  %v11986_v42 = vsel %vm9860_vm13, %v41486_v34, 0 }
 0x4b3   : > { %44381 = vmatpush3.bf16.msra.mxu1 %v48800_v11  ;;  %42861 = vmatprep.mubr.f32.mxu1 %v48766_v36  ;;  %v11990_v36 = vand.u32 4294901760, %v11972_v33  ;;  %v48843_v39 = vand.u32 4294901760, %v11986_v42 }
 0x4b4   : > { %44383 = vmatprep.subr.bf16.mxu1 %v44382_v22 }
 0x4b5   : > { %v48850_v49 = vsub.f32 %v11986_v42, %v48843_v39  ;;  %v44392_v9 = vpack.c.bf16 %v11994_v35, %v11990_v36  ;;  %v13046_v35 = vpop.permute.xlu1 %13045 }
 0x4b7   : > { %v48857_v10 = vand.u32 4294901760, %v48850_v49 }
 0x4ba   : > { %42862 = vmatmul.mubr.f32.vlgmr.msra.gmra.mrb[6].mxu1 %v48775_v41  ;;  %v12086_v41 = vsub.f32 %v11972_v33, %v11990_v36  ;;  %v13048_v33 = vpop.permute.xlu0 %13047  ;;  %v13052_v36 = vsel %vm3559_vm3, %v13042_v30, %v48893_v29 }
 0x4bb   : > { %44385 = vmatpush3.bf16.msra.mxu1 %v44382_v22  ;;  %42868 = vmatprep.mubr.f32.mxu1 %v48751_v23  ;;  %v12618_v22 = vand.u32 4294901760, %v12617_v19  ;;  %v13054_v34 = vsel %vm3559_vm3, %v13048_v33, %v48898_v31 }
 0x4bc   : > { %44387 = vmatprep.subr.bf16.mxu1 %v48800_v11  ;;  %v12087_v62 = vand.u32 4294901760, %v12086_v41 }
 0x4bd   : > { %v12619_v20 = vsub.f32 %v12617_v19, %v12618_v22  ;;  %v44430_v47 = vpack.c.bf16 %v12625_v21, %v12618_v22 }
 0x4be   : > { %v12088_v61 = vsub.f32 %v12086_v41, %v12087_v62  ;;  %v44408_v13 = vpack.c.bf16 %v12099_v43, %v12087_v62  ;;  %v13040_v42 = vpop.permute.xlu0 %13039 }
 0x4bf   : > { %v12620_v16 = vand.u32 4294901760, %v12619_v20 }
 0x4c0   : > { %v12089_v8 = vand.u32 4294901760, %v12088_v61 }
 0x4c1   : > { %v44418_v26 = vpack.c.bf16 %v12627_v18, %v12620_v16  ;;  %v13611_v18 = vand.u32 4294901760, %v48898_v31  ;;  %v13608_v16 = vand.u32 4294901760, %v48893_v29 }
 0x4c2   : > { %42869 = vmatmul.mubr.f32.vlgmr.msra.gmra.mrb[6].mxu1 %v48761_v28  ;;  %v44396_v7 = vpack.c.bf16 %v12101_v0, %v12089_v8 }
 0x4c3   : > { %44389 = vmatpush3.bf16.msra.mxu1 %v48800_v11  ;;  %42875 = vmatprep.mubr.f32.mxu1 %v48751_v23  ;;  %v12071_v23 = vsub.f32 %v48850_v49, %v48857_v10  ;;  %v44398_v11 = vpack.c.bf16 %v12092_v24, %v12080_v53  ;;  %v41487_v24 = vld [vmem:[%s53921_s5 + $0x30] sm:$0xff]  ;;  %v13053_v53 = vsel %vm3559_vm3, %v13046_v35, %v13048_v33 }
 0x4c4   : > { %44391 = vmatprep.subr.bf16.mxu1 %v44390_v44  ;;  %v13062_v38 = vsel %vm9860_vm13, %v41487_v24, 0  ;;  %v13073_v43 = vand.u32 4294901760, %v13053_v53 }
 0x4c5   : > { %v12072_v12 = vand.u32 4294901760, %v12071_v23  ;;  %v48917_v45 = vand.u32 4294901760, %v13062_v38 }
 0x4c6   : > { %v13177_v54 = vsub.f32 %v13053_v53, %v13073_v43  ;;  %v48975_v53 = vpop.permute.xlu1 %14122 }
 0x4c7   : > { %v48923_v57 = vsub.f32 %v13062_v38, %v48917_v45 }
 0x4c8   : > { %v13178_v1 = vand.u32 4294901760, %v13177_v54 }
 0x4ca   : > { %42876 = vmatmul.mubr.f32.vlgmr.msra.gmra.mrb[6].mxu1 %v48761_v28  ;;  %v44400_v28 = vpack.c.bf16 %v12098_v37, %v12086_v41  ;;  %v13071_v37 = vand.u32 4294901760, %v13054_v34  ;;  %v13067_v41 = vand.u32 4294901760, %v13052_v36  ;;  %v48980_v38 = vpop.permute.xlu1 %14128 }
 0x4cb   : > { %44393 = vmatpush1.bf16.msra.mxu1 %v44392_v9  ;;  %12056 = vmatprep.mubr.f32.mxu1 %v48706_v48 }
 0x4cc   : > { %44395 = vmatprep.subr.bf16.mxu1 %v44394_v4  ;;  %v13159_v62 = vsub.f32 %v13052_v36, %v13067_v41  ;;  %v48929_v4 = vand.u32 4294901760, %v48923_v57 }
 0x4ce   : > { %12062 = vmatmul.mubr.f32.vlgmr.msra.gmra.mrb[2].mxu1 %v12061_v5  ;;  %v13160_v61 = vand.u32 4294901760, %v13159_v62 }
 0x4cf   : > { %44397 = vmatpush1.bf16.msra.mxu1 %v44396_v7  ;;  %12067 = vmatprep.mubr.f32.mxu1 %v48706_v48  ;;  %v13179_v7 = vsub.f32 %v13177_v54, %v13178_v1 }
 0x4d0   : > { %44399 = vmatprep.subr.bf16.mxu1 %v44398_v11  ;;  %v13161_v8 = vsub.f32 %v13159_v62, %v13160_v61 }
 0x4d2   : > { %12073 = vmatmul.mubr.f32.gmra.mrb[4].mxu1 %v12072_v12  ;;  %v13162_v50 = vand.u32 4294901760, %v13161_v8 }
 0x4d3   : > { %12163 = vmatprep.mubr.f32.mxu1 %v48706_v48 }
 0x4d6   : > { %12165 = vmatmul.mubr.f32.vlgmr.msra.gmra.mrb[2].mxu1 %v48835_v32 }
 0x4d7   : > { %44401 = vmatpush1.bf16.msra.mxu1 %v44400_v28  ;;  %12170 = vmatprep.mubr.f32.mxu1 %v48706_v48 }
 0x4d8   : > { %44403 = vmatprep.subr.bf16.mxu1 %v44390_v44 }
 0x4da   : > { %12172 = vmatmul.mubr.f32.gmra.mrb[4].mxu1 %v48843_v39 }
 0x4db   : > { %12250 = vmatprep.mubr.f32.mxu1 %v48706_v48 }
 0x4de   : > { %12253 = vmatmul.mubr.f32.vlgmr.msra.gmra.mrb[2].mxu1 %v48841_v51 }
 0x4df   : > { %44405 = vmatpush1.bf16.msra.mxu1 %v44392_v9  ;;  %12258 = vmatprep.mubr.f32.mxu1 %v48706_v48 }
 0x4e0   : > { %44407 = vmatprep.subr.bf16.mxu1 %v44406_v52 }
 0x4e2   : > { %12261 = vmatmul.mubr.f32.gmra.mrb[4].mxu1 %v48850_v49 }
 0x4e3   : > { %12335 = vmatprep.mubr.f32.mxu1 %v48706_v48 }
 0x4e6   : > { %12339 = vmatmul.mubr.f32.vlgmr.msra.gmra.mrb[2].mxu1 %v48847_v46 }
 0x4e7   : > { %44409 = vmatpush1.bf16.msra.mxu1 %v44408_v13  ;;  %12344 = vmatprep.mubr.f32.mxu1 %v48706_v48  ;;  %v13180_v13 = vand.u32 4294901760, %v13179_v7 }
 0x4e8   : > { %44411 = vmatprep.subr.bf16.mxu1 %v44390_v44  ;;  %v13171_v44 = vsub.f32 %v13054_v34, %v13071_v37  ;;  %v48963_v34 = vpack.c.bf16 %v13611_v18, %v13608_v16 }
 0x4ea   : > { %12348 = vmatmul.mubr.f32.gmra.mrb[4].mxu1 %v48857_v10  ;;  %v13172_v56 = vand.u32 4294901760, %v13171_v44 }
 0x4eb   : > { %12430 = vmatprep.mubr.f32.mxu1 %v48706_v48 }
 0x4ec   : > { %v13173_v0 = vsub.f32 %v13171_v44, %v13172_v56  ;;  %v44454_v20 = vpack.c.bf16 %v13172_v56, %v13160_v61  ;;  %v41490_v61 = vld [vmem:[%s53921_s5 + $0x48] sm:$0xff] }
 0x4ee   : > { %12432 = vmatmul.mubr.f32.vlgmr.msra.gmra.mrb[2].mxu1 %v48835_v32  ;;  %v13174_v11 = vand.u32 4294901760, %v13173_v0 }
 0x4ef   : > { %44413 = vmatpush1.bf16.msra.mxu1 %v44392_v9  ;;  %12437 = vmatprep.mubr.f32.mxu1 %v48706_v48  ;;  %v44438_v9 = vpack.c.bf16 %v13071_v37, %v13067_v41  ;;  %v14121_v37 = vpop.permute.xlu0 %14120 }
 0x4f0   : > { %44415 = vmatprep.subr.bf16.mxu1 %v48881_v3  ;;  %v44442_v15 = vpack.c.bf16 %v13174_v11, %v13162_v50 }
 0x4f2   : > { %12439 = vmatmul.mubr.f32.gmra.mrb[4].mxu1 %v48843_v39 }
 0x4f3   : > { %12513 = vmatprep.mubr.f32.mxu1 %v48706_v48 }
 0x4f6   : > { %12515 = vmatmul.mubr.f32.vlgmr.msra.gmra.mrb[2].mxu1 %v48835_v32 }
 0x4f7   : > { %44417 = vmatpush3.bf16.msra.mxu1 %v48881_v3  ;;  %12520 = vmatprep.mubr.f32.mxu1 %v48706_v48 }
 0x4f8   : > { %44419 = vmatprep.subr.bf16.mxu1 %v44418_v26 }
 0x4fa   : > { %12522 = vmatmul.mubr.f32.gmra.mrb[4].mxu1 %v48843_v39 }
 0x4fb   : > { %42882 = vmatprep.mubr.f32.mxu1 %v12061_v5 }
 0x4fe   : > { %42883 = vmatmul.mubr.f32.vlgmr.msra.gmra.mrb[6].mxu1 %v12072_v12  ;;  %v13139_v12 = vsub.f32 %v48923_v57, %v48929_v4 }
 0x4ff   : > { %44421 = vmatpush3.bf16.msra.mxu1 %v44418_v26  ;;  %42889 = vmatprep.mubr.f32.mxu1 %v48835_v32 }
 0x500   : > { %44423 = vmatprep.subr.bf16.mxu1 %v44422_v27  ;;  %v13140_v19 = vand.u32 4294901760, %v13139_v12 }
 0x506   : > { %42890 = vmatmul.mubr.f32.vlgmr.msra.gmra.mrb[6].mxu1 %v48843_v39 }
 0x507   : > { %44425 = vmatpush3.bf16.msra.mxu1 %v44422_v27  ;;  %42896 = vmatprep.mubr.f32.mxu1 %v48841_v51  ;;  %v13051_v51 = vsel %vm3559_vm3, %v13040_v42, %v13042_v30  ;;  %v13703_v27 = vsub.f32 %v48898_v31, %v13611_v18  ;;  %v13696_v30 = vsub.f32 %v48893_v29, %v13608_v16 }
 0x508   : > { %44427 = vmatprep.subr.bf16.mxu1 %v48881_v3 }
 0x509   : > { %v13704_v33 = vand.u32 4294901760, %v13703_v27  ;;  %v44470_v42 = vpack.c.bf16 %v13703_v27, %v13696_v30 }
 0x50b   : > { %v13705_v35 = vsub.f32 %v13703_v27, %v13704_v33 }
 0x50d   : > { %v13706_v29 = vand.u32 4294901760, %v13705_v35 }
 0x50e   : > { %42897 = vmatmul.mubr.f32.vlgmr.msra.gmra.mrb[6].mxu1 %v48850_v49  ;;  %v13065_v49 = vsel %vm9860_vm13, %v41488_v40, 0 }
 0x50f   : > { %44429 = vmatpush3.bf16.msra.mxu1 %v48881_v3  ;;  %42903 = vmatprep.mubr.f32.mxu1 %v48847_v46  ;;  %v13069_v46 = vand.u32 4294901760, %v13051_v51  ;;  %v48925_v60 = vand.u32 4294901760, %v13065_v49 }
 0x510   : > { %44431 = vmatprep.subr.bf16.mxu1 %v44430_v47 }
 0x511   : > { %v48932_v5 = vsub.f32 %v13065_v49, %v48925_v60  ;;  %v44440_v2 = vpack.c.bf16 %v13073_v43, %v13069_v46  ;;  %v14125_v43 = vpop.permute.xlu1 %14124 }
 0x513   : > { %v48939_v28 = vand.u32 4294901760, %v48932_v5 }
 0x516   : > { %42904 = vmatmul.mubr.f32.vlgmr.msra.gmra.mrb[6].mxu1 %v48857_v10  ;;  %v13165_v10 = vsub.f32 %v13051_v51, %v13069_v46  ;;  %v14127_v51 = vpop.permute.xlu0 %14126  ;;  %v14131_v46 = vsel %vm4589_vm4, %v14121_v37, %v48975_v53 }
 0x517   : > { %44433 = vmatpush3.bf16.msra.mxu1 %v44430_v47  ;;  %42910 = vmatprep.mubr.f32.mxu1 %v48835_v32  ;;  %v13697_v47 = vand.u32 4294901760, %v13696_v30  ;;  %v14133_v40 = vsel %vm4589_vm4, %v14127_v51, %v48980_v38 }
 0x518   : > { %44435 = vmatprep.subr.bf16.mxu1 %v48881_v3  ;;  %v13166_v23 = vand.u32 4294901760, %v13165_v10 }
 0x519   : > { %v13698_v31 = vsub.f32 %v13696_v30, %v13697_v47  ;;  %v44478_v41 = vpack.c.bf16 %v13704_v33, %v13697_v47 }
 0x51a   : > { %v13167_v52 = vsub.f32 %v13165_v10, %v13166_v23  ;;  %v44456_v26 = vpack.c.bf16 %v13178_v1, %v13166_v23  ;;  %v14119_v49 = vpop.permute.xlu0 %14118 }
 0x51b   : > { %v13699_v24 = vand.u32 4294901760, %v13698_v31 }
 0x51c   : > { %v13168_v21 = vand.u32 4294901760, %v13167_v52 }
 0x51d   : > { %v44466_v36 = vpack.c.bf16 %v13706_v29, %v13699_v24  ;;  %v14690_v29 = vand.u32 4294901760, %v48980_v38  ;;  %v49037_v24 = vld [vmem:[#allocation2 + $0x30] sm:$0xff] }
 0x51e   : > { %42911 = vmatmul.mubr.f32.vlgmr.msra.gmra.mrb[6].mxu1 %v48843_v39  ;;  %v44444_v22 = vpack.c.bf16 %v13180_v13, %v13168_v21 }
 0x51f   : > { %44437 = vmatpush3.bf16.msra.mxu1 %v48881_v3  ;;  %42917 = vmatprep.mubr.f32.mxu1 %v48835_v32  ;;  %v13150_v32 = vsub.f32 %v48932_v5, %v48939_v28  ;;  %v44446_v3 = vpack.c.bf16 %v13171_v44, %v13159_v62  ;;  %v41489_v44 = vld [vmem:[%s53921_s5 + $0x40] sm:$0xff]  ;;  %v14132_v62 = vsel %vm4589_vm4, %v14125_v43, %v14127_v51 }
 0x520   : > { %44439 = vmatprep.subr.bf16.mxu1 %v44438_v9  ;;  %v14141_v56 = vsel %vm9860_vm13, %v41489_v44, 0  ;;  %v14152_v1 = vand.u32 4294901760, %v14132_v62 }
 0x521   : > { %v13151_v17 = vand.u32 4294901760, %v13150_v32  ;;  %v48999_v0 = vand.u32 4294901760, %v14141_v56 }
 0x522   : > { %v14256_v8 = vsub.f32 %v14132_v62, %v14152_v1  ;;  %v49059_v62 = vpop.permute.xlu1 %15201 }
 0x523   : > { %v49005_v11 = vsub.f32 %v14141_v56, %v48999_v0 }
 0x524   : > { %v14257_v50 = vand.u32 4294901760, %v14256_v8 }
 0x526   : > { %42918 = vmatmul.mubr.f32.vlgmr.msra.gmra.mrb[6].mxu1 %v48843_v39  ;;  %v44448_v39 = vpack.c.bf16 %v13177_v54, %v13165_v10  ;;  %v14150_v54 = vand.u32 4294901760, %v14133_v40  ;;  %v14146_v10 = vand.u32 4294901760, %v14131_v46  ;;  %v49064_v56 = vpop.permute.xlu1 %15207 }
 0x527   : > { %44441 = vmatpush1.bf16.msra.mxu1 %v44440_v2  ;;  %13135 = vmatprep.mubr.f32.mxu1 %v48706_v48 }
 0x528   : > { %44443 = vmatprep.subr.bf16.mxu1 %v44442_v15  ;;  %v14238_v23 = vsub.f32 %v14131_v46, %v14146_v10  ;;  %v49011_v15 = vand.u32 4294901760, %v49005_v11 }
 0x52a   : > { %13141 = vmatmul.mubr.f32.vlgmr.msra.gmra.mrb[2].mxu1 %v13140_v19  ;;  %v14239_v52 = vand.u32 4294901760, %v14238_v23 }
 0x52b   : > { %44445 = vmatpush1.bf16.msra.mxu1 %v44444_v22  ;;  %13146 = vmatprep.mubr.f32.mxu1 %v48706_v48  ;;  %v14258_v22 = vsub.f32 %v14256_v8, %v14257_v50 }
 0x52c   : > { %44447 = vmatprep.subr.bf16.mxu1 %v44446_v3  ;;  %v14240_v21 = vsub.f32 %v14238_v23, %v14239_v52 }
 0x52e   : > { %13152 = vmatmul.mubr.f32.gmra.mrb[4].mxu1 %v13151_v17  ;;  %v14241_v18 = vand.u32 4294901760, %v14240_v21 }
 0x52f   : > { %13242 = vmatprep.mubr.f32.mxu1 %v48706_v48 }
 0x532   : > { %13244 = vmatmul.mubr.f32.vlgmr.msra.gmra.mrb[2].mxu1 %v48917_v45 }
 0x533   : > { %44449 = vmatpush1.bf16.msra.mxu1 %v44448_v39  ;;  %13249 = vmatprep.mubr.f32.mxu1 %v48706_v48 }
 0x534   : > { %44451 = vmatprep.subr.bf16.mxu1 %v44438_v9 }
 0x536   : > { %13251 = vmatmul.mubr.f32.gmra.mrb[4].mxu1 %v48925_v60 }
 0x537   : > { %13329 = vmatprep.mubr.f32.mxu1 %v48706_v48 }
 0x53a   : > { %13332 = vmatmul.mubr.f32.vlgmr.msra.gmra.mrb[2].mxu1 %v48923_v57 }
 0x53b   : > { %44453 = vmatpush1.bf16.msra.mxu1 %v44440_v2  ;;  %13337 = vmatprep.mubr.f32.mxu1 %v48706_v48 }
 0x53c   : > { %44455 = vmatprep.subr.bf16.mxu1 %v44454_v20 }
 0x53e   : > { %13340 = vmatmul.mubr.f32.gmra.mrb[4].mxu1 %v48932_v5 }
 0x53f   : > { %13414 = vmatprep.mubr.f32.mxu1 %v48706_v48 }
 0x542   : > { %13418 = vmatmul.mubr.f32.vlgmr.msra.gmra.mrb[2].mxu1 %v48929_v4 }
 0x543   : > { %44457 = vmatpush1.bf16.msra.mxu1 %v44456_v26  ;;  %13423 = vmatprep.mubr.f32.mxu1 %v48706_v48  ;;  %v14259_v26 = vand.u32 4294901760, %v14258_v22 }
 0x544   : > { %44459 = vmatprep.subr.bf16.mxu1 %v44438_v9  ;;  %v14250_v9 = vsub.f32 %v14133_v40, %v14150_v54 }
 0x546   : > { %13427 = vmatmul.mubr.f32.gmra.mrb[4].mxu1 %v48939_v28  ;;  %v14251_v7 = vand.u32 4294901760, %v14250_v9 }
 0x547   : > { %13509 = vmatprep.mubr.f32.mxu1 %v48706_v48 }
 0x548   : > { %v14252_v13 = vsub.f32 %v14250_v9, %v14251_v7  ;;  %v44502_v31 = vpack.c.bf16 %v14251_v7, %v14239_v52  ;;  %v41492_v52 = vld [vmem:[%s53921_s5 + $0x58] sm:$0xff] }
 0x54a   : > { %13511 = vmatmul.mubr.f32.vlgmr.msra.gmra.mrb[2].mxu1 %v48917_v45  ;;  %v14253_v3 = vand.u32 4294901760, %v14252_v13 }
 0x54b   : > { %44461 = vmatpush1.bf16.msra.mxu1 %v44440_v2  ;;  %13516 = vmatprep.mubr.f32.mxu1 %v48706_v48  ;;  %v44486_v2 = vpack.c.bf16 %v14150_v54, %v14146_v10  ;;  %v15200_v54 = vpop.permute.xlu0 %15199 }
 0x54c   : > { %44463 = vmatprep.subr.bf16.mxu1 %v48963_v34  ;;  %v44490_v27 = vpack.c.bf16 %v14253_v3, %v14241_v18 }
 0x54e   : > { %13518 = vmatmul.mubr.f32.gmra.mrb[4].mxu1 %v48925_v60 }
 0x54f   : > { %13592 = vmatprep.mubr.f32.mxu1 %v48706_v48 }
 0x552   : > { %13594 = vmatmul.mubr.f32.vlgmr.msra.gmra.mrb[2].mxu1 %v48917_v45 }
 0x553   : > { %44465 = vmatpush3.bf16.msra.mxu1 %v48963_v34  ;;  %13599 = vmatprep.mubr.f32.mxu1 %v48706_v48 }
 0x554   : > { %44467 = vmatprep.subr.bf16.mxu1 %v44466_v36 }
 0x556   : > { %13601 = vmatmul.mubr.f32.gmra.mrb[4].mxu1 %v48925_v60 }
 0x557   : > { %42924 = vmatprep.mubr.f32.mxu1 %v13140_v19 }
 0x55a   : > { %42925 = vmatmul.mubr.f32.vlgmr.msra.gmra.mrb[6].mxu1 %v13151_v17  ;;  %v14218_v17 = vsub.f32 %v49005_v11, %v49011_v15 }
 0x55b   : > { %44469 = vmatpush3.bf16.msra.mxu1 %v44466_v36  ;;  %42931 = vmatprep.mubr.f32.mxu1 %v48917_v45  ;;  %v14687_v36 = vand.u32 4294901760, %v48975_v53 }
 0x55c   : > { %44471 = vmatprep.subr.bf16.mxu1 %v44470_v42  ;;  %v14219_v30 = vand.u32 4294901760, %v14218_v17 }
 0x55d   : > { %v49047_v40 = vpack.c.bf16 %v14690_v29, %v14687_v36 }
 0x562   : > { %42932 = vmatmul.mubr.f32.vlgmr.msra.gmra.mrb[6].mxu1 %v48925_v60 }
 0x563   : > { %44473 = vmatpush3.bf16.msra.mxu1 %v44470_v42  ;;  %42938 = vmatprep.mubr.f32.mxu1 %v48923_v57  ;;  %v14130_v57 = vsel %vm4589_vm4, %v14119_v49, %v14121_v37  ;;  %v14782_v37 = vsub.f32 %v48980_v38, %v14690_v29 }
 0x564   : > { %44475 = vmatprep.subr.bf16.mxu1 %v48963_v34 }
 0x565   : > { %v14783_v51 = vand.u32 4294901760, %v14782_v37 }
 0x567   : > { %v14784_v43 = vsub.f32 %v14782_v37, %v14783_v51 }
 0x56a   : > { %42939 = vmatmul.mubr.f32.vlgmr.msra.gmra.mrb[6].mxu1 %v48932_v5  ;;  %v14144_v5 = vsel %vm9860_vm13, %v41490_v61, 0 }
 0x56b   : > { %44477 = vmatpush3.bf16.msra.mxu1 %v48963_v34  ;;  %42945 = vmatprep.mubr.f32.mxu1 %v48929_v4  ;;  %v14148_v4 = vand.u32 4294901760, %v14130_v57  ;;  %v49007_v12 = vand.u32 4294901760, %v14144_v5 }
 0x56c   : > { %44479 = vmatprep.subr.bf16.mxu1 %v44478_v41 }
 0x56d   : > { %v49014_v19 = vsub.f32 %v14144_v5, %v49007_v12  ;;  %v44488_v16 = vpack.c.bf16 %v14152_v1, %v14148_v4  ;;  %v15204_v1 = vpop.permute.xlu1 %15203 }
 0x56f   : > { %v49021_v39 = vand.u32 4294901760, %v49014_v19 }
 0x572   : > { %42946 = vmatmul.mubr.f32.vlgmr.msra.gmra.mrb[6].mxu1 %v48939_v28  ;;  %v14244_v28 = vsub.f32 %v14130_v57, %v14148_v4  ;;  %v15206_v57 = vpop.permute.xlu0 %15205  ;;  %v15210_v4 = vsel %vm5619_vm5, %v15200_v54, %v49059_v62 }
 0x573   : > { %44481 = vmatpush3.bf16.msra.mxu1 %v44478_v41  ;;  %42952 = vmatprep.mubr.f32.mxu1 %v48917_v45  ;;  %v15212_v61 = vsel %vm5619_vm5, %v15206_v57, %v49064_v56 }
 0x574   : > { %44483 = vmatprep.subr.bf16.mxu1 %v48963_v34  ;;  %v14245_v32 = vand.u32 4294901760, %v14244_v28 }
 0x576   : > { %v14246_v20 = vsub.f32 %v14244_v28, %v14245_v32  ;;  %v44504_v42 = vpack.c.bf16 %v14257_v50, %v14245_v32  ;;  %v15198_v5 = vpop.permute.xlu0 %15197 }
 0x578   : > { %v14247_v33 = vand.u32 4294901760, %v14246_v20 }
 0x57a   : > { %42953 = vmatmul.mubr.f32.vlgmr.msra.gmra.mrb[6].mxu1 %v48925_v60  ;;  %v44492_v47 = vpack.c.bf16 %v14259_v26, %v14247_v33 }
 0x57b   : > { %44485 = vmatpush3.bf16.msra.mxu1 %v48963_v34  ;;  %42959 = vmatprep.mubr.f32.mxu1 %v48917_v45  ;;  %v14229_v45 = vsub.f32 %v49014_v19, %v49021_v39  ;;  %v44494_v34 = vpack.c.bf16 %v14250_v9, %v14238_v23  ;;  %v41491_v9 = vld [vmem:[%s53921_s5 + $0x50] sm:$0xff]  ;;  %v15211_v23 = vsel %vm5619_vm5, %v15204_v1, %v15206_v57 }
 0x57c   : > { %44487 = vmatprep.subr.bf16.mxu1 %v44486_v2  ;;  %v15220_v7 = vsel %vm9860_vm13, %v41491_v9, 0  ;;  %v15231_v50 = vand.u32 4294901760, %v15211_v23 }
 0x57d   : > { %v14230_v35 = vand.u32 4294901760, %v14229_v45  ;;  %v49083_v13 = vand.u32 4294901760, %v15220_v7 }
 0x57e   : > { %v15335_v21 = vsub.f32 %v15211_v23, %v15231_v50  ;;  %v49141_v23 = vpop.permute.xlu1 %16280 }
 0x57f   : > { %v49089_v3 = vsub.f32 %v15220_v7, %v49083_v13 }
 0x580   : > { %v15336_v18 = vand.u32 4294901760, %v15335_v21 }
 0x582   : > { %42960 = vmatmul.mubr.f32.vlgmr.msra.gmra.mrb[6].mxu1 %v48925_v60  ;;  %v44496_v60 = vpack.c.bf16 %v14256_v8, %v14244_v28  ;;  %v15229_v8 = vand.u32 4294901760, %v15212_v61  ;;  %v15225_v28 = vand.u32 4294901760, %v15210_v4  ;;  %v49146_v7 = vpop.permute.xlu1 %16286 }
 0x583   : > { %44489 = vmatpush1.bf16.msra.mxu1 %v44488_v16  ;;  %14214 = vmatprep.mubr.f32.mxu1 %v48706_v48 }
 0x584   : > { %44491 = vmatprep.subr.bf16.mxu1 %v44490_v27  ;;  %v15317_v32 = vsub.f32 %v15210_v4, %v15225_v28  ;;  %v49095_v27 = vand.u32 4294901760, %v49089_v3 }
 0x586   : > { %14220 = vmatmul.mubr.f32.vlgmr.msra.gmra.mrb[2].mxu1 %v14219_v30  ;;  %v15318_v20 = vand.u32 4294901760, %v15317_v32 }
 0x587   : > { %44493 = vmatpush1.bf16.msra.mxu1 %v44492_v47  ;;  %14225 = vmatprep.mubr.f32.mxu1 %v48706_v48  ;;  %v15337_v47 = vsub.f32 %v15335_v21, %v15336_v18 }
 0x588   : > { %44495 = vmatprep.subr.bf16.mxu1 %v44494_v34  ;;  %v15319_v33 = vsub.f32 %v15317_v32, %v15318_v20 }
 0x58a   : > { %14231 = vmatmul.mubr.f32.gmra.mrb[4].mxu1 %v14230_v35  ;;  %v15320_v29 = vand.u32 4294901760, %v15319_v33 }
 0x58b   : > { %14321 = vmatprep.mubr.f32.mxu1 %v48706_v48 }
 0x58e   : > { %14323 = vmatmul.mubr.f32.vlgmr.msra.gmra.mrb[2].mxu1 %v48999_v0 }
 0x58f   : > { %44497 = vmatpush1.bf16.msra.mxu1 %v44496_v60  ;;  %14328 = vmatprep.mubr.f32.mxu1 %v48706_v48 }
 0x590   : > { %44499 = vmatprep.subr.bf16.mxu1 %v44486_v2 }
 0x592   : > { %14330 = vmatmul.mubr.f32.gmra.mrb[4].mxu1 %v49007_v12 }
 0x593   : > { %14408 = vmatprep.mubr.f32.mxu1 %v48706_v48 }
 0x596   : > { %14411 = vmatmul.mubr.f32.vlgmr.msra.gmra.mrb[2].mxu1 %v49005_v11 }
 0x597   : > { %44501 = vmatpush1.bf16.msra.mxu1 %v44488_v16  ;;  %14416 = vmatprep.mubr.f32.mxu1 %v48706_v48  ;;  %v14775_v48 = vsub.f32 %v48975_v53, %v14687_v36  ;;  %v14785_v53 = vand.u32 4294901760, %v14784_v43 }
 0x598   : > { %44503 = vmatprep.subr.bf16.mxu1 %v44502_v31 }
 0x599   : > { %v14776_v41 = vand.u32 4294901760, %v14775_v48  ;;  %v44518_v49 = vpack.c.bf16 %v14782_v37, %v14775_v48 }
 0x59a   : > { %14419 = vmatmul.mubr.f32.gmra.mrb[4].mxu1 %v49014_v19 }
 0x59b   : > { %14493 = vmatprep.mubr.f32.mxu1 %v49037_v24  ;;  %v14777_v38 = vsub.f32 %v14775_v48, %v14776_v41  ;;  %v44526_v10 = vpack.c.bf16 %v14783_v51, %v14776_v41 }
 0x59d   : > { %v14778_v44 = vand.u32 4294901760, %v14777_v38 }
 0x59e   : > { %14497 = vmatmul.mubr.f32.vlgmr.msra.gmra.mrb[2].mxu1 %v49011_v15 }
 0x59f   : > { %44505 = vmatpush1.bf16.msra.mxu1 %v44504_v42  ;;  %14502 = vmatprep.mubr.f32.mxu1 %v49037_v24  ;;  %v44514_v46 = vpack.c.bf16 %v14785_v53, %v14778_v44  ;;  %v15338_v42 = vand.u32 4294901760, %v15337_v47  ;;  %v15769_v53 = vand.u32 4294901760, %v49064_v56  ;;  %v15766_v44 = vand.u32 4294901760, %v49059_v62 }
 0x5a0   : > { %44507 = vmatprep.subr.bf16.mxu1 %v44486_v2  ;;  %v15329_v2 = vsub.f32 %v15212_v61, %v15229_v8 }
 0x5a1   : > { %v49129_v61 = vpack.c.bf16 %v15769_v53, %v15766_v44 }
 0x5a2   : > { %14506 = vmatmul.mubr.f32.gmra.mrb[4].mxu1 %v49021_v39  ;;  %v15330_v22 = vand.u32 4294901760, %v15329_v2 }
 0x5a3   : > { %14588 = vmatprep.mubr.f32.mxu1 %v49037_v24 }
 0x5a4   : > { %v15331_v26 = vsub.f32 %v15329_v2, %v15330_v22  ;;  %v44550_v38 = vpack.c.bf16 %v15330_v22, %v15318_v20  ;;  %v41494_v20 = vld [vmem:[%s53921_s5 + $0x68] sm:$0xff] }
 0x5a6   : > { %14590 = vmatmul.mubr.f32.vlgmr.msra.gmra.mrb[2].mxu1 %v48999_v0  ;;  %v15332_v34 = vand.u32 4294901760, %v15331_v26 }
 0x5a7   : > { %44509 = vmatpush1.bf16.msra.mxu1 %v44488_v16  ;;  %14595 = vmatprep.mubr.f32.mxu1 %v49037_v24  ;;  %v44534_v16 = vpack.c.bf16 %v15229_v8, %v15225_v28  ;;  %v16279_v8 = vpop.permute.xlu0 %16278 }
 0x5a8   : > { %44511 = vmatprep.subr.bf16.mxu1 %v49047_v40  ;;  %v44538_v37 = vpack.c.bf16 %v15332_v34, %v15320_v29 }
 0x5aa   : > { %14597 = vmatmul.mubr.f32.gmra.mrb[4].mxu1 %v49007_v12 }
 0x5ab   : > { %14671 = vmatprep.mubr.f32.mxu1 %v49037_v24 }
 0x5ae   : > { %14673 = vmatmul.mubr.f32.vlgmr.msra.gmra.mrb[2].mxu1 %v48999_v0 }
 0x5af   : > { %44513 = vmatpush3.bf16.msra.mxu1 %v49047_v40  ;;  %14678 = vmatprep.mubr.f32.mxu1 %v49037_v24 }
 0x5b0   : > { %44515 = vmatprep.subr.bf16.mxu1 %v44514_v46 }
 0x5b2   : > { %14680 = vmatmul.mubr.f32.gmra.mrb[4].mxu1 %v49007_v12 }
 0x5b3   : > { %42966 = vmatprep.mubr.f32.mxu1 %v14219_v30 }
 0x5b6   : > { %42967 = vmatmul.mubr.f32.vlgmr.msra.gmra.mrb[6].mxu1 %v14230_v35  ;;  %v15297_v35 = vsub.f32 %v49089_v3, %v49095_v27 }
 0x5b7   : > { %44517 = vmatpush3.bf16.msra.mxu1 %v44514_v46  ;;  %42973 = vmatprep.mubr.f32.mxu1 %v48999_v0 }
 0x5b8   : > { %44519 = vmatprep.subr.bf16.mxu1 %v44518_v49  ;;  %v15298_v48 = vand.u32 4294901760, %v15297_v35 }
 0x5be   : > { %42974 = vmatmul.mubr.f32.vlgmr.msra.gmra.mrb[6].mxu1 %v49007_v12 }
 0x5bf   : > { %44521 = vmatpush3.bf16.msra.mxu1 %v44518_v49  ;;  %42980 = vmatprep.mubr.f32.mxu1 %v49005_v11  ;;  %v15209_v11 = vsel %vm5619_vm5, %v15198_v5, %v15200_v54  ;;  %v15861_v49 = vsub.f32 %v49064_v56, %v15769_v53  ;;  %v15854_v54 = vsub.f32 %v49059_v62, %v15766_v44 }
 0x5c0   : > { %44523 = vmatprep.subr.bf16.mxu1 %v49047_v40 }
 0x5c1   : > { %v15862_v57 = vand.u32 4294901760, %v15861_v49  ;;  %v44566_v5 = vpack.c.bf16 %v15861_v49, %v15854_v54 }
 0x5c3   : > { %v15863_v1 = vsub.f32 %v15861_v49, %v15862_v57 }
 0x5c5   : > { %v15864_v62 = vand.u32 4294901760, %v15863_v1 }
 0x5c6   : > { %42981 = vmatmul.mubr.f32.vlgmr.msra.gmra.mrb[6].mxu1 %v49014_v19  ;;  %v15223_v19 = vsel %vm9860_vm13, %v41492_v52, 0 }
 0x5c7   : > { %44525 = vmatpush3.bf16.msra.mxu1 %v49047_v40  ;;  %42987 = vmatprep.mubr.f32.mxu1 %v49011_v15  ;;  %v15227_v15 = vand.u32 4294901760, %v15209_v11  ;;  %v49091_v17 = vand.u32 4294901760, %v15223_v19 }
 0x5c8   : > { %44527 = vmatprep.subr.bf16.mxu1 %v44526_v10 }
 0x5c9   : > { %v49098_v30 = vsub.f32 %v15223_v19, %v49091_v17  ;;  %v44536_v36 = vpack.c.bf16 %v15231_v50, %v15227_v15  ;;  %v16283_v50 = vpop.permute.xlu1 %16282 }
 0x5cb   : > { %v49105_v60 = vand.u32 4294901760, %v49098_v30 }
 0x5ce   : > { %42988 = vmatmul.mubr.f32.vlgmr.msra.gmra.mrb[6].mxu1 %v49021_v39  ;;  %v15323_v39 = vsub.f32 %v15209_v11, %v15227_v15  ;;  %v16285_v11 = vpop.permute.xlu0 %16284  ;;  %v16289_v15 = vsel %vm6649_vm6, %v16279_v8, %v49141_v23 }
 0x5cf   : > { %44529 = vmatpush3.bf16.msra.mxu1 %v44526_v10  ;;  %42994 = vmatprep.mubr.f32.mxu1 %v48999_v0  ;;  %v15855_v10 = vand.u32 4294901760, %v15854_v54  ;;  %v16291_v52 = vsel %vm6649_vm6, %v16285_v11, %v49146_v7 }
 0x5d0   : > { %44531 = vmatprep.subr.bf16.mxu1 %v49047_v40  ;;  %v15324_v45 = vand.u32 4294901760, %v15323_v39 }
 0x5d1   : > { %v15856_v56 = vsub.f32 %v15854_v54, %v15855_v10  ;;  %v44574_v28 = vpack.c.bf16 %v15862_v57, %v15855_v10 }
 0x5d2   : > { %v15325_v31 = vsub.f32 %v15323_v39, %v15324_v45  ;;  %v44552_v46 = vpack.c.bf16 %v15336_v18, %v15324_v45  ;;  %v16277_v19 = vpop.permute.xlu0 %16276 }
 0x5d3   : > { %v15857_v9 = vand.u32 4294901760, %v15856_v56 }
 0x5d4   : > { %v15326_v51 = vand.u32 4294901760, %v15325_v31 }
 0x5d5   : > { %v44562_v4 = vpack.c.bf16 %v15864_v62, %v15857_v9  ;;  %v16848_v62 = vand.u32 4294901760, %v49146_v7  ;;  %v16845_v9 = vand.u32 4294901760, %v49141_v23 }
 0x5d6   : > { %42995 = vmatmul.mubr.f32.vlgmr.msra.gmra.mrb[6].mxu1 %v49007_v12  ;;  %v44540_v41 = vpack.c.bf16 %v15338_v42, %v15326_v51 }
 0x5d7   : > { %44533 = vmatpush3.bf16.msra.mxu1 %v49047_v40  ;;  %43001 = vmatprep.mubr.f32.mxu1 %v48999_v0  ;;  %v15308_v0 = vsub.f32 %v49098_v30, %v49105_v60  ;;  %v44542_v40 = vpack.c.bf16 %v15329_v2, %v15317_v32  ;;  %v41493_v2 = vld [vmem:[%s53921_s5 + $0x60] sm:$0xff]  ;;  %v16290_v32 = vsel %vm6649_vm6, %v16283_v50, %v16285_v11 }
 0x5d8   : > { %44535 = vmatprep.subr.bf16.mxu1 %v44534_v16  ;;  %v16299_v22 = vsel %vm9860_vm13, %v41493_v2, 0  ;;  %v16310_v18 = vand.u32 4294901760, %v16290_v32 }
 0x5d9   : > { %v15309_v43 = vand.u32 4294901760, %v15308_v0  ;;  %v49165_v26 = vand.u32 4294901760, %v16299_v22 }
 0x5da   : > { %v16414_v33 = vsub.f32 %v16290_v32, %v16310_v18  ;;  %v49223_v32 = vpop.permute.xlu1 %17359 }
 0x5db   : > { %v49171_v34 = vsub.f32 %v16299_v22, %v49165_v26 }
 0x5dc   : > { %v16415_v29 = vand.u32 4294901760, %v16414_v33 }
 0x5de   : > { %43002 = vmatmul.mubr.f32.vlgmr.msra.gmra.mrb[6].mxu1 %v49007_v12  ;;  %v44544_v12 = vpack.c.bf16 %v15335_v21, %v15323_v39  ;;  %v16308_v21 = vand.u32 4294901760, %v16291_v52  ;;  %v16304_v39 = vand.u32 4294901760, %v16289_v15  ;;  %v49228_v22 = vpop.permute.xlu1 %17365 }
 0x5df   : > { %44537 = vmatpush1.bf16.msra.mxu1 %v44536_v36  ;;  %15293 = vmatprep.mubr.f32.mxu1 %v49037_v24 }
 0x5e0   : > { %44539 = vmatprep.subr.bf16.mxu1 %v44538_v37  ;;  %v16396_v45 = vsub.f32 %v16289_v15, %v16304_v39  ;;  %v49177_v37 = vand.u32 4294901760, %v49171_v34 }
 0x5e2   : > { %15299 = vmatmul.mubr.f32.vlgmr.msra.gmra.mrb[2].mxu1 %v15298_v48  ;;  %v16397_v31 = vand.u32 4294901760, %v16396_v45 }
 0x5e3   : > { %44541 = vmatpush1.bf16.msra.mxu1 %v44540_v41  ;;  %15304 = vmatprep.mubr.f32.mxu1 %v49037_v24  ;;  %v16416_v41 = vsub.f32 %v16414_v33, %v16415_v29 }
 0x5e4   : > { %44543 = vmatprep.subr.bf16.mxu1 %v44542_v40  ;;  %v16398_v51 = vsub.f32 %v16396_v45, %v16397_v31 }
 0x5e6   : > { %15310 = vmatmul.mubr.f32.gmra.mrb[4].mxu1 %v15309_v43  ;;  %v16399_v53 = vand.u32 4294901760, %v16398_v51 }
 0x5e7   : > { %15400 = vmatprep.mubr.f32.mxu1 %v49037_v24 }
 0x5ea   : > { %15402 = vmatmul.mubr.f32.vlgmr.msra.gmra.mrb[2].mxu1 %v49083_v13 }
 0x5eb   : > { %44545 = vmatpush1.bf16.msra.mxu1 %v44544_v12  ;;  %15407 = vmatprep.mubr.f32.mxu1 %v49037_v24 }
 0x5ec   : > { %44547 = vmatprep.subr.bf16.mxu1 %v44534_v16 }
 0x5ee   : > { %15409 = vmatmul.mubr.f32.gmra.mrb[4].mxu1 %v49091_v17 }
 0x5ef   : > { %15487 = vmatprep.mubr.f32.mxu1 %v49037_v24 }
 0x5f2   : > { %15490 = vmatmul.mubr.f32.vlgmr.msra.gmra.mrb[2].mxu1 %v49089_v3 }
 0x5f3   : > { %44549 = vmatpush1.bf16.msra.mxu1 %v44536_v36  ;;  %15495 = vmatprep.mubr.f32.mxu1 %v49037_v24 }
 0x5f4   : > { %44551 = vmatprep.subr.bf16.mxu1 %v44550_v38 }
 0x5f6   : > { %15498 = vmatmul.mubr.f32.gmra.mrb[4].mxu1 %v49098_v30 }
 0x5f7   : > { %15572 = vmatprep.mubr.f32.mxu1 %v49037_v24 }
 0x5fa   : > { %15576 = vmatmul.mubr.f32.vlgmr.msra.gmra.mrb[2].mxu1 %v49095_v27 }
 0x5fb   : > { %44553 = vmatpush1.bf16.msra.mxu1 %v44552_v46  ;;  %15581 = vmatprep.mubr.f32.mxu1 %v49037_v24  ;;  %v16417_v46 = vand.u32 4294901760, %v16416_v41 }
 0x5fc   : > { %44555 = vmatprep.subr.bf16.mxu1 %v44534_v16  ;;  %v16408_v16 = vsub.f32 %v16291_v52, %v16308_v21  ;;  %v49211_v52 = vpack.c.bf16 %v16848_v62, %v16845_v9 }
 0x5fe   : > { %15585 = vmatmul.mubr.f32.gmra.mrb[4].mxu1 %v49105_v60  ;;  %v16409_v47 = vand.u32 4294901760, %v16408_v16 }
 0x5ff   : > { %15667 = vmatprep.mubr.f32.mxu1 %v49037_v24 }
 0x600   : > { %v16410_v42 = vsub.f32 %v16408_v16, %v16409_v47  ;;  %v44598_v56 = vpack.c.bf16 %v16409_v47, %v16397_v31  ;;  %v41496_v31 = vld [vmem:[%s53921_s5 + $0x78] sm:$0xff] }
 0x602   : > { %15669 = vmatmul.mubr.f32.vlgmr.msra.gmra.mrb[2].mxu1 %v49083_v13  ;;  %v16411_v40 = vand.u32 4294901760, %v16410_v42 }
 0x603   : > { %44557 = vmatpush1.bf16.msra.mxu1 %v44536_v36  ;;  %15674 = vmatprep.mubr.f32.mxu1 %v49037_v24  ;;  %v44582_v36 = vpack.c.bf16 %v16308_v21, %v16304_v39  ;;  %v17358_v21 = vpop.permute.xlu0 %17357 }
 0x604   : > { %44559 = vmatprep.subr.bf16.mxu1 %v49129_v61  ;;  %v44586_v49 = vpack.c.bf16 %v16411_v40, %v16399_v53 }
 0x606   : > { %15676 = vmatmul.mubr.f32.gmra.mrb[4].mxu1 %v49091_v17 }
 0x607   : > { %15750 = vmatprep.mubr.f32.mxu1 %v49037_v24 }
 0x60a   : > { %15752 = vmatmul.mubr.f32.vlgmr.msra.gmra.mrb[2].mxu1 %v49083_v13 }
 0x60b   : > { %44561 = vmatpush3.bf16.msra.mxu1 %v49129_v61  ;;  %15757 = vmatprep.mubr.f32.mxu1 %v49037_v24 }
 0x60c   : > { %44563 = vmatprep.subr.bf16.mxu1 %v44562_v4 }
 0x60e   : > { %15759 = vmatmul.mubr.f32.gmra.mrb[4].mxu1 %v49091_v17 }
 0x60f   : > { %43008 = vmatprep.mubr.f32.mxu1 %v15298_v48 }
 0x612   : > { %43009 = vmatmul.mubr.f32.vlgmr.msra.gmra.mrb[6].mxu1 %v15309_v43  ;;  %v16376_v43 = vsub.f32 %v49171_v34, %v49177_v37 }
 0x613   : > { %44565 = vmatpush3.bf16.msra.mxu1 %v44562_v4  ;;  %43015 = vmatprep.mubr.f32.mxu1 %v49083_v13 }
 0x614   : > { %44567 = vmatprep.subr.bf16.mxu1 %v44566_v5  ;;  %v16377_v54 = vand.u32 4294901760, %v16376_v43 }
 0x61a   : > { %43016 = vmatmul.mubr.f32.vlgmr.msra.gmra.mrb[6].mxu1 %v49091_v17 }
 0x61b   : > { %44569 = vmatpush3.bf16.msra.mxu1 %v44566_v5  ;;  %43022 = vmatprep.mubr.f32.mxu1 %v49089_v3  ;;  %v16288_v3 = vsel %vm6649_vm6, %v16277_v19, %v16279_v8  ;;  %v16940_v5 = vsub.f32 %v49146_v7, %v16848_v62  ;;  %v16933_v8 = vsub.f32 %v49141_v23, %v16845_v9 }
 0x61c   : > { %44571 = vmatprep.subr.bf16.mxu1 %v49129_v61 }
 0x61d   : > { %v16941_v11 = vand.u32 4294901760, %v16940_v5  ;;  %v44614_v19 = vpack.c.bf16 %v16940_v5, %v16933_v8 }
 0x61f   : > { %v16942_v50 = vsub.f32 %v16940_v5, %v16941_v11 }
 0x621   : > { %v16943_v23 = vand.u32 4294901760, %v16942_v50 }
 0x622   : > { %43023 = vmatmul.mubr.f32.vlgmr.msra.gmra.mrb[6].mxu1 %v49098_v30  ;;  %v16302_v30 = vsel %vm9860_vm13, %v41494_v20, 0 }
 0x623   : > { %44573 = vmatpush3.bf16.msra.mxu1 %v49129_v61  ;;  %43029 = vmatprep.mubr.f32.mxu1 %v49095_v27  ;;  %v16306_v27 = vand.u32 4294901760, %v16288_v3  ;;  %v49173_v35 = vand.u32 4294901760, %v16302_v30 }
 0x624   : > { %44575 = vmatprep.subr.bf16.mxu1 %v44574_v28 }
 0x625   : > { %v49180_v48 = vsub.f32 %v16302_v30, %v49173_v35  ;;  %v44584_v44 = vpack.c.bf16 %v16310_v18, %v16306_v27  ;;  %v17362_v18 = vpop.permute.xlu1 %17361 }
 0x627   : > { %v49187_v12 = vand.u32 4294901760, %v49180_v48 }
 0x62a   : > { %43030 = vmatmul.mubr.f32.vlgmr.msra.gmra.mrb[6].mxu1 %v49105_v60  ;;  %v16402_v60 = vsub.f32 %v16288_v3, %v16306_v27  ;;  %v17364_v3 = vpop.permute.xlu0 %17363  ;;  %v17368_v27 = vsel %vm7679_vm7, %v17358_v21, %v49223_v32 }
 0x62b   : > { %44577 = vmatpush3.bf16.msra.mxu1 %v44574_v28  ;;  %43036 = vmatprep.mubr.f32.mxu1 %v49083_v13  ;;  %v16934_v28 = vand.u32 4294901760, %v16933_v8  ;;  %v17370_v20 = vsel %vm7679_vm7, %v17364_v3, %v49228_v22 }
 0x62c   : > { %44579 = vmatprep.subr.bf16.mxu1 %v49129_v61  ;;  %v16403_v0 = vand.u32 4294901760, %v16402_v60 }
 0x62d   : > { %v16935_v7 = vsub.f32 %v16933_v8, %v16934_v28  ;;  %v44622_v39 = vpack.c.bf16 %v16941_v11, %v16934_v28 }
 0x62e   : > { %v16404_v38 = vsub.f32 %v16402_v60, %v16403_v0  ;;  %v44600_v4 = vpack.c.bf16 %v16415_v29, %v16403_v0  ;;  %v17356_v30 = vpop.permute.xlu0 %17355 }
 0x62f   : > { %v16936_v2 = vand.u32 4294901760, %v16935_v7 }
 0x630   : > { %v16405_v57 = vand.u32 4294901760, %v16404_v38 }
 0x631   : > { %v44610_v15 = vpack.c.bf16 %v16943_v23, %v16936_v2  ;;  %v17927_v23 = vand.u32 4294901760, %v49228_v22  ;;  %v17924_v2 = vand.u32 4294901760, %v49223_v32 }
 0x632   : > { %43037 = vmatmul.mubr.f32.vlgmr.msra.gmra.mrb[6].mxu1 %v49091_v17  ;;  %v44588_v10 = vpack.c.bf16 %v16417_v46, %v16405_v57 }
 0x633   : > { %44581 = vmatpush3.bf16.msra.mxu1 %v49129_v61  ;;  %43043 = vmatprep.mubr.f32.mxu1 %v49083_v13  ;;  %v16387_v13 = vsub.f32 %v49180_v48, %v49187_v12  ;;  %v44590_v61 = vpack.c.bf16 %v16408_v16, %v16396_v45  ;;  %v41495_v16 = vld [vmem:[%s53921_s5 + $0x70] sm:$0xff]  ;;  %v17369_v45 = vsel %vm7679_vm7, %v17362_v18, %v17364_v3 }
 0x634   : > { %44583 = vmatprep.subr.bf16.mxu1 %v44582_v36  ;;  %v17378_v47 = vsel %vm9860_vm13, %v41495_v16, 0  ;;  %v17389_v29 = vand.u32 4294901760, %v17369_v45 }
 0x635   : > { %v16388_v1 = vand.u32 4294901760, %v16387_v13  ;;  %v49247_v42 = vand.u32 4294901760, %v17378_v47 }
 0x636   : > { %v17493_v51 = vsub.f32 %v17369_v45, %v17389_v29  ;;  %v49305_v45 = vpop.permute.xlu1 %18438 }
 0x637   : > { %v49253_v40 = vsub.f32 %v17378_v47, %v49247_v42 }
 0x638   : > { %v17494_v53 = vand.u32 4294901760, %v17493_v51 }
 0x63a   : > { %43044 = vmatmul.mubr.f32.vlgmr.msra.gmra.mrb[6].mxu1 %v49091_v17  ;;  %v44592_v17 = vpack.c.bf16 %v16414_v33, %v16402_v60  ;;  %v17387_v33 = vand.u32 4294901760, %v17370_v20  ;;  %v17383_v60 = vand.u32 4294901760, %v17368_v27  ;;  %v49310_v47 = vpop.permute.xlu1 %18444 }
 0x63b   : > { %44585 = vmatpush1.bf16.msra.mxu1 %v44584_v44  ;;  %16372 = vmatprep.mubr.f32.mxu1 %v49037_v24 }
 0x63c   : > { %44587 = vmatprep.subr.bf16.mxu1 %v44586_v49  ;;  %v17475_v0 = vsub.f32 %v17368_v27, %v17383_v60  ;;  %v49259_v49 = vand.u32 4294901760, %v49253_v40 }
 0x63e   : > { %16378 = vmatmul.mubr.f32.vlgmr.msra.gmra.mrb[2].mxu1 %v16377_v54  ;;  %v17476_v38 = vand.u32 4294901760, %v17475_v0 }
 0x63f   : > { %44589 = vmatpush1.bf16.msra.mxu1 %v44588_v10  ;;  %16383 = vmatprep.mubr.f32.mxu1 %v49037_v24  ;;  %v17495_v10 = vsub.f32 %v17493_v51, %v17494_v53 }
 0x640   : > { %44591 = vmatprep.subr.bf16.mxu1 %v44590_v61  ;;  %v17477_v57 = vsub.f32 %v17475_v0, %v17476_v38 }
 0x642   : > { %16389 = vmatmul.mubr.f32.gmra.mrb[4].mxu1 %v16388_v1  ;;  %v17478_v62 = vand.u32 4294901760, %v17477_v57 }
 0x643   : > { %16479 = vmatprep.mubr.f32.mxu1 %v49037_v24 }
 0x646   : > { %16481 = vmatmul.mubr.f32.vlgmr.msra.gmra.mrb[2].mxu1 %v49165_v26 }
 0x647   : > { %44593 = vmatpush1.bf16.msra.mxu1 %v44592_v17  ;;  %16486 = vmatprep.mubr.f32.mxu1 %v49037_v24 }
 0x648   : > { %44595 = vmatprep.subr.bf16.mxu1 %v44582_v36 }
 0x64a   : > { %16488 = vmatmul.mubr.f32.gmra.mrb[4].mxu1 %v49173_v35 }
 0x64b   : > { %16566 = vmatprep.mubr.f32.mxu1 %v49037_v24 }
 0x64e   : > { %16569 = vmatmul.mubr.f32.vlgmr.msra.gmra.mrb[2].mxu1 %v49171_v34 }
 0x64f   : > { %44597 = vmatpush1.bf16.msra.mxu1 %v44584_v44  ;;  %16574 = vmatprep.mubr.f32.mxu1 %v49037_v24 }
 0x650   : > { %44599 = vmatprep.subr.bf16.mxu1 %v44598_v56 }
 0x652   : > { %16577 = vmatmul.mubr.f32.gmra.mrb[4].mxu1 %v49180_v48 }
 0x653   : > { %16651 = vmatprep.mubr.f32.mxu1 %v49037_v24 }
 0x656   : > { %16655 = vmatmul.mubr.f32.vlgmr.msra.gmra.mrb[2].mxu1 %v49177_v37 }
 0x657   : > { %44601 = vmatpush1.bf16.msra.mxu1 %v44600_v4  ;;  %16660 = vmatprep.mubr.f32.mxu1 %v49037_v24  ;;  %v17496_v4 = vand.u32 4294901760, %v17495_v10 }
 0x658   : > { %44603 = vmatprep.subr.bf16.mxu1 %v44582_v36  ;;  %v17487_v36 = vsub.f32 %v17370_v20, %v17387_v33  ;;  %v49293_v20 = vpack.c.bf16 %v17927_v23, %v17924_v2 }
 0x65a   : > { %16664 = vmatmul.mubr.f32.gmra.mrb[4].mxu1 %v49187_v12  ;;  %v17488_v41 = vand.u32 4294901760, %v17487_v36 }
 0x65b   : > { %16746 = vmatprep.mubr.f32.mxu1 %v49037_v24 }
 0x65c   : > { %v17489_v46 = vsub.f32 %v17487_v36, %v17488_v41  ;;  %v44646_v7 = vpack.c.bf16 %v17488_v41, %v17476_v38  ;;  %v41498_v38 = vld [vmem:[%s53921_s5 + $0x88] sm:$0xff] }
 0x65e   : > { %16748 = vmatmul.mubr.f32.vlgmr.msra.gmra.mrb[2].mxu1 %v49165_v26  ;;  %v17490_v61 = vand.u32 4294901760, %v17489_v46 }
 0x65f   : > { %44605 = vmatpush1.bf16.msra.mxu1 %v44584_v44  ;;  %16753 = vmatprep.mubr.f32.mxu1 %v49037_v24  ;;  %v44630_v44 = vpack.c.bf16 %v17387_v33, %v17383_v60  ;;  %v18437_v33 = vpop.permute.xlu0 %18436 }
 0x660   : > { %44607 = vmatprep.subr.bf16.mxu1 %v49211_v52  ;;  %v44634_v5 = vpack.c.bf16 %v17490_v61, %v17478_v62 }
 0x662   : > { %16755 = vmatmul.mubr.f32.gmra.mrb[4].mxu1 %v49173_v35 }
 0x663   : > { %16829 = vmatprep.mubr.f32.mxu1 %v49037_v24 }
 0x666   : > { %16831 = vmatmul.mubr.f32.vlgmr.msra.gmra.mrb[2].mxu1 %v49165_v26 }
 0x667   : > { %44609 = vmatpush3.bf16.msra.mxu1 %v49211_v52  ;;  %16836 = vmatprep.mubr.f32.mxu1 %v49037_v24 }
 0x668   : > { %44611 = vmatprep.subr.bf16.mxu1 %v44610_v15 }
 0x66a   : > { %16838 = vmatmul.mubr.f32.gmra.mrb[4].mxu1 %v49173_v35 }
 0x66b   : > { %43050 = vmatprep.mubr.f32.mxu1 %v16377_v54 }
 0x66e   : > { %43051 = vmatmul.mubr.f32.vlgmr.msra.gmra.mrb[6].mxu1 %v16388_v1  ;;  %v17455_v1 = vsub.f32 %v49253_v40, %v49259_v49 }
 0x66f   : > { %44613 = vmatpush3.bf16.msra.mxu1 %v44610_v15  ;;  %43057 = vmatprep.mubr.f32.mxu1 %v49165_v26 }
 0x670   : > { %44615 = vmatprep.subr.bf16.mxu1 %v44614_v19  ;;  %v17456_v8 = vand.u32 4294901760, %v17455_v1 }
 0x676   : > { %43058 = vmatmul.mubr.f32.vlgmr.msra.gmra.mrb[6].mxu1 %v49173_v35 }
 0x677   : > { %44617 = vmatpush3.bf16.msra.mxu1 %v44614_v19  ;;  %43064 = vmatprep.mubr.f32.mxu1 %v49171_v34  ;;  %v17367_v34 = vsel %vm7679_vm7, %v17356_v30, %v17358_v21  ;;  %v18019_v19 = vsub.f32 %v49228_v22, %v17927_v23  ;;  %v18012_v21 = vsub.f32 %v49223_v32, %v17924_v2 }
 0x678   : > { %44619 = vmatprep.subr.bf16.mxu1 %v49211_v52 }
 0x679   : > { %v18020_v3 = vand.u32 4294901760, %v18019_v19  ;;  %v44662_v30 = vpack.c.bf16 %v18019_v19, %v18012_v21 }
 0x67b   : > { %v18021_v18 = vsub.f32 %v18019_v19, %v18020_v3 }
 0x67d   : > { %v18022_v32 = vand.u32 4294901760, %v18021_v18 }
 0x67e   : > { %43065 = vmatmul.mubr.f32.vlgmr.msra.gmra.mrb[6].mxu1 %v49180_v48  ;;  %v17381_v48 = vsel %vm9860_vm13, %v41496_v31, 0 }
 0x67f   : > { %44621 = vmatpush3.bf16.msra.mxu1 %v49211_v52  ;;  %43071 = vmatprep.mubr.f32.mxu1 %v49177_v37  ;;  %v17385_v37 = vand.u32 4294901760, %v17367_v34  ;;  %v49255_v43 = vand.u32 4294901760, %v17381_v48 }
 0x680   : > { %44623 = vmatprep.subr.bf16.mxu1 %v44622_v39 }
 0x681   : > { %v49262_v54 = vsub.f32 %v17381_v48, %v49255_v43  ;;  %v44632_v9 = vpack.c.bf16 %v17389_v29, %v17385_v37  ;;  %v18441_v29 = vpop.permute.xlu1 %18440 }
 0x683   : > { %v49269_v17 = vand.u32 4294901760, %v49262_v54 }
 0x686   : > { %43072 = vmatmul.mubr.f32.vlgmr.msra.gmra.mrb[6].mxu1 %v49187_v12  ;;  %v17481_v12 = vsub.f32 %v17367_v34, %v17385_v37  ;;  %v18443_v34 = vpop.permute.xlu0 %18442  ;;  %v18447_v37 = vsel %vm8709_vm8, %v18437_v33, %v49305_v45 }
 0x687   : > { %44625 = vmatpush3.bf16.msra.mxu1 %v44622_v39  ;;  %43078 = vmatprep.mubr.f32.mxu1 %v49165_v26  ;;  %v18013_v39 = vand.u32 4294901760, %v18012_v21  ;;  %v18449_v31 = vsel %vm8709_vm8, %v18443_v34, %v49310_v47 }
 0x688   : > { %44627 = vmatprep.subr.bf16.mxu1 %v49211_v52  ;;  %v17482_v13 = vand.u32 4294901760, %v17481_v12 }
 0x689   : > { %v18014_v22 = vsub.f32 %v18012_v21, %v18013_v39  ;;  %v44670_v60 = vpack.c.bf16 %v18020_v3, %v18013_v39 }
 0x68a   : > { %v17483_v56 = vsub.f32 %v17481_v12, %v17482_v13  ;;  %v44648_v15 = vpack.c.bf16 %v17494_v53, %v17482_v13  ;;  %v18435_v48 = vpop.permute.xlu0 %18434 }
 0x68b   : > { %v18015_v16 = vand.u32 4294901760, %v18014_v22 }
 0x68c   : > { %v17484_v11 = vand.u32 4294901760, %v17483_v56 }
 0x68d   : > { %v44658_v27 = vpack.c.bf16 %v18022_v32, %v18015_v16  ;;  %v19006_v32 = vand.u32 4294901760, %v49310_v47  ;;  %v19003_v16 = vand.u32 4294901760, %v49305_v45 }
 0x68e   : > { %43079 = vmatmul.mubr.f32.vlgmr.msra.gmra.mrb[6].mxu1 %v49173_v35  ;;  %v44636_v28 = vpack.c.bf16 %v17496_v4, %v17484_v11 }
 0x68f   : > { %44629 = vmatpush3.bf16.msra.mxu1 %v49211_v52  ;;  %43085 = vmatprep.mubr.f32.mxu1 %v49165_v26  ;;  %v17466_v26 = vsub.f32 %v49262_v54, %v49269_v17  ;;  %v44638_v52 = vpack.c.bf16 %v17487_v36, %v17475_v0  ;;  %v41497_v36 = vld [vmem:[%s53921_s5 + $0x80] sm:$0xff]  ;;  %v18448_v0 = vsel %vm8709_vm8, %v18441_v29, %v18443_v34 }
 0x690   : > { %44631 = vmatprep.subr.bf16.mxu1 %v44630_v44  ;;  %v18457_v41 = vsel %vm9860_vm13, %v41497_v36, 0  ;;  %v18468_v53 = vand.u32 4294901760, %v18448_v0  ;;  %v44702_v29 = vpack.c.bf16 %v19006_v32, %v19003_v16 }
 0x691   : > { %v17467_v50 = vand.u32 4294901760, %v17466_v26  ;;  %v49329_v46 = vand.u32 4294901760, %v18457_v41 }
 0x692   : > { %v18572_v57 = vsub.f32 %v18448_v0, %v18468_v53 }
 0x693   : > { %v49335_v61 = vsub.f32 %v18457_v41, %v49329_v46 }
 0x694   : > { %v18573_v62 = vand.u32 4294901760, %v18572_v57 }
 0x696   : > { %43086 = vmatmul.mubr.f32.vlgmr.msra.gmra.mrb[6].mxu1 %v49173_v35  ;;  %v44640_v35 = vpack.c.bf16 %v17493_v51, %v17481_v12  ;;  %v18466_v51 = vand.u32 4294901760, %v18449_v31  ;;  %v18462_v12 = vand.u32 4294901760, %v18447_v37 }
 0x697   : > { %44633 = vmatpush1.bf16.msra.mxu1 %v44632_v9  ;;  %17451 = vmatprep.mubr.f32.mxu1 %v49037_v24 }
 0x698   : > { %44635 = vmatprep.subr.bf16.mxu1 %v44634_v5  ;;  %v18554_v13 = vsub.f32 %v18447_v37, %v18462_v12  ;;  %v49341_v5 = vand.u32 4294901760, %v49335_v61 }
 0x69a   : > { %17457 = vmatmul.mubr.f32.vlgmr.msra.gmra.mrb[2].mxu1 %v17456_v8  ;;  %v18555_v56 = vand.u32 4294901760, %v18554_v13 }
 0x69b   : > { %44637 = vmatpush1.bf16.msra.mxu1 %v44636_v28  ;;  %17462 = vmatprep.mubr.f32.mxu1 %v49037_v24  ;;  %v18574_v28 = vsub.f32 %v18572_v57, %v18573_v62 }
 0x69c   : > { %44639 = vmatprep.subr.bf16.mxu1 %v44638_v52  ;;  %v18556_v11 = vsub.f32 %v18554_v13, %v18555_v56 }
 0x69e   : > { %17468 = vmatmul.mubr.f32.gmra.mrb[4].mxu1 %v17467_v50  ;;  %v18557_v23 = vand.u32 4294901760, %v18556_v11 }
 0x69f   : > { %17558 = vmatprep.mubr.f32.mxu1 %v49037_v24 }
 0x6a2   : > { %17560 = vmatmul.mubr.f32.vlgmr.msra.gmra.mrb[2].mxu1 %v49247_v42 }
 0x6a3   : > { %44641 = vmatpush1.bf16.msra.mxu1 %v44640_v35  ;;  %17565 = vmatprep.mubr.f32.mxu1 %v49037_v24 }
 0x6a4   : > { %44643 = vmatprep.subr.bf16.mxu1 %v44630_v44 }
 0x6a6   : > { %17567 = vmatmul.mubr.f32.gmra.mrb[4].mxu1 %v49255_v43 }
 0x6a7   : > { %17645 = vmatprep.mubr.f32.mxu1 %v49037_v24 }
 0x6aa   : > { %17648 = vmatmul.mubr.f32.vlgmr.msra.gmra.mrb[2].mxu1 %v49253_v40 }
 0x6ab   : > { %44645 = vmatpush1.bf16.msra.mxu1 %v44632_v9  ;;  %17653 = vmatprep.mubr.f32.mxu1 %v49037_v24 }
 0x6ac   : > { %44647 = vmatprep.subr.bf16.mxu1 %v44646_v7 }
 0x6ae   : > { %17656 = vmatmul.mubr.f32.gmra.mrb[4].mxu1 %v49262_v54 }
 0x6af   : > { %17730 = vmatprep.mubr.f32.mxu1 %v49037_v24 }
 0x6b2   : > { %17734 = vmatmul.mubr.f32.vlgmr.msra.gmra.mrb[2].mxu1 %v49259_v49 }
 0x6b3   : > { %44649 = vmatpush1.bf16.msra.mxu1 %v44648_v15  ;;  %17739 = vmatprep.mubr.f32.mxu1 %v49037_v24  ;;  %v18575_v15 = vand.u32 4294901760, %v18574_v28 }
 0x6b4   : > { %44651 = vmatprep.subr.bf16.mxu1 %v44630_v44  ;;  %v18566_v44 = vsub.f32 %v18449_v31, %v18466_v51 }
 0x6b6   : > { %17743 = vmatmul.mubr.f32.gmra.mrb[4].mxu1 %v49269_v17  ;;  %v18567_v10 = vand.u32 4294901760, %v18566_v44 }
 0x6b7   : > { %17825 = vmatprep.mubr.f32.mxu1 %v49037_v24 }
 0x6b8   : > { %v18568_v4 = vsub.f32 %v18566_v44, %v18567_v10  ;;  %v44694_v22 = vpack.c.bf16 %v18567_v10, %v18555_v56 }
 0x6ba   : > { %17827 = vmatmul.mubr.f32.vlgmr.msra.gmra.mrb[2].mxu1 %v49247_v42  ;;  %v18569_v52 = vand.u32 4294901760, %v18568_v4 }
 0x6bb   : > { %44653 = vmatpush1.bf16.msra.mxu1 %v44632_v9  ;;  %17832 = vmatprep.mubr.f32.mxu1 %v49037_v24  ;;  %v44678_v9 = vpack.c.bf16 %v18466_v51, %v18462_v12  ;;  %v19515_v51 = vpop.permute.xlu0 %19514 }
 0x6bc   : > { %44655 = vmatprep.subr.bf16.mxu1 %v49293_v20  ;;  %v44682_v19 = vpack.c.bf16 %v18569_v52, %v18557_v23 }
 0x6be   : > { %17834 = vmatmul.mubr.f32.gmra.mrb[4].mxu1 %v49255_v43 }
 0x6bf   : > { %17908 = vmatprep.mubr.f32.mxu1 %v49037_v24 }
 0x6c2   : > { %17910 = vmatmul.mubr.f32.vlgmr.msra.gmra.mrb[2].mxu1 %v49247_v42 }
 0x6c3   : > { %44657 = vmatpush3.bf16.msra.mxu1 %v49293_v20  ;;  %17915 = vmatprep.mubr.f32.mxu1 %v49037_v24 }
 0x6c4   : > { %44659 = vmatprep.subr.bf16.mxu1 %v44658_v27 }
 0x6c6   : > { %17917 = vmatmul.mubr.f32.gmra.mrb[4].mxu1 %v49255_v43 }
 0x6c7   : > { %43092 = vmatprep.mubr.f32.mxu1 %v17456_v8 }
 0x6ca   : > { %43093 = vmatmul.mubr.f32.vlgmr.msra.gmra.mrb[6].mxu1 %v17467_v50  ;;  %v18534_v50 = vsub.f32 %v49335_v61, %v49341_v5 }
 0x6cb   : > { %44661 = vmatpush3.bf16.msra.mxu1 %v44658_v27  ;;  %43099 = vmatprep.mubr.f32.mxu1 %v49247_v42 }
 0x6cc   : > { %44663 = vmatprep.subr.bf16.mxu1 %v44662_v30  ;;  %v18535_v21 = vand.u32 4294901760, %v18534_v50 }
 0x6d2   : > { %43100 = vmatmul.mubr.f32.vlgmr.msra.gmra.mrb[6].mxu1 %v49255_v43 }
 0x6d3   : > { %44665 = vmatpush3.bf16.msra.mxu1 %v44662_v30  ;;  %43106 = vmatprep.mubr.f32.mxu1 %v49253_v40  ;;  %v18446_v40 = vsel %vm8709_vm8, %v18435_v48, %v18437_v33  ;;  %v19098_v30 = vsub.f32 %v49310_v47, %v19006_v32  ;;  %v19091_v33 = vsub.f32 %v49305_v45, %v19003_v16  ;;  %v29326_v32 = vld [vmem:[%s455_s30] sm:$0xff]  ;;  %v29263_v16 = vld [vmem:[%s53924_s8 + $0x8] sm:$0xff] }
 0x6d4   : > { %44667 = vmatprep.subr.bf16.mxu1 %v49293_v20 }
 0x6d5   : > { %v19099_v34 = vand.u32 4294901760, %v19098_v30  ;;  %v19092_v31 = vand.u32 4294901760, %v19091_v33  ;;  %v44710_v48 = vpack.c.bf16 %v19098_v30, %v19091_v33 }
 0x6d7   : > { %v19100_v47 = vsub.f32 %v19098_v30, %v19099_v34  ;;  %v44718_v0 = vpack.c.bf16 %v19099_v34, %v19092_v31 }
 0x6d9   : > { %v19101_v45 = vand.u32 4294901760, %v19100_v47 }
 0x6da   : > { %43107 = vmatmul.mubr.f32.vlgmr.msra.gmra.mrb[6].mxu1 %v49262_v54  ;;  %v18460_v54 = vsel %vm9860_vm13, %v41498_v38, 0 }
 0x6db   : > { %44669 = vmatpush3.bf16.msra.mxu1 %v49293_v20  ;;  %43113 = vmatprep.mubr.f32.mxu1 %v49259_v49  ;;  %v18464_v49 = vand.u32 4294901760, %v18446_v40  ;;  %v49337_v1 = vand.u32 4294901760, %v18460_v54 }
 0x6dc   : > { %44671 = vmatprep.subr.bf16.mxu1 %v44670_v60 }
 0x6dd   : > { %v49344_v8 = vsub.f32 %v18460_v54, %v49337_v1  ;;  %v44680_v2 = vpack.c.bf16 %v18468_v53, %v18464_v49 }
 0x6df   : > { %v49351_v35 = vand.u32 4294901760, %v49344_v8 }
 0x6e2   : > { %43114 = vmatmul.mubr.f32.vlgmr.msra.gmra.mrb[6].mxu1 %v49269_v17  ;;  %v18560_v17 = vsub.f32 %v18446_v40, %v18464_v49 }
 0x6e3   : > { %44673 = vmatpush3.bf16.msra.mxu1 %v44670_v60  ;;  %43120 = vmatprep.mubr.f32.mxu1 %v49247_v42  ;;  %v49374_v60 = vld [vmem:[#allocation2 + $0x30] sm:$0xff] }
 0x6e4   : > { %44675 = vmatprep.subr.bf16.mxu1 %v49293_v20  ;;  %v18561_v26 = vand.u32 4294901760, %v18560_v17 }
 0x6e6   : > { %v18562_v7 = vsub.f32 %v18560_v17, %v18561_v26  ;;  %v44696_v27 = vpack.c.bf16 %v18573_v62, %v18561_v26 }
 0x6e8   : > { %v18563_v3 = vand.u32 4294901760, %v18562_v7 }
 0x6ea   : > { %43121 = vmatmul.mubr.f32.vlgmr.msra.gmra.mrb[6].mxu1 %v49255_v43  ;;  %v44684_v39 = vpack.c.bf16 %v18575_v15, %v18563_v3 }
 0x6eb   : > { %44677 = vmatpush3.bf16.msra.mxu1 %v49293_v20  ;;  %43127 = vmatprep.mubr.f32.mxu1 %v49247_v42  ;;  %v18545_v42 = vsub.f32 %v49344_v8, %v49351_v35  ;;  %v44686_v20 = vpack.c.bf16 %v18566_v44, %v18554_v13  ;;  %v19520_v44 = vpop.permute.xlu1 %19519 }
 0x6ec   : > { %44679 = vmatprep.subr.bf16.mxu1 %v44678_v9 }
 0x6ed   : > { %v18546_v18 = vand.u32 4294901760, %v18545_v42 }
 0x6f2   : > { %43128 = vmatmul.mubr.f32.vlgmr.msra.gmra.mrb[6].mxu1 %v49255_v43  ;;  %v44688_v43 = vpack.c.bf16 %v18572_v57, %v18560_v17 }
 0x6f3   : > { %44681 = vmatpush1.bf16.msra.mxu1 %v44680_v2  ;;  %18530 = vmatprep.mubr.f32.mxu1 %v49037_v24 }
 0x6f4   : > { %44683 = vmatprep.subr.bf16.mxu1 %v44682_v19 }
 0x6f6   : > { %18536 = vmatmul.mubr.f32.vlgmr.msra.gmra.mrb[2].mxu1 %v18535_v21 }
 0x6f7   : > { %44685 = vmatpush1.bf16.msra.mxu1 %v44684_v39  ;;  %18541 = vmatprep.mubr.f32.mxu1 %v49037_v24 }
 0x6f8   : > { %44687 = vmatprep.subr.bf16.mxu1 %v44686_v20 }
 0x6fa   : > { %18547 = vmatmul.mubr.f32.gmra.mrb[4].mxu1 %v18546_v18 }
 0x6fb   : > { %18637 = vmatprep.mubr.f32.mxu1 %v49037_v24 }
 0x6fe   : > { %18639 = vmatmul.mubr.f32.vlgmr.msra.gmra.mrb[2].mxu1 %v49329_v46 }
 0x6ff   : > { %44689 = vmatpush1.bf16.msra.mxu1 %v44688_v43  ;;  %18644 = vmatprep.mubr.f32.mxu1 %v49037_v24 }
 0x700   : > { %44691 = vmatprep.subr.bf16.mxu1 %v44678_v9 }
 0x702   : > { %18646 = vmatmul.mubr.f32.gmra.mrb[4].mxu1 %v49337_v1 }
 0x703   : > { %18724 = vmatprep.mubr.f32.mxu1 %v49037_v24 }
 0x706   : > { %18727 = vmatmul.mubr.f32.vlgmr.msra.gmra.mrb[2].mxu1 %v49335_v61 }
 0x707   : > { %44693 = vmatpush1.bf16.msra.mxu1 %v44680_v2  ;;  %18732 = vmatprep.mubr.f32.mxu1 %v49037_v24 }
 0x708   : > { %44695 = vmatprep.subr.bf16.mxu1 %v44694_v22  ;;  %v29262_v22 = vld [vmem:[%s53924_s8] sm:$0xff] }
 0x70a   : > { %18735 = vmatmul.mubr.f32.gmra.mrb[4].mxu1 %v49344_v8 }
 0x70b   : > { %18809 = vmatprep.mubr.f32.mxu1 %v49037_v24 }
 0x70e   : > { %18813 = vmatmul.mubr.f32.vlgmr.msra.gmra.mrb[2].mxu1 %v49341_v5 }
 0x70f   : > { %44697 = vmatpush1.bf16.msra.mxu1 %v44696_v27  ;;  %18818 = vmatprep.mubr.f32.mxu1 %v49037_v24  ;;  %v19093_v24 = vsub.f32 %v19091_v33, %v19092_v31  ;;  %v29327_v27 = vld [vmem:[%s455_s30 + $0x8] sm:$0xff]  ;;  %v41499_v33 = vld [vmem:[%s53923_s7 + $0x10] sm:$0xff] }
 0x710   : > { %44699 = vmatprep.subr.bf16.mxu1 %v44678_v9  ;;  %v19614_v31 = vsel %vm9860_vm13, %v41499_v33, 0 }
 0x711   : > { %v19094_v36 = vand.u32 4294901760, %v19093_v24  ;;  %v49540_v24 = vand.u32 4294901760, %v19614_v31 }
 0x712   : > { %18822 = vmatmul.mubr.f32.gmra.mrb[4].mxu1 %v49351_v35 }
 0x713   : > { %18904 = vmatprep.mubr.f32.mxu1 %v49374_v60  ;;  %v44706_v37 = vpack.c.bf16 %v19101_v45, %v19094_v36 }
 0x716   : > { %18906 = vmatmul.mubr.f32.vlgmr.msra.gmra.mrb[2].mxu1 %v49329_v46 }
 0x717   : > { %44701 = vmatpush1.bf16.msra.mxu1 %v44680_v2  ;;  %18911 = vmatprep.mubr.f32.mxu1 %v49374_v60 }
 0x718   : > { %44703 = vmatprep.subr.bf16.mxu1 %v44702_v29 }
 0x71a   : > { %18913 = vmatmul.mubr.f32.gmra.mrb[4].mxu1 %v49337_v1 }
 0x71b   : > { %18987 = vmatprep.mubr.f32.mxu1 %v49374_v60 }
 0x71e   : > { %18989 = vmatmul.mubr.f32.vlgmr.msra.gmra.mrb[2].mxu1 %v49329_v46 }
 0x71f   : > { %44705 = vmatpush3.bf16.msra.mxu1 %v44702_v29  ;;  %18994 = vmatprep.mubr.f32.mxu1 %v49374_v60 }
 0x720   : > { %44707 = vmatprep.subr.bf16.mxu1 %v44706_v37 }
 0x722   : > { %18996 = vmatmul.mubr.f32.gmra.mrb[4].mxu1 %v49337_v1 }
 0x723   : > { %43134 = vmatprep.mubr.f32.mxu1 %v18535_v21 }
 0x726   : > { %43135 = vmatmul.mubr.f32.vlgmr.msra.gmra.mrb[6].mxu1 %v18546_v18 }
 0x727   : > { %44709 = vmatpush3.bf16.msra.mxu1 %v44706_v37  ;;  %43141 = vmatprep.mubr.f32.mxu1 %v49329_v46 }
 0x728   : > { %44711 = vmatprep.subr.bf16.mxu1 %v44710_v48 }
 0x72e   : > { %43142 = vmatmul.mubr.f32.vlgmr.msra.gmra.mrb[6].mxu1 %v49337_v1 }
 0x72f   : > { %44713 = vmatpush3.bf16.msra.mxu1 %v44710_v48  ;;  %43148 = vmatprep.mubr.f32.mxu1 %v49335_v61 }
 0x730   : > { %44715 = vmatprep.subr.bf16.mxu1 %v44702_v29 }
 0x736   : > { %43149 = vmatmul.mubr.f32.vlgmr.msra.gmra.mrb[6].mxu1 %v49344_v8 }
 0x737   : > { %44717 = vmatpush3.bf16.msra.mxu1 %v44702_v29  ;;  %43155 = vmatprep.mubr.f32.mxu1 %v49341_v5 }
 0x738   : > { %44719 = vmatprep.subr.bf16.mxu1 %v44718_v0 }
 0x73e   : > { %43156 = vmatmul.mubr.f32.vlgmr.msra.gmra.mrb[6].mxu1 %v49351_v35 }
 0x73f   : > { %44721 = vmatpush3.bf16.msra.mxu1 %v44718_v0  ;;  %43162 = vmatprep.mubr.f32.mxu1 %v49329_v46 }
 0x740   : > { %44723 = vmatprep.subr.bf16.mxu1 %v44702_v29 }
 0x746   : > { %43163 = vmatmul.mubr.f32.vlgmr.msra.gmra.mrb[6].mxu1 %v49337_v1 }
 0x747   : > { %44725 = vmatpush3.bf16.msra.mxu1 %v44702_v29  ;;  %43169 = vmatprep.mubr.f32.mxu1 %v49329_v46  ;;  %v41500_v29 = vld [vmem:[%s53923_s7 + $0x18] sm:$0xff] }
 0x748   : > { %v19617_v45 = vsel %vm9860_vm13, %v41500_v29, 0 }
 0x74e   : > { %43170 = vmatmul.mubr.f32.vlgmr.msra.gmra.mrb[6].mxu1 %v49337_v1 }
 0x74f   : > { %33601 = vmatprep.mubr.f32.mxu1 %v49374_v60 }
 0x7f1   : > { %v18990_v41 = vpop.f32.mrb[2].mxu1 }
 0x7f2   : > { %v19522_v40 = vadd.f32 %v19515_v51, %v18990_v41  ;;  %v18992_v12 = vpop.f32.mrb[3].mxu1  ;;  %v49553_v41 = vand.u32 4294901760, %v19617_v45 }
 0x7f3   : > { %v19523_v38 = vadd.f32 %v19515_v51, %v18992_v12 }
 0x7f4   : > { %v19528_v53 = vmax.f32 %v19522_v40, 0.0 }
 0x7f5   : > { %v19529_v49 = vmax.f32 %v19523_v38, 0.0  ;;  %v18997_v54 = vpop.f32.mrb[4].mxu1 }
 0x7f6   : > { %v19534_v13 = vmul.f32 %v19528_v53, %v48529_v6  ;;  %v19525_v57 = vadd.f32 %v19520_v44, %v18997_v54  ;;  %v18999_v10 = vpop.f32.mrb[5].mxu1 }
 0x7f7   : > { %v19535_v61 = vmul.f32 %v19529_v49, %v48526_v25  ;;  %v19526_v9 = vadd.f32 %v19520_v44, %v18999_v10 }
 0x7f8   : > { %v19531_v46 = vmax.f32 %v19525_v57, 0.0  ;;  %19546 = vrot.lane.b32.xlu0 %v19534_v13, %s47443_s15  ;;  %v49567_v13 = vsub.f32 %v19617_v45, %v49553_v41 }
 0x7f9   : > { %19548 = vrot.lane.b32.xlu1 %v19535_v61, %s47443_s15  ;;  %v19532_v11 = vmax.f32 %v19526_v9, 0.0 }
 0x7fa   : > { %v19537_v1 = vmul.f32 %v19531_v46, %v48529_v6 }
 0x7fb   : > { %v19538_v52 = vmul.f32 %v19532_v11, %v48526_v25 }
 0x7fd   : > { %19552 = vrot.lane.b32.xlu1 %v19537_v1, %s47443_s15 }
 0x821   : > { %v43171_v17 = vpop.f32.mrb[6].mxu1 }
 0x822   : > { %v19527_v56 = vadd.f32 %v43171_v17, %v19520_v44  ;;  %v19494_v62 = vpop.f32.mrb[7].mxu1 }
 0x823   : > { %v19524_v4 = vadd.f32 %v19515_v51, %v19494_v62  ;;  %v49551_v51 = vsub.f32 %v19614_v31, %v49540_v24 }
 0x824   : > { %v19533_v5 = vmax.f32 %v19527_v56, 0.0 }
 0x825   : > { %v19530_v8 = vmax.f32 %v19524_v4, 0.0  ;;  %v49564_v54 = vand.u32 4294901760, %v49551_v51  ;;  %v49580_v4 = vand.u32 4294901760, %v49567_v13 }
 0x826   : > { %v19539_v26 = vmul.f32 %v19533_v5, %v48522_v14 }
 0x827   : > { %v19536_v28 = vmul.f32 %v19530_v8, %v48522_v14  ;;  %v19691_v9 = vsub.f32 %v49551_v51, %v49564_v54 }
 0x828   : > { %19556 = vrot.lane.b32.xlu1 %v19539_v26, %s47443_s15 }
 0x829   : > { %19550 = vrot.lane.b32.xlu0 %v19536_v28, %s47443_s15 }
 0x82d   : > { %19554 = vrot.lane.b32.xlu0 %v19538_v52, %s47443_s15 }
 0x86a   : > { %v19547_v50 = vpop.permute.xlu0 %19546 }
 0x86b   : > { %19568 = vst.msk [vmem:[#allocation2] sm:$0xff] %vm9813_vm10, %v19547_v50  ;;  %v19549_v35 = vpop.permute.xlu1 %19548 }
 0x86c   : > { %v49409_v7 = vsel %vm9802_vm11, %v19547_v50, %v19549_v35 }
 0x86d   : > { %19593 = vrot.lane.b32.xlu0 %v49409_v7, %s47434_s16 }
 0x86f   : > { %v19553_v23 = vpop.permute.xlu1 %19552 }
 0x870   : > { %19571 = vst.msk [vmem:[#allocation2 + $0x18] sm:$0xff] %vm9813_vm10, %v19553_v23 }
 0x872   : > { %v49423_v39 = vld [vmem:[#allocation2] sm:$0xff] }
 0x877   : > { %v49439_v43 = vld [vmem:[#allocation2 + $0x18] sm:$0xff] }
 0x89a   : > { %v19557_v19 = vpop.permute.xlu1 %19556 }
 0x89b   : > { %v19551_v2 = vpop.permute.xlu0 %19550 }
 0x89c   : > { %v19559_v15 = vsel %vm9802_vm11, %v19549_v35, %v19551_v2  ;;  %v49591_v2 = vand.u32 4294901760, %v19691_v9 }
 0x89d   : > { %19570 = vst.msk [vmem:[#allocation2 + $0x10] sm:$0xff] %vm9816_vm12, %v19559_v15  ;;  %v19702_v15 = vsub.f32 %v49567_v13, %v49580_v4 }
 0x89f   : > { %v19555_v21 = vpop.permute.xlu0 %19554  ;;  %v49602_v33 = vand.u32 4294901760, %v19702_v15 }
 0x8a0   : > { %v49417_v42 = vsel %vm9802_vm11, %v19553_v23, %v19555_v21  ;;  %v19561_v3 = vsel %vm9802_vm11, %v19555_v21, %v19557_v19 }
 0x8a1   : > { %19573 = vst.msk [vmem:[#allocation2 + $0x28] sm:$0xff] %vm9816_vm12, %v19561_v3  ;;  %19599 = vrot.lane.b32.xlu0 %v49417_v42, %s47434_s16 }
 0x8a4   : > { %v49433_v18 = vld [vmem:[#allocation2 + $0x10] sm:$0xff] }
 0x8a5   : > { %19591 = vrot.lane.b32.xlu0 %v49423_v39, %s47434_s16 }
 0x8a8   : > { %v49427_v20 = vld [vmem:[#allocation2 + $0x28] sm:$0xff] }
 0x8a9   : > { %19601 = vrot.lane.b32.xlu1 %v49427_v20, %s47434_s16  ;;  %21714 = vrot.lane.b32.xlu0 %v49409_v7, %s53930_s17 }
 0x8ad   : > { %19595 = vrot.lane.b32.xlu1 %v49433_v18, %s47434_s16  ;;  %21720 = vrot.lane.b32.xlu0 %v49417_v42, %s53930_s17 }
 0x8b1   : > { %19597 = vrot.lane.b32.xlu1 %v49439_v43, %s47434_s16  ;;  %21712 = vrot.lane.b32.xlu0 %v49423_v39, %s53930_s17 }
 0x8b5   : > { %21722 = vrot.lane.b32.xlu1 %v49427_v20, %s53930_s17  ;;  %22793 = vrot.lane.b32.xlu0 %v49409_v7, %s47436_s18 }
 0x8b9   : > { %21716 = vrot.lane.b32.xlu1 %v49433_v18, %s53930_s17  ;;  %22799 = vrot.lane.b32.xlu0 %v49417_v42, %s47436_s18 }
 0x8bd   : > { %21718 = vrot.lane.b32.xlu1 %v49439_v43, %s53930_s17  ;;  %22791 = vrot.lane.b32.xlu0 %v49423_v39, %s47436_s18 }
 0x8c1   : > { %22801 = vrot.lane.b32.xlu1 %v49427_v20, %s47436_s18  ;;  %23872 = vrot.lane.b32.xlu0 %v49409_v7, %s47437_s19 }
 0x8c5   : > { %22795 = vrot.lane.b32.xlu1 %v49433_v18, %s47436_s18  ;;  %23878 = vrot.lane.b32.xlu0 %v49417_v42, %s47437_s19 }
 0x8c9   : > { %22797 = vrot.lane.b32.xlu1 %v49439_v43, %s47436_s18  ;;  %23870 = vrot.lane.b32.xlu0 %v49423_v39, %s47437_s19 }
 0x8cd   : > { %23880 = vrot.lane.b32.xlu1 %v49427_v20, %s47437_s19  ;;  %24951 = vrot.lane.b32.xlu0 %v49409_v7, %s47438_s22 }
 0x8d1   : > { %23874 = vrot.lane.b32.xlu1 %v49433_v18, %s47437_s19  ;;  %24957 = vrot.lane.b32.xlu0 %v49417_v42, %s47438_s22 }
 0x8d5   : > { %23876 = vrot.lane.b32.xlu1 %v49439_v43, %s47437_s19  ;;  %24949 = vrot.lane.b32.xlu0 %v49423_v39, %s47438_s22 }
 0x8d9   : > { %24959 = vrot.lane.b32.xlu1 %v49427_v20, %s47438_s22  ;;  %26030 = vrot.lane.b32.xlu0 %v49409_v7, %s47439_s29 }
 0x8dd   : > { %24953 = vrot.lane.b32.xlu1 %v49433_v18, %s47438_s22  ;;  %26036 = vrot.lane.b32.xlu0 %v49417_v42, %s47439_s29 }
 0x8df   : > { %v19594_v30 = vpop.permute.xlu0 %19593 }
 0x8e1   : > { %24955 = vrot.lane.b32.xlu1 %v49439_v43, %s47438_s22  ;;  %26028 = vrot.lane.b32.xlu0 %v49423_v39, %s47439_s29 }
 0x8e5   : > { %26038 = vrot.lane.b32.xlu1 %v49427_v20, %s47439_s29  ;;  %27109 = vrot.lane.b32.xlu0 %v49409_v7, %s53932_s23 }
 0x8e9   : > { %26032 = vrot.lane.b32.xlu1 %v49433_v18, %s47439_s29  ;;  %27115 = vrot.lane.b32.xlu0 %v49417_v42, %s53932_s23 }
 0x8ed   : > { %26034 = vrot.lane.b32.xlu1 %v49439_v43, %s47439_s29  ;;  %27107 = vrot.lane.b32.xlu0 %v49423_v39, %s53932_s23 }
 0x8f1   : > { %27117 = vrot.lane.b32.xlu1 %v49427_v20, %s53932_s23  ;;  %28188 = vrot.lane.b32.xlu0 %v49409_v7, %s47441_s14 }
 0x8f5   : > { %27111 = vrot.lane.b32.xlu1 %v49433_v18, %s53932_s23  ;;  %28194 = vrot.lane.b32.xlu0 %v49417_v42, %s47441_s14 }
 0x8f9   : > { %27113 = vrot.lane.b32.xlu1 %v49439_v43, %s53932_s23  ;;  %28186 = vrot.lane.b32.xlu0 %v49423_v39, %s47441_s14 }
 0x8fd   : > { %28196 = vrot.lane.b32.xlu1 %v49427_v20, %s47441_s14  ;;  %29266 = vperm.xlu0 %47382, %v29262_v22  }
 0x901   : > { %28190 = vrot.lane.b32.xlu1 %v49433_v18, %s47441_s14  ;;  %29331 = vperm.xlu0 %47382, %v29326_v32  }
 0x905   : > { %28192 = vrot.lane.b32.xlu1 %v49439_v43, %s47441_s14 }
 0x909   : > { %29271 = vperm.xlu1 %47383, %v29263_v16  }
 0x90d   : > { %29336 = vperm.xlu1 %47383, %v29327_v27  }
 0x913   : > { %v19600_v34 = vpop.permute.xlu0 %19599 }
 0x917   : > { %v19592_v47 = vpop.permute.xlu0 %19591 }
 0x918   : > { %v19603_v36 = vsel %vm495_vm1, %v19592_v47, %v19594_v30 }
 0x919   : > { %v19621_v12 = vand.u32 4294901760, %v19603_v36 }
 0x91b   : > { %v49544_v37 = vpop.permute.xlu1 %19601  ;;  %v49546_v48 = vpop.permute.xlu0 %21714  ;;  %v49569_v57 = vsub.f32 %v19603_v36, %v19621_v12 }
 0x91c   : > { %v19606_v0 = vsel %vm495_vm1, %v19600_v34, %v49544_v37 }
 0x91d   : > { %v19623_v40 = vand.u32 4294901760, %v19606_v0  ;;  %v19718_v5 = vand.u32 4294901760, %v49569_v57 }
 0x91f   : > { %v49555_v38 = vsub.f32 %v19606_v0, %v19623_v40  ;;  %v49557_v53 = vpop.permute.xlu1 %19595  ;;  %v49559_v44 = vpop.permute.xlu0 %21720  ;;  %v19719_v19 = vsub.f32 %v49569_v57, %v19718_v5 }
 0x920   : > { %v19604_v49 = vsel %vm495_vm1, %v19594_v30, %v49557_v53  ;;  %v20160_v9 = vand.u32 4294901760, %v49557_v53 }
 0x921   : > { %v19619_v10 = vand.u32 4294901760, %v19604_v49  ;;  %v19724_v61 = vand.u32 4294901760, %v49555_v38 }
 0x923   : > { %v19598_v46 = vpop.permute.xlu1 %19597  ;;  %v49572_v1 = vpack.c.bf16 %v19623_v40, %v19619_v10  ;;  %v19711_v17 = vsub.f32 %v19604_v49, %v19619_v10  ;;  %v49574_v56 = vpop.permute.xlu0 %21712  ;;  %v19725_v11 = vsub.f32 %v49555_v38, %v19724_v61 }
 0x924   : > { %v19605_v62 = vsel %vm495_vm1, %v19598_v46, %v19600_v34  ;;  %v19720_v34 = vand.u32 4294901760, %v19719_v19 }
 0x925   : > { %v19625_v8 = vand.u32 4294901760, %v19605_v62  ;;  %44727 = vmatprep.subr.bf16.mxu0 %v49572_v1  ;;  %v19712_v26 = vand.u32 4294901760, %v19711_v17  ;;  %v19726_v22 = vand.u32 4294901760, %v19725_v11  ;;  %v44734_v36 = vpack.c.bf16 %v49555_v38, %v19711_v17 }
 0x927   : > { %v49585_v28 = vpack.c.bf16 %v19625_v8, %v19621_v12  ;;  %v19729_v52 = vsub.f32 %v19605_v62, %v19625_v8  ;;  %v49587_v50 = vpop.permute.xlu1 %21722  ;;  %v19713_v35 = vsub.f32 %v19711_v17, %v19712_v26  ;;  %v49589_v23 = vpop.permute.xlu0 %22793  ;;  %v44742_v46 = vpack.c.bf16 %v19724_v61, %v19712_v26 }
 0x928   : > { %v20163_v8 = vand.u32 4294901760, %v49544_v37 }
 0x929   : > { %v19730_v21 = vand.u32 4294901760, %v19729_v52  ;;  %44729 = vmatpush1.bf16.msra.mxu0 %v49585_v28  ;;  %v19714_v3 = vand.u32 4294901760, %v19713_v35  ;;  %v44736_v0 = vpack.c.bf16 %v19729_v52, %v49569_v57 }
 0x92a   : > { %v20255_v35 = vsub.f32 %v49544_v37, %v20163_v8 }
 0x92b   : > { %v19731_v32 = vsub.f32 %v19729_v52, %v19730_v21  ;;  %v49597_v16 = vpop.permute.xlu1 %21716  ;;  %v49599_v27 = vpop.permute.xlu0 %22799  ;;  %v44730_v30 = vpack.c.bf16 %v19726_v22, %v19714_v3  ;;  %v44744_v61 = vpack.c.bf16 %v19730_v21, %v19718_v5  ;;  %v20248_v52 = vsub.f32 %v49557_v53, %v20160_v9 }
 0x92c   : > { %19693 = vmatmul.mubr.f32.vlgmr.msra.gmra.mrb[4].mxu0 %v49591_v2  ;;  %v20256_v21 = vand.u32 4294901760, %v20255_v35  ;;  %v49660_v22 = vpack.c.bf16 %v20163_v8, %v20160_v9 }
 0x92d   : > { %v19732_v31 = vand.u32 4294901760, %v19731_v32  ;;  %19698 = vmatprep.mubr.f32.mxu0 %v49374_v60  ;;  %44731 = vmatprep.subr.bf16.mxu0 %v44730_v30  ;;  %v20249_v5 = vand.u32 4294901760, %v20248_v52  ;;  %v44758_v8 = vpack.c.bf16 %v20255_v35, %v20248_v52 }
 0x92f   : > { %v49605_v29 = vpop.permute.xlu1 %21718  ;;  %v44732_v47 = vpack.c.bf16 %v19732_v31, %v19720_v34  ;;  %v49607_v45 = vpop.permute.xlu0 %22791  ;;  %v20250_v37 = vsub.f32 %v20248_v52, %v20249_v5 }
 0x930   : > { %19704 = vmatmul.mubr.f32.gmra.mrb[6].mxu0 %v49602_v33 }
 0x931   : > { %44733 = vmatpush1.bf16.msra.mxu0 %v44732_v47  ;;  %19794 = vmatprep.mubr.f32.mxu0 %v49374_v60  ;;  %v20251_v34 = vand.u32 4294901760, %v20250_v37 }
 0x932   : > { %44735 = vmatprep.subr.bf16.mxu0 %v44734_v36 }
 0x933   : > { %v49613_v40 = vpop.permute.xlu1 %22801  ;;  %v49615_v12 = vpop.permute.xlu0 %23872 }
 0x934   : > { %19796 = vmatmul.mubr.f32.vlgmr.msra.gmra.mrb[4].mxu0 %v49540_v24 }
 0x935   : > { %44737 = vmatpush1.bf16.msra.mxu0 %v44736_v0  ;;  %19801 = vmatprep.mubr.f32.mxu0 %v49374_v60 }
 0x936   : > { %44739 = vmatprep.subr.bf16.mxu0 %v49572_v1 }
 0x937   : > { %v49620_v49 = vpop.permute.xlu1 %22795  ;;  %v49622_v38 = vpop.permute.xlu0 %23878 }
 0x938   : > { %19803 = vmatmul.mubr.f32.gmra.mrb[6].mxu0 %v49553_v41 }
 0x939   : > { %19881 = vmatprep.mubr.f32.mxu0 %v49374_v60 }
 0x93b   : > { %v49626_v57 = vpop.permute.xlu1 %22797  ;;  %v49628_v10 = vpop.permute.xlu0 %23870 }
 0x93c   : > { %19884 = vmatmul.mubr.f32.vlgmr.msra.gmra.mrb[4].mxu0 %v49551_v51 }
 0x93d   : > { %44741 = vmatpush1.bf16.msra.mxu0 %v49585_v28  ;;  %19889 = vmatprep.mubr.f32.mxu0 %v49374_v60 }
 0x93e   : > { %44743 = vmatprep.subr.bf16.mxu0 %v44742_v46 }
 0x93f   : > { %v49633_v17 = vpop.permute.xlu1 %23880  ;;  %v49635_v62 = vpop.permute.xlu0 %24951 }
 0x940   : > { %19892 = vmatmul.mubr.f32.gmra.mrb[6].mxu0 %v49567_v13 }
 0x941   : > { %19966 = vmatprep.mubr.f32.mxu0 %v49374_v60 }
 0x943   : > { %v49641_v11 = vpop.permute.xlu1 %23874  ;;  %v49643_v26 = vpop.permute.xlu0 %24957 }
 0x944   : > { %19970 = vmatmul.mubr.f32.vlgmr.msra.gmra.mrb[4].mxu0 %v49564_v54 }
 0x945   : > { %44745 = vmatpush1.bf16.msra.mxu0 %v44744_v61  ;;  %19975 = vmatprep.mubr.f32.mxu0 %v49374_v60 }
 0x946   : > { %44747 = vmatprep.subr.bf16.mxu0 %v49572_v1  ;;  %v20257_v1 = vsub.f32 %v20255_v35, %v20256_v21  ;;  %v44766_v35 = vpack.c.bf16 %v20256_v21, %v20249_v5  ;;  %v19575_v5 = vld [vmem:[%s53923_s7 + $0x8] sm:$0xff] }
 0x947   : > { %v49650_v15 = vpop.permute.xlu1 %23876  ;;  %v49652_v19 = vpop.permute.xlu0 %24949  ;;  %v20665_v59 = vsel %vm9860_vm13, %v19575_v5, 0 }
 0x948   : > { %19979 = vmatmul.mubr.f32.gmra.mrb[6].mxu0 %v49580_v4  ;;  %v20258_v31 = vand.u32 4294901760, %v20257_v1  ;;  %v49745_v6 = vand.u32 4294901760, %v20665_v59 }
 0x949   : > { %20061 = vmatprep.mubr.f32.mxu0 %v49374_v60 }
 0x94b   : > { %v49656_v53 = vpop.permute.xlu1 %24959  ;;  %v49658_v3 = vpop.permute.xlu0 %26030 }
 0x94c   : > { %20063 = vmatmul.mubr.f32.vlgmr.msra.gmra.mrb[4].mxu0 %v49540_v24 }
 0x94d   : > { %44749 = vmatpush1.bf16.msra.mxu0 %v49585_v28  ;;  %20068 = vmatprep.mubr.f32.mxu0 %v49374_v60  ;;  %v44754_v28 = vpack.c.bf16 %v20258_v31, %v20251_v34  ;;  %v20671_v34 = vand.u32 4294901760, %v49417_v42 }
 0x94e   : > { %44751 = vmatprep.subr.bf16.mxu0 %v49660_v22 }
 0x94f   : > { %v49666_v32 = vpop.permute.xlu1 %24953  ;;  %v49668_v30 = vpop.permute.xlu0 %26036  ;;  %v49723_v21 = vsub.f32 %v49417_v42, %v20671_v34 }
 0x950   : > { %20070 = vmatmul.mubr.f32.gmra.mrb[6].mxu0 %v49553_v41 }
 0x951   : > { %20144 = vmatprep.mubr.f32.mxu0 %v49374_v60 }
 0x953   : > { %v49672_v47 = vpop.permute.xlu1 %24955  ;;  %v49675_v36 = vpop.permute.xlu0 %26028 }
 0x954   : > { %20146 = vmatmul.mubr.f32.vlgmr.msra.gmra.mrb[4].mxu0 %v49540_v24  ;;  %54186 = vst [vmem:[#allocation6_spill] sm:$0xff] %v49675_v36 }
 0x955   : > { %44753 = vmatpush3.bf16.msra.mxu0 %v49660_v22  ;;  %20151 = vmatprep.mubr.f32.mxu0 %v49374_v60 }
 0x956   : > { %44755 = vmatprep.subr.bf16.mxu0 %v44754_v28 }
 0x957   : > { %v49679_v0 = vpop.permute.xlu1 %26038  ;;  %v49683_v46 = vpop.permute.xlu0 %27109 }
 0x958   : > { %20153 = vmatmul.mubr.f32.gmra.mrb[6].mxu0 %v49553_v41  ;;  %54187 = vst [vmem:[#allocation7_spill] sm:$0xff] %v49683_v46 }
 0x959   : > { %43176 = vmatprep.mubr.f32.mxu0 %v49591_v2 }
 0x95b   : > { %v49685_v9 = vpop.permute.xlu1 %26032  ;;  %v49691_v37 = vpop.permute.xlu0 %27115 }
 0x95c   : > { %43177 = vmatmul.mubr.f32.vlgmr.msra.gmra.mrb[8].mxu0 %v49602_v33  ;;  %54189 = vst [vmem:[#allocation9_spill] sm:$0xff] %v49691_v37 }
 0x95d   : > { %44757 = vmatpush3.bf16.msra.mxu0 %v44754_v28  ;;  %43183 = vmatprep.mubr.f32.mxu0 %v49540_v24 }
 0x95e   : > { %44759 = vmatprep.subr.bf16.mxu0 %v44758_v8 }
 0x95f   : > { %v49689_v61 = vpop.permute.xlu1 %26034  ;;  %v49698_v1 = vpop.permute.xlu0 %27107 }
 0x960   : > { %54188 = vst [vmem:[#allocation8_spill] sm:$0xff] %v49689_v61  ;;  %54191 = vst [vmem:[#allocation11_spill] sm:$0xff] %v49698_v1 }
 0x963   : > { %v49695_v2 = vpop.permute.xlu1 %27117  ;;  %v49702_v52 = vpop.permute.xlu0 %28188 }
 0x964   : > { %43184 = vmatmul.mubr.f32.vlgmr.msra.gmra.mrb[8].mxu0 %v49553_v41  ;;  %54190 = vst [vmem:[#allocation10_spill] sm:$0xff] %v49695_v2  ;;  %54193 = vst [vmem:[#allocation13_spill] sm:$0xff] %v49702_v52 }
 0x965   : > { %44761 = vmatpush3.bf16.msra.mxu0 %v44758_v8  ;;  %43190 = vmatprep.mubr.f32.mxu0 %v49551_v51  ;;  %v19574_v51 = vld [vmem:[%s53923_s7] sm:$0xff] }
 0x966   : > { %44763 = vmatprep.subr.bf16.mxu0 %v49660_v22  ;;  %v20662_v31 = vsel %vm9860_vm13, %v19574_v51, 0  ;;  %v20669_v51 = vand.u32 4294901760, %v49423_v39 }
 0x967   : > { %v49700_v33 = vpop.permute.xlu1 %27111  ;;  %v49714_v8 = vpop.permute.xlu0 %28194  ;;  %v49725_v63 = vand.u32 4294901760, %v20662_v31 }
 0x968   : > { %54192 = vst [vmem:[#allocation12_spill] sm:$0xff] %v49700_v33  ;;  %54195 = vst [vmem:[#allocation15_spill] sm:$0xff] %v49714_v8  ;;  %v49748_v5 = vsub.f32 %v49423_v39, %v20669_v51 }
 0x969   : > { %v49743_v25 = vsub.f32 %v20662_v31, %v49725_v63  ;;  %v54199_v31 = vand.u32 4294901760, %v49723_v21 }
 0x96b   : > { %v49712_v28 = vpop.permute.xlu1 %27113  ;;  %v49739_v42 = vpop.permute.xlu0 %28186  ;;  %v49764_v39 = vand.u32 4294901760, %v49743_v25 }
 0x96c   : > { %43191 = vmatmul.mubr.f32.vlgmr.msra.gmra.mrb[8].mxu0 %v49567_v13  ;;  %54194 = vst [vmem:[#allocation14_spill] sm:$0xff] %v49712_v28  ;;  %v20667_v13 = vand.u32 4294901760, %v49409_v7  ;;  %54197 = vst [vmem:[#allocation17_spill] sm:$0xff] %v49739_v42 }
 0x96d   : > { %44765 = vmatpush3.bf16.msra.mxu0 %v49660_v22  ;;  %43197 = vmatprep.mubr.f32.mxu0 %v49564_v54  ;;  %v20673_v54 = vand.u32 4294901760, %v49439_v43 }
 0x96e   : > { %44767 = vmatprep.subr.bf16.mxu0 %v44766_v35  ;;  %v49732_v58 = vsub.f32 %v49409_v7, %v20667_v13  ;;  %v49756_v42 = vpack.c.bf16 %v20671_v34, %v20667_v13  ;;  %v49767_v7 = vsub.f32 %v20665_v59, %v49745_v6  ;;  %v54200_v34 = vsub.s32 0, %v48273_v55 }
 0x96f   : > { %v49735_v14 = vsub.f32 %v49439_v43, %v20673_v54  ;;  %v29328_v43 = vld [vmem:[%s53918_s2] sm:$0x7]  ;;  %v44776_v33 = vpack.c.bf16 %v20673_v54, %v20669_v51 }
 0x970   : > { %v29343_v13 = vrot.slane %v29328_v43, %v54200_v34  ;;  %v54204_v59 = vand.u32 4294901760, %v49732_v58  ;;  %v20739_v34 = vsub.f32 %v49743_v25, %v49764_v39 }
 0x972   : > { %v49799_v61 = vand.u32 4294901760, %v20739_v34  ;;  %v21211_v34 = vand.u32 4294901760, %v49427_v20 }
 0x974   : > { %43198 = vmatmul.mubr.f32.vlgmr.msra.gmra.mrb[8].mxu0 %v49580_v4  ;;  %v49737_v4 = vpop.permute.xlu1 %28196 }
 0x975   : > { %44769 = vmatpush3.bf16.msra.mxu0 %v44766_v35  ;;  %43204 = vmatprep.mubr.f32.mxu0 %v49540_v24  ;;  %54196 = vst [vmem:[#allocation16_spill] sm:$0xff] %v49737_v4  ;;  %v20773_v4 = vsub.f32 %v49723_v21, %v54199_v31  ;;  %v54202_v31 = vsub.s32 2, %v48273_v55 }
 0x976   : > { %44771 = vmatprep.subr.bf16.mxu0 %v49660_v22 }
 0x977   : > { %v29351_v1 = vrot.slane %v29328_v43, %v54202_v31  ;;  %v20774_v37 = vand.u32 4294901760, %v20773_v4 }
 0x978   : > { %v49778_v28 = vpop.permute.xlu1 %28190 }
 0x979   : > { %54203 = vst [vmem:[#allocation19_spill] sm:$0xff] %v49778_v28 }
 0x97c   : > { %43205 = vmatmul.mubr.f32.vlgmr.msra.gmra.mrb[8].mxu0 %v49553_v41  ;;  %v49758_v35 = vpop.permute.xlu0 %29266  ;;  %v49796_v4 = vpop.permute.xlu1 %28192 }
 0x97d   : > { %54198 = vst [vmem:[#allocation18_spill] sm:$0xff] %v49758_v35  ;;  %44773 = vmatpush3.bf16.msra.mxu0 %v49660_v22  ;;  %43211 = vmatprep.mubr.f32.mxu0 %v49540_v24  ;;  %v54201_v35 = vsub.s32 1, %v48273_v55  ;;  %v20761_v22 = vsub.f32 %v49732_v58, %v54204_v59  ;;  %v54205_v24 = vand.u32 4294901760, %v49735_v14  ;;  %v49790_v55 = vand.u32 4294901760, %v49767_v7 }
 0x97e   : > { %44775 = vmatprep.subr.bf16.mxu0 %v49756_v42 }
 0x97f   : > { %v29347_v52 = vrot.slane %v29328_v43, %v54201_v35  ;;  %v20779_v8 = vsub.f32 %v49735_v14, %v54205_v24  ;;  %v54206_v43 = vand.u32 4294901760, %v49748_v5  ;;  %v20762_v59 = vand.u32 4294901760, %v20761_v22 }
 0x980   : > { %v29332_v35 = vpop.permute.xlu0 %29331 }
 0x981   : > { %v20767_v31 = vsub.f32 %v49748_v5, %v54206_v43  ;;  %v29355_v28 = vmul.f32 %v29343_v13, %v29332_v35  ;;  %v29356_v2 = vmul.f32 %v29347_v52, %v29332_v35  ;;  %v29357_v46 = vmul.f32 %v29351_v1, %v29332_v35 }
 0x982   : > { %v20780_v36 = vand.u32 4294901760, %v20779_v8  ;;  %v44778_v24 = vpack.c.bf16 %v20774_v37, %v20762_v59  ;;  %v20750_v43 = vsub.f32 %v49767_v7, %v49790_v55  ;;  %v21208_v35 = vand.u32 4294901760, %v49433_v18 }
 0x983   : > { %29361 = vst [vmem:[#allocation2] sm:$0xff] %v29355_v28  ;;  %29362 = vst [vmem:[#allocation2 + $0x8] sm:$0xff] %v29356_v2  ;;  %v20768_v22 = vand.u32 4294901760, %v20767_v31  ;;  %v54209_v31 = vand.u32 4294901760, %v49748_v5  ;;  %v54210_v59 = vand.u32 4294901760, %v49735_v14 }
 0x984   : > { %29363 = vst.msk [vmem:[#allocation2 + $0x10] sm:$0xff] %vm463_vm9, %v29357_v46  ;;  %43212 = vmatmul.mubr.f32.vlgmr.msra.gmra.mrb[8].mxu0 %v49553_v41  ;;  %v44782_v46 = vpack.c.bf16 %v49723_v21, %v49732_v58  ;;  %v20751_v41 = vand.u32 4294901760, %v20750_v43 }
 0x985   : > { %44777 = vmatpush1.bf16.msra.mxu0 %v44776_v33  ;;  %20735 = vmatprep.mubr.f32.mxu0 %v49374_v60  ;;  %v44780_v8 = vpack.c.bf16 %v20780_v36, %v20768_v22  ;;  %v44784_v36 = vpack.c.bf16 %v49735_v14, %v49748_v5  ;;  %v44798_v14 = vpack.c.bf16 %v21211_v34, %v21208_v35 }
 0x986   : > { %44779 = vmatprep.subr.bf16.mxu0 %v44778_v24  ;;  %v21296_v24 = vsub.f32 %v49433_v18, %v21208_v35 }
 0x988   : > { %v49804_v28 = vpop.permute.xlu1 %29271  ;;  %20741 = vmatmul.mubr.f32.vlgmr.msra.gmra.mrb[4].mxu0 %v49799_v61  ;;  %v21297_v5 = vand.u32 4294901760, %v21296_v24 }
 0x989   : > { %44781 = vmatpush1.bf16.msra.mxu0 %v44780_v8  ;;  %20746 = vmatprep.mubr.f32.mxu0 %v49374_v60 }
 0x98a   : > { %44783 = vmatprep.subr.bf16.mxu0 %v44782_v46 }
 0x98c   : > { %v29337_v37 = vpop.permute.xlu1 %29336  ;;  %20752 = vmatmul.mubr.f32.gmra.mrb[6].mxu0 %v20751_v41 }
 0x98d   : > { %v29358_v2 = vmul.f32 %v29343_v13, %v29337_v37  ;;  %v29359_v54 = vmul.f32 %v29347_v52, %v29337_v37  ;;  %v29360_v51 = vmul.f32 %v29351_v1, %v29337_v37  ;;  %20842 = vmatprep.mubr.f32.mxu0 %v49374_v60  ;;  %v54207_v1 = vand.u32 4294901760, %v49732_v58 }
 0x98e   : > { %v54208_v52 = vand.u32 4294901760, %v49723_v21  ;;  %v44792_v58 = vpack.c.bf16 %v54210_v59, %v54209_v31  ;;  %v21303_v21 = vsub.f32 %v49427_v20, %v21211_v34  ;;  %v21298_v20 = vsub.f32 %v21296_v24, %v21297_v5 }
 0x98f   : > { %29364 = vst [vmem:[#allocation2 + $0x18] sm:$0xff] %v29358_v2  ;;  %29365 = vst [vmem:[#allocation2 + $0x20] sm:$0xff] %v29359_v54  ;;  %v21725_v37 = vsel %vm2529_vm2, %v49546_v48, %v49597_v16 }
 0x990   : > { %29366 = vst.msk [vmem:[#allocation2 + $0x28] sm:$0xff] %vm463_vm9, %v29360_v51  ;;  %20844 = vmatmul.mubr.f32.vlgmr.msra.gmra.mrb[4].mxu0 %v49725_v63  ;;  %v44790_v13 = vpack.c.bf16 %v54208_v52, %v54207_v1  ;;  %v21304_v43 = vand.u32 4294901760, %v21303_v21  ;;  %v21299_v18 = vand.u32 4294901760, %v21298_v20  ;;  %v41502_v51 = vld [vmem:[%s53923_s7 + $0x28] sm:$0xff] }
 0x991   : > { %44785 = vmatpush1.bf16.msra.mxu0 %v44784_v36  ;;  %20849 = vmatprep.mubr.f32.mxu0 %v49374_v60 }
 0x992   : > { %44787 = vmatprep.subr.bf16.mxu0 %v49756_v42  ;;  %v21305_v22 = vsub.f32 %v21303_v21, %v21304_v43  ;;  %v44814_v46 = vpack.c.bf16 %v21304_v43, %v21297_v5 }
 0x994   : > { %20851 = vmatmul.mubr.f32.gmra.mrb[6].mxu0 %v49745_v6 }
 0x995   : > { %20929 = vmatprep.mubr.f32.mxu0 %v49374_v60 }
 0x998   : > { %20932 = vmatmul.mubr.f32.vlgmr.msra.gmra.mrb[4].mxu0 %v49743_v25 }
 0x999   : > { %44789 = vmatpush1.bf16.msra.mxu0 %v44776_v33  ;;  %20937 = vmatprep.mubr.f32.mxu0 %v49374_v60 }
 0x99a   : > { %44791 = vmatprep.subr.bf16.mxu0 %v44790_v13 }
 0x99c   : > { %20940 = vmatmul.mubr.f32.gmra.mrb[6].mxu0 %v49767_v7 }
 0x99d   : > { %21014 = vmatprep.mubr.f32.mxu0 %v49374_v60 }
 0x9a0   : > { %21018 = vmatmul.mubr.f32.vlgmr.msra.gmra.mrb[4].mxu0 %v49764_v39 }
 0x9a1   : > { %44793 = vmatpush1.bf16.msra.mxu0 %v44792_v58  ;;  %21023 = vmatprep.mubr.f32.mxu0 %v49374_v60 }
 0x9a2   : > { %44795 = vmatprep.subr.bf16.mxu0 %v49756_v42  ;;  %v21306_v42 = vand.u32 4294901760, %v21305_v22 }
 0x9a4   : > { %21027 = vmatmul.mubr.f32.gmra.mrb[6].mxu0 %v49790_v55  ;;  %v44802_v8 = vpack.c.bf16 %v21306_v42, %v21299_v18 }
 0x9a5   : > { %21109 = vmatprep.mubr.f32.mxu0 %v49374_v60 }
 0x9a8   : > { %21111 = vmatmul.mubr.f32.vlgmr.msra.gmra.mrb[4].mxu0 %v49725_v63 }
 0x9a9   : > { %44797 = vmatpush1.bf16.msra.mxu0 %v44776_v33  ;;  %21116 = vmatprep.mubr.f32.mxu0 %v49374_v60  ;;  %v44806_v33 = vpack.c.bf16 %v21303_v21, %v21296_v24 }
 0x9aa   : > { %44799 = vmatprep.subr.bf16.mxu0 %v44798_v14 }
 0x9ac   : > { %21118 = vmatmul.mubr.f32.gmra.mrb[6].mxu0 %v49745_v6 }
 0x9ad   : > { %21192 = vmatprep.mubr.f32.mxu0 %v49374_v60 }
 0x9b0   : > { %21194 = vmatmul.mubr.f32.vlgmr.msra.gmra.mrb[4].mxu0 %v49725_v63 }
 0x9b1   : > { %44801 = vmatpush3.bf16.msra.mxu0 %v44798_v14  ;;  %21199 = vmatprep.mubr.f32.mxu0 %v49374_v60 }
 0x9b2   : > { %44803 = vmatprep.subr.bf16.mxu0 %v44802_v8 }
 0x9b4   : > { %21201 = vmatmul.mubr.f32.gmra.mrb[6].mxu0 %v49745_v6 }
 0x9b5   : > { %43218 = vmatprep.mubr.f32.mxu0 %v49799_v61  ;;  %v41501_v61 = vld [vmem:[%s53923_s7 + $0x20] sm:$0xff] }
 0x9b6   : > { %v21735_v2 = vsel %vm9860_vm13, %v41501_v61, 0 }
 0x9b7   : > { %v49873_v52 = vand.u32 4294901760, %v21735_v2 }
 0x9b8   : > { %43219 = vmatmul.mubr.f32.vlgmr.msra.gmra.mrb[8].mxu0 %v20751_v41  ;;  %v21740_v41 = vand.u32 4294901760, %v21725_v37 }
 0x9b9   : > { %44805 = vmatpush3.bf16.msra.mxu0 %v44802_v8  ;;  %43225 = vmatprep.mubr.f32.mxu0 %v49725_v63 }
 0x9ba   : > { %44807 = vmatprep.subr.bf16.mxu0 %v44806_v33  ;;  %v21832_v1 = vsub.f32 %v21725_v37, %v21740_v41 }
 0x9c0   : > { %43226 = vmatmul.mubr.f32.vlgmr.msra.gmra.mrb[8].mxu0 %v49745_v6 }
 0x9c1   : > { %44809 = vmatpush3.bf16.msra.mxu0 %v44806_v33  ;;  %43232 = vmatprep.mubr.f32.mxu0 %v49743_v25  ;;  %v21727_v25 = vsel %vm2529_vm2, %v49559_v44, %v49587_v50 }
 0x9c2   : > { %44811 = vmatprep.subr.bf16.mxu0 %v44798_v14  ;;  %v21744_v54 = vand.u32 4294901760, %v21727_v25 }
 0x9c4   : > { %v44822_v58 = vpack.c.bf16 %v21744_v54, %v21740_v41 }
 0x9c8   : > { %43233 = vmatmul.mubr.f32.vlgmr.msra.gmra.mrb[8].mxu0 %v49767_v7  ;;  %v21726_v7 = vsel %vm2529_vm2, %v49605_v29, %v49559_v44  ;;  %v21738_v44 = vsel %vm9860_vm13, %v41502_v51, 0  ;;  %v21844_v29 = vsub.f32 %v21727_v25, %v21744_v54 }
 0x9c9   : > { %44813 = vmatpush3.bf16.msra.mxu0 %v44798_v14  ;;  %43239 = vmatprep.mubr.f32.mxu0 %v49764_v39  ;;  %v21724_v39 = vsel %vm2529_vm2, %v49574_v56, %v49546_v48  ;;  %v21746_v36 = vand.u32 4294901760, %v21726_v7  ;;  %v21833_v48 = vand.u32 4294901760, %v21832_v1  ;;  %v49878_v56 = vsub.f32 %v21735_v2, %v49873_v52 }
 0x9ca   : > { %44815 = vmatprep.subr.bf16.mxu0 %v44814_v46  ;;  %v21742_v13 = vand.u32 4294901760, %v21724_v39  ;;  %v49880_v35 = vand.u32 4294901760, %v21738_v44  ;;  %v44830_v2 = vpack.c.bf16 %v21844_v29, %v21832_v1 }
 0x9cb   : > { %v21850_v34 = vsub.f32 %v21726_v7, %v21746_v36  ;;  %v21834_v21 = vsub.f32 %v21832_v1, %v21833_v48  ;;  %v49884_v24 = vand.u32 4294901760, %v49878_v56 }
 0x9cc   : > { %v21838_v31 = vsub.f32 %v21724_v39, %v21742_v13  ;;  %v49887_v43 = vsub.f32 %v21738_v44, %v49880_v35  ;;  %v44824_v37 = vpack.c.bf16 %v21746_v36, %v21742_v13  ;;  %v49904_v39 = vld [vmem:[#allocation2 + $0x30] sm:$0xff]  ;;  %v22281_v36 = vand.u32 4294901760, %v49597_v16 }
 0x9cd   : > { %v21851_v59 = vand.u32 4294901760, %v21850_v34  ;;  %v21835_v42 = vand.u32 4294901760, %v21834_v21  ;;  %v21812_v18 = vsub.f32 %v49878_v56, %v49884_v24 }
 0x9ce   : > { %v21839_v5 = vand.u32 4294901760, %v21838_v31  ;;  %v49893_v8 = vand.u32 4294901760, %v49887_v43  ;;  %v22369_v13 = vsub.f32 %v49597_v16, %v22281_v36 }
 0x9cf   : > { %v21852_v20 = vsub.f32 %v21850_v34, %v21851_v59 }
 0x9d0   : > { %43240 = vmatmul.mubr.f32.vlgmr.msra.gmra.mrb[8].mxu0 %v49790_v55  ;;  %v21845_v55 = vand.u32 4294901760, %v21844_v29  ;;  %v21840_v33 = vsub.f32 %v21838_v31, %v21839_v5  ;;  %v44840_v1 = vpack.c.bf16 %v21851_v59, %v21839_v5  ;;  %v22804_v5 = vsel %vm3559_vm3, %v49589_v23, %v49620_v49 }
 0x9d1   : > { %44817 = vmatpush3.bf16.msra.mxu0 %v44814_v46  ;;  %43246 = vmatprep.mubr.f32.mxu0 %v49725_v63  ;;  %v21853_v61 = vand.u32 4294901760, %v21852_v20  ;;  %v22819_v20 = vand.u32 4294901760, %v22804_v5 }
 0x9d2   : > { %44819 = vmatprep.subr.bf16.mxu0 %v44798_v14  ;;  %v21846_v22 = vsub.f32 %v21844_v29, %v21845_v55  ;;  %v21841_v7 = vand.u32 4294901760, %v21840_v33  ;;  %v44838_v51 = vpack.c.bf16 %v21845_v55, %v21833_v48  ;;  %v22370_v29 = vand.u32 4294901760, %v22369_v13  ;;  %v41504_v33 = vld [vmem:[%s53923_s7 + $0x38] sm:$0xff] }
 0x9d4   : > { %v21847_v46 = vand.u32 4294901760, %v21846_v22  ;;  %v44828_v41 = vpack.c.bf16 %v21853_v61, %v21841_v7  ;;  %v41503_v22 = vld [vmem:[%s53923_s7 + $0x30] sm:$0xff] }
 0x9d6   : > { %v44826_v25 = vpack.c.bf16 %v21847_v46, %v21835_v42  ;;  %v22814_v42 = vsel %vm9860_vm13, %v41503_v22, 0 }
 0x9d7   : > { %v49957_v61 = vand.u32 4294901760, %v22814_v42 }
 0x9d8   : > { %43247 = vmatmul.mubr.f32.vlgmr.msra.gmra.mrb[8].mxu0 %v49745_v6 }
 0x9d9   : > { %44821 = vmatpush3.bf16.msra.mxu0 %v44798_v14  ;;  %43253 = vmatprep.mubr.f32.mxu0 %v49725_v63  ;;  %v21813_v14 = vand.u32 4294901760, %v21812_v18  ;;  %v21823_v63 = vsub.f32 %v49887_v43, %v49893_v8 }
 0x9da   : > { %44823 = vmatprep.subr.bf16.mxu0 %v44822_v58 }
 0x9db   : > { %v21824_v54 = vand.u32 4294901760, %v21823_v63 }
 0x9e0   : > { %43254 = vmatmul.mubr.f32.vlgmr.msra.gmra.mrb[8].mxu0 %v49745_v6  ;;  %v44832_v6 = vpack.c.bf16 %v21850_v34, %v21838_v31  ;;  %v22371_v31 = vsub.f32 %v22369_v13, %v22370_v29 }
 0x9e1   : > { %44825 = vmatpush1.bf16.msra.mxu0 %v44824_v37  ;;  %21808 = vmatprep.mubr.f32.mxu0 %v49374_v60 }
 0x9e2   : > { %44827 = vmatprep.subr.bf16.mxu0 %v44826_v25 }
 0x9e4   : > { %21814 = vmatmul.mubr.f32.vlgmr.msra.gmra.mrb[4].mxu0 %v21813_v14 }
 0x9e5   : > { %44829 = vmatpush1.bf16.msra.mxu0 %v44828_v41  ;;  %21819 = vmatprep.mubr.f32.mxu0 %v49374_v60 }
 0x9e6   : > { %44831 = vmatprep.subr.bf16.mxu0 %v44830_v2 }
 0x9e8   : > { %21825 = vmatmul.mubr.f32.gmra.mrb[6].mxu0 %v21824_v54 }
 0x9e9   : > { %21915 = vmatprep.mubr.f32.mxu0 %v49374_v60 }
 0x9ec   : > { %21917 = vmatmul.mubr.f32.vlgmr.msra.gmra.mrb[4].mxu0 %v49873_v52 }
 0x9ed   : > { %44833 = vmatpush1.bf16.msra.mxu0 %v44832_v6  ;;  %21922 = vmatprep.mubr.f32.mxu0 %v49374_v60  ;;  %v22284_v60 = vand.u32 4294901760, %v49587_v50 }
 0x9ee   : > { %44835 = vmatprep.subr.bf16.mxu0 %v44822_v58 }
 0x9ef   : > { %v22376_v44 = vsub.f32 %v49587_v50, %v22284_v60  ;;  %v49919_v48 = vpack.c.bf16 %v22284_v60, %v22281_v36  ;;  %v22372_v50 = vand.u32 4294901760, %v22371_v31 }
 0x9f0   : > { %21924 = vmatmul.mubr.f32.gmra.mrb[6].mxu0 %v49880_v35 }
 0x9f1   : > { %22002 = vmatprep.mubr.f32.mxu0 %v49904_v39  ;;  %v22377_v34 = vand.u32 4294901760, %v22376_v44 }
 0x9f3   : > { %v22378_v16 = vsub.f32 %v22376_v44, %v22377_v34  ;;  %v44862_v21 = vpack.c.bf16 %v22377_v34, %v22370_v29 }
 0x9f4   : > { %22005 = vmatmul.mubr.f32.vlgmr.msra.gmra.mrb[4].mxu0 %v49878_v56 }
 0x9f5   : > { %44837 = vmatpush1.bf16.msra.mxu0 %v44824_v37  ;;  %22010 = vmatprep.mubr.f32.mxu0 %v49904_v39  ;;  %v22379_v55 = vand.u32 4294901760, %v22378_v16 }
 0x9f6   : > { %44839 = vmatprep.subr.bf16.mxu0 %v44838_v51 }
 0x9f7   : > { %v44850_v59 = vpack.c.bf16 %v22379_v55, %v22372_v50 }
 0x9f8   : > { %22013 = vmatmul.mubr.f32.gmra.mrb[6].mxu0 %v49887_v43 }
 0x9f9   : > { %22087 = vmatprep.mubr.f32.mxu0 %v49904_v39 }
 0x9fc   : > { %22091 = vmatmul.mubr.f32.vlgmr.msra.gmra.mrb[4].mxu0 %v49884_v24 }
 0x9fd   : > { %44841 = vmatpush1.bf16.msra.mxu0 %v44840_v1  ;;  %22096 = vmatprep.mubr.f32.mxu0 %v49904_v39 }
 0x9fe   : > { %44843 = vmatprep.subr.bf16.mxu0 %v44822_v58  ;;  %v44854_v58 = vpack.c.bf16 %v22376_v44, %v22369_v13 }
 0xa00   : > { %22100 = vmatmul.mubr.f32.gmra.mrb[6].mxu0 %v49893_v8 }
 0xa01   : > { %22182 = vmatprep.mubr.f32.mxu0 %v49904_v39 }
 0xa04   : > { %22184 = vmatmul.mubr.f32.vlgmr.msra.gmra.mrb[4].mxu0 %v49873_v52 }
 0xa05   : > { %44845 = vmatpush1.bf16.msra.mxu0 %v44824_v37  ;;  %22189 = vmatprep.mubr.f32.mxu0 %v49904_v39  ;;  %v22911_v37 = vsub.f32 %v22804_v5, %v22819_v20 }
 0xa06   : > { %44847 = vmatprep.subr.bf16.mxu0 %v49919_v48 }
 0xa08   : > { %22191 = vmatmul.mubr.f32.gmra.mrb[6].mxu0 %v49880_v35 }
 0xa09   : > { %22265 = vmatprep.mubr.f32.mxu0 %v49904_v39 }
 0xa0c   : > { %22267 = vmatmul.mubr.f32.vlgmr.msra.gmra.mrb[4].mxu0 %v49873_v52 }
 0xa0d   : > { %44849 = vmatpush3.bf16.msra.mxu0 %v49919_v48  ;;  %22272 = vmatprep.mubr.f32.mxu0 %v49904_v39 }
 0xa0e   : > { %44851 = vmatprep.subr.bf16.mxu0 %v44850_v59 }
 0xa10   : > { %22274 = vmatmul.mubr.f32.gmra.mrb[6].mxu0 %v49880_v35 }
 0xa11   : > { %43260 = vmatprep.mubr.f32.mxu0 %v21813_v14  ;;  %v49963_v14 = vsub.f32 %v22814_v42, %v49957_v61 }
 0xa13   : > { %v49969_v6 = vand.u32 4294901760, %v49963_v14 }
 0xa14   : > { %43261 = vmatmul.mubr.f32.vlgmr.msra.gmra.mrb[8].mxu0 %v21824_v54 }
 0xa15   : > { %44853 = vmatpush3.bf16.msra.mxu0 %v44850_v59  ;;  %43267 = vmatprep.mubr.f32.mxu0 %v49873_v52  ;;  %v22891_v44 = vsub.f32 %v49963_v14, %v49969_v6 }
 0xa16   : > { %44855 = vmatprep.subr.bf16.mxu0 %v44854_v58 }
 0xa1c   : > { %43268 = vmatmul.mubr.f32.vlgmr.msra.gmra.mrb[8].mxu0 %v49880_v35 }
 0xa1d   : > { %44857 = vmatpush3.bf16.msra.mxu0 %v44854_v58  ;;  %43274 = vmatprep.mubr.f32.mxu0 %v49878_v56  ;;  %v22806_v56 = vsel %vm3559_vm3, %v49599_v27, %v49613_v40 }
 0xa1e   : > { %44859 = vmatprep.subr.bf16.mxu0 %v49919_v48  ;;  %v22823_v18 = vand.u32 4294901760, %v22806_v56 }
 0xa20   : > { %v44870_v2 = vpack.c.bf16 %v22823_v18, %v22819_v20 }
 0xa24   : > { %43275 = vmatmul.mubr.f32.vlgmr.msra.gmra.mrb[8].mxu0 %v49887_v43  ;;  %v22805_v43 = vsel %vm3559_vm3, %v49626_v57, %v49599_v27  ;;  %v22817_v27 = vsel %vm9860_vm13, %v41504_v33, 0  ;;  %v22923_v57 = vsub.f32 %v22806_v56, %v22823_v18  ;;  %v23360_v56 = vand.u32 4294901760, %v49620_v49 }
 0xa25   : > { %44861 = vmatpush3.bf16.msra.mxu0 %v49919_v48  ;;  %43281 = vmatprep.mubr.f32.mxu0 %v49884_v24  ;;  %v22803_v24 = vsel %vm3559_vm3, %v49607_v45, %v49589_v23  ;;  %v22825_v46 = vand.u32 4294901760, %v22805_v43  ;;  %v22912_v45 = vand.u32 4294901760, %v22911_v37  ;;  %v49965_v63 = vand.u32 4294901760, %v22817_v27 }
 0xa26   : > { %44863 = vmatprep.subr.bf16.mxu0 %v44862_v21  ;;  %v22821_v25 = vand.u32 4294901760, %v22803_v24  ;;  %v22924_v7 = vand.u32 4294901760, %v22923_v57  ;;  %v23448_v42 = vsub.f32 %v49620_v49, %v23360_v56 }
 0xa27   : > { %v22929_v23 = vsub.f32 %v22805_v43, %v22825_v46  ;;  %v22913_v54 = vsub.f32 %v22911_v37, %v22912_v45  ;;  %v49972_v51 = vsub.f32 %v22817_v27, %v49965_v63  ;;  %v23363_v43 = vand.u32 4294901760, %v49613_v40 }
 0xa28   : > { %v22925_v60 = vsub.f32 %v22923_v57, %v22924_v7  ;;  %v44872_v16 = vpack.c.bf16 %v22825_v46, %v22821_v25  ;;  %v44886_v22 = vpack.c.bf16 %v22924_v7, %v22912_v45  ;;  %v23883_v45 = vsel %vm4589_vm4, %v49615_v12, %v49641_v11 }
 0xa29   : > { %v22930_v41 = vand.u32 4294901760, %v22929_v23  ;;  %v22914_v13 = vand.u32 4294901760, %v22913_v54  ;;  %v49979_v29 = vand.u32 4294901760, %v49972_v51  ;;  %v23455_v18 = vsub.f32 %v49613_v40, %v23363_v43 }
 0xa2a   : > { %v22926_v31 = vand.u32 4294901760, %v22925_v60  ;;  %v50003_v46 = vpack.c.bf16 %v23363_v43, %v23360_v56  ;;  %v23884_v7 = vsel %vm4589_vm4, %v49650_v15, %v49622_v38 }
 0xa2b   : > { %v22931_v1 = vsub.f32 %v22929_v23, %v22930_v41  ;;  %v23456_v33 = vand.u32 4294901760, %v23455_v18 }
 0xa2c   : > { %43282 = vmatmul.mubr.f32.vlgmr.msra.gmra.mrb[8].mxu0 %v49893_v8  ;;  %v22917_v8 = vsub.f32 %v22803_v24, %v22821_v25  ;;  %v44874_v55 = vpack.c.bf16 %v22926_v31, %v22914_v13  ;;  %v23449_v24 = vand.u32 4294901760, %v23448_v42 }
 0xa2d   : > { %44865 = vmatpush3.bf16.msra.mxu0 %v44862_v21  ;;  %43288 = vmatprep.mubr.f32.mxu0 %v49873_v52  ;;  %v22932_v50 = vand.u32 4294901760, %v22931_v1  ;;  %v44878_v21 = vpack.c.bf16 %v22923_v57, %v22911_v37  ;;  %v23457_v49 = vsub.f32 %v23455_v18, %v23456_v33  ;;  %v44902_v57 = vpack.c.bf16 %v23455_v18, %v23448_v42 }
 0xa2e   : > { %44867 = vmatprep.subr.bf16.mxu0 %v49919_v48  ;;  %v22918_v36 = vand.u32 4294901760, %v22917_v8  ;;  %v23450_v37 = vsub.f32 %v23448_v42, %v23449_v24 }
 0xa2f   : > { %v23458_v25 = vand.u32 4294901760, %v23457_v49 }
 0xa30   : > { %v22919_v34 = vsub.f32 %v22917_v8, %v22918_v36  ;;  %v44888_v20 = vpack.c.bf16 %v22930_v41, %v22918_v36  ;;  %v23451_v40 = vand.u32 4294901760, %v23450_v37  ;;  %v23898_v41 = vand.u32 4294901760, %v23883_v45 }
 0xa31   : > { %v23904_v36 = vand.u32 4294901760, %v23884_v7 }
 0xa32   : > { %v22920_v59 = vand.u32 4294901760, %v22919_v34  ;;  %v44898_v27 = vpack.c.bf16 %v23458_v25, %v23451_v40  ;;  %v23990_v60 = vsub.f32 %v23883_v45, %v23898_v41  ;;  %v24439_v25 = vand.u32 4294901760, %v49641_v11 }
 0xa34   : > { %43289 = vmatmul.mubr.f32.vlgmr.msra.gmra.mrb[8].mxu0 %v49880_v35  ;;  %v44876_v58 = vpack.c.bf16 %v22932_v50, %v22920_v59 }
 0xa35   : > { %44869 = vmatpush3.bf16.msra.mxu0 %v49919_v48  ;;  %43295 = vmatprep.mubr.f32.mxu0 %v49873_v52  ;;  %v22892_v48 = vand.u32 4294901760, %v22891_v44  ;;  %v22902_v52 = vsub.f32 %v49972_v51, %v49979_v29 }
 0xa36   : > { %44871 = vmatprep.subr.bf16.mxu0 %v44870_v2 }
 0xa37   : > { %v22903_v5 = vand.u32 4294901760, %v22902_v52 }
 0xa3c   : > { %43296 = vmatmul.mubr.f32.vlgmr.msra.gmra.mrb[8].mxu0 %v49880_v35  ;;  %v44880_v35 = vpack.c.bf16 %v22929_v23, %v22917_v8  ;;  %v44910_v23 = vpack.c.bf16 %v23456_v33, %v23449_v24  ;;  %v41505_v8 = vld [vmem:[%s53923_s7 + $0x40] sm:$0xff] }
 0xa3d   : > { %44873 = vmatpush1.bf16.msra.mxu0 %v44872_v16  ;;  %22887 = vmatprep.mubr.f32.mxu0 %v49904_v39 }
 0xa3e   : > { %44875 = vmatprep.subr.bf16.mxu0 %v44874_v55 }
 0xa40   : > { %22893 = vmatmul.mubr.f32.vlgmr.msra.gmra.mrb[4].mxu0 %v22892_v48 }
 0xa41   : > { %44877 = vmatpush1.bf16.msra.mxu0 %v44876_v58  ;;  %22898 = vmatprep.mubr.f32.mxu0 %v49904_v39 }
 0xa42   : > { %44879 = vmatprep.subr.bf16.mxu0 %v44878_v21 }
 0xa44   : > { %22904 = vmatmul.mubr.f32.gmra.mrb[6].mxu0 %v22903_v5 }
 0xa45   : > { %22994 = vmatprep.mubr.f32.mxu0 %v49904_v39 }
 0xa48   : > { %22996 = vmatmul.mubr.f32.vlgmr.msra.gmra.mrb[4].mxu0 %v49957_v61 }
 0xa49   : > { %44881 = vmatpush1.bf16.msra.mxu0 %v44880_v35  ;;  %23001 = vmatprep.mubr.f32.mxu0 %v49904_v39 }
 0xa4a   : > { %44883 = vmatprep.subr.bf16.mxu0 %v44870_v2 }
 0xa4c   : > { %23003 = vmatmul.mubr.f32.gmra.mrb[6].mxu0 %v49965_v63 }
 0xa4d   : > { %23081 = vmatprep.mubr.f32.mxu0 %v49904_v39 }
 0xa50   : > { %23084 = vmatmul.mubr.f32.vlgmr.msra.gmra.mrb[4].mxu0 %v49963_v14 }
 0xa51   : > { %44885 = vmatpush1.bf16.msra.mxu0 %v44872_v16  ;;  %23089 = vmatprep.mubr.f32.mxu0 %v49904_v39 }
 0xa52   : > { %44887 = vmatprep.subr.bf16.mxu0 %v44886_v22 }
 0xa54   : > { %23092 = vmatmul.mubr.f32.gmra.mrb[6].mxu0 %v49972_v51 }
 0xa55   : > { %23166 = vmatprep.mubr.f32.mxu0 %v49904_v39 }
 0xa58   : > { %23170 = vmatmul.mubr.f32.vlgmr.msra.gmra.mrb[4].mxu0 %v49969_v6 }
 0xa59   : > { %44889 = vmatpush1.bf16.msra.mxu0 %v44888_v20  ;;  %23175 = vmatprep.mubr.f32.mxu0 %v49904_v39 }
 0xa5a   : > { %44891 = vmatprep.subr.bf16.mxu0 %v44870_v2  ;;  %v23893_v2 = vsel %vm9860_vm13, %v41505_v8, 0 }
 0xa5b   : > { %v50041_v1 = vand.u32 4294901760, %v23893_v2 }
 0xa5c   : > { %23179 = vmatmul.mubr.f32.gmra.mrb[6].mxu0 %v49979_v29 }
 0xa5d   : > { %23261 = vmatprep.mubr.f32.mxu0 %v49904_v39  ;;  %v50047_v44 = vsub.f32 %v23893_v2, %v50041_v1 }
 0xa60   : > { %23263 = vmatmul.mubr.f32.vlgmr.msra.gmra.mrb[4].mxu0 %v49957_v61 }
 0xa61   : > { %44893 = vmatpush1.bf16.msra.mxu0 %v44872_v16  ;;  %23268 = vmatprep.mubr.f32.mxu0 %v49904_v39 }
 0xa62   : > { %44895 = vmatprep.subr.bf16.mxu0 %v50003_v46 }
 0xa64   : > { %23270 = vmatmul.mubr.f32.gmra.mrb[6].mxu0 %v49965_v63 }
 0xa65   : > { %23344 = vmatprep.mubr.f32.mxu0 %v49904_v39 }
 0xa68   : > { %23346 = vmatmul.mubr.f32.vlgmr.msra.gmra.mrb[4].mxu0 %v49957_v61 }
 0xa69   : > { %44897 = vmatpush3.bf16.msra.mxu0 %v50003_v46  ;;  %23351 = vmatprep.mubr.f32.mxu0 %v49904_v39 }
 0xa6a   : > { %44899 = vmatprep.subr.bf16.mxu0 %v44898_v27 }
 0xa6c   : > { %23353 = vmatmul.mubr.f32.gmra.mrb[6].mxu0 %v49965_v63 }
 0xa6d   : > { %43302 = vmatprep.mubr.f32.mxu0 %v22892_v48  ;;  %v50053_v48 = vand.u32 4294901760, %v50047_v44 }
 0xa6f   : > { %v23970_v35 = vsub.f32 %v50047_v44, %v50053_v48 }
 0xa70   : > { %43303 = vmatmul.mubr.f32.vlgmr.msra.gmra.mrb[8].mxu0 %v22903_v5 }
 0xa71   : > { %44901 = vmatpush3.bf16.msra.mxu0 %v44898_v27  ;;  %43309 = vmatprep.mubr.f32.mxu0 %v49957_v61  ;;  %v23971_v24 = vand.u32 4294901760, %v23970_v35  ;;  %v24442_v27 = vand.u32 4294901760, %v49633_v17 }
 0xa72   : > { %44903 = vmatprep.subr.bf16.mxu0 %v44902_v57 }
 0xa73   : > { %v24534_v45 = vsub.f32 %v49633_v17, %v24442_v27 }
 0xa78   : > { %43310 = vmatmul.mubr.f32.vlgmr.msra.gmra.mrb[8].mxu0 %v49965_v63 }
 0xa79   : > { %44905 = vmatpush3.bf16.msra.mxu0 %v44902_v57  ;;  %43316 = vmatprep.mubr.f32.mxu0 %v49963_v14  ;;  %v23885_v14 = vsel %vm4589_vm4, %v49622_v38, %v49633_v17 }
 0xa7a   : > { %44907 = vmatprep.subr.bf16.mxu0 %v50003_v46  ;;  %v23902_v54 = vand.u32 4294901760, %v23885_v14 }
 0xa7c   : > { %v24002_v15 = vsub.f32 %v23885_v14, %v23902_v54  ;;  %v44918_v50 = vpack.c.bf16 %v23902_v54, %v23898_v41  ;;  %v24535_v14 = vand.u32 4294901760, %v24534_v45 }
 0xa7e   : > { %v24003_v31 = vand.u32 4294901760, %v24002_v15  ;;  %v44926_v37 = vpack.c.bf16 %v24002_v15, %v23990_v60 }
 0xa80   : > { %43317 = vmatmul.mubr.f32.vlgmr.msra.gmra.mrb[8].mxu0 %v49972_v51  ;;  %v41506_v51 = vld [vmem:[%s53923_s7 + $0x48] sm:$0xff]  ;;  %v24004_v58 = vsub.f32 %v24002_v15, %v24003_v31 }
 0xa81   : > { %44909 = vmatpush3.bf16.msra.mxu0 %v50003_v46  ;;  %43323 = vmatprep.mubr.f32.mxu0 %v49969_v6  ;;  %v23882_v6 = vsel %vm4589_vm4, %v49628_v10, %v49615_v12  ;;  %v23896_v38 = vsel %vm9860_vm13, %v41506_v51, 0  ;;  %v24008_v12 = vsub.f32 %v23884_v7, %v23904_v36  ;;  %v23991_v10 = vand.u32 4294901760, %v23990_v60 }
 0xa82   : > { %44911 = vmatprep.subr.bf16.mxu0 %v44910_v23  ;;  %v23900_v13 = vand.u32 4294901760, %v23882_v6  ;;  %v50049_v34 = vand.u32 4294901760, %v23896_v38  ;;  %v24005_v43 = vand.u32 4294901760, %v24004_v58  ;;  %v50087_v7 = vpack.c.bf16 %v24442_v27, %v24439_v25 }
 0xa83   : > { %v24009_v16 = vand.u32 4294901760, %v24008_v12  ;;  %v23992_v55 = vsub.f32 %v23990_v60, %v23991_v10  ;;  %v44934_v40 = vpack.c.bf16 %v24003_v31, %v23991_v10  ;;  %v41507_v60 = vld [vmem:[%s53923_s7 + $0x50] sm:$0xff] }
 0xa84   : > { %v50056_v52 = vsub.f32 %v23896_v38, %v50049_v34  ;;  %v44920_v20 = vpack.c.bf16 %v23904_v36, %v23900_v13  ;;  %v24962_v36 = vsel %vm5619_vm5, %v49635_v62, %v49666_v32  ;;  %v24963_v38 = vsel %vm5619_vm5, %v49672_v47, %v49643_v26 }
 0xa85   : > { %v24010_v21 = vsub.f32 %v24008_v12, %v24009_v16  ;;  %v23993_v5 = vand.u32 4294901760, %v23992_v55  ;;  %v24977_v15 = vand.u32 4294901760, %v24962_v36  ;;  %v24983_v31 = vand.u32 4294901760, %v24963_v38 }
 0xa86   : > { %v50063_v22 = vand.u32 4294901760, %v50056_v52 }
 0xa87   : > { %v24011_v42 = vand.u32 4294901760, %v24010_v21  ;;  %v44922_v18 = vpack.c.bf16 %v24005_v43, %v23993_v5 }
 0xa88   : > { %43324 = vmatmul.mubr.f32.vlgmr.msra.gmra.mrb[8].mxu0 %v49979_v29  ;;  %v23996_v29 = vsub.f32 %v23882_v6, %v23900_v13  ;;  %v24964_v13 = vsel %vm5619_vm5, %v49643_v26, %v49656_v53 }
 0xa89   : > { %44913 = vmatpush3.bf16.msra.mxu0 %v44910_v23  ;;  %43330 = vmatprep.mubr.f32.mxu0 %v49957_v61  ;;  %v24527_v23 = vsub.f32 %v49641_v11, %v24439_v25  ;;  %v24536_v11 = vsub.f32 %v24534_v45, %v24535_v14  ;;  %v24981_v10 = vand.u32 4294901760, %v24964_v13 }
 0xa8a   : > { %44915 = vmatprep.subr.bf16.mxu0 %v50003_v46  ;;  %v23997_v59 = vand.u32 4294901760, %v23996_v29 }
 0xa8b   : > { %v24528_v8 = vand.u32 4294901760, %v24527_v23  ;;  %v24537_v2 = vand.u32 4294901760, %v24536_v11  ;;  %v44950_v6 = vpack.c.bf16 %v24534_v45, %v24527_v23  ;;  %v25081_v47 = vsub.f32 %v24964_v13, %v24981_v10 }
 0xa8c   : > { %v23998_v56 = vsub.f32 %v23996_v29, %v23997_v59  ;;  %v44936_v57 = vpack.c.bf16 %v24009_v16, %v23997_v59  ;;  %v25069_v16 = vsub.f32 %v24962_v36, %v24977_v15  ;;  %v44966_v5 = vpack.c.bf16 %v24981_v10, %v24977_v15  ;;  %v41509_v15 = vld [vmem:[%s53923_s7 + $0x60] sm:$0xff] }
 0xa8d   : > { %v24529_v41 = vsub.f32 %v24527_v23, %v24528_v8  ;;  %v44958_v51 = vpack.c.bf16 %v24535_v14, %v24528_v8  ;;  %v25082_v58 = vand.u32 4294901760, %v25081_v47  ;;  %v25518_v8 = vand.u32 4294901760, %v49666_v32  ;;  %v54211_v10 = vld [vmem:[#allocation8_spill] sm:$0xff] }
 0xa8e   : > { %v23999_v33 = vand.u32 4294901760, %v23998_v56  ;;  %v25521_v14 = vand.u32 4294901760, %v49656_v53 }
 0xa8f   : > { %v24530_v17 = vand.u32 4294901760, %v24529_v41  ;;  %v25606_v41 = vsub.f32 %v49666_v32, %v25518_v8 }
 0xa90   : > { %43331 = vmatmul.mubr.f32.vlgmr.msra.gmra.mrb[8].mxu0 %v49965_v63  ;;  %v25613_v11 = vsub.f32 %v49656_v53, %v25521_v14 }
 0xa91   : > { %44917 = vmatpush3.bf16.msra.mxu0 %v50003_v46  ;;  %43337 = vmatprep.mubr.f32.mxu0 %v49957_v61  ;;  %v23981_v61 = vsub.f32 %v50056_v52, %v50063_v22  ;;  %v44924_v46 = vpack.c.bf16 %v24011_v42, %v23999_v33  ;;  %v44946_v54 = vpack.c.bf16 %v24537_v2, %v24530_v17  ;;  %v25607_v17 = vand.u32 4294901760, %v25606_v41 }
 0xa92   : > { %44919 = vmatprep.subr.bf16.mxu0 %v44918_v50  ;;  %v25614_v2 = vand.u32 4294901760, %v25613_v11 }
 0xa93   : > { %v23982_v49 = vand.u32 4294901760, %v23981_v61 }
 0xa94   : > { %v25615_v32 = vsub.f32 %v25613_v11, %v25614_v2  ;;  %v45006_v13 = vpack.c.bf16 %v25614_v2, %v25607_v17 }
 0xa98   : > { %43338 = vmatmul.mubr.f32.vlgmr.msra.gmra.mrb[8].mxu0 %v49965_v63  ;;  %v44928_v63 = vpack.c.bf16 %v24008_v12, %v23996_v29  ;;  %v24972_v12 = vsel %vm9860_vm13, %v41507_v60, 0  ;;  %v41508_v29 = vld [vmem:[%s53923_s7 + $0x58] sm:$0xff]  ;;  %v44998_v60 = vpack.c.bf16 %v25613_v11, %v25606_v41  ;;  %v26600_v11 = vand.u32 4294901760, %v49679_v0 }
 0xa99   : > { %44921 = vmatpush1.bf16.msra.mxu0 %v44920_v20  ;;  %23966 = vmatprep.mubr.f32.mxu0 %v49904_v39  ;;  %v24975_v26 = vsel %vm9860_vm13, %v41508_v29, 0 }
 0xa9a   : > { %44923 = vmatprep.subr.bf16.mxu0 %v44922_v18 }
 0xa9c   : > { %23972 = vmatmul.mubr.f32.vlgmr.msra.gmra.mrb[4].mxu0 %v23971_v24 }
 0xa9d   : > { %44925 = vmatpush1.bf16.msra.mxu0 %v44924_v46  ;;  %23977 = vmatprep.mubr.f32.mxu0 %v49904_v39 }
 0xa9e   : > { %44927 = vmatprep.subr.bf16.mxu0 %v44926_v37 }
 0xaa0   : > { %23983 = vmatmul.mubr.f32.gmra.mrb[6].mxu0 %v23982_v49 }
 0xaa1   : > { %24073 = vmatprep.mubr.f32.mxu0 %v49904_v39 }
 0xaa4   : > { %24075 = vmatmul.mubr.f32.vlgmr.msra.gmra.mrb[4].mxu0 %v50041_v1 }
 0xaa5   : > { %44929 = vmatpush1.bf16.msra.mxu0 %v44928_v63  ;;  %24080 = vmatprep.mubr.f32.mxu0 %v49904_v39 }
 0xaa6   : > { %44931 = vmatprep.subr.bf16.mxu0 %v44918_v50 }
 0xaa8   : > { %24082 = vmatmul.mubr.f32.gmra.mrb[6].mxu0 %v50049_v34 }
 0xaa9   : > { %24160 = vmatprep.mubr.f32.mxu0 %v49904_v39 }
 0xaac   : > { %24163 = vmatmul.mubr.f32.vlgmr.msra.gmra.mrb[4].mxu0 %v50047_v44 }
 0xaad   : > { %44933 = vmatpush1.bf16.msra.mxu0 %v44920_v20  ;;  %24168 = vmatprep.mubr.f32.mxu0 %v49904_v39 }
 0xaae   : > { %44935 = vmatprep.subr.bf16.mxu0 %v44934_v40 }
 0xab0   : > { %24171 = vmatmul.mubr.f32.gmra.mrb[6].mxu0 %v50056_v52 }
 0xab1   : > { %24245 = vmatprep.mubr.f32.mxu0 %v49904_v39 }
 0xab4   : > { %24249 = vmatmul.mubr.f32.vlgmr.msra.gmra.mrb[4].mxu0 %v50053_v48 }
 0xab5   : > { %44937 = vmatpush1.bf16.msra.mxu0 %v44936_v57  ;;  %24254 = vmatprep.mubr.f32.mxu0 %v49904_v39  ;;  %v44974_v57 = vpack.c.bf16 %v25081_v47, %v25069_v16 }
 0xab6   : > { %44939 = vmatprep.subr.bf16.mxu0 %v44918_v50  ;;  %v50125_v50 = vand.u32 4294901760, %v24972_v12 }
 0xab8   : > { %24258 = vmatmul.mubr.f32.gmra.mrb[6].mxu0 %v50063_v22 }
 0xab9   : > { %24340 = vmatprep.mubr.f32.mxu0 %v49904_v39 }
 0xabc   : > { %24342 = vmatmul.mubr.f32.vlgmr.msra.gmra.mrb[4].mxu0 %v50041_v1 }
 0xabd   : > { %44941 = vmatpush1.bf16.msra.mxu0 %v44920_v20  ;;  %24347 = vmatprep.mubr.f32.mxu0 %v49904_v39  ;;  %v25083_v20 = vsub.f32 %v25081_v47, %v25082_v58  ;;  %v41510_v47 = vld [vmem:[%s53923_s7 + $0x68] sm:$0xff] }
 0xabe   : > { %44943 = vmatprep.subr.bf16.mxu0 %v50087_v7 }
 0xabf   : > { %v25084_v46 = vand.u32 4294901760, %v25083_v20 }
 0xac0   : > { %24349 = vmatmul.mubr.f32.gmra.mrb[6].mxu0 %v50049_v34 }
 0xac1   : > { %24423 = vmatprep.mubr.f32.mxu0 %v49904_v39 }
 0xac4   : > { %24425 = vmatmul.mubr.f32.vlgmr.msra.gmra.mrb[4].mxu0 %v50041_v1 }
 0xac5   : > { %44945 = vmatpush3.bf16.msra.mxu0 %v50087_v7  ;;  %24430 = vmatprep.mubr.f32.mxu0 %v49904_v39 }
 0xac6   : > { %44947 = vmatprep.subr.bf16.mxu0 %v44946_v54 }
 0xac8   : > { %24432 = vmatmul.mubr.f32.gmra.mrb[6].mxu0 %v50049_v34 }
 0xac9   : > { %43344 = vmatprep.mubr.f32.mxu0 %v23971_v24 }
 0xacc   : > { %43345 = vmatmul.mubr.f32.vlgmr.msra.gmra.mrb[8].mxu0 %v23982_v49 }
 0xacd   : > { %44949 = vmatpush3.bf16.msra.mxu0 %v44946_v54  ;;  %43351 = vmatprep.mubr.f32.mxu0 %v50041_v1  ;;  %v50171_v54 = vpack.c.bf16 %v25521_v14, %v25518_v8 }
 0xace   : > { %44951 = vmatprep.subr.bf16.mxu0 %v44950_v6 }
 0xad4   : > { %43352 = vmatmul.mubr.f32.vlgmr.msra.gmra.mrb[8].mxu0 %v50049_v34 }
 0xad5   : > { %44953 = vmatpush3.bf16.msra.mxu0 %v44950_v6  ;;  %43358 = vmatprep.mubr.f32.mxu0 %v50047_v44  ;;  %v24961_v44 = vsel %vm5619_vm5, %v49652_v19, %v49635_v62  ;;  %v25087_v62 = vsub.f32 %v24963_v38, %v24983_v31  ;;  %v25070_v19 = vand.u32 4294901760, %v25069_v16  ;;  %v25608_v6 = vsub.f32 %v25606_v41, %v25607_v17 }
 0xad6   : > { %44955 = vmatprep.subr.bf16.mxu0 %v50087_v7  ;;  %v24979_v55 = vand.u32 4294901760, %v24961_v44  ;;  %v26041_v38 = vsel %vm6649_vm6, %v49658_v3, %v49685_v9  ;;  %v26597_v41 = vand.u32 4294901760, %v49685_v9 }
 0xad7   : > { %v25088_v21 = vand.u32 4294901760, %v25087_v62  ;;  %v25071_v35 = vsub.f32 %v25069_v16, %v25070_v19  ;;  %v44982_v45 = vpack.c.bf16 %v25082_v58, %v25070_v19  ;;  %v25609_v53 = vand.u32 4294901760, %v25608_v6 }
 0xad8   : > { %v25075_v59 = vsub.f32 %v24961_v44, %v24979_v55  ;;  %v44968_v37 = vpack.c.bf16 %v24983_v31, %v24979_v55  ;;  %v26042_v44 = vsel %vm6649_vm6, %v54211_v10, %v49668_v30  ;;  %v26056_v29 = vand.u32 4294901760, %v26041_v38  ;;  %v54212_v55 = vld [vmem:[#allocation6_spill] sm:$0xff] }
 0xad9   : > { %v25089_v42 = vsub.f32 %v25087_v62, %v25088_v21  ;;  %v25072_v18 = vand.u32 4294901760, %v25071_v35  ;;  %v26051_v31 = vsel %vm9860_vm13, %v41509_v15, 0  ;;  %v26685_v2 = vsub.f32 %v49685_v9, %v26597_v41  ;;  %v54213_v15 = vld [vmem:[#allocation12_spill] sm:$0xff] }
 0xada   : > { %v25076_v43 = vand.u32 4294901760, %v25075_v59  ;;  %v26148_v19 = vsub.f32 %v26041_v38, %v26056_v29 }
 0xadb   : > { %v25090_v49 = vand.u32 4294901760, %v25089_v42  ;;  %v44970_v63 = vpack.c.bf16 %v25084_v46, %v25072_v18  ;;  %v26686_v6 = vand.u32 4294901760, %v26685_v2 }
 0xadc   : > { %43359 = vmatmul.mubr.f32.vlgmr.msra.gmra.mrb[8].mxu0 %v50056_v52  ;;  %v50133_v52 = vand.u32 4294901760, %v24975_v26  ;;  %v25077_v33 = vsub.f32 %v25075_v59, %v25076_v43 }
 0xadd   : > { %44957 = vmatpush3.bf16.msra.mxu0 %v50087_v7  ;;  %43365 = vmatprep.mubr.f32.mxu0 %v50053_v48  ;;  %v50131_v48 = vsub.f32 %v24972_v12, %v50125_v50  ;;  %v26043_v12 = vsel %vm6649_vm6, %v49668_v30, %v49679_v0  ;;  %v26054_v30 = vsel %vm9860_vm13, %v41510_v47, 0 }
 0xade   : > { %44959 = vmatprep.subr.bf16.mxu0 %v44958_v51  ;;  %v50140_v56 = vsub.f32 %v24975_v26, %v50133_v52  ;;  %v25078_v25 = vand.u32 4294901760, %v25077_v33  ;;  %v26060_v16 = vand.u32 4294901760, %v26043_v12  ;;  %v26040_v26 = vsel %vm6649_vm6, %v54212_v55, %v49658_v3  ;;  %v54217_v55 = vld [vmem:[#allocation14_spill] sm:$0xff] }
 0xadf   : > { %v50217_v35 = vand.u32 4294901760, %v26054_v30 }
 0xae0   : > { %v50147_v61 = vand.u32 4294901760, %v50140_v56  ;;  %v44972_v27 = vpack.c.bf16 %v25090_v49, %v25078_v25  ;;  %v26160_v58 = vsub.f32 %v26043_v12, %v26060_v16  ;;  %v45014_v20 = vpack.c.bf16 %v26060_v16, %v26056_v29  ;;  %v54214_v12 = vld [vmem:[#allocation7_spill] sm:$0xff]  ;;  %v54215_v29 = vld [vmem:[#allocation10_spill] sm:$0xff] }
 0xae1   : > { %v27120_v10 = vsel %vm7679_vm7, %v54214_v12, %v54213_v15 }
 0xae2   : > { %v45022_v8 = vpack.c.bf16 %v26160_v58, %v26148_v19  ;;  %v27135_v47 = vand.u32 4294901760, %v27120_v10 }
 0xae4   : > { %43366 = vmatmul.mubr.f32.vlgmr.msra.gmra.mrb[8].mxu0 %v50063_v22  ;;  %v50137_v22 = vand.u32 4294901760, %v50131_v48 }
 0xae5   : > { %44961 = vmatpush3.bf16.msra.mxu0 %v44958_v51  ;;  %43372 = vmatprep.mubr.f32.mxu0 %v50041_v1  ;;  %v25616_v51 = vand.u32 4294901760, %v25615_v32 }
 0xae6   : > { %44963 = vmatprep.subr.bf16.mxu0 %v50087_v7  ;;  %v25049_v24 = vsub.f32 %v50131_v48, %v50137_v22 }
 0xae7   : > { %v44994_v36 = vpack.c.bf16 %v25616_v51, %v25609_v53  ;;  %v50255_v53 = vpack.c.bf16 %v26600_v11, %v26597_v41  ;;  %v26687_v51 = vsub.f32 %v26685_v2, %v26686_v6 }
 0xae8   : > { %v25050_v40 = vand.u32 4294901760, %v25049_v24  ;;  %v50224_v24 = vsub.f32 %v26054_v30, %v50217_v35 }
 0xaec   : > { %43373 = vmatmul.mubr.f32.vlgmr.msra.gmra.mrb[8].mxu0 %v50049_v34 }
 0xaed   : > { %44965 = vmatpush3.bf16.msra.mxu0 %v50087_v7  ;;  %43379 = vmatprep.mubr.f32.mxu0 %v50041_v1  ;;  %v25060_v1 = vsub.f32 %v50140_v56, %v50147_v61  ;;  %v44984_v7 = vpack.c.bf16 %v25088_v21, %v25076_v43  ;;  %v26149_v21 = vand.u32 4294901760, %v26148_v19 }
 0xaee   : > { %44967 = vmatprep.subr.bf16.mxu0 %v44966_v5 }
 0xaef   : > { %v25061_v23 = vand.u32 4294901760, %v25060_v1  ;;  %v26150_v42 = vsub.f32 %v26148_v19, %v26149_v21 }
 0xaf4   : > { %43380 = vmatmul.mubr.f32.vlgmr.msra.gmra.mrb[8].mxu0 %v50049_v34  ;;  %v44976_v34 = vpack.c.bf16 %v25087_v62, %v25075_v59  ;;  %v26062_v62 = vand.u32 4294901760, %v26042_v44  ;;  %v26058_v59 = vand.u32 4294901760, %v26040_v26 }
 0xaf5   : > { %44969 = vmatpush1.bf16.msra.mxu0 %v44968_v37  ;;  %25045 = vmatprep.mubr.f32.mxu0 %v49904_v39 }
 0xaf6   : > { %44971 = vmatprep.subr.bf16.mxu0 %v44970_v63  ;;  %v26166_v3 = vsub.f32 %v26042_v44, %v26062_v62  ;;  %v50231_v63 = vand.u32 4294901760, %v50224_v24  ;;  %v45016_v25 = vpack.c.bf16 %v26062_v62, %v26058_v59  ;;  %v41511_v44 = vld [vmem:[%s53923_s7 + $0x70] sm:$0xff] }
 0xaf7   : > { %v27130_v62 = vsel %vm9860_vm13, %v41511_v44, 0 }
 0xaf8   : > { %25051 = vmatmul.mubr.f32.vlgmr.msra.gmra.mrb[4].mxu0 %v25050_v40  ;;  %v26167_v43 = vand.u32 4294901760, %v26166_v3 }
 0xaf9   : > { %44973 = vmatpush1.bf16.msra.mxu0 %v44972_v27  ;;  %25056 = vmatprep.mubr.f32.mxu0 %v49904_v39 }
 0xafa   : > { %44975 = vmatprep.subr.bf16.mxu0 %v44974_v57  ;;  %v26168_v46 = vsub.f32 %v26166_v3, %v26167_v43 }
 0xafc   : > { %25062 = vmatmul.mubr.f32.gmra.mrb[6].mxu0 %v25061_v23  ;;  %v26169_v27 = vand.u32 4294901760, %v26168_v46 }
 0xafd   : > { %25152 = vmatprep.mubr.f32.mxu0 %v49904_v39 }
 0xb00   : > { %25154 = vmatmul.mubr.f32.vlgmr.msra.gmra.mrb[4].mxu0 %v50125_v50 }
 0xb01   : > { %44977 = vmatpush1.bf16.msra.mxu0 %v44976_v34  ;;  %25159 = vmatprep.mubr.f32.mxu0 %v49904_v39 }
 0xb02   : > { %44979 = vmatprep.subr.bf16.mxu0 %v44966_v5 }
 0xb04   : > { %25161 = vmatmul.mubr.f32.gmra.mrb[6].mxu0 %v50133_v52 }
 0xb05   : > { %25239 = vmatprep.mubr.f32.mxu0 %v49904_v39 }
 0xb08   : > { %25242 = vmatmul.mubr.f32.vlgmr.msra.gmra.mrb[4].mxu0 %v50131_v48 }
 0xb09   : > { %44981 = vmatpush1.bf16.msra.mxu0 %v44968_v37  ;;  %25247 = vmatprep.mubr.f32.mxu0 %v49904_v39 }
 0xb0a   : > { %44983 = vmatprep.subr.bf16.mxu0 %v44982_v45 }
 0xb0c   : > { %25250 = vmatmul.mubr.f32.gmra.mrb[6].mxu0 %v50140_v56 }
 0xb0d   : > { %25324 = vmatprep.mubr.f32.mxu0 %v49904_v39 }
 0xb10   : > { %25328 = vmatmul.mubr.f32.vlgmr.msra.gmra.mrb[4].mxu0 %v50137_v22 }
 0xb11   : > { %44985 = vmatpush1.bf16.msra.mxu0 %v44984_v7  ;;  %25333 = vmatprep.mubr.f32.mxu0 %v49904_v39 }
 0xb12   : > { %44987 = vmatprep.subr.bf16.mxu0 %v44966_v5 }
 0xb14   : > { %25337 = vmatmul.mubr.f32.gmra.mrb[6].mxu0 %v50147_v61 }
 0xb15   : > { %25419 = vmatprep.mubr.f32.mxu0 %v49904_v39 }
 0xb18   : > { %25421 = vmatmul.mubr.f32.vlgmr.msra.gmra.mrb[4].mxu0 %v50125_v50 }
 0xb19   : > { %44989 = vmatpush1.bf16.msra.mxu0 %v44968_v37  ;;  %25426 = vmatprep.mubr.f32.mxu0 %v49904_v39  ;;  %v26151_v37 = vand.u32 4294901760, %v26150_v42 }
 0xb1a   : > { %44991 = vmatprep.subr.bf16.mxu0 %v50171_v54 }
 0xb1c   : > { %25428 = vmatmul.mubr.f32.gmra.mrb[6].mxu0 %v50133_v52 }
 0xb1d   : > { %25502 = vmatprep.mubr.f32.mxu0 %v49904_v39 }
 0xb20   : > { %25504 = vmatmul.mubr.f32.vlgmr.msra.gmra.mrb[4].mxu0 %v50125_v50 }
 0xb21   : > { %44993 = vmatpush3.bf16.msra.mxu0 %v50171_v54  ;;  %25509 = vmatprep.mubr.f32.mxu0 %v49904_v39 }
 0xb22   : > { %44995 = vmatprep.subr.bf16.mxu0 %v44994_v36 }
 0xb24   : > { %25511 = vmatmul.mubr.f32.gmra.mrb[6].mxu0 %v50133_v52 }
 0xb25   : > { %43386 = vmatprep.mubr.f32.mxu0 %v25050_v40 }
 0xb28   : > { %43387 = vmatmul.mubr.f32.vlgmr.msra.gmra.mrb[8].mxu0 %v25061_v23 }
 0xb29   : > { %44997 = vmatpush3.bf16.msra.mxu0 %v44994_v36  ;;  %43393 = vmatprep.mubr.f32.mxu0 %v50125_v50 }
 0xb2a   : > { %44999 = vmatprep.subr.bf16.mxu0 %v44998_v60 }
 0xb30   : > { %43394 = vmatmul.mubr.f32.vlgmr.msra.gmra.mrb[8].mxu0 %v50133_v52 }
 0xb31   : > { %45001 = vmatpush3.bf16.msra.mxu0 %v44998_v60  ;;  %43400 = vmatprep.mubr.f32.mxu0 %v50131_v48  ;;  %v50209_v48 = vand.u32 4294901760, %v26051_v31 }
 0xb32   : > { %45003 = vmatprep.subr.bf16.mxu0 %v50171_v54 }
 0xb33   : > { %v50215_v5 = vsub.f32 %v26051_v31, %v50209_v48  ;;  %v54216_v31 = vld [vmem:[#allocation9_spill] sm:$0xff] }
 0xb34   : > { %v27122_v16 = vsel %vm7679_vm7, %v54216_v31, %v54215_v29 }
 0xb35   : > { %v50221_v18 = vand.u32 4294901760, %v50215_v5  ;;  %v27139_v19 = vand.u32 4294901760, %v27122_v16 }
 0xb37   : > { %v26128_v49 = vsub.f32 %v50215_v5, %v50221_v18 }
 0xb38   : > { %43401 = vmatmul.mubr.f32.vlgmr.msra.gmra.mrb[8].mxu0 %v50140_v56  ;;  %v26161_v56 = vand.u32 4294901760, %v26160_v58 }
 0xb39   : > { %45005 = vmatpush3.bf16.msra.mxu0 %v50171_v54  ;;  %43407 = vmatprep.mubr.f32.mxu0 %v50137_v22  ;;  %v26154_v22 = vsub.f32 %v26040_v26, %v26058_v59  ;;  %v26129_v23 = vand.u32 4294901760, %v26128_v49  ;;  %v27121_v26 = vsel %vm7679_vm7, %v54217_v55, %v54216_v31  ;;  %v54218_v59 = vld [vmem:[#allocation11_spill] sm:$0xff] }
 0xb3a   : > { %45007 = vmatprep.subr.bf16.mxu0 %v45006_v13  ;;  %v26162_v33 = vsub.f32 %v26160_v58, %v26161_v56  ;;  %v45030_v7 = vpack.c.bf16 %v26161_v56, %v26149_v21  ;;  %v27119_v30 = vsel %vm7679_vm7, %v54218_v59, %v54214_v12  ;;  %v41512_v58 = vld [vmem:[%s53923_s7 + $0x78] sm:$0xff]  ;;  %v27227_v21 = vsub.f32 %v27120_v10, %v27135_v47 }
 0xb3b   : > { %v27133_v56 = vsel %vm9860_vm13, %v41512_v58, 0  ;;  %v54219_v31 = vld [vmem:[#allocation19_spill] sm:$0xff] }
 0xb3c   : > { %v26163_v1 = vand.u32 4294901760, %v26162_v33  ;;  %v27228_v42 = vand.u32 4294901760, %v27227_v21 }
 0xb3e   : > { %v45018_v57 = vpack.c.bf16 %v26163_v1, %v26151_v37  ;;  %v45062_v37 = vpack.c.bf16 %v27139_v19, %v27135_v47  ;;  %v27229_v49 = vsub.f32 %v27227_v21, %v27228_v42  ;;  %v54221_v47 = vld [vmem:[#allocation16_spill] sm:$0xff] }
 0xb40   : > { %43408 = vmatmul.mubr.f32.vlgmr.msra.gmra.mrb[8].mxu0 %v50147_v61  ;;  %v26155_v61 = vand.u32 4294901760, %v26154_v22 }
 0xb41   : > { %45009 = vmatpush3.bf16.msra.mxu0 %v45006_v13  ;;  %43414 = vmatprep.mubr.f32.mxu0 %v50125_v50  ;;  %v50264_v13 = vld [vmem:[#allocation2 + $0x30] sm:$0xff] }
 0xb42   : > { %45011 = vmatprep.subr.bf16.mxu0 %v50171_v54  ;;  %v26156_v40 = vsub.f32 %v26154_v22, %v26155_v61  ;;  %v45032_v17 = vpack.c.bf16 %v26167_v43, %v26155_v61  ;;  %v27239_v43 = vsub.f32 %v27122_v16, %v27139_v19  ;;  %v54220_v16 = vld [vmem:[#allocation13_spill] sm:$0xff] }
 0xb43   : > { %v28199_v55 = vsel %vm8709_vm8, %v54220_v16, %v54219_v31 }
 0xb44   : > { %v26157_v34 = vand.u32 4294901760, %v26156_v40  ;;  %v27240_v33 = vand.u32 4294901760, %v27239_v43 }
 0xb46   : > { %v45020_v45 = vpack.c.bf16 %v26169_v27, %v26157_v34 }
 0xb48   : > { %43415 = vmatmul.mubr.f32.vlgmr.msra.gmra.mrb[8].mxu0 %v50133_v52 }
 0xb49   : > { %45013 = vmatpush3.bf16.msra.mxu0 %v50171_v54  ;;  %43421 = vmatprep.mubr.f32.mxu0 %v50125_v50  ;;  %v26139_v50 = vsub.f32 %v50224_v24, %v50231_v63  ;;  %v26692_v54 = vsub.f32 %v49679_v0, %v26600_v11  ;;  %v26688_v0 = vand.u32 4294901760, %v26687_v51 }
 0xb4a   : > { %45015 = vmatprep.subr.bf16.mxu0 %v45014_v20 }
 0xb4b   : > { %v26140_v14 = vand.u32 4294901760, %v26139_v50  ;;  %v26693_v32 = vand.u32 4294901760, %v26692_v54  ;;  %v45046_v38 = vpack.c.bf16 %v26692_v54, %v26685_v2 }
 0xb4d   : > { %v26694_v9 = vsub.f32 %v26692_v54, %v26693_v32  ;;  %v45078_v54 = vpack.c.bf16 %v27240_v33, %v27228_v42 }
 0xb4f   : > { %v26695_v36 = vand.u32 4294901760, %v26694_v9 }
 0xb50   : > { %43422 = vmatmul.mubr.f32.vlgmr.msra.gmra.mrb[8].mxu0 %v50133_v52  ;;  %v45024_v52 = vpack.c.bf16 %v26166_v3, %v26154_v22  ;;  %v27141_v3 = vand.u32 4294901760, %v27121_v26  ;;  %v27137_v22 = vand.u32 4294901760, %v27119_v30 }
 0xb51   : > { %45017 = vmatpush1.bf16.msra.mxu0 %v45016_v25  ;;  %26124 = vmatprep.mubr.f32.mxu0 %v49904_v39  ;;  %v45042_v60 = vpack.c.bf16 %v26695_v36, %v26688_v0 }
 0xb52   : > { %45019 = vmatprep.subr.bf16.mxu0 %v45018_v57  ;;  %v27233_v61 = vsub.f32 %v27119_v30, %v27137_v22  ;;  %v27230_v57 = vand.u32 4294901760, %v27229_v49  ;;  %v28214_v30 = vand.u32 4294901760, %v28199_v55 }
 0xb54   : > { %26130 = vmatmul.mubr.f32.vlgmr.msra.gmra.mrb[4].mxu0 %v26129_v23  ;;  %v27234_v1 = vand.u32 4294901760, %v27233_v61 }
 0xb55   : > { %45021 = vmatpush1.bf16.msra.mxu0 %v45020_v45  ;;  %26135 = vmatprep.mubr.f32.mxu0 %v49904_v39 }
 0xb56   : > { %45023 = vmatprep.subr.bf16.mxu0 %v45022_v8  ;;  %v27235_v34 = vsub.f32 %v27233_v61, %v27234_v1  ;;  %v45064_v8 = vpack.c.bf16 %v27141_v3, %v27137_v22 }
 0xb58   : > { %26141 = vmatmul.mubr.f32.gmra.mrb[6].mxu0 %v26140_v14  ;;  %v27236_v41 = vand.u32 4294901760, %v27235_v34 }
 0xb59   : > { %26231 = vmatprep.mubr.f32.mxu0 %v49904_v39 }
 0xb5c   : > { %26233 = vmatmul.mubr.f32.vlgmr.msra.gmra.mrb[4].mxu0 %v50209_v48 }
 0xb5d   : > { %45025 = vmatpush1.bf16.msra.mxu0 %v45024_v52  ;;  %26238 = vmatprep.mubr.f32.mxu0 %v49904_v39 }
 0xb5e   : > { %45027 = vmatprep.subr.bf16.mxu0 %v45014_v20 }
 0xb60   : > { %26240 = vmatmul.mubr.f32.gmra.mrb[6].mxu0 %v50217_v35 }
 0xb61   : > { %26318 = vmatprep.mubr.f32.mxu0 %v49904_v39 }
 0xb64   : > { %26321 = vmatmul.mubr.f32.vlgmr.msra.gmra.mrb[4].mxu0 %v50215_v5 }
 0xb65   : > { %45029 = vmatpush1.bf16.msra.mxu0 %v45016_v25  ;;  %26326 = vmatprep.mubr.f32.mxu0 %v49904_v39 }
 0xb66   : > { %45031 = vmatprep.subr.bf16.mxu0 %v45030_v7 }
 0xb68   : > { %26329 = vmatmul.mubr.f32.gmra.mrb[6].mxu0 %v50224_v24 }
 0xb69   : > { %26403 = vmatprep.mubr.f32.mxu0 %v49904_v39 }
 0xb6c   : > { %26407 = vmatmul.mubr.f32.vlgmr.msra.gmra.mrb[4].mxu0 %v50221_v18 }
 0xb6d   : > { %45033 = vmatpush1.bf16.msra.mxu0 %v45032_v17  ;;  %26412 = vmatprep.mubr.f32.mxu0 %v49904_v39  ;;  %v45070_v17 = vpack.c.bf16 %v27239_v43, %v27227_v21  ;;  %v54223_v21 = vld [vmem:[#allocation17_spill] sm:$0xff] }
 0xb6e   : > { %45035 = vmatprep.subr.bf16.mxu0 %v45014_v20  ;;  %v27245_v20 = vsub.f32 %v27121_v26, %v27141_v3  ;;  %v41513_v26 = vld [vmem:[%s53923_s7 + $0x80] sm:$0xff]  ;;  %v28198_v22 = vsel %vm8709_vm8, %v54223_v21, %v54220_v16  ;;  %v54225_v21 = vld [vmem:[#allocation5_spill] sm:$0xff] }
 0xb6f   : > { %v28209_v58 = vsel %vm9860_vm13, %v41513_v26, 0 }
 0xb70   : > { %26416 = vmatmul.mubr.f32.gmra.mrb[6].mxu0 %v50231_v63  ;;  %v27246_v46 = vand.u32 4294901760, %v27245_v20  ;;  %v50379_v42 = vand.u32 4294901760, %v28209_v58 }
 0xb71   : > { %26498 = vmatprep.mubr.f32.mxu0 %v49904_v39 }
 0xb72   : > { %v27247_v27 = vsub.f32 %v27245_v20, %v27246_v46 }
 0xb74   : > { %26500 = vmatmul.mubr.f32.vlgmr.msra.gmra.mrb[4].mxu0 %v50209_v48 }
 0xb75   : > { %45037 = vmatpush1.bf16.msra.mxu0 %v45016_v25  ;;  %26505 = vmatprep.mubr.f32.mxu0 %v49904_v39  ;;  %v27241_v25 = vsub.f32 %v27239_v43, %v27240_v33 }
 0xb76   : > { %45039 = vmatprep.subr.bf16.mxu0 %v50255_v53 }
 0xb77   : > { %v27242_v45 = vand.u32 4294901760, %v27241_v25 }
 0xb78   : > { %26507 = vmatmul.mubr.f32.gmra.mrb[6].mxu0 %v50217_v35 }
 0xb79   : > { %26581 = vmatprep.mubr.f32.mxu0 %v49904_v39  ;;  %v45054_v39 = vpack.c.bf16 %v26693_v32, %v26686_v6  ;;  %v45066_v52 = vpack.c.bf16 %v27242_v45, %v27230_v57  ;;  %v27676_v6 = vand.u32 4294901760, %v54213_v15  ;;  %v27679_v32 = vand.u32 4294901760, %v54215_v29 }
 0xb7b   : > { %v27764_v51 = vsub.f32 %v54213_v15, %v27676_v6  ;;  %v27771_v9 = vsub.f32 %v54215_v29, %v27679_v32 }
 0xb7c   : > { %26583 = vmatmul.mubr.f32.vlgmr.msra.gmra.mrb[4].mxu0 %v50209_v48 }
 0xb7d   : > { %45041 = vmatpush3.bf16.msra.mxu0 %v50255_v53  ;;  %26588 = vmatprep.mubr.f32.mxu0 %v50264_v13  ;;  %v27765_v0 = vand.u32 4294901760, %v27764_v51  ;;  %v27772_v36 = vand.u32 4294901760, %v27771_v9  ;;  %v45094_v44 = vpack.c.bf16 %v27771_v9, %v27764_v51 }
 0xb7e   : > { %45043 = vmatprep.subr.bf16.mxu0 %v45042_v60 }
 0xb7f   : > { %v45102_v29 = vpack.c.bf16 %v27772_v36, %v27765_v0 }
 0xb80   : > { %26590 = vmatmul.mubr.f32.gmra.mrb[6].mxu0 %v50217_v35 }
 0xb81   : > { %43428 = vmatprep.mubr.f32.mxu0 %v26129_v23 }
 0xb84   : > { %43429 = vmatmul.mubr.f32.vlgmr.msra.gmra.mrb[8].mxu0 %v26140_v14  ;;  %v27248_v14 = vand.u32 4294901760, %v27247_v27 }
 0xb85   : > { %45045 = vmatpush3.bf16.msra.mxu0 %v45042_v60  ;;  %43435 = vmatprep.mubr.f32.mxu0 %v50209_v48  ;;  %v50341_v60 = vpack.c.bf16 %v27679_v32, %v27676_v6 }
 0xb86   : > { %45047 = vmatprep.subr.bf16.mxu0 %v45046_v38  ;;  %v45068_v11 = vpack.c.bf16 %v27248_v14, %v27236_v41 }
 0xb8c   : > { %43436 = vmatmul.mubr.f32.vlgmr.msra.gmra.mrb[8].mxu0 %v50217_v35 }
 0xb8d   : > { %45049 = vmatpush3.bf16.msra.mxu0 %v45046_v38  ;;  %43442 = vmatprep.mubr.f32.mxu0 %v50215_v5  ;;  %v50295_v5 = vand.u32 4294901760, %v27130_v62  ;;  %v27766_v38 = vsub.f32 %v27764_v51, %v27765_v0  ;;  %v28755_v51 = vand.u32 4294901760, %v54219_v31 }
 0xb8e   : > { %45051 = vmatprep.subr.bf16.mxu0 %v50255_v53 }
 0xb8f   : > { %v27767_v15 = vand.u32 4294901760, %v27766_v38 }
 0xb94   : > { %43443 = vmatmul.mubr.f32.vlgmr.msra.gmra.mrb[8].mxu0 %v50224_v24  ;;  %v50303_v24 = vand.u32 4294901760, %v27133_v56 }
 0xb95   : > { %45053 = vmatpush3.bf16.msra.mxu0 %v50255_v53  ;;  %43449 = vmatprep.mubr.f32.mxu0 %v50221_v18  ;;  %v50301_v18 = vsub.f32 %v27130_v62, %v50295_v5  ;;  %v54222_v62 = vld [vmem:[#allocation15_spill] sm:$0xff] }
 0xb96   : > { %45055 = vmatprep.subr.bf16.mxu0 %v45054_v39  ;;  %v50310_v40 = vsub.f32 %v27133_v56, %v50303_v24  ;;  %v28201_v19 = vsel %vm8709_vm8, %v54222_v62, %v54221_v47  ;;  %v28200_v59 = vsel %vm8709_vm8, %v49796_v4, %v54222_v62  ;;  %v41514_v56 = vld [vmem:[%s53923_s7 + $0x88] sm:$0xff] }
 0xb97   : > { %v28218_v3 = vand.u32 4294901760, %v28201_v19  ;;  %v28220_v43 = vand.u32 4294901760, %v28200_v59  ;;  %v28212_v4 = vsel %vm9860_vm13, %v41514_v56, 0 }
 0xb98   : > { %v50317_v50 = vand.u32 4294901760, %v50310_v40  ;;  %v50387_v49 = vand.u32 4294901760, %v28212_v4 }
 0xb99   : > { %v28324_v33 = vsub.f32 %v28200_v59, %v28220_v43  ;;  %v45110_v25 = vpack.c.bf16 %v28218_v3, %v28214_v30 }
 0xb9c   : > { %43450 = vmatmul.mubr.f32.vlgmr.msra.gmra.mrb[8].mxu0 %v50231_v63  ;;  %v50307_v63 = vand.u32 4294901760, %v50301_v18 }
 0xb9d   : > { %45057 = vmatpush3.bf16.msra.mxu0 %v45054_v39  ;;  %43456 = vmatprep.mubr.f32.mxu0 %v50209_v48  ;;  %v27773_v39 = vsub.f32 %v27771_v9, %v27772_v36  ;;  %v28758_v9 = vand.u32 4294901760, %v54221_v47  ;;  %v28843_v36 = vsub.f32 %v54219_v31, %v28755_v51 }
 0xb9e   : > { %45059 = vmatprep.subr.bf16.mxu0 %v50255_v53  ;;  %v27207_v23 = vsub.f32 %v50301_v18, %v50307_v63 }
 0xb9f   : > { %v27774_v12 = vand.u32 4294901760, %v27773_v39  ;;  %v28844_v38 = vand.u32 4294901760, %v28843_v36 }
 0xba0   : > { %v27208_v7 = vand.u32 4294901760, %v27207_v23  ;;  %v50394_v23 = vsub.f32 %v28212_v4, %v50387_v49 }
 0xba1   : > { %v45090_v10 = vpack.c.bf16 %v27774_v12, %v27767_v15  ;;  %v45134_v15 = vpack.c.bf16 %v28758_v9, %v28755_v51  ;;  %v28845_v12 = vsub.f32 %v28843_v36, %v28844_v38 }
 0xba4   : > { %43457 = vmatmul.mubr.f32.vlgmr.msra.gmra.mrb[8].mxu0 %v50217_v35 }
 0xba5   : > { %45061 = vmatpush3.bf16.msra.mxu0 %v50255_v53  ;;  %43463 = vmatprep.mubr.f32.mxu0 %v50209_v48  ;;  %v27218_v48 = vsub.f32 %v50310_v40, %v50317_v50  ;;  %v45080_v53 = vpack.c.bf16 %v27246_v46, %v27234_v1  ;;  %v28325_v1 = vand.u32 4294901760, %v28324_v33 }
 0xba6   : > { %45063 = vmatprep.subr.bf16.mxu0 %v45062_v37 }
 0xba7   : > { %v27219_v2 = vand.u32 4294901760, %v27218_v48  ;;  %v28326_v45 = vsub.f32 %v28324_v33, %v28325_v1 }
 0xbac   : > { %43464 = vmatmul.mubr.f32.vlgmr.msra.gmra.mrb[8].mxu0 %v50217_v35  ;;  %v45072_v35 = vpack.c.bf16 %v27245_v20, %v27233_v61  ;;  %v28306_v20 = vsub.f32 %v28199_v55, %v28214_v30  ;;  %v28318_v61 = vsub.f32 %v28201_v19, %v28218_v3 }
 0xbad   : > { %45065 = vmatpush1.bf16.msra.mxu0 %v45064_v8  ;;  %27203 = vmatprep.mubr.f32.mxu0 %v50264_v13 }
 0xbae   : > { %45067 = vmatprep.subr.bf16.mxu0 %v45066_v52  ;;  %v28307_v46 = vand.u32 4294901760, %v28306_v20  ;;  %v50401_v52 = vand.u32 4294901760, %v50394_v23  ;;  %v45118_v6 = vpack.c.bf16 %v28318_v61, %v28306_v20 }
 0xbb0   : > { %27209 = vmatmul.mubr.f32.vlgmr.msra.gmra.mrb[4].mxu0 %v27208_v7  ;;  %v28308_v27 = vsub.f32 %v28306_v20, %v28307_v46  ;;  %v54226_v20 = vld [vmem:[#allocation4_spill] sm:$0xff] }
 0xbb1   : > { %45069 = vmatpush1.bf16.msra.mxu0 %v45068_v11  ;;  %27214 = vmatprep.mubr.f32.mxu0 %v50264_v13  ;;  %v28327_v11 = vand.u32 4294901760, %v28326_v45  ;;  %v50473_v45 = vld [vmem:[#allocation2 + $0x18] sm:$0xff] }
 0xbb2   : > { %45071 = vmatprep.subr.bf16.mxu0 %v45070_v17 }
 0xbb4   : > { %27220 = vmatmul.mubr.f32.gmra.mrb[6].mxu0 %v27219_v2 }
 0xbb5   : > { %27310 = vmatprep.mubr.f32.mxu0 %v50264_v13 }
 0xbb8   : > { %27312 = vmatmul.mubr.f32.vlgmr.msra.gmra.mrb[4].mxu0 %v50295_v5 }
 0xbb9   : > { %45073 = vmatpush1.bf16.msra.mxu0 %v45072_v35  ;;  %27317 = vmatprep.mubr.f32.mxu0 %v50264_v13 }
 0xbba   : > { %45075 = vmatprep.subr.bf16.mxu0 %v45062_v37 }
 0xbbc   : > { %27319 = vmatmul.mubr.f32.gmra.mrb[6].mxu0 %v50303_v24 }
 0xbbd   : > { %27397 = vmatprep.mubr.f32.mxu0 %v50264_v13 }
 0xbc0   : > { %27400 = vmatmul.mubr.f32.vlgmr.msra.gmra.mrb[4].mxu0 %v50301_v18 }
 0xbc1   : > { %45077 = vmatpush1.bf16.msra.mxu0 %v45064_v8  ;;  %27405 = vmatprep.mubr.f32.mxu0 %v50264_v13 }
 0xbc2   : > { %45079 = vmatprep.subr.bf16.mxu0 %v45078_v54 }
 0xbc4   : > { %27408 = vmatmul.mubr.f32.gmra.mrb[6].mxu0 %v50310_v40 }
 0xbc5   : > { %27482 = vmatprep.mubr.f32.mxu0 %v50264_v13 }
 0xbc8   : > { %27486 = vmatmul.mubr.f32.vlgmr.msra.gmra.mrb[4].mxu0 %v50307_v63 }
 0xbc9   : > { %45081 = vmatpush1.bf16.msra.mxu0 %v45080_v53  ;;  %27491 = vmatprep.mubr.f32.mxu0 %v50264_v13 }
 0xbca   : > { %45083 = vmatprep.subr.bf16.mxu0 %v45062_v37  ;;  %v50385_v37 = vsub.f32 %v28209_v58, %v50379_v42 }
 0xbcc   : > { %27495 = vmatmul.mubr.f32.gmra.mrb[6].mxu0 %v50317_v50  ;;  %v50391_v57 = vand.u32 4294901760, %v50385_v37 }
 0xbcd   : > { %27577 = vmatprep.mubr.f32.mxu0 %v50264_v13 }
 0xbce   : > { %v28286_v14 = vsub.f32 %v50385_v37, %v50391_v57 }
 0xbd0   : > { %27579 = vmatmul.mubr.f32.vlgmr.msra.gmra.mrb[4].mxu0 %v50295_v5 }
 0xbd1   : > { %45085 = vmatpush1.bf16.msra.mxu0 %v45064_v8  ;;  %27584 = vmatprep.mubr.f32.mxu0 %v50264_v13  ;;  %v28309_v8 = vand.u32 4294901760, %v28308_v27 }
 0xbd2   : > { %45087 = vmatprep.subr.bf16.mxu0 %v50341_v60 }
 0xbd4   : > { %27586 = vmatmul.mubr.f32.gmra.mrb[6].mxu0 %v50303_v24 }
 0xbd5   : > { %27660 = vmatprep.mubr.f32.mxu0 %v50264_v13 }
 0xbd8   : > { %27662 = vmatmul.mubr.f32.vlgmr.msra.gmra.mrb[4].mxu0 %v50295_v5 }
 0xbd9   : > { %45089 = vmatpush3.bf16.msra.mxu0 %v50341_v60  ;;  %27667 = vmatprep.mubr.f32.mxu0 %v50264_v13 }
 0xbda   : > { %45091 = vmatprep.subr.bf16.mxu0 %v45090_v10 }
 0xbdc   : > { %27669 = vmatmul.mubr.f32.gmra.mrb[6].mxu0 %v50303_v24 }
 0xbdd   : > { %43470 = vmatprep.mubr.f32.mxu0 %v27208_v7 }
 0xbe0   : > { %43471 = vmatmul.mubr.f32.vlgmr.msra.gmra.mrb[8].mxu0 %v27219_v2  ;;  %v28287_v2 = vand.u32 4294901760, %v28286_v14  ;;  %v50481_v14 = vld [vmem:[#allocation2] sm:$0xff] }
 0xbe1   : > { %45093 = vmatpush3.bf16.msra.mxu0 %v45090_v10  ;;  %43477 = vmatprep.mubr.f32.mxu0 %v50295_v5 }
 0xbe2   : > { %45095 = vmatprep.subr.bf16.mxu0 %v45094_v44 }
 0xbe8   : > { %43478 = vmatmul.mubr.f32.vlgmr.msra.gmra.mrb[8].mxu0 %v50303_v24 }
 0xbe9   : > { %45097 = vmatpush3.bf16.msra.mxu0 %v45094_v44  ;;  %43484 = vmatprep.mubr.f32.mxu0 %v50301_v18  ;;  %v28216_v18 = vand.u32 4294901760, %v28198_v22  ;;  %v28846_v44 = vand.u32 4294901760, %v28845_v12 }
 0xbea   : > { %45099 = vmatprep.subr.bf16.mxu0 %v50341_v60 }
 0xbeb   : > { %v45112_v41 = vpack.c.bf16 %v28220_v43, %v28216_v18 }
 0xbf0   : > { %43485 = vmatmul.mubr.f32.vlgmr.msra.gmra.mrb[8].mxu0 %v50310_v40  ;;  %v28319_v40 = vand.u32 4294901760, %v28318_v61 }
 0xbf1   : > { %45101 = vmatpush3.bf16.msra.mxu0 %v50341_v60  ;;  %43491 = vmatprep.mubr.f32.mxu0 %v50307_v63  ;;  %v28312_v63 = vsub.f32 %v28198_v22, %v28216_v18 }
 0xbf2   : > { %45103 = vmatprep.subr.bf16.mxu0 %v45102_v29  ;;  %v28320_v34 = vsub.f32 %v28318_v61, %v28319_v40  ;;  %v45126_v53 = vpack.c.bf16 %v28319_v40, %v28307_v46 }
 0xbf4   : > { %v28321_v48 = vand.u32 4294901760, %v28320_v34  ;;  %v50469_v34 = vld [vmem:[#allocation2 + $0x8] sm:$0xff] }
 0xbf6   : > { %v45114_v17 = vpack.c.bf16 %v28321_v48, %v28309_v8  ;;  %v50477_v8 = vld [vmem:[#allocation2 + $0x20] sm:$0xff] }
 0xbf8   : > { %43492 = vmatmul.mubr.f32.vlgmr.msra.gmra.mrb[8].mxu0 %v50317_v50  ;;  %v28313_v50 = vand.u32 4294901760, %v28312_v63 }
 0xbf9   : > { %45105 = vmatpush3.bf16.msra.mxu0 %v45102_v29  ;;  %43498 = vmatprep.mubr.f32.mxu0 %v50295_v5 }
 0xbfa   : > { %45107 = vmatprep.subr.bf16.mxu0 %v50341_v60  ;;  %v28314_v7 = vsub.f32 %v28312_v63, %v28313_v50  ;;  %v45128_v0 = vpack.c.bf16 %v28325_v1, %v28313_v50  ;;  %v54227_v1 = vld [vmem:[#allocation3_spill] sm:$0xff]  ;;  %v50460_v50 = vld [vmem:[#allocation2 + $0x10] sm:$0xff] }
 0xbfc   : > { %v28315_v35 = vand.u32 4294901760, %v28314_v7 }
 0xbfe   : > { %v45116_v54 = vpack.c.bf16 %v28327_v11, %v28315_v35 }
 0xc00   : > { %43499 = vmatmul.mubr.f32.vlgmr.msra.gmra.mrb[8].mxu0 %v50303_v24 }
 0xc01   : > { %45109 = vmatpush3.bf16.msra.mxu0 %v50341_v60  ;;  %43505 = vmatprep.mubr.f32.mxu0 %v50295_v5  ;;  %v28297_v5 = vsub.f32 %v50394_v23, %v50401_v52  ;;  %v28850_v60 = vsub.f32 %v54221_v47, %v28758_v9  ;;  %v54224_v47 = vld [vmem:[#allocation18_spill] sm:$0xff] }
 0xc02   : > { %45111 = vmatprep.subr.bf16.mxu0 %v45110_v25 }
 0xc03   : > { %v28298_v32 = vand.u32 4294901760, %v28297_v5  ;;  %v28851_v39 = vand.u32 4294901760, %v28850_v60  ;;  %v45142_v16 = vpack.c.bf16 %v28850_v60, %v28843_v36 }
 0xc05   : > { %v28852_v10 = vsub.f32 %v28850_v60, %v28851_v39  ;;  %v45150_v55 = vpack.c.bf16 %v28851_v39, %v28844_v38  ;;  %v50517_v60 = vld [vmem:[#allocation2 + $0x60] sm:$0xff] }
 0xc07   : > { %v28853_v29 = vand.u32 4294901760, %v28852_v10 }
 0xc08   : > { %43506 = vmatmul.mubr.f32.vlgmr.msra.gmra.mrb[8].mxu0 %v50303_v24  ;;  %v45120_v24 = vpack.c.bf16 %v28324_v33, %v28312_v63 }
 0xc09   : > { %45113 = vmatpush1.bf16.msra.mxu0 %v45112_v41  ;;  %28282 = vmatprep.mubr.f32.mxu0 %v50264_v13  ;;  %v45138_v31 = vpack.c.bf16 %v28853_v29, %v28846_v44 }
 0xc0a   : > { %45115 = vmatprep.subr.bf16.mxu0 %v45114_v17 }
 0xc0c   : > { %28288 = vmatmul.mubr.f32.vlgmr.msra.gmra.mrb[4].mxu0 %v28287_v2 }
 0xc0d   : > { %45117 = vmatpush1.bf16.msra.mxu0 %v45116_v54  ;;  %28293 = vmatprep.mubr.f32.mxu0 %v50264_v13 }
 0xc0e   : > { %45119 = vmatprep.subr.bf16.mxu0 %v45118_v6 }
 0xc10   : > { %28299 = vmatmul.mubr.f32.gmra.mrb[6].mxu0 %v28298_v32 }
 0xc11   : > { %28389 = vmatprep.mubr.f32.mxu0 %v50264_v13 }
 0xc14   : > { %28391 = vmatmul.mubr.f32.vlgmr.msra.gmra.mrb[4].mxu0 %v50379_v42 }
 0xc15   : > { %45121 = vmatpush1.bf16.msra.mxu0 %v45120_v24  ;;  %28396 = vmatprep.mubr.f32.mxu0 %v50264_v13 }
 0xc16   : > { %45123 = vmatprep.subr.bf16.mxu0 %v45110_v25 }
 0xc18   : > { %28398 = vmatmul.mubr.f32.gmra.mrb[6].mxu0 %v50387_v49 }
 0xc19   : > { %28476 = vmatprep.mubr.f32.mxu0 %v50264_v13 }
 0xc1c   : > { %28479 = vmatmul.mubr.f32.vlgmr.msra.gmra.mrb[4].mxu0 %v50385_v37 }
 0xc1d   : > { %45125 = vmatpush1.bf16.msra.mxu0 %v45112_v41  ;;  %28484 = vmatprep.mubr.f32.mxu0 %v50264_v13 }
 0xc1e   : > { %45127 = vmatprep.subr.bf16.mxu0 %v45126_v53  ;;  %v50511_v53 = vld [vmem:[#allocation2 + $0x68] sm:$0xff] }
 0xc20   : > { %28487 = vmatmul.mubr.f32.gmra.mrb[6].mxu0 %v50394_v23 }
 0xc21   : > { %28561 = vmatprep.mubr.f32.mxu0 %v50264_v13 }
 0xc24   : > { %28565 = vmatmul.mubr.f32.vlgmr.msra.gmra.mrb[4].mxu0 %v50391_v57 }
 0xc25   : > { %45129 = vmatpush1.bf16.msra.mxu0 %v45128_v0  ;;  %28570 = vmatprep.mubr.f32.mxu0 %v50264_v13 }
 0xc26   : > { %45131 = vmatprep.subr.bf16.mxu0 %v45110_v25 }
 0xc28   : > { %28574 = vmatmul.mubr.f32.gmra.mrb[6].mxu0 %v50401_v52 }
 0xc29   : > { %28656 = vmatprep.mubr.f32.mxu0 %v50264_v13 }
 0xc2c   : > { %28658 = vmatmul.mubr.f32.vlgmr.msra.gmra.mrb[4].mxu0 %v50379_v42 }
 0xc2d   : > { %45133 = vmatpush1.bf16.msra.mxu0 %v45112_v41  ;;  %28663 = vmatprep.mubr.f32.mxu0 %v50264_v13 }
 0xc2e   : > { %45135 = vmatprep.subr.bf16.mxu0 %v45134_v15 }
 0xc30   : > { %28665 = vmatmul.mubr.f32.gmra.mrb[6].mxu0 %v50387_v49 }
 0xc31   : > { %28739 = vmatprep.mubr.f32.mxu0 %v50264_v13 }
 0xc34   : > { %28741 = vmatmul.mubr.f32.vlgmr.msra.gmra.mrb[4].mxu0 %v50379_v42 }
 0xc35   : > { %45137 = vmatpush3.bf16.msra.mxu0 %v45134_v15  ;;  %28746 = vmatprep.mubr.f32.mxu0 %v50264_v13 }
 0xc36   : > { %45139 = vmatprep.subr.bf16.mxu0 %v45138_v31 }
 0xc38   : > { %28748 = vmatmul.mubr.f32.gmra.mrb[6].mxu0 %v50387_v49 }
 0xc39   : > { %43512 = vmatprep.mubr.f32.mxu0 %v28287_v2 }
 0xc3c   : > { %43513 = vmatmul.mubr.f32.vlgmr.msra.gmra.mrb[8].mxu0 %v28298_v32 }
 0xc3d   : > { %45141 = vmatpush3.bf16.msra.mxu0 %v45138_v31  ;;  %43519 = vmatprep.mubr.f32.mxu0 %v50379_v42 }
 0xc3e   : > { %45143 = vmatprep.subr.bf16.mxu0 %v45142_v16 }
 0xc44   : > { %43520 = vmatmul.mubr.f32.vlgmr.msra.gmra.mrb[8].mxu0 %v50387_v49 }
 0xc45   : > { %45145 = vmatpush3.bf16.msra.mxu0 %v45142_v16  ;;  %43526 = vmatprep.mubr.f32.mxu0 %v50385_v37 }
 0xc46   : > { %45147 = vmatprep.subr.bf16.mxu0 %v45134_v15 }
 0xc4c   : > { %43527 = vmatmul.mubr.f32.vlgmr.msra.gmra.mrb[8].mxu0 %v50394_v23 }
 0xc4d   : > { %45149 = vmatpush3.bf16.msra.mxu0 %v45134_v15  ;;  %43533 = vmatprep.mubr.f32.mxu0 %v50391_v57 }
 0xc4e   : > { %45151 = vmatprep.subr.bf16.mxu0 %v45150_v55 }
 0xc54   : > { %43534 = vmatmul.mubr.f32.vlgmr.msra.gmra.mrb[8].mxu0 %v50401_v52 }
 0xc55   : > { %45153 = vmatpush3.bf16.msra.mxu0 %v45150_v55  ;;  %43540 = vmatprep.mubr.f32.mxu0 %v50379_v42 }
 0xc56   : > { %45155 = vmatprep.subr.bf16.mxu0 %v45134_v15 }
 0xc5c   : > { %43541 = vmatmul.mubr.f32.vlgmr.msra.gmra.mrb[8].mxu0 %v50387_v49 }
 0xc5d   : > { %45157 = vmatpush3.bf16.msra.mxu0 %v45134_v15  ;;  %43547 = vmatprep.mubr.f32.mxu0 %v50379_v42 }
 0xc64   : > { %43548 = vmatmul.mubr.f32.vlgmr.msra.gmra.mrb[8].mxu0 %v50387_v49 }
 0xc65   : > { %29544 = vmatprep.mubr.f32.mxu0 %v50264_v13 }
 0xd07   : > { %v28742_v26 = vpop.f32.mrb[4].mxu0 }
 0xd08   : > { %v29274_v62 = vadd.f32 %v54224_v47, %v28742_v26  ;;  %v28744_v19 = vpop.f32.mrb[5].mxu0 }
 0xd09   : > { %v29275_v59 = vadd.f32 %v54224_v47, %v28744_v19 }
 0xd0a   : > { %v29280_v30 = vmax.f32 %v29274_v62, 0.0 }
 0xd0b   : > { %v29281_v58 = vmax.f32 %v29275_v59, 0.0  ;;  %v28749_v3 = vpop.f32.mrb[6].mxu0 }
 0xd0c   : > { %v29286_v22 = vmul.f32 %v29280_v30, %v54225_v21  ;;  %v29277_v56 = vadd.f32 %v49804_v28, %v28749_v3  ;;  %v28751_v43 = vpop.f32.mrb[7].mxu0 }
 0xd0d   : > { %v29287_v42 = vmul.f32 %v29281_v58, %v54226_v20  ;;  %v29278_v37 = vadd.f32 %v49804_v28, %v28751_v43 }
 0xd0e   : > { %v29283_v18 = vmax.f32 %v29277_v56, 0.0  ;;  %29298 = vrot.lane.b32.xlu0 %v29286_v22, %s47443_s15 }
 0xd0f   : > { %29300 = vrot.lane.b32.xlu1 %v29287_v42, %s47443_s15  ;;  %v29284_v27 = vmax.f32 %v29278_v37, 0.0 }
 0xd10   : > { %v29289_v4 = vmul.f32 %v29283_v18, %v54225_v21 }
 0xd11   : > { %v29290_v23 = vmul.f32 %v29284_v27, %v54226_v20 }
 0xd13   : > { %29304 = vrot.lane.b32.xlu1 %v29289_v4, %s47443_s15 }
 0xd37   : > { %v43549_v61 = vpop.f32.mrb[8].mxu0 }
 0xd38   : > { %v29279_v33 = vadd.f32 %v43549_v61, %v49804_v28  ;;  %v29246_v46 = vpop.f32.mrb[9].mxu0  ;;  %v50465_v28 = vld [vmem:[#allocation2 + $0x28] sm:$0xff] }
 0xd39   : > { %v29276_v49 = vadd.f32 %v54224_v47, %v29246_v46 }
 0xd3a   : > { %v29285_v63 = vmax.f32 %v29279_v33, 0.0  ;;  %v50562_v33 = vld [vmem:[#allocation2 + $0x70] sm:$0xff] }
 0xd3b   : > { %v29282_v40 = vmax.f32 %v29276_v49, 0.0 }
 0xd3c   : > { %v29291_v25 = vmul.f32 %v29285_v63, %v54227_v1 }
 0xd3d   : > { %v29288_v57 = vmul.f32 %v29282_v40, %v54227_v1 }
 0xd3e   : > { %29308 = vrot.lane.b32.xlu1 %v29291_v25, %s47443_s15 }
 0xd3f   : > { %29302 = vrot.lane.b32.xlu0 %v29288_v57, %s47443_s15 }
 0xd42   : > { %33030 = vrot.lane.b32.xlu1 %v50460_v50, %s47436_s18 }
 0xd43   : > { %29306 = vrot.lane.b32.xlu0 %v29290_v23, %s47443_s15 }
 0xd46   : > { %33036 = vrot.lane.b32.xlu1 %v50465_v28, %s47436_s18 }
 0xd47   : > { %33028 = vrot.lane.b32.xlu0 %v50469_v34, %s47436_s18 }
 0xd4a   : > { %33032 = vrot.lane.b32.xlu1 %v50473_v45, %s47436_s18 }
 0xd4b   : > { %33034 = vrot.lane.b32.xlu0 %v50477_v8, %s47436_s18 }
 0xd4f   : > { %33026 = vrot.lane.b32.xlu0 %v50481_v14, %s47436_s18 }
 0xd80   : > { %v29299_v52 = vpop.permute.xlu0 %29298 }
 0xd81   : > { %29320 = vst.msk [vmem:[#allocation2 + $0x30] sm:$0xff] %vm9813_vm10, %v29299_v52  ;;  %v29301_v7 = vpop.permute.xlu1 %29300 }
 0xd82   : > { %v50487_v48 = vsel %vm9802_vm11, %v29299_v52, %v29301_v7 }
 0xd83   : > { %29321 = vst [vmem:[#allocation2 + $0x38] sm:$0xff] %v50487_v48 }
 0xd85   : > { %v29305_v41 = vpop.permute.xlu1 %29304 }
 0xd86   : > { %29323 = vst.msk [vmem:[#allocation2 + $0x48] sm:$0xff] %vm9813_vm10, %v29305_v41 }
 0xd88   : > { %v50491_v11 = vld [vmem:[#allocation2 + $0x30] sm:$0xff] }
 0xd89   : > { %33038 = vrot.lane.b32.xlu0 %v50491_v11, %s47436_s18 }
 0xd8d   : > { %33040 = vrot.lane.b32.xlu0 %v50487_v48, %s47436_s18  ;;  %v50554_v42 = vld [vmem:[#allocation2 + $0x48] sm:$0xff] }
 0xdb0   : > { %v29309_v17 = vpop.permute.xlu1 %29308 }
 0xdb1   : > { %v29303_v2 = vpop.permute.xlu0 %29302 }
 0xdb2   : > { %v29311_v5 = vsel %vm9802_vm11, %v29301_v7, %v29303_v2 }
 0xdb3   : > { %29322 = vst.msk [vmem:[#allocation2 + $0x40] sm:$0xff] %vm9816_vm12, %v29311_v5 }
 0xdb4   : > { %v50499_v35 = vpop.permute.xlu1 %33030 }
 0xdb5   : > { %v29307_v54 = vpop.permute.xlu0 %29306 }
 0xdb6   : > { %v50502_v6 = vsel %vm9802_vm11, %v29305_v41, %v29307_v54  ;;  %v29313_v32 = vsel %vm9802_vm11, %v29307_v54, %v29309_v17 }
 0xdb7   : > { %29324 = vst [vmem:[#allocation2 + $0x50] sm:$0xff] %v50502_v6  ;;  %29325 = vst.msk [vmem:[#allocation2 + $0x58] sm:$0xff] %vm9816_vm12, %v29313_v32  ;;  %33046 = vrot.lane.b32.xlu0 %v50502_v6, %s47436_s18 }
 0xdb8   : > { %v50509_v24 = vpop.permute.xlu1 %33036 }
 0xdb9   : > { %v33029_v51 = vpop.permute.xlu0 %33028 }
 0xdba   : > { %v33057_v9 = vsel %vm3559_vm3, %v33029_v51, %v50499_v35  ;;  %v50538_v19 = vld [vmem:[#allocation2 + $0x40] sm:$0xff] }
 0xdbb   : > { %v33087_v0 = vand.u32 4294901760, %v33057_v9  ;;  %33052 = vrot.lane.b32.xlu0 %v50511_v53, %s47436_s18 }
 0xdbc   : > { %v33033_v36 = vpop.permute.xlu1 %33032 }
 0xdbd   : > { %v50519_v38 = vsub.f32 %v33057_v9, %v33087_v0  ;;  %v33035_v39 = vpop.permute.xlu0 %33034 }
 0xdbe   : > { %v33058_v15 = vsel %vm3559_vm3, %v33033_v36, %v33035_v39  ;;  %v33059_v12 = vsel %vm3559_vm3, %v33035_v39, %v50509_v24  ;;  %v50524_v10 = vld [vmem:[#allocation2 + $0x58] sm:$0xff] }
 0xdbf   : > { %54228 = vst [vmem:[#allocation8_spill] sm:$0xff] %v50519_v38  ;;  %v33091_v44 = vand.u32 4294901760, %v33059_v12  ;;  %v33093_v29 = vand.u32 4294901760, %v33058_v15  ;;  %33048 = vrot.lane.b32.xlu1 %v50524_v10, %s47436_s18  ;;  %33050 = vrot.lane.b32.xlu0 %v50517_v60, %s47436_s18  ;;  %v33186_v31 = vand.u32 4294901760, %v50519_v38 }
 0xdc1   : > { %v50531_v16 = vsub.f32 %v33059_v12, %v33091_v44  ;;  %v50533_v55 = vsub.f32 %v33058_v15, %v33093_v29  ;;  %v33027_v26 = vpop.permute.xlu0 %33026  ;;  %v50535_v47 = vpack.c.bf16 %v33091_v44, %v33087_v0  ;;  %v33187_v3 = vsub.f32 %v50519_v38, %v33186_v31 }
 0xdc2   : > { %v33056_v62 = vsel %vm3559_vm3, %v33027_v26, %v33029_v51 }
 0xdc3   : > { %54229 = vst [vmem:[#allocation6_spill] sm:$0xff] %v50531_v16  ;;  %54230 = vst [vmem:[#allocation12_spill] sm:$0xff] %v50533_v55  ;;  %v33204_v59 = vand.u32 4294901760, %v50533_v55  ;;  %v33089_v30 = vand.u32 4294901760, %v33056_v62  ;;  %33042 = vrot.lane.b32.xlu1 %v50538_v19, %s47436_s18  ;;  %v33198_v58 = vand.u32 4294901760, %v50531_v16  ;;  %34259 = vrot.lane.b32.xlu0 %v50460_v50, %s47437_s19  ;;  %v33188_v49 = vand.u32 4294901760, %v33187_v3 }
 0xdc4   : > { %54231 = vst [vmem:[#allocation7_spill] sm:$0xff] %v50535_v47  ;;  %v53952_v3 = vand.u32 4294901760, %v50509_v24 }
 0xdc5   : > { %v33205_v22 = vsub.f32 %v50533_v55, %v33204_v59  ;;  %v50550_v56 = vpack.c.bf16 %v33093_v29, %v33089_v30  ;;  %v50552_v43 = vsub.f32 %v33056_v62, %v33089_v30  ;;  %v45478_v20 = vpack.c.bf16 %v33198_v58, %v33186_v31 }
 0xdc6   : > { %v33199_v61 = vsub.f32 %v50531_v16, %v33198_v58 }
 0xdc7   : > { %54232 = vst [vmem:[#allocation10_spill] sm:$0xff] %v50550_v56  ;;  %54233 = vst [vmem:[#allocation9_spill] sm:$0xff] %v50552_v43  ;;  %v33192_v18 = vand.u32 4294901760, %v50552_v43  ;;  %33044 = vrot.lane.b32.xlu1 %v50554_v42, %s47436_s18  ;;  %45479 = vmatprep.subr.bf16.mxu1 %v45478_v20  ;;  %v33206_v25 = vand.u32 4294901760, %v33205_v22 }
 0xdc8   : > { %34265 = vrot.lane.b32.xlu0 %v50465_v28, %s47437_s19  ;;  %v33200_v63 = vand.u32 4294901760, %v33199_v61 }
 0xdc9   : > { %v33193_v46 = vsub.f32 %v50552_v43, %v33192_v18  ;;  %v45480_v37 = vpack.c.bf16 %v33204_v59, %v33192_v18 }
 0xdca   : > { %v50569_v1 = vpack.c.bf16 %v33200_v63, %v33188_v49  ;;  %v41519_v49 = vld [vmem:[%s53925_s9 + $0x30] sm:$0xff]  ;;  %v53955_v63 = vand.u32 4294901760, %v50499_v35 }
 0xdcb   : > { %v33194_v40 = vand.u32 4294901760, %v33193_v46  ;;  %33054 = vrot.lane.b32.xlu1 %v50562_v33, %s47436_s18  ;;  %45481 = vmatpush1.bf16.msra.mxu1 %v45480_v37 }
 0xdcc   : > { %54234 = vst [vmem:[#allocation14_spill] sm:$0xff] %v50569_v1  ;;  %34261 = vrot.lane.b32.xlu0 %v50473_v45, %s47437_s19 }
 0xdcd   : > { %v50573_v27 = vpack.c.bf16 %v33206_v25, %v33194_v40 }
 0xdcf   : > { %54235 = vst [vmem:[#allocation11_spill] sm:$0xff] %v50573_v27  ;;  %34257 = vrot.lane.b32.xlu1 %v50469_v34, %s47437_s19 }
 0xdd0   : > { %34277 = vrot.lane.b32.xlu0 %v50524_v10, %s47437_s19 }
 0xdd3   : > { %34263 = vrot.lane.b32.xlu1 %v50477_v8, %s47437_s19 }
 0xdd4   : > { %34271 = vrot.lane.b32.xlu0 %v50538_v19, %s47437_s19 }
 0xdd7   : > { %34255 = vrot.lane.b32.xlu1 %v50481_v14, %s47437_s19 }
 0xdd8   : > { %34273 = vrot.lane.b32.xlu0 %v50554_v42, %s47437_s19 }
 0xddb   : > { %34269 = vrot.lane.b32.xlu1 %v50487_v48, %s47437_s19 }
 0xddc   : > { %34283 = vrot.lane.b32.xlu0 %v50562_v33, %s47437_s19 }
 0xddf   : > { %34275 = vrot.lane.b32.xlu1 %v50502_v6, %s47437_s19 }
 0xde0   : > { %35486 = vrot.lane.b32.xlu0 %v50469_v34, %s47438_s22 }
 0xde3   : > { %34267 = vrot.lane.b32.xlu1 %v50491_v11, %s47437_s19 }
 0xde4   : > { %35492 = vrot.lane.b32.xlu0 %v50477_v8, %s47438_s22 }
 0xde7   : > { %34281 = vrot.lane.b32.xlu1 %v50511_v53, %s47437_s19 }
 0xde8   : > { %35484 = vrot.lane.b32.xlu0 %v50481_v14, %s47438_s22 }
 0xdeb   : > { %34279 = vrot.lane.b32.xlu1 %v50517_v60, %s47437_s19  ;;  %s47360_s19 = smul.u32 12, %s54773_s26 }
 0xdec   : > { %35498 = vrot.lane.b32.xlu0 %v50487_v48, %s47438_s22 }
 0xdef   : > { %35488 = vrot.lane.b32.xlu1 %v50460_v50, %s47438_s22 }
 0xdf0   : > { %35504 = vrot.lane.b32.xlu0 %v50502_v6, %s47438_s22 }
 0xdf3   : > { %35494 = vrot.lane.b32.xlu1 %v50465_v28, %s47438_s22 }
 0xdf4   : > { %35496 = vrot.lane.b32.xlu0 %v50491_v11, %s47438_s22 }
 0xdf7   : > { %35490 = vrot.lane.b32.xlu1 %v50473_v45, %s47438_s22 }
 0xdf8   : > { %35510 = vrot.lane.b32.xlu0 %v50511_v53, %s47438_s22 }
 0xdfb   : > { %35506 = vrot.lane.b32.xlu1 %v50524_v10, %s47438_s22  ;;  %v33039_v57 = vpop.permute.xlu0 %33038 }
 0xdfc   : > { %35508 = vrot.lane.b32.xlu0 %v50517_v60, %s47438_s22 }
 0xdff   : > { %35500 = vrot.lane.b32.xlu1 %v50538_v19, %s47438_s22  ;;  %v33041_v23 = vpop.permute.xlu0 %33040 }
 0xe00   : > { %v50626_v52 = vsel %vm3559_vm3, %v33039_v57, %v33041_v23  ;;  %29412 = vrot.lane.b32.xlu0 %v50460_v50, %s47434_s16 }
 0xe01   : > { %v53954_v7 = vand.u32 4294901760, %v50626_v52  ;;  %v54259_v55 = vand.u32 4294901760, %v50626_v52 }
 0xe03   : > { %v50634_v41 = vsub.f32 %v50626_v52, %v53954_v7  ;;  %35502 = vrot.lane.b32.xlu1 %v50554_v42, %s47438_s22 }
 0xe04   : > { %29418 = vrot.lane.b32.xlu0 %v50465_v28, %s47434_s16 }
 0xe05   : > { %54236 = vst [vmem:[#allocation19_spill] sm:$0xff] %v50634_v41  ;;  %v33216_v17 = vand.u32 4294901760, %v50634_v41 }
 0xe07   : > { %v50644_v2 = vsub.f32 %v50634_v41, %v33216_v17  ;;  %35512 = vrot.lane.b32.xlu1 %v50562_v33, %s47438_s22 }
 0xe08   : > { %29414 = vrot.lane.b32.xlu0 %v50473_v45, %s47434_s16 }
 0xe0b   : > { %29410 = vrot.lane.b32.xlu1 %v50469_v34, %s47434_s16 }
 0xe0c   : > { %29430 = vrot.lane.b32.xlu0 %v50524_v10, %s47434_s16 }
 0xe0f   : > { %29416 = vrot.lane.b32.xlu1 %v50477_v8, %s47434_s16 }
 0xe10   : > { %29424 = vrot.lane.b32.xlu0 %v50538_v19, %s47434_s16 }
 0xe13   : > { %29408 = vrot.lane.b32.xlu1 %v50481_v14, %s47434_s16 }
 0xe14   : > { %29426 = vrot.lane.b32.xlu0 %v50554_v42, %s47434_s16 }
 0xe17   : > { %29422 = vrot.lane.b32.xlu1 %v50487_v48, %s47434_s16 }
 0xe18   : > { %29436 = vrot.lane.b32.xlu0 %v50562_v33, %s47434_s16 }
 0xe1b   : > { %29428 = vrot.lane.b32.xlu1 %v50502_v6, %s47434_s16 }
 0xe1c   : > { %36715 = vrot.lane.b32.xlu0 %v50469_v34, %s47439_s29 }
 0xe1f   : > { %29420 = vrot.lane.b32.xlu1 %v50491_v11, %s47434_s16 }
 0xe20   : > { %36721 = vrot.lane.b32.xlu0 %v50477_v8, %s47439_s29 }
 0xe23   : > { %29434 = vrot.lane.b32.xlu1 %v50511_v53, %s47434_s16 }
 0xe24   : > { %36713 = vrot.lane.b32.xlu0 %v50481_v14, %s47439_s29 }
 0xe27   : > { %29432 = vrot.lane.b32.xlu1 %v50517_v60, %s47434_s16  ;;  %s54241_s16 = smov 91  }
 0xe28   : > { %36727 = vrot.lane.b32.xlu0 %v50487_v48, %s47439_s29 }
 0xe29   : > { %v33047_v5 = vpop.permute.xlu0 %33046 }
 0xe2b   : > { %36717 = vrot.lane.b32.xlu1 %v50460_v50, %s47439_s29 }
 0xe2c   : > { %36733 = vrot.lane.b32.xlu0 %v50502_v6, %s47439_s29 }
 0xe2d   : > { %v33053_v54 = vpop.permute.xlu0 %33052 }
 0xe2f   : > { %36723 = vrot.lane.b32.xlu1 %v50465_v28, %s47439_s29 }
 0xe30   : > { %36725 = vrot.lane.b32.xlu0 %v50491_v11, %s47439_s29 }
 0xe31   : > { %v50690_v32 = vpop.permute.xlu1 %33048  ;;  %v33051_v51 = vpop.permute.xlu0 %33050 }
 0xe32   : > { %v50694_v9 = vsel %vm3559_vm3, %v33047_v5, %v50690_v32  ;;  %v33064_v30 = vsel %vm3559_vm3, %v33051_v51, %v33053_v54 }
 0xe33   : > { %v53957_v0 = vand.u32 4294901760, %v50694_v9  ;;  %36719 = vrot.lane.b32.xlu1 %v50473_v45, %s47439_s29  ;;  %v50746_v61 = vand.u32 4294901760, %v33064_v30 }
 0xe34   : > { %36739 = vrot.lane.b32.xlu0 %v50511_v53, %s47439_s29 }
 0xe35   : > { %v50704_v36 = vsub.f32 %v50694_v9, %v53957_v0  ;;  %v50706_v39 = vpop.permute.xlu1 %33042  ;;  %v50708_v15 = vpop.permute.xlu0 %34259  ;;  %54243 = vst [vmem:[#allocation5_spill] sm:$0xff] %v50746_v61  ;;  %v50776_v21 = vsub.f32 %v33064_v30, %v50746_v61 }
 0xe36   : > { %54238 = vst [vmem:[#allocation16_spill] sm:$0xff] %v50708_v15  ;;  %v50712_v12 = vsel %vm3559_vm3, %v33041_v23, %v50706_v39  ;;  %v53956_v40 = vand.u32 4294901760, %v50706_v39  ;;  %v50759_v23 = vsub.f32 %v50509_v24, %v53952_v3 }
 0xe37   : > { %54237 = vst [vmem:[#allocation13_spill] sm:$0xff] %v50704_v36  ;;  %v53959_v44 = vand.u32 4294901760, %v50712_v12  ;;  %36735 = vrot.lane.b32.xlu1 %v50524_v10, %s47439_s29  ;;  %v33222_v29 = vand.u32 4294901760, %v50704_v36  ;;  %54245 = vst [vmem:[#allocation3_spill] sm:$0xff] %v50776_v21 }
 0xe38   : > { %36737 = vrot.lane.b32.xlu0 %v50517_v60, %s47439_s29 }
 0xe39   : > { %v50723_v31 = vsub.f32 %v50712_v12, %v53959_v44  ;;  %v33045_v26 = vpop.permute.xlu1 %33044  ;;  %v50726_v62 = vsub.f32 %v50704_v36, %v33222_v29 }
 0xe3a   : > { %v50729_v59 = vsel %vm3559_vm3, %v33045_v26, %v33047_v5  ;;  %v50732_v58 = vpop.permute.xlu0 %34265  ;;  %v50772_v26 = vsel %vm29463_vm14, %v41519_v49, 0  ;;  %v50793_v49 = vsub.f32 %v50706_v39, %v53956_v40 }
 0xe3b   : > { %54239 = vst [vmem:[#allocation15_spill] sm:$0xff] %v50723_v31  ;;  %54240 = vst [vmem:[#allocation17_spill] sm:$0xff] %v50732_v58  ;;  %v53953_v22 = vand.u32 4294901760, %v50729_v59  ;;  %36729 = vrot.lane.b32.xlu1 %v50538_v19, %s47439_s29  ;;  %v33210_v20 = vand.u32 4294901760, %v50723_v31  ;;  %v50811_v0 = vand.u32 4294901760, %v50772_v26  ;;  %v54260_v38 = vand.u32 4294901760, %v50729_v59 }
 0xe3c   : > { %37946 = vrot.lane.b32.xlu0 %v50460_v50, %s54241_s16 }
 0xe3d   : > { %v50744_v18 = vsub.f32 %v50729_v59, %v53953_v22  ;;  %v33055_v46 = vpop.permute.xlu1 %33054  ;;  %v45482_v37 = vpack.c.bf16 %v33222_v29, %v33210_v20  ;;  %v50788_v22 = vsub.f32 %v50499_v35, %v53955_v63  ;;  %v33218_v63 = vand.u32 4294901760, %v50644_v2  ;;  %54248 = vst [vmem:[#allocation22_spill] sm:$0xff] %v50811_v0 }
 0xe3e   : > { %v33065_v25 = vsel %vm3559_vm3, %v33053_v54, %v33055_v46  ;;  %v50754_v57 = vpop.permute.xlu0 %34261  ;;  %v53958_v54 = vand.u32 4294901760, %v50690_v32  ;;  %v50830_v41 = vand.u32 4294901760, %v33055_v46 }
 0xe3f   : > { %54242 = vst [vmem:[#allocation18_spill] sm:$0xff] %v50744_v18  ;;  %v33228_v5 = vand.u32 4294901760, %v50744_v18  ;;  %v50764_v29 = vand.u32 4294901760, %v33065_v25  ;;  %36731 = vrot.lane.b32.xlu1 %v50554_v42, %s47439_s29  ;;  %45483 = vmatprep.subr.bf16.mxu1 %v45482_v37 }
 0xe40   : > { %37952 = vrot.lane.b32.xlu0 %v50465_v28, %s54241_s16  ;;  %v50808_v40 = vsub.f32 %v50690_v32, %v53958_v54  ;;  %54250 = vst [vmem:[#allocation24_spill] sm:$0xff] %v50830_v41 }
 0xe41   : > { %54244 = vst [vmem:[#allocation4_spill] sm:$0xff] %v50764_v29  ;;  %v33229_v4 = vsub.f32 %v50744_v18, %v33228_v5  ;;  %v50779_v51 = vsub.f32 %v33065_v25, %v50764_v29  ;;  %v50781_v3 = vpop.permute.xlu1 %34257  ;;  %v45484_v37 = vpack.c.bf16 %v33228_v5, %v33216_v17  ;;  %v41520_v25 = vld [vmem:[%s53925_s9 + $0x38] sm:$0xff]  ;;  %v53964_v5 = vand.u32 4294901760, %v50776_v21 }
 0xe42   : > { %v50795_v30 = vpop.permute.xlu0 %34277  ;;  %v50826_v54 = vsel %vm29463_vm14, %v41520_v25, 0 }
 0xe43   : > { %54246 = vst [vmem:[#allocation20_spill] sm:$0xff] %v50779_v51  ;;  %54247 = vst [vmem:[#allocation21_spill] sm:$0xff] %v50795_v30  ;;  %v33230_v7 = vand.u32 4294901760, %v33229_v4  ;;  %36741 = vrot.lane.b32.xlu1 %v50562_v33, %s47439_s29  ;;  %45485 = vmatpush1.bf16.msra.mxu1 %v45484_v37  ;;  %v53962_v17 = vand.u32 4294901760, %v50779_v51  ;;  %v50816_v4 = vsub.f32 %v50723_v31, %v33210_v20  ;;  %v54256_v37 = vand.u32 4294901760, %v50759_v23  ;;  %s460_s29 = scalar_lea.vmem %s53929_s13, %s47360_s19 }
 0xe44   : > { %37948 = vrot.lane.b32.xlu0 %v50473_v45, %s54241_s16  ;;  %v54258_v31 = vand.u32 4294901760, %v50793_v49 }
 0xe45   : > { %v50821_v2 = vpop.permute.xlu1 %34263  ;;  %33542 = vmatprep.subr.mxu1 %v53962_v17  ;;  %v50828_v44 = vpack.c.bf16 %v33230_v7, %v33218_v63  ;;  %v54252_v7 = vand.u32 4294901760, %v50712_v12  ;;  %v54253_v63 = vand.u32 4294901760, %v50694_v9  ;;  %v50849_v17 = vand.u32 4294901760, %v50826_v54  ;;  %v41522_v9 = vld [vmem:[%s53925_s9 + $0x48] sm:$0xff] }
 0xe46   : > { %v50832_v18 = vpop.permute.xlu0 %34271  ;;  %v33806_v20 = vsub.f32 %v50759_v23, %v54256_v37  ;;  %v50863_v12 = vsub.f32 %v33055_v46, %v50830_v41  ;;  %v33813_v43 = vsub.f32 %v50793_v49, %v54258_v31  ;;  %v50879_v46 = vpack.c.bf16 %v54260_v38, %v54259_v55 }
 0xe47   : > { %54249 = vst [vmem:[#allocation23_spill] sm:$0xff] %v50828_v44  ;;  %54251 = vst [vmem:[#allocation25_spill] sm:$0xff] %v50832_v18  ;;  %37944 = vrot.lane.b32.xlu1 %v50469_v34, %s54241_s16  ;;  %33546 = vmatpush1.msra.mxu1 %v53964_v5  ;;  %v50846_v25 = vpack.c.bf16 %v54253_v63, %v54252_v7  ;;  %v41521_v5 = vld [vmem:[%s53925_s9 + $0x40] sm:$0xff]  ;;  %v54257_v7 = vand.u32 4294901760, %v50788_v22  ;;  %v54262_v44 = vand.u32 4294901760, %v50808_v40  ;;  %v34314_v52 = vsel %vm29463_vm14, %v41522_v9, 0 }
 0xe48   : > { %45487 = vmatprep.subr.bf16.mxu1 %v50535_v47  ;;  %33603 = vmatmul.mubr.f32.vlgmr.msra.gmra.mrb[8].mxu1 %v50811_v0  ;;  %54255 = vst [vmem:[#allocation27_spill] sm:$0xff] %v50849_v17  ;;  %54261 = vst [vmem:[#allocation28_spill] sm:$0xff] %v50879_v46  ;;  %v34311_v16 = vsel %vm29463_vm14, %v41521_v5, 0  ;;  %v33814_v55 = vand.u32 4294901760, %v33813_v43 }
 0xe49   : > { %54254 = vst [vmem:[#allocation26_spill] sm:$0xff] %v50846_v25  ;;  %v34256_v36 = vpop.permute.xlu1 %34255  ;;  %45489 = vmatpush1.bf16.msra.mxu1 %v50550_v56  ;;  %33608 = vmatprep.mubr.f32.mxu1 %v50264_v13  ;;  %v33799_v63 = vsub.f32 %v50788_v22, %v54257_v7  ;;  %v33807_v7 = vand.u32 4294901760, %v33806_v20  ;;  %v33820_v31 = vsub.f32 %v50808_v40, %v54262_v44  ;;  %v50899_v20 = vand.u32 4294901760, %v50863_v12 }
 0xe4a   : > { %45491 = vmatprep.subr.bf16.mxu1 %v50846_v25  ;;  %v50867_v37 = vpop.permute.xlu0 %34273  ;;  %37964 = vrot.lane.b32.xlu0 %v50524_v10, %s54241_s16  ;;  %v50901_v21 = vand.u32 4294901760, %v34311_v16  ;;  %v50907_v44 = vand.u32 4294901760, %v34314_v52 }
 0xe4b   : > { %37950 = vrot.lane.b32.xlu1 %v50477_v8, %s54241_s16  ;;  %v33800_v38 = vand.u32 4294901760, %v33799_v63  ;;  %v33821_v27 = vand.u32 4294901760, %v33820_v31  ;;  %v33212_v63 = vand.u32 4294901760, %v50816_v4  ;;  %v33827_v1 = vsub.f32 %v50863_v12, %v50899_v20 }
 0xe4c   : > { %33610 = vmatmul.mubr.f32.gmra.mrb[10].mxu1 %v50849_v17  ;;  %54263 = vst [vmem:[#allocation29_spill] sm:$0xff] %v50901_v21  ;;  %54264 = vst [vmem:[#allocation30_spill] sm:$0xff] %v50907_v44  ;;  %v50925_v4 = vsub.f32 %v34314_v52, %v50907_v44  ;;  %v50947_v52 = vsel %vm4589_vm4, %v50821_v2, %v50732_v58 }
 0xe4d   : > { %v50891_v59 = vpop.permute.xlu1 %34269  ;;  %45493 = vmatpush1.bf16.msra.mxu1 %v50879_v46  ;;  %33690 = vmatprep.mubr.f32.mxu1 %v50264_v13  ;;  %v45502_v9 = vpack.c.bf16 %v33807_v7, %v33800_v38  ;;  %v45506_v51 = vpack.c.bf16 %v33821_v27, %v33814_v55  ;;  %v50919_v46 = vsub.f32 %v34311_v16, %v50901_v21  ;;  %v33224_v7 = vand.u32 4294901760, %v50726_v62 }
 0xe4e   : > { %33633 = vmatprep.subr.mxu1 %v50764_v29  ;;  %v50896_v5 = vpop.permute.xlu0 %34283  ;;  %37958 = vrot.lane.b32.xlu0 %v50538_v19, %s54241_s16  ;;  %54266 = vst [vmem:[#allocation32_spill] sm:$0xff] %v50925_v4  ;;  %v50930_v27 = vsel %vm4589_vm4, %v50781_v3, %v50708_v15  ;;  %v50939_v62 = vsel %vm4589_vm4, %v50754_v57, %v50821_v2  ;;  %v33828_v55 = vand.u32 4294901760, %v33827_v1  ;;  %v50963_v2 = vand.u32 4294901760, %v50925_v4  ;;  %v41515_v1 = vld [vmem:[%s53925_s9 + $0x10] sm:$0xff] }
 0xe4f   : > { %37942 = vrot.lane.b32.xlu1 %v50481_v14, %s54241_s16  ;;  %54265 = vst [vmem:[#allocation31_spill] sm:$0xff] %v50919_v46  ;;  %v50934_v16 = vpack.c.bf16 %v33224_v7, %v33212_v63  ;;  %v50951_v38 = vsel %vm4589_vm4, %v34256_v36, %v50781_v3  ;;  %v50957_v57 = vand.u32 4294901760, %v50919_v46  ;;  %v34320_v3 = vand.u32 4294901760, %v50947_v52 }
 0xe50   : > { %54269 = vst [vmem:[#allocation35_spill] sm:$0xff] %v50963_v2  ;;  %v34318_v7 = vand.u32 4294901760, %v50951_v38  ;;  %v29465_v25 = vsel %vm29463_vm14, %v41515_v1, 0  ;;  %v54271_v56 = vand.u32 4294901760, %v50930_v27  ;;  %v45514_v15 = vpack.c.bf16 %v50808_v40, %v50793_v49 }
 0xe51   : > { %v50910_v43 = vpop.permute.xlu1 %34275  ;;  %33635 = vmatpush1.msra.mxu1 %v50746_v61  ;;  %54267 = vst [vmem:[#allocation33_spill] sm:$0xff] %v50934_v16  ;;  %54268 = vst [vmem:[#allocation34_spill] sm:$0xff] %v50957_v57  ;;  %v50980_v61 = vsub.f32 %v50772_v26, %v50811_v0  ;;  %v34394_v36 = vsub.f32 %v50919_v46, %v50957_v57  ;;  %v34405_v26 = vsub.f32 %v50925_v4, %v50963_v2 }
 0xe52   : > { %45503 = vmatprep.subr.bf16.mxu1 %v45502_v9  ;;  %33692 = vmatmul.mubr.f32.vlgmr.msra.gmra.mrb[8].mxu1 %v50811_v0  ;;  %v50916_v29 = vpop.permute.xlu0 %35486  ;;  %v50988_v47 = vsub.f32 %v50930_v27, %v54271_v56  ;;  %v54273_v58 = vand.u32 4294901760, %v50939_v62  ;;  %v51004_v56 = vsel %vm4589_vm4, %v50891_v59, %v50832_v18  ;;  %v51012_v1 = vsub.f32 %v50947_v52, %v34320_v3 }
 0xe53   : > { %37956 = vrot.lane.b32.xlu1 %v50487_v48, %s54241_s16  ;;  %45505 = vmatpush3.bf16.msra.mxu1 %v45502_v9  ;;  %54270 = vst [vmem:[#allocation36_spill] sm:$0xff] %v50980_v61  ;;  %v51015_v2 = vsub.f32 %v50951_v38, %v34318_v7  ;;  %v51023_v4 = vsub.f32 %v50826_v54, %v50849_v17  ;;  %v51025_v18 = vand.u32 4294901760, %v29465_v25  ;;  %v54281_v52 = vand.u32 4294901760, %v50509_v24 }
 0xe54   : > { %45507 = vmatprep.subr.bf16.mxu1 %v45506_v51  ;;  %37960 = vrot.lane.b32.xlu0 %v50554_v42, %s54241_s16  ;;  %54272 = vst [vmem:[#allocation37_spill] sm:$0xff] %v50988_v47  ;;  %v50999_v57 = vsub.f32 %v50939_v62, %v54273_v58  ;;  %54275 = vst [vmem:[#allocation39_spill] sm:$0xff] %v51012_v1  ;;  %v54285_v54 = vand.u32 4294901760, %v50759_v23  ;;  %v54290_v21 = vand.u32 4294901760, %v50690_v32 }
 0xe55   : > { %v50941_v31 = vpop.permute.xlu1 %34267  ;;  %33697 = vmatprep.mubr.f32.mxu1 %v50264_v13  ;;  %54276 = vst [vmem:[#allocation40_spill] sm:$0xff] %v51015_v2  ;;  %54278 = vst [vmem:[#allocation41_spill] sm:$0xff] %v51023_v4 }
 0xe56   : > { %33699 = vmatmul.mubr.f32.gmra.mrb[10].mxu1 %v50849_v17  ;;  %v50954_v9 = vpop.permute.xlu0 %35492  ;;  %54274 = vst [vmem:[#allocation38_spill] sm:$0xff] %v50999_v57  ;;  %54279 = vst [vmem:[#allocation42_spill] sm:$0xff] %v51025_v18 }
 0xe57   : > { %37962 = vrot.lane.b32.xlu1 %v50502_v6, %s54241_s16  ;;  %45509 = vmatpush3.bf16.msra.mxu1 %v45506_v51  ;;  %v45510_v51 = vpack.c.bf16 %v50759_v23, %v50788_v22 }
 0xe58   : > { %43805 = vmatprep.subr.mxu1 %v33828_v55  ;;  %37970 = vrot.lane.b32.xlu0 %v50562_v33, %s54241_s16 }
 0xe59   : > { %v50973_v63 = vpop.permute.xlu1 %34281  ;;  %43807 = vmatprep.mubr.f32.mxu1 %v50811_v0 }
 0xe5a   : > { %v35485_v16 = vpop.permute.xlu0 %35484 }
 0xe5b   : > { %37954 = vrot.lane.b32.xlu1 %v50491_v11, %s54241_s16  ;;  %43806 = vmatpush3.msra.mxu1 %v33828_v55  ;;  %v51009_v55 = vsel %vm5619_vm5, %v35485_v16, %v50916_v29  ;;  %v54280_v16 = vand.u32 4294901760, %v50499_v35  ;;  %v51048_v35 = vand.u32 4294901760, %v51023_v4 }
 0xe5c   : > { %45511 = vmatprep.subr.bf16.mxu1 %v45510_v51  ;;  %43808 = vmatmul.mubr.f32.vlgmr.msra.gmra.mrb[12].mxu1 %v50849_v17  ;;  %v54010_v23 = vand.u32 4294901760, %v51009_v55 }
 0xe5d   : > { %v51017_v58 = vpop.permute.xlu1 %34279  ;;  %45513 = vmatpush3.bf16.msra.mxu1 %v45510_v51  ;;  %31799 = vrot.lane.b32.xlu0 %v50469_v34, %s54277_s27  ;;  %v51031_v46 = vpack.c.bf16 %v54281_v52, %v54280_v16  ;;  %v51037_v51 = vand.u32 4294901760, %v50980_v61  ;;  %v54284_v34 = vand.u32 4294901760, %v50788_v22  ;;  %54286 = vst [vmem:[#allocation45_spill] sm:$0xff] %v51048_v35  ;;  %v51051_v16 = vand.u32 4294901760, %v34394_v36 }
 0xe5e   : > { %45515 = vmatprep.subr.bf16.mxu1 %v45514_v15  ;;  %v51033_v38 = vpop.permute.xlu0 %35498  ;;  %43820 = vmatprep.mubr.f32.mxu1 %v50980_v61  ;;  %v51053_v52 = vand.u32 4294901760, %v34405_v26  ;;  %v51059_v22 = vsel %vm4589_vm4, %v50910_v43, %v50795_v30  ;;  %v51074_v30 = vsub.f32 %v29465_v25, %v51025_v18 }
 0xe5f   : > { %54282 = vst [vmem:[#allocation43_spill] sm:$0xff] %v51031_v46  ;;  %54283 = vst [vmem:[#allocation44_spill] sm:$0xff] %v51037_v51  ;;  %v51043_v44 = vpack.c.bf16 %v54285_v54, %v54284_v34  ;;  %37968 = vrot.lane.b32.xlu1 %v50511_v53, %s54241_s16  ;;  %v54289_v54 = vand.u32 4294901760, %v50706_v39  ;;  %v51079_v39 = vsel %vm4589_vm4, %v50867_v37, %v50910_v43  ;;  %v34328_v25 = vand.u32 4294901760, %v51059_v22 }
 0xe60   : > { %54287 = vst [vmem:[#allocation46_spill] sm:$0xff] %v51051_v16  ;;  %54288 = vst [vmem:[#allocation47_spill] sm:$0xff] %v51053_v52  ;;  %v54295_v37 = vand.u32 4294901760, %v50930_v27  ;;  %v54296_v43 = vand.u32 4294901760, %v51004_v56  ;;  %v51116_v27 = vsub.f32 %v51009_v55, %v54010_v23 }
 0xe61   : > { %v51067_v24 = vpack.c.bf16 %v54290_v21, %v54289_v54  ;;  %v35489_v26 = vpop.permute.xlu1 %35488  ;;  %45517 = vmatpush3.bf16.msra.mxu1 %v45514_v15  ;;  %31805 = vrot.lane.b32.xlu0 %v50477_v8, %s54277_s27  ;;  %54292 = vst [vmem:[#allocation49_spill] sm:$0xff] %v51074_v30  ;;  %v54293_v8 = vand.u32 4294901760, %v50793_v49  ;;  %v54294_v54 = vand.u32 4294901760, %v50808_v40  ;;  %v54298_v49 = vand.u32 4294901760, %v50999_v57 }
 0xe62   : > { %v35515_v21 = vsel %vm5619_vm5, %v50916_v29, %v35489_v26  ;;  %v36164_v32 = vand.u32 4294901760, %v35489_v26  ;;  %43818 = vmatprep.subr.mxu1 %v50863_v12  ;;  %v51084_v15 = vpop.permute.xlu0 %35504  ;;  %v51097_v29 = vpack.c.bf16 %v34320_v3, %v54295_v37  ;;  %v51102_v34 = vsub.f32 %v51004_v56, %v54296_v43  ;;  %54300 = vst [vmem:[#allocation51_spill] sm:$0xff] %v51116_v27 }
 0xe63   : > { %54291 = vst [vmem:[#allocation48_spill] sm:$0xff] %v51067_v24  ;;  %v51090_v61 = vpack.c.bf16 %v54294_v54, %v54293_v8  ;;  %v35545_v36 = vand.u32 4294901760, %v35515_v21  ;;  %37966 = vrot.lane.b32.xlu1 %v50517_v60, %s54241_s16  ;;  %v51107_v40 = vsub.f32 %v50999_v57, %v54298_v49  ;;  %v54299_v8 = vand.u32 4294901760, %v50939_v62 }
 0xe64   : > { %54297 = vst [vmem:[#allocation50_spill] sm:$0xff] %v51102_v34  ;;  %v54301_v3 = vand.u32 4294901760, %v50988_v47  ;;  %v54302_v43 = vand.u32 4294901760, %v51015_v2  ;;  %v36255_v23 = vsub.f32 %v35489_v26, %v36164_v32  ;;  %v35650_v26 = vand.u32 4294901760, %v51116_v27 }
 0xe65   : > { %v51111_v54 = vpack.c.bf16 %v54299_v8, %v34318_v7  ;;  %v51129_v62 = vsub.f32 %v35515_v21, %v35545_v36  ;;  %v35495_v7 = vpop.permute.xlu1 %35494  ;;  %43819 = vmatpush3.msra.mxu1 %v50863_v12  ;;  %31797 = vrot.lane.b32.xlu0 %v50481_v14, %s54277_s27  ;;  %v54304_v8 = vand.u32 4294901760, %v51012_v1  ;;  %v51149_v12 = vsub.f32 %v51059_v22, %v34328_v25 }
 0xe66   : > { %v51121_v37 = vsub.f32 %v50988_v47, %v54301_v3  ;;  %v51126_v18 = vsub.f32 %v51015_v2, %v54302_v43  ;;  %v51142_v43 = vsel %vm4589_vm4, %v50941_v31, %v50891_v59  ;;  %v35517_v21 = vsel %vm5619_vm5, %v50954_v9, %v35495_v7  ;;  %45519 = vmatprep.subr.bf16.mxu1 %v51031_v46  ;;  %v35497_v14 = vpop.permute.xlu0 %35496 }
 0xe67   : > { %54303 = vst [vmem:[#allocation52_spill] sm:$0xff] %v51129_v62  ;;  %v51137_v3 = vsub.f32 %v51012_v1, %v54304_v8  ;;  %v36167_v49 = vand.u32 4294901760, %v35495_v7  ;;  %43821 = vmatmul.mubr.f32.vlgmr.msra.gmra.mrb[12].mxu1 %v51023_v4  ;;  %v35549_v8 = vand.u32 4294901760, %v35517_v21  ;;  %31801 = vrot.lane.b32.xlu1 %v50460_v50, %s54277_s27  ;;  %v51156_v59 = vsel %vm5619_vm5, %v35497_v14, %v51033_v38 }
 0xe68   : > { %45521 = vmatpush3.bf16.msra.mxu1 %v51031_v46  ;;  %43833 = vmatprep.mubr.f32.mxu1 %v51037_v51  ;;  %v35644_v22 = vand.u32 4294901760, %v51129_v62  ;;  %v54306_v2 = vand.u32 4294901760, %v51079_v39 }
 0xe69   : > { %v51160_v57 = vpack.c.bf16 %v36167_v49, %v36164_v32  ;;  %v36262_v4 = vsub.f32 %v35495_v7, %v36167_v49  ;;  %45523 = vmatprep.subr.bf16.mxu1 %v51067_v24  ;;  %v51171_v47 = vsub.f32 %v35517_v21, %v35549_v8  ;;  %v35491_v31 = vpop.permute.xlu1 %35490  ;;  %31811 = vrot.lane.b32.xlu0 %v50487_v48, %s54277_s27  ;;  %v36256_v49 = vand.u32 4294901760, %v36255_v23 }
 0xe6a   : > { %v51168_v1 = vsub.f32 %v51079_v39, %v54306_v2  ;;  %v51175_v32 = vpack.c.bf16 %v35549_v8, %v35545_v36  ;;  %v35516_v51 = vsel %vm5619_vm5, %v35491_v31, %v50954_v9  ;;  %v51180_v30 = vpop.permute.xlu0 %35510  ;;  %v54309_v21 = vand.u32 4294901760, %v51004_v56 }
 0xe6b   : > { %54305 = vst [vmem:[#allocation53_spill] sm:$0xff] %v51160_v57  ;;  %54307 = vst [vmem:[#allocation54_spill] sm:$0xff] %v51171_v47  ;;  %v36263_v7 = vand.u32 4294901760, %v36262_v4  ;;  %v35551_v2 = vand.u32 4294901760, %v35516_v51  ;;  %31807 = vrot.lane.b32.xlu1 %v50465_v28, %s54277_s27  ;;  %v35656_v36 = vand.u32 4294901760, %v51171_v47  ;;  %v51193_v9 = vsub.f32 %v51116_v27, %v35650_v26 }
 0xe6c   : > { %54308 = vst [vmem:[#allocation55_spill] sm:$0xff] %v51175_v32  ;;  %45525 = vmatpush3.bf16.msra.mxu1 %v51067_v24  ;;  %v51187_v48 = vpack.c.bf16 %v34328_v25, %v54309_v21  ;;  %v35645_v31 = vsub.f32 %v51129_v62, %v35644_v22  ;;  %v51197_v57 = vpack.c.bf16 %v36262_v4, %v36255_v23  ;;  %v54312_v56 = vand.u32 4294901760, %v51009_v55 }
 0xe6d   : > { %43831 = vmatprep.subr.mxu1 %v50830_v41  ;;  %v51199_v28 = vpack.c.bf16 %v36263_v7, %v36256_v49  ;;  %v51205_v21 = vsub.f32 %v35516_v51, %v35551_v2  ;;  %v35507_v14 = vpop.permute.xlu1 %35506  ;;  %31817 = vrot.lane.b32.xlu0 %v50502_v6, %s54277_s27  ;;  %v35657_v8 = vsub.f32 %v51171_v47, %v35656_v36  ;;  %v54316_v62 = vand.u32 4294901760, %v51142_v43 }
 0xe6e   : > { %54310 = vst [vmem:[#allocation56_spill] sm:$0xff] %v51197_v57  ;;  %v51203_v25 = vpack.c.bf16 %v35551_v2, %v54312_v56  ;;  %v51210_v32 = vpack.c.bf16 %v35656_v36, %v35644_v22  ;;  %v35521_v55 = vsel %vm5619_vm5, %v51084_v15, %v35507_v14  ;;  %v54317_v56 = vand.u32 4294901760, %v51156_v59  ;;  %v35509_v2 = vpop.permute.xlu0 %35508 }
 0xe6f   : > { %54311 = vst [vmem:[#allocation57_spill] sm:$0xff] %v51199_v28  ;;  %54314 = vst [vmem:[#allocation59_spill] sm:$0xff] %v51205_v21  ;;  %v51215_v57 = vsub.f32 %v51142_v43, %v54316_v62  ;;  %v54319_v6 = vand.u32 4294901760, %v51102_v34  ;;  %v35662_v22 = vand.u32 4294901760, %v51205_v21  ;;  %v35557_v36 = vand.u32 4294901760, %v35521_v55  ;;  %31803 = vrot.lane.b32.xlu1 %v50473_v45, %s54277_s27 }
 0xe70   : > { %54313 = vst [vmem:[#allocation58_spill] sm:$0xff] %v51203_v25  ;;  %54315 = vst [vmem:[#allocation60_spill] sm:$0xff] %v51210_v32  ;;  %v51222_v51 = vsub.f32 %v51156_v59, %v54317_v56  ;;  %43832 = vmatpush3.msra.mxu1 %v50830_v41  ;;  %v51237_v56 = vsel %vm5619_vm5, %v35509_v2, %v51180_v30  ;;  %v35652_v32 = vand.u32 4294901760, %v51193_v9  ;;  %v35646_v2 = vand.u32 4294901760, %v35645_v31 }
 0xe71   : > { %v51227_v28 = vsub.f32 %v51102_v34, %v54319_v6  ;;  %54320 = vst [vmem:[#allocation62_spill] sm:$0xff] %v51237_v56  ;;  %45527 = vmatprep.subr.bf16.mxu1 %v51043_v44  ;;  %43834 = vmatmul.mubr.f32.vlgmr.msra.gmra.mrb[12].mxu1 %v51048_v35  ;;  %v35658_v6 = vand.u32 4294901760, %v35657_v8  ;;  %v36257_v47 = vsub.f32 %v36255_v23, %v36256_v49  ;;  %v35501_v45 = vpop.permute.xlu1 %35500  ;;  %v36173_v9 = vand.u32 4294901760, %v35507_v14 }
 0xe72   : > { %54318 = vst [vmem:[#allocation61_spill] sm:$0xff] %v51222_v51  ;;  %v36264_v25 = vsub.f32 %v36262_v4, %v36263_v7  ;;  %v35663_v62 = vsub.f32 %v51205_v21, %v35662_v22  ;;  %v51243_v27 = vsub.f32 %v35521_v55, %v35557_v36  ;;  %45529 = vmatpush3.bf16.msra.mxu1 %v51043_v44  ;;  %v36170_v4 = vand.u32 4294901760, %v35501_v45  ;;  %v51254_v49 = vpop.permute.xlu0 %29412 }
 0xe73   : > { %31809 = vrot.lane.b32.xlu0 %v50491_v11, %s54277_s27  ;;  %v51248_v56 = vpack.c.bf16 %v35662_v22, %v35650_v26  ;;  %v35519_v23 = vsel %vm5619_vm5, %v51033_v38, %v35501_v45  ;;  %45531 = vmatprep.subr.bf16.mxu1 %v51090_v61  ;;  %v30089_v11 = vand.u32 4294901760, %v51254_v49  ;;  %v51260_v26 = vpack.c.bf16 %v35658_v6, %v35646_v2 }
 0xe74   : > { %54321 = vst [vmem:[#allocation63_spill] sm:$0xff] %v51243_v27  ;;  %43846 = vmatprep.mubr.f32.mxu1 %v50811_v0  ;;  %v35664_v44 = vand.u32 4294901760, %v35663_v62  ;;  %v35553_v7 = vand.u32 4294901760, %v35519_v23  ;;  %31819 = vrot.lane.b32.xlu1 %v50524_v10, %s54277_s27  ;;  %v51262_v8 = vpack.c.bf16 %v36173_v9, %v36170_v4  ;;  %v51264_v31 = vsub.f32 %v35501_v45, %v36170_v4 }
 0xe75   : > { %54322 = vst [vmem:[#allocation64_spill] sm:$0xff] %v51248_v56  ;;  %54323 = vst [vmem:[#allocation65_spill] sm:$0xff] %v51260_v26  ;;  %v35680_v38 = vand.u32 4294901760, %v51243_v27  ;;  %v36265_v55 = vand.u32 4294901760, %v36264_v25  ;;  %v35503_v34 = vpop.permute.xlu1 %35502  ;;  %v30180_v10 = vsub.f32 %v51254_v49, %v30089_v11  ;;  %v36258_v6 = vand.u32 4294901760, %v36257_v47 }
 0xe76   : > { %54324 = vst [vmem:[#allocation66_spill] sm:$0xff] %v51262_v8  ;;  %v51267_v22 = vsub.f32 %v35519_v23, %v35553_v7  ;;  %45533 = vmatpush3.bf16.msra.mxu1 %v51090_v61  ;;  %v51273_v62 = vpack.c.bf16 %v35557_v36, %v35553_v7  ;;  %v51275_v2 = vsub.f32 %v35507_v14, %v36173_v9  ;;  %v54327_v45 = vand.u32 4294901760, %v51222_v51  ;;  %v51285_v61 = vpop.permute.xlu0 %29418 }
 0xe77   : > { %31823 = vrot.lane.b32.xlu0 %v50511_v53, %s54277_s27  ;;  %v35520_v25 = vsel %vm5619_vm5, %v35503_v34, %v51084_v15  ;;  %43844 = vmatprep.subr.mxu1 %v50899_v20  ;;  %v51287_v53 = vpack.c.bf16 %v35664_v44, %v35652_v32  ;;  %v30181_v47 = vand.u32 4294901760, %v30180_v10  ;;  %v30092_v14 = vand.u32 4294901760, %v51285_v61 }
 0xe78   : > { %54325 = vst [vmem:[#allocation67_spill] sm:$0xff] %v51267_v22  ;;  %54326 = vst [vmem:[#allocation68_spill] sm:$0xff] %v51273_v62  ;;  %v51280_v4 = vsub.f32 %v51222_v51, %v54327_v45  ;;  %v35559_v23 = vand.u32 4294901760, %v35520_v25  ;;  %31813 = vrot.lane.b32.xlu1 %v50538_v19, %s54277_s27  ;;  %v35668_v36 = vand.u32 4294901760, %v51267_v22  ;;  %v35681_v7 = vsub.f32 %v51243_v27, %v35680_v38 }
 0xe79   : > { %54328 = vst [vmem:[#allocation69_spill] sm:$0xff] %v51287_v53  ;;  %v51297_v15 = vpack.c.bf16 %v36265_v55, %v36258_v6  ;;  %v54330_v32 = vand.u32 4294901760, %v51156_v59  ;;  %v51305_v19 = vpop.permute.xlu1 %35512  ;;  %v51310_v9 = vpack.c.bf16 %v30092_v14, %v30089_v11  ;;  %v30187_v59 = vsub.f32 %v51285_v61, %v30092_v14 }
 0xe7a   : > { %v51303_v45 = vsub.f32 %v35520_v25, %v35559_v23  ;;  %54333 = vst [vmem:[#allocation73_spill] sm:$0xff] %v51305_v19  ;;  %43845 = vmatpush3.msra.mxu1 %v50899_v20  ;;  %v51316_v55 = vsel %vm5619_vm5, %v51180_v30, %v51305_v19  ;;  %v29415_v6 = vpop.permute.xlu0 %29414  ;;  %v30182_v25 = vsub.f32 %v30180_v10, %v30181_v47  ;;  %v36277_v14 = vand.u32 4294901760, %v51275_v2 }
 0xe7b   : > { %54329 = vst [vmem:[#allocation70_spill] sm:$0xff] %v51297_v15  ;;  %v51301_v44 = vpack.c.bf16 %v35559_v23, %v54330_v32  ;;  %31821 = vrot.lane.b32.xlu0 %v50517_v60, %s54277_s27  ;;  %54334 = vst [vmem:[#allocation74_spill] sm:$0xff] %v51310_v9  ;;  %45535 = vmatprep.subr.bf16.mxu1 %v51031_v46  ;;  %v51325_v60 = vsel %vm4589_vm4, %v50973_v63, %v50896_v5  ;;  %v30188_v32 = vand.u32 4294901760, %v30187_v59 }
 0xe7c   : > { %54332 = vst [vmem:[#allocation72_spill] sm:$0xff] %v51303_v45  ;;  %54335 = vst [vmem:[#allocation75_spill] sm:$0xff] %v51316_v55  ;;  %43847 = vmatmul.mubr.f32.vlgmr.msra.gmra.mrb[12].mxu1 %v50849_v17  ;;  %v35686_v11 = vand.u32 4294901760, %v51303_v45  ;;  %31815 = vrot.lane.b32.xlu1 %v50554_v42, %s54277_s27  ;;  %v35669_v23 = vsub.f32 %v51267_v22, %v35668_v36  ;;  %v51337_v34 = vpack.c.bf16 %v30187_v59, %v30180_v10 }
 0xe7d   : > { %54331 = vst [vmem:[#allocation71_spill] sm:$0xff] %v51301_v44  ;;  %45537 = vmatpush3.bf16.msra.mxu1 %v51031_v46  ;;  %43859 = vmatprep.mubr.f32.mxu1 %v50811_v0  ;;  %v54337_v20 = vand.u32 4294901760, %v51264_v31  ;;  %v35676_v35 = vand.u32 4294901760, %v51280_v4  ;;  %v29411_v46 = vpop.permute.xlu1 %29410  ;;  %v35682_v8 = vand.u32 4294901760, %v35681_v7  ;;  %v30183_v56 = vand.u32 4294901760, %v30182_v25  ;;  %v47396_v25 = vld [vmem:[#allocation2 + $0x28] sm:$0xff] }
 0xe7e   : > { %45539 = vmatprep.subr.bf16.mxu1 %v51067_v24  ;;  %54336 = vst [vmem:[#allocation76_spill] sm:$0xff] %v51337_v34  ;;  %v35687_v42 = vsub.f32 %v51303_v45, %v35686_v11  ;;  %v35670_v15 = vand.u32 4294901760, %v35669_v23  ;;  %v51346_v19 = vpop.permute.xlu0 %29430  ;;  %v30189_v0 = vsub.f32 %v30187_v59, %v30188_v32  ;;  %v51348_v10 = vpack.c.bf16 %v30188_v32, %v30181_v47 }
 0xe7f   : > { %v36271_v30 = vsub.f32 %v51264_v31, %v54337_v20  ;;  %39175 = vrot.lane.b32.xlu0 %v50460_v50, %s47441_s14  ;;  %v51350_v22 = vpack.c.bf16 %v35680_v38, %v35668_v36  ;;  %v51354_v4 = vsel %vm495_vm1, %v29411_v46, %v51254_v49  ;;  %v30098_v50 = vand.u32 4294901760, %v51346_v19 }
 0xe80   : > { %54338 = vst [vmem:[#allocation77_spill] sm:$0xff] %v51348_v10  ;;  %v35688_v27 = vand.u32 4294901760, %v35687_v42  ;;  %31825 = vrot.lane.b32.xlu1 %v50562_v33, %s54277_s27  ;;  %v51360_v7 = vpack.c.bf16 %v35682_v8, %v35670_v15  ;;  %v30190_v47 = vand.u32 4294901760, %v30189_v0  ;;  %v54341_v38 = vand.u32 4294901760, %v51222_v51  ;;  %v47397_v42 = vld [vmem:[#allocation2 + $0x8] sm:$0xff]  ;;  %v47401_v51 = vld [vmem:[#allocation2] sm:$0xff] }
 0xe81   : > { %54339 = vst [vmem:[#allocation78_spill] sm:$0xff] %v51350_v22  ;;  %45541 = vmatpush3.bf16.msra.mxu1 %v51067_v24  ;;  %v36272_v59 = vand.u32 4294901760, %v36271_v30  ;;  %v36278_v49 = vsub.f32 %v51275_v2, %v36277_v14  ;;  %v34293_v33 = vsel %vm4589_vm4, %v51017_v58, %v50973_v63  ;;  %v29417_v20 = vpop.permute.xlu1 %29416  ;;  %v54049_v8 = vand.u32 4294901760, %v51149_v12 }
 0xe82   : > { %54340 = vst [vmem:[#allocation79_spill] sm:$0xff] %v51360_v7  ;;  %43857 = vmatprep.subr.mxu1 %v50830_v41  ;;  %v51365_v36 = vpack.c.bf16 %v35686_v11, %v54341_v38  ;;  %v51373_v15 = vpack.c.bf16 %v35688_v27, %v35676_v35  ;;  %v51377_v0 = vpack.c.bf16 %v51275_v2, %v51264_v31  ;;  %v29425_v63 = vpop.permute.xlu0 %29424  ;;  %v51390_v35 = vand.u32 4294901760, %v51325_v60 }
 0xe83   : > { %39181 = vrot.lane.b32.xlu0 %v47396_v25, %s47441_s14  ;;  %v51381_v11 = vsel %vm495_vm1, %v29417_v20, %v51285_v61  ;;  %v51384_v30 = vsub.f32 %v51346_v19, %v30098_v50  ;;  %v51386_v58 = vpack.c.bf16 %v30190_v47, %v30183_v56  ;;  %v36279_v23 = vand.u32 4294901760, %v36278_v49 }
 0xe84   : > { %54342 = vst [vmem:[#allocation80_spill] sm:$0xff] %v51365_v36  ;;  %54343 = vst [vmem:[#allocation81_spill] sm:$0xff] %v51373_v15  ;;  %v54046_v27 = vand.u32 4294901760, %v51354_v4  ;;  %v29474_v2 = vand.u32 4294901760, %v51381_v11  ;;  %39173 = vrot.lane.b32.xlu1 %v47397_v42, %s47441_s14  ;;  %v51397_v61 = vsel %vm495_vm1, %v29415_v6, %v29417_v20  ;;  %v30095_v56 = vand.u32 4294901760, %v29425_v63  ;;  %v47398_v6 = vld [vmem:[#allocation2 + $0x18] sm:$0xff] }
 0xe85   : > { %54344 = vst [vmem:[#allocation82_spill] sm:$0xff] %v51377_v0  ;;  %54345 = vst [vmem:[#allocation83_spill] sm:$0xff] %v51386_v58  ;;  %43858 = vmatpush3.msra.mxu1 %v50830_v41  ;;  %v51401_v47 = vpack.c.bf16 %v36279_v23, %v36272_v59  ;;  %v54347_v38 = vand.u32 4294901760, %v51264_v31  ;;  %v51408_v32 = vand.u32 4294901760, %v34293_v33  ;;  %v29409_v42 = vpop.permute.xlu1 %29408  ;;  %v34452_v31 = vsub.f32 %v51149_v12, %v54049_v8 }
 0xe86   : > { %45543 = vmatprep.subr.bf16.mxu1 %v51097_v29  ;;  %43860 = vmatmul.mubr.f32.vlgmr.msra.gmra.mrb[12].mxu1 %v50849_v17  ;;  %v51414_v20 = vpack.c.bf16 %v29474_v2, %v54046_v27  ;;  %v51422_v23 = vpack.c.bf16 %v30098_v50, %v30095_v56  ;;  %v29427_v25 = vpop.permute.xlu0 %29426  ;;  %v54351_v27 = vand.u32 4294901760, %v51079_v39  ;;  %v47399_v50 = vld [vmem:[#allocation2 + $0x20] sm:$0xff]  ;;  %v34423_v39 = vand.u32 4294901760, %v51126_v18 }
 0xe87   : > { %54346 = vst [vmem:[#allocation84_spill] sm:$0xff] %v51401_v47  ;;  %v51405_v49 = vpack.c.bf16 %v36277_v14, %v54347_v38  ;;  %45545 = vmatpush1.bf16.msra.mxu1 %v51111_v54  ;;  %39177 = vrot.lane.b32.xlu0 %v47398_v6, %s47441_s14  ;;  %v29438_v14 = vsel %vm495_vm1, %v29409_v42, %v29411_v46  ;;  %v54350_v6 = vand.u32 4294901760, %v51142_v43  ;;  %v41516_v43 = vld [vmem:[%s53925_s9 + $0x18] sm:$0xff]  ;;  %v54355_v24 = vand.u32 4294901760, %v51397_v61 }
 0xe88   : > { %45547 = vmatprep.subr.bf16.mxu1 %v51187_v48  ;;  %54349 = vst [vmem:[#allocation86_spill] sm:$0xff] %v51422_v23  ;;  %v51424_v38 = vsub.f32 %v29425_v63, %v30095_v56  ;;  %34390 = vmatprep.mubr.f32.mxu1 %v50264_v13  ;;  %v51435_v46 = vsub.f32 %v51325_v60, %v51390_v35  ;;  %v29472_v8 = vand.u32 4294901760, %v29438_v14  ;;  %v34435_v0 = vand.u32 4294901760, %v51107_v40 }
 0xe89   : > { %54348 = vst [vmem:[#allocation85_spill] sm:$0xff] %v51405_v49  ;;  %v51431_v41 = vpack.c.bf16 %v54351_v27, %v54350_v6  ;;  %39179 = vrot.lane.b32.xlu1 %v47399_v50, %s47441_s14  ;;  %45159 = vmatprep.subr.bf16.mxu0 %v51414_v20  ;;  %v54352_v27 = vand.u32 4294901760, %v51215_v57  ;;  %v54354_v50 = vand.u32 4294901760, %v51168_v1  ;;  %v51456_v42 = vsub.f32 %v34293_v33, %v51408_v32  ;;  %v29423_v17 = vpop.permute.xlu1 %29422 }
 0xe8a   : > { %v30195_v60 = vand.u32 4294901760, %v51424_v38  ;;  %v51450_v6 = vpack.c.bf16 %v51384_v30, %v51424_v38  ;;  %v51460_v18 = vpack.c.bf16 %v54355_v24, %v29472_v8  ;;  %v34453_v49 = vand.u32 4294901760, %v34452_v31  ;;  %v51466_v47 = vpop.permute.xlu0 %29436 }
 0xe8b   : > { %v34446_v56 = vsub.f32 %v51215_v57, %v54352_v27  ;;  %v34458_v59 = vsub.f32 %v51168_v1, %v54354_v50  ;;  %45549 = vmatpush1.bf16.msra.mxu1 %v51431_v41  ;;  %v47400_v27 = vld [vmem:[#allocation2 + $0x58] sm:$0xff]  ;;  %54356 = vst [vmem:[#allocation88_spill] sm:$0xff] %v51466_v47  ;;  %v51469_v33 = vsel %vm29463_vm14, %v41516_v43, 0  ;;  %v54357_v24 = vand.u32 4294901760, %v51384_v30 }
 0xe8c   : > { %54353 = vst [vmem:[#allocation87_spill] sm:$0xff] %v51450_v6  ;;  %39193 = vrot.lane.b32.xlu0 %v47400_v27, %s47441_s14  ;;  %34333 = vmatprep.subr.mxu1 %v51390_v35  ;;  %v30196_v50 = vsub.f32 %v51424_v38, %v30195_v60  ;;  %v29443_v22 = vsel %vm495_vm1, %v29423_v17, %v29425_v63  ;;  %v54358_v40 = vand.u32 4294901760, %v51121_v37  ;;  %v54359_v31 = vand.u32 4294901760, %v51137_v3 }
 0xe8d   : > { %v30203_v36 = vsub.f32 %v51384_v30, %v54357_v24  ;;  %39171 = vrot.lane.b32.xlu1 %v47401_v51, %s47441_s14  ;;  %45161 = vmatpush1.bf16.msra.mxu0 %v51460_v18  ;;  %v34441_v43 = vand.u32 4294901760, %v51227_v28  ;;  %v54061_v38 = vand.u32 4294901760, %v51435_v46  ;;  %v34447_v45 = vand.u32 4294901760, %v34446_v56  ;;  %v29429_v3 = vpop.permute.xlu1 %29428  ;;  %v47402_v28 = vld [vmem:[#allocation2 + $0x40] sm:$0xff] }
 0xe8e   : > { %v45550_v27 = vpack.c.bf16 %v54359_v31, %v54358_v40  ;;  %v51485_v21 = vsub.f32 %v51381_v11, %v29474_v2  ;;  %v45552_v24 = vpack.c.bf16 %v34435_v0, %v34423_v39  ;;  %v30197_v63 = vand.u32 4294901760, %v30196_v50  ;;  %v51499_v2 = vpop.permute.xlu0 %36715  ;;  %v47403_v39 = vld [vmem:[#allocation2 + $0x38] sm:$0xff] }
 0xe8f   : > { %v34459_v15 = vand.u32 4294901760, %v34458_v59  ;;  %v54060_v51 = vand.u32 4294901760, %v51456_v42  ;;  %v54360_v7 = vand.u32 4294901760, %v51354_v4  ;;  %34335 = vmatpush1.msra.mxu1 %v51408_v32  ;;  %v45554_v56 = vpack.c.bf16 %v34453_v49, %v34441_v43  ;;  %54361 = vst [vmem:[#allocation89_spill] sm:$0xff] %v51499_v2 }
 0xe90   : > { %39187 = vrot.lane.b32.xlu0 %v47402_v28, %s47441_s14  ;;  %v29478_v40 = vand.u32 4294901760, %v29443_v22  ;;  %v29445_v0 = vsel %vm495_vm1, %v29429_v3, %v51346_v19  ;;  %v29444_v11 = vsel %vm495_vm1, %v29427_v25, %v29429_v3  ;;  %45551 = vmatprep.subr.bf16.mxu1 %v45550_v27  ;;  %v34464_v49 = vsub.f32 %v51435_v46, %v54061_v38  ;;  %v47404_v28 = vld [vmem:[#allocation2 + $0x48] sm:$0xff] }
 0xe91   : > { %v51491_v37 = vsub.f32 %v51354_v4, %v54360_v7  ;;  %34396 = vmatmul.mubr.f32.vlgmr.msra.gmra.mrb[8].mxu1 %v51051_v16  ;;  %v30204_v4 = vand.u32 4294901760, %v30203_v36  ;;  %v51501_v7 = vsub.f32 %v29438_v14, %v29472_v8  ;;  %v29482_v59 = vand.u32 4294901760, %v29445_v0  ;;  %39185 = vrot.lane.b32.xlu1 %v47403_v39, %s47441_s14  ;;  %v29421_v3 = vpop.permute.xlu1 %29420  ;;  %v54372_v39 = vld [vmem:[#allocation38_spill] sm:$0xff] }
 0xe92   : > { %45553 = vmatpush1.bf16.msra.mxu1 %v45552_v24  ;;  %v51508_v19 = vand.u32 4294901760, %v51469_v33  ;;  %v54059_v25 = vand.u32 4294901760, %v51485_v21  ;;  %v45556_v50 = vpack.c.bf16 %v34459_v15, %v34447_v45  ;;  %34401 = vmatprep.mubr.f32.mxu1 %v50264_v13  ;;  %v54363_v8 = vand.u32 4294901760, %v51384_v30 }
 0xe93   : > { %45555 = vmatprep.subr.bf16.mxu1 %v45554_v56  ;;  %v51512_v36 = vpack.c.bf16 %v30204_v4, %v30197_v63  ;;  %v54365_v31 = vand.u32 4294901760, %v51397_v61  ;;  %v51523_v43 = vsub.f32 %v29445_v0, %v29482_v59  ;;  %v29484_v24 = vand.u32 4294901760, %v29444_v11  ;;  %v51536_v63 = vpop.permute.xlu0 %36721  ;;  %v47405_v4 = vld [vmem:[#allocation2 + $0x50] sm:$0xff] }
 0xe94   : > { %v51516_v14 = vpack.c.bf16 %v54363_v8, %v30195_v60  ;;  %39189 = vrot.lane.b32.xlu0 %v47404_v28, %s47441_s14  ;;  %v51526_v45 = vpack.c.bf16 %v29482_v59, %v29478_v40  ;;  %v34470_v15 = vsub.f32 %v51456_v42, %v54060_v51  ;;  %v54062_v30 = vand.u32 4294901760, %v51491_v37  ;;  %54366 = vst [vmem:[#allocation92_spill] sm:$0xff] %v51536_v63 }
 0xe95   : > { %54362 = vst [vmem:[#allocation90_spill] sm:$0xff] %v51512_v36  ;;  %v51521_v27 = vsub.f32 %v51397_v61, %v54365_v31  ;;  %v51532_v60 = vsub.f32 %v29443_v22, %v29478_v40  ;;  %v29442_v61 = vsel %vm495_vm1, %v29421_v3, %v29423_v17  ;;  %34407 = vmatmul.mubr.f32.gmra.mrb[10].mxu1 %v51053_v52  ;;  %v54064_v56 = vand.u32 4294901760, %v51501_v7  ;;  %v54367_v22 = vld [vmem:[#allocation49_spill] sm:$0xff]  ;;  %v29435_v28 = vpop.permute.xlu1 %29434 }
 0xe96   : > { %54364 = vst [vmem:[#allocation91_spill] sm:$0xff] %v51516_v14  ;;  %v29480_v0 = vand.u32 4294901760, %v29442_v61  ;;  %39191 = vrot.lane.b32.xlu1 %v47405_v4, %s47441_s14  ;;  %45163 = vmatprep.subr.bf16.mxu0 %v51526_v45  ;;  %v34465_v59 = vand.u32 4294901760, %v34464_v49  ;;  %v29582_v17 = vsub.f32 %v51485_v21, %v54059_v25  ;;  %v51547_v40 = vand.u32 4294901760, %v54367_v22  ;;  %v47406_v4 = vld [vmem:[#allocation2 + $0x70] sm:$0xff] }
 0xe97   : > { %45557 = vmatpush1.bf16.msra.mxu1 %v45556_v50  ;;  %34527 = vmatprep.mubr.f32.mxu1 %v50264_v13  ;;  %v51551_v8 = vsub.f32 %v51469_v33, %v51508_v19  ;;  %v51554_v3 = vsub.f32 %v29444_v11, %v29484_v24  ;;  %v29447_v25 = vsel %vm495_vm1, %v29435_v28, %v51466_v47  ;;  %v34471_v51 = vand.u32 4294901760, %v34470_v15  ;;  %v51563_v38 = vpop.permute.xlu0 %36713  ;;  %v54369_v15 = vld [vmem:[#allocation37_spill] sm:$0xff]  ;;  %v54371_v11 = vld [vmem:[#allocation40_spill] sm:$0xff] }
 0xe98   : > { %v51556_v49 = vpack.c.bf16 %v29484_v24, %v29480_v0  ;;  %v51558_v50 = vsub.f32 %v29442_v61, %v29480_v0  ;;  %34466 = vmatprep.subr.mxu1 %v34465_v59  ;;  %39199 = vrot.lane.b32.xlu0 %v47406_v4, %s47441_s14  ;;  %54368 = vst [vmem:[#allocation93_spill] sm:$0xff] %v51563_v38  ;;  %v51573_v0 = vand.u32 4294901760, %v29447_v25  ;;  %v47407_v59 = vld [vmem:[#allocation2 + $0x30] sm:$0xff]  ;;  %v54370_v4 = vld [vmem:[#allocation39_spill] sm:$0xff]  ;;  %v54373_v38 = vand.u32 4294901760, %v51523_v43 }
 0xe99   : > { %v29570_v33 = vsub.f32 %v51491_v37, %v54062_v30  ;;  %v29576_v24 = vsub.f32 %v51501_v7, %v54064_v56  ;;  %v45558_v31 = vpack.c.bf16 %v54370_v4, %v54369_v15  ;;  %v40397_v30 = vld [vmem:[%s53926_s10] sm:$0xff]  ;;  %v45560_v63 = vpack.c.bf16 %v54372_v39, %v54371_v11  ;;  %v29433_v62 = vpop.permute.xlu1 %29432 }
 0xe9a   : > { %39183 = vrot.lane.b32.xlu1 %v47407_v59, %s47441_s14  ;;  %45165 = vmatpush1.bf16.msra.mxu0 %v51556_v49  ;;  %v29583_v56 = vand.u32 4294901760, %v29582_v17  ;;  %v29548_v61 = vsub.f32 %v54367_v22, %v51547_v40  ;;  %v29606_v59 = vsub.f32 %v51523_v43, %v54373_v38  ;;  %v54374_v2 = vand.u32 4294901760, %v51521_v27  ;;  %v54376_v17 = vld [vmem:[#allocation50_spill] sm:$0xff] }
 0xe9b   : > { %34472 = vmatpush1.msra.mxu1 %v34471_v51  ;;  %v51594_v44 = vsub.f32 %v29447_v25, %v51573_v0  ;;  %v54375_v51 = vld [vmem:[#allocation29_spill] sm:$0xff]  ;;  %v45562_v14 = vpack.c.bf16 %v51149_v12, %v54376_v17  ;;  %v29446_v55 = vsel %vm495_vm1, %v29433_v62, %v29435_v28  ;;  %v29571_v38 = vand.u32 4294901760, %v29570_v33  ;;  %v51603_v26 = vpop.permute.xlu0 %36727  ;;  %29487 = vmatprep.subr.mxu0 %v51573_v0 }
 0xe9c   : > { %v29588_v53 = vsub.f32 %v51521_v27, %v54374_v2  ;;  %45559 = vmatprep.subr.bf16.mxu1 %v45558_v31  ;;  %34529 = vmatmul.mubr.f32.vlgmr.msra.gmra.mrb[8].mxu1 %v54375_v51  ;;  %v54377_v10 = vand.u32 4294901760, %v51532_v60  ;;  %54378 = vst [vmem:[#allocation37_spill] sm:$0xff] %v51603_v26  ;;  %v51606_v25 = vand.u32 4294901760, %v51551_v8  ;;  %v29577_v31 = vand.u32 4294901760, %v29576_v24  ;;  %v47408_v62 = vld [vmem:[#allocation2 + $0x68] sm:$0xff]  ;;  %v47409_v26 = vld [vmem:[#allocation2 + $0x60] sm:$0xff] }
 0xe9d   : > { %45561 = vmatpush1.bf16.msra.mxu1 %v45560_v63  ;;  %40401 = vperm.xlu0 %47382, %v40397_v30   ;;  %v54379_v6 = vand.u32 4294901760, %v51558_v50  ;;  %v51611_v36 = vand.u32 4294901760, %v29446_v55  ;;  %v45166_v63 = vpack.c.bf16 %v29583_v56, %v29571_v38  ;;  %v51619_v28 = vand.u32 4294901760, %v29548_v61  ;;  %v51627_v30 = vpop.permute.xlu1 %36717  ;;  %v40422_v56 = vld [vmem:[%s53928_s12] sm:$0x7]  ;;  %v54383_v38 = vld [vmem:[#allocation30_spill] sm:$0xff] }
 0xe9e   : > { %v29594_v2 = vsub.f32 %v51532_v60, %v54377_v10  ;;  %45563 = vmatprep.subr.bf16.mxu1 %v45562_v14  ;;  %39197 = vrot.lane.b32.xlu1 %v47408_v62, %s47441_s14  ;;  %v45564_v10 = vpack.c.bf16 %v51168_v1, %v51215_v57  ;;  %v29607_v33 = vand.u32 4294901760, %v29606_v59  ;;  %v54381_v24 = vand.u32 4294901760, %v51554_v3  ;;  %54382 = vst [vmem:[#allocation40_spill] sm:$0xff] %v51627_v30 }
 0xe9f   : > { %v29600_v34 = vsub.f32 %v51558_v50, %v54379_v6  ;;  %34534 = vmatprep.mubr.f32.mxu1 %v50264_v13  ;;  %54380 = vst [vmem:[#allocation39_spill] sm:$0xff] %v51619_v28  ;;  %v29589_v6 = vand.u32 4294901760, %v29588_v53  ;;  %v51625_v62 = vsub.f32 %v29446_v55, %v51611_v36  ;;  %29489 = vmatpush1.msra.mxu0 %v51611_v36  ;;  %v51636_v59 = vpop.permute.xlu0 %36733  ;;  %v54385_v23 = vand.u32 4294901760, %v51594_v44 }
 0xea0   : > { %v29612_v14 = vsub.f32 %v51554_v3, %v54381_v24  ;;  %34536 = vmatmul.mubr.f32.gmra.mrb[10].mxu1 %v54383_v38  ;;  %45167 = vmatprep.subr.bf16.mxu0 %v45166_v63  ;;  %v29595_v53 = vand.u32 4294901760, %v29594_v2  ;;  %v29559_v61 = vsub.f32 %v51551_v8, %v51606_v25  ;;  %54384 = vst [vmem:[#allocation38_spill] sm:$0xff] %v51636_v59  ;;  %v54409_v52 = vand.u32 4294901760, %v54376_v17 }
 0xea1   : > { %45565 = vmatpush1.bf16.msra.mxu1 %v45564_v10  ;;  %v29601_v55 = vand.u32 4294901760, %v29600_v34  ;;  %v54078_v24 = vand.u32 4294901760, %v51625_v62  ;;  %v45168_v58 = vpack.c.bf16 %v29589_v6, %v29577_v31  ;;  %v29618_v10 = vsub.f32 %v51594_v44, %v54385_v23  ;;  %40425 = vperm.xlu0 %47382, %v40422_v56   ;;  %v40398_v34 = vld [vmem:[%s53926_s10 + $0x8] sm:$0xff] }
 0xea2   : > { %34568 = vmatprep.subr.mxu1 %v51435_v46  ;;  %39195 = vrot.lane.b32.xlu1 %v47409_v26, %s47441_s14  ;;  %v45170_v2 = vpack.c.bf16 %v29607_v33, %v29595_v53  ;;  %v29613_v63 = vand.u32 4294901760, %v29612_v14  ;;  %v51651_v26 = vpop.permute.xlu1 %36723  ;;  %v54080_v23 = vand.u32 4294901760, %v51627_v30  ;;  %v51657_v33 = vand.u32 4294901760, %v29559_v61  ;;  %v54390_v53 = vld [vmem:[#allocation31_spill] sm:$0xff]  ;;  %v54396_v61 = vld [vmem:[#allocation21_spill] sm:$0xff] }
 0xea3   : > { %29550 = vmatmul.mubr.f32.vlgmr.msra.gmra.mrb[10].mxu0 %v51619_v28  ;;  %v29624_v59 = vsub.f32 %v51625_v62, %v54078_v24  ;;  %54386 = vst [vmem:[#allocation29_spill] sm:$0xff] %v51651_v26  ;;  %34626 = vmatprep.mubr.f32.mxu1 %v50264_v13  ;;  %v54079_v31 = vand.u32 4294901760, %v51651_v26  ;;  %v51659_v6 = vpop.permute.xlu0 %36725  ;;  %v45180_v47 = vpack.c.bf16 %v51554_v3, %v51558_v50 }
 0xea4   : > { %45169 = vmatpush1.bf16.msra.mxu0 %v45168_v58  ;;  %54387 = vst [vmem:[#allocation50_spill] sm:$0xff] %v51657_v33  ;;  %54388 = vst [vmem:[#allocation30_spill] sm:$0xff] %v51659_v6  ;;  %v45172_v14 = vpack.c.bf16 %v29613_v63, %v29601_v55  ;;  %v29619_v58 = vand.u32 4294901760, %v29618_v10  ;;  %29555 = vmatprep.mubr.f32.mxu0 %v50264_v13  ;;  %v54394_v10 = vld [vmem:[#allocation25_spill] sm:$0xff] }
 0xea5   : > { %45171 = vmatprep.subr.bf16.mxu0 %v45170_v2  ;;  %34571 = vmatpush1.msra.mxu1 %v51456_v42  ;;  %v51666_v56 = vpack.c.bf16 %v54079_v31, %v54080_v23  ;;  %v54391_v2 = vld [vmem:[#allocation17_spill] sm:$0xff]  ;;  %v54084_v63 = vand.u32 4294901760, %v54394_v10  ;;  %v54395_v31 = vld [vmem:[#allocation16_spill] sm:$0xff]  ;;  %v45176_v23 = vpack.c.bf16 %v51521_v27, %v51501_v7 }
 0xea6   : > { %45567 = vmatprep.subr.bf16.mxu1 %v51097_v29  ;;  %40406 = vperm.xlu1 %47383, %v40398_v34   ;;  %v51672_v24 = vpop.permute.xlu1 %36719  ;;  %v29625_v34 = vand.u32 4294901760, %v29624_v59  ;;  %v54397_v59 = vand.u32 4294901760, %v54391_v2 }
 0xea7   : > { %54389 = vst [vmem:[#allocation94_spill] sm:$0xff] %v51666_v56  ;;  %34629 = vmatmul.mubr.f32.vlgmr.msra.gmra.mrb[8].mxu1 %v54390_v53  ;;  %54392 = vst [vmem:[#allocation17_spill] sm:$0xff] %v51672_v24  ;;  %29561 = vmatmul.mubr.f32.gmra.mrb[12].mxu0 %v51657_v33  ;;  %v51676_v55 = vpop.permute.xlu0 %36739  ;;  %v45174_v56 = vpack.c.bf16 %v51485_v21, %v51491_v37  ;;  %v45178_v24 = vpack.c.bf16 %v51523_v43, %v51532_v60  ;;  %v54401_v33 = vand.u32 4294901760, %v54395_v31 }
 0xea8   : > { %45173 = vmatpush1.bf16.msra.mxu0 %v45172_v14  ;;  %45569 = vmatpush1.bf16.msra.mxu1 %v51111_v54  ;;  %54393 = vst [vmem:[#allocation95_spill] sm:$0xff] %v51676_v55  ;;  %v51688_v6 = vsub.f32 %v54391_v2, %v54397_v59  ;;  %v51701_v55 = vsub.f32 %v54394_v10, %v54084_v63  ;;  %v54399_v59 = vld [vmem:[#allocation42_spill] sm:$0xff]  ;;  %v54402_v53 = vand.u32 4294901760, %v54396_v61  ;;  %v54403_v63 = vand.u32 4294901760, %v54369_v15 }
 0xea9   : > { %45571 = vmatprep.subr.bf16.mxu1 %v51187_v48  ;;  %29620 = vmatprep.subr.mxu0 %v29619_v58  ;;  %v54406_v15 = vand.u32 4294901760, %v54371_v11 }
 0xeaa   : > { %29681 = vmatprep.mubr.f32.mxu0 %v50264_v13  ;;  %34634 = vmatprep.mubr.f32.mxu1 %v50264_v13  ;;  %v51691_v58 = vpop.permute.xlu1 %36735  ;;  %v54092_v11 = vand.u32 4294901760, %v51701_v55 }
 0xeab   : > { %v51696_v14 = vpop.permute.xlu0 %36737 }
 0xeac   : > { %29626 = vmatpush1.msra.mxu0 %v29625_v34  ;;  %45573 = vmatpush1.bf16.msra.mxu1 %v51431_v41  ;;  %54398 = vst [vmem:[#allocation25_spill] sm:$0xff] %v51696_v14  ;;  %v54400_v34 = vld [vmem:[#allocation32_spill] sm:$0xff]  ;;  %v51715_v14 = vsub.f32 %v54396_v61, %v54402_v53  ;;  %v37402_v53 = vand.u32 4294901760, %v51691_v58 }
 0xead   : > { %45175 = vmatprep.subr.bf16.mxu0 %v45174_v56  ;;  %34660 = vmatprep.subr.mxu1 %v51390_v35  ;;  %v51710_v56 = vsub.f32 %v54395_v31, %v54401_v33  ;;  %v54408_v33 = vld [vmem:[#allocation34_spill] sm:$0xff] }
 0xeae   : > { %29683 = vmatmul.mubr.f32.vlgmr.msra.gmra.mrb[10].mxu0 %v54399_v59  ;;  %34637 = vmatmul.mubr.f32.gmra.mrb[10].mxu1 %v54400_v34  ;;  %v54404_v34 = vand.u32 4294901760, %v54370_v4  ;;  %v51723_v9 = vpop.permute.xlu1 %36729  ;;  %v54407_v4 = vand.u32 4294901760, %v54372_v39 }
 0xeaf   : > { %45177 = vmatpush1.bf16.msra.mxu0 %v45176_v23  ;;  %34717 = vmatprep.mubr.f32.mxu1 %v50264_v13  ;;  %54405 = vst [vmem:[#allocation16_spill] sm:$0xff] %v51723_v9  ;;  %v37399_v23 = vand.u32 4294901760, %v51723_v9 }
 0xeb0   : > { %v45574_v28 = vpack.c.bf16 %v54404_v34, %v54403_v63  ;;  %45179 = vmatprep.subr.bf16.mxu0 %v45178_v24  ;;  %34662 = vmatpush1.msra.mxu1 %v51408_v32  ;;  %v45576_v63 = vpack.c.bf16 %v54407_v4, %v54406_v15  ;;  %v51735_v24 = vpop.permute.xlu0 %37946  ;;  %v51738_v34 = vand.u32 4294901760, %v50896_v5  ;;  %v54416_v4 = vld [vmem:[#allocation35_spill] sm:$0xff] }
 0xeb1   : > { %29688 = vmatprep.mubr.f32.mxu0 %v50264_v13  ;;  %v51747_v39 = vpack.c.bf16 %v37402_v53, %v37399_v23 }
 0xeb2   : > { %45575 = vmatprep.subr.bf16.mxu1 %v45574_v28  ;;  %34721 = vmatmul.mubr.f32.vlgmr.msra.gmra.mrb[8].mxu1 %v54408_v33  ;;  %v54410_v28 = vand.u32 4294901760, %v51149_v12  ;;  %v51752_v33 = vpop.permute.xlu1 %36731  ;;  %v54413_v12 = vand.u32 4294901760, %v51215_v57  ;;  %v38622_v57 = vand.u32 4294901760, %v51735_v24 }
 0xeb3   : > { %29690 = vmatmul.mubr.f32.gmra.mrb[12].mxu0 %v51508_v19  ;;  %54411 = vst [vmem:[#allocation21_spill] sm:$0xff] %v51747_v39  ;;  %45577 = vmatpush1.bf16.msra.mxu1 %v45576_v63  ;;  %54412 = vst [vmem:[#allocation42_spill] sm:$0xff] %v51752_v33  ;;  %v54415_v63 = vand.u32 4294901760, %v51688_v6  ;;  %v54419_v39 = vand.u32 4294901760, %v51715_v14  ;;  %v54420_v33 = vand.u32 4294901760, %v51651_v26 }
 0xeb4   : > { %v45578_v16 = vpack.c.bf16 %v54410_v28, %v54409_v52  ;;  %45181 = vmatpush1.bf16.msra.mxu0 %v45180_v47  ;;  %v54414_v52 = vand.u32 4294901760, %v51168_v1  ;;  %29780 = vmatprep.mubr.f32.mxu0 %v50264_v13  ;;  %v51760_v47 = vpop.permute.xlu0 %37952 }
 0xeb5   : > { %29722 = vmatprep.subr.mxu0 %v51594_v44  ;;  %34726 = vmatprep.mubr.f32.mxu1 %v50264_v13  ;;  %v35035_v28 = vsub.f32 %v51688_v6, %v54415_v63  ;;  %v35049_v1 = vsub.f32 %v51715_v14, %v54419_v39 }
 0xeb6   : > { %45579 = vmatprep.subr.bf16.mxu1 %v45578_v16  ;;  %v45580_v17 = vpack.c.bf16 %v54414_v52, %v54413_v12  ;;  %v51767_v16 = vsub.f32 %v50896_v5, %v51738_v34  ;;  %34730 = vmatmul.mubr.f32.gmra.mrb[10].mxu1 %v54416_v4  ;;  %v35042_v12 = vsub.f32 %v51701_v55, %v54092_v11  ;;  %v54417_v52 = vand.u32 4294901760, %v51627_v30 }
 0xeb7   : > { %v54418_v5 = vand.u32 4294901760, %v51710_v56  ;;  %v51790_v11 = vsub.f32 %v51651_v26, %v54420_v33  ;;  %v51793_v4 = vsub.f32 %v51723_v9, %v37399_v23  ;;  %34830 = vmatprep.mubr.f32.mxu1 %v50264_v13  ;;  %v35036_v33 = vand.u32 4294901760, %v35035_v28 }
 0xeb8   : > { %v51778_v15 = vsub.f32 %v51627_v30, %v54417_v52  ;;  %29725 = vmatpush1.msra.mxu0 %v51625_v62  ;;  %45581 = vmatpush1.bf16.msra.mxu1 %v45580_v17  ;;  %v54421_v17 = vand.u32 4294901760, %v51435_v46  ;;  %v51798_v52 = vpop.permute.xlu1 %36741  ;;  %v37949_v23 = vpop.permute.xlu0 %37948  ;;  %v35043_v39 = vand.u32 4294901760, %v35042_v12  ;;  %v51809_v46 = vand.u32 4294901760, %v51767_v16 }
 0xeb9   : > { %v35028_v63 = vsub.f32 %v51710_v56, %v54418_v5  ;;  %45183 = vmatprep.subr.bf16.mxu0 %v51414_v20  ;;  %54422 = vst [vmem:[#allocation96_spill] sm:$0xff] %v51798_v52  ;;  %v54423_v5 = vand.u32 4294901760, %v51760_v47  ;;  %29783 = vmatmul.mubr.f32.vlgmr.msra.gmra.mrb[10].mxu0 %v54367_v22  ;;  %v51813_v52 = vsub.f32 %v51691_v58, %v37402_v53  ;;  %v54427_v9 = vand.u32 4294901760, %v54391_v2 }
 0xeba   : > { %34771 = vmatprep.subr.mxu1 %v54421_v17  ;;  %45185 = vmatpush1.bf16.msra.mxu0 %v51460_v18  ;;  %v37492_v12 = vand.u32 4294901760, %v51790_v11  ;;  %v54101_v22 = vand.u32 4294901760, %v51793_v4  ;;  %v35050_v17 = vand.u32 4294901760, %v35049_v1  ;;  %v54431_v2 = vand.u32 4294901760, %v51485_v21 }
 0xebb   : > { %v51802_v30 = vpack.c.bf16 %v54423_v5, %v38622_v57  ;;  %29788 = vmatprep.mubr.f32.mxu0 %v50264_v13  ;;  %45187 = vmatprep.subr.bf16.mxu0 %v51526_v45  ;;  %v54425_v5 = vand.u32 4294901760, %v51456_v42  ;;  %v35029_v28 = vand.u32 4294901760, %v35028_v63  ;;  %v54428_v42 = vand.u32 4294901760, %v54394_v10 }
 0xebc   : > { %v37945_v53 = vpop.permute.xlu1 %37944  ;;  %v54429_v63 = vand.u32 4294901760, %v54396_v61  ;;  %v54100_v1 = vand.u32 4294901760, %v51813_v52  ;;  %v54435_v21 = vand.u32 4294901760, %v51523_v43  ;;  %v37493_v43 = vsub.f32 %v51790_v11, %v37492_v12 }
 0xebd   : > { %54424 = vst [vmem:[#allocation97_spill] sm:$0xff] %v51802_v30  ;;  %34775 = vmatpush1.msra.mxu1 %v54425_v5  ;;  %v54426_v30 = vand.u32 4294901760, %v54395_v31  ;;  %29791 = vmatmul.mubr.f32.gmra.mrb[12].mxu0 %v51551_v8  ;;  %v54430_v31 = vand.u32 4294901760, %v51491_v37  ;;  %v54434_v37 = vand.u32 4294901760, %v51532_v60  ;;  %v37500_v60 = vsub.f32 %v51793_v4, %v54101_v22 }
 0xebe   : > { %45583 = vmatprep.subr.bf16.mxu1 %v51097_v29  ;;  %34832 = vmatmul.mubr.f32.vlgmr.msra.gmra.mrb[8].mxu1 %v54375_v51  ;;  %v51832_v5 = vpack.c.bf16 %v54429_v63, %v54428_v42  ;;  %v51868_v63 = vsub.f32 %v51735_v24, %v38622_v57 }
 0xebf   : > { %v51822_v26 = vpack.c.bf16 %v54427_v9, %v54426_v30  ;;  %45585 = vmatpush1.bf16.msra.mxu1 %v51111_v54  ;;  %v51837_v9 = vsel %vm7679_vm7, %v37945_v53, %v51735_v24  ;;  %v51840_v30 = vpack.c.bf16 %v35036_v33, %v35029_v28  ;;  %45189 = vmatpush1.bf16.msra.mxu0 %v51556_v49  ;;  %v54433_v33 = vand.u32 4294901760, %v51521_v27 }
 0xec0   : > { %45587 = vmatprep.subr.bf16.mxu1 %v51187_v48  ;;  %v54099_v29 = vand.u32 4294901760, %v51837_v9  ;;  %v45190_v61 = vpack.c.bf16 %v54431_v2, %v54430_v31  ;;  %v51849_v54 = vpack.c.bf16 %v35050_v17, %v35043_v39  ;;  %29814 = vmatprep.subr.mxu0 %v51573_v0  ;;  %v54432_v48 = vand.u32 4294901760, %v51501_v7  ;;  %v37951_v31 = vpop.permute.xlu1 %37950 }
 0xec1   : > { %29871 = vmatprep.mubr.f32.mxu0 %v50264_v13  ;;  %v45194_v39 = vpack.c.bf16 %v54435_v21, %v54434_v37  ;;  %v54436_v17 = vand.u32 4294901760, %v51778_v15  ;;  %34837 = vmatprep.mubr.f32.mxu1 %v50264_v13  ;;  %v54437_v7 = vand.u32 4294901760, %v51558_v50  ;;  %v54438_v27 = vand.u32 4294901760, %v51554_v3 }
 0xec2   : > { %v45192_v28 = vpack.c.bf16 %v54433_v33, %v54432_v48  ;;  %v51875_v48 = vpop.permute.xlu0 %37964  ;;  %v51886_v24 = vsub.f32 %v51837_v9, %v54099_v29  ;;  %v37975_v3 = vsel %vm7679_vm7, %v37951_v31, %v51760_v47  ;;  %v37974_v50 = vsel %vm7679_vm7, %v37949_v23, %v37951_v31  ;;  %34839 = vmatmul.mubr.f32.gmra.mrb[10].mxu1 %v54383_v38 }
 0xec3   : > { %v37486_v42 = vsub.f32 %v51778_v15, %v54436_v17  ;;  %v45196_v2 = vpack.c.bf16 %v54438_v27, %v54437_v7  ;;  %45589 = vmatpush1.bf16.msra.mxu1 %v51431_v41  ;;  %v38631_v57 = vand.u32 4294901760, %v51875_v48  ;;  %29816 = vmatpush1.msra.mxu0 %v51611_v36  ;;  %v38007_v33 = vand.u32 4294901760, %v37975_v3 }
 0xec4   : > { %54439 = vst [vmem:[#allocation98_spill] sm:$0xff] %v51886_v24  ;;  %34862 = vmatprep.subr.mxu1 %v51390_v35  ;;  %v38009_v37 = vand.u32 4294901760, %v37974_v50  ;;  %v37494_v17 = vand.u32 4294901760, %v37493_v43  ;;  %v54440_v7 = vand.u32 4294901760, %v51760_v47  ;;  %45191 = vmatprep.subr.bf16.mxu0 %v45190_v61  ;;  %v37501_v41 = vand.u32 4294901760, %v37500_v60 }
 0xec5   : > { %v37487_v21 = vand.u32 4294901760, %v37486_v42  ;;  %29875 = vmatmul.mubr.f32.vlgmr.msra.gmra.mrb[10].mxu0 %v51547_v40  ;;  %v37507_v23 = vsub.f32 %v51813_v52, %v54100_v1  ;;  %v51906_v35 = vpack.c.bf16 %v51790_v11, %v51778_v15  ;;  %v51908_v31 = vsub.f32 %v37975_v3, %v38007_v33  ;;  %34919 = vmatprep.mubr.f32.mxu1 %v50264_v13 }
 0xec6   : > { %v51898_v27 = vsub.f32 %v51760_v47, %v54440_v7  ;;  %45193 = vmatpush1.bf16.msra.mxu0 %v45192_v28  ;;  %v51911_v42 = vsub.f32 %v37974_v50, %v38009_v37  ;;  %v37943_v47 = vpop.permute.xlu1 %37942  ;;  %v37959_v61 = vpop.permute.xlu0 %37958  ;;  %v38102_v60 = vand.u32 4294901760, %v51886_v24  ;;  %v51922_v50 = vsub.f32 %v51875_v48, %v38631_v57  ;;  %29880 = vmatprep.mubr.f32.mxu0 %v50264_v13 }
 0xec7   : > { %54441 = vst [vmem:[#allocation99_spill] sm:$0xff] %v51906_v35  ;;  %54442 = vst [vmem:[#allocation100_spill] sm:$0xff] %v51908_v31  ;;  %v51913_v43 = vpack.c.bf16 %v37494_v17, %v37487_v21  ;;  %45195 = vmatprep.subr.bf16.mxu0 %v45194_v39  ;;  %34864 = vmatpush1.msra.mxu1 %v51408_v32  ;;  %v37972_v7 = vsel %vm7679_vm7, %v37943_v47, %v37945_v53  ;;  %v38628_v10 = vand.u32 4294901760, %v37959_v61 }
 0xec8   : > { %54443 = vst [vmem:[#allocation101_spill] sm:$0xff] %v51911_v42  ;;  %v37508_v29 = vand.u32 4294901760, %v37507_v23  ;;  %v38120_v3 = vand.u32 4294901760, %v51911_v42  ;;  %45591 = vmatprep.subr.bf16.mxu1 %v51822_v26  ;;  %v38005_v28 = vand.u32 4294901760, %v37972_v7  ;;  %v51926_v21 = vpack.c.bf16 %v51813_v52, %v51793_v4  ;;  %34921 = vmatmul.mubr.f32.vlgmr.msra.gmra.mrb[8].mxu1 %v54375_v51 }
 0xec9   : > { %54444 = vst [vmem:[#allocation102_spill] sm:$0xff] %v51913_v43  ;;  %v38114_v32 = vand.u32 4294901760, %v51908_v31  ;;  %v51930_v53 = vpack.c.bf16 %v38631_v57, %v38628_v10  ;;  %v54448_v17 = vand.u32 4294901760, %v51778_v15  ;;  %45593 = vmatpush3.bf16.msra.mxu1 %v51822_v26  ;;  %29884 = vmatmul.mubr.f32.gmra.mrb[12].mxu0 %v51606_v25  ;;  %v54452_v11 = vand.u32 4294901760, %v51793_v4 }
 0xeca   : > { %54445 = vst [vmem:[#allocation103_spill] sm:$0xff] %v51926_v21  ;;  %v51932_v39 = vpack.c.bf16 %v37508_v29, %v37501_v41  ;;  %v51940_v47 = vpack.c.bf16 %v38009_v37, %v38005_v28  ;;  %v51942_v1 = vsub.f32 %v37972_v7, %v38005_v28  ;;  %45197 = vmatpush1.bf16.msra.mxu0 %v45196_v2  ;;  %v37957_v22 = vpop.permute.xlu1 %37956  ;;  %v37961_v29 = vpop.permute.xlu0 %37960  ;;  %v54455_v2 = vand.u32 4294901760, %v51837_v9 }
 0xecb   : > { %54446 = vst [vmem:[#allocation104_spill] sm:$0xff] %v51930_v53  ;;  %v51938_v23 = vpack.c.bf16 %v37492_v12, %v54448_v17  ;;  %v51945_v21 = vsub.f32 %v37959_v61, %v38628_v10  ;;  %v37977_v15 = vsel %vm7679_vm7, %v37957_v22, %v37959_v61  ;;  %v54453_v12 = vand.u32 4294901760, %v51813_v52  ;;  %45595 = vmatprep.subr.bf16.mxu1 %v51832_v5 }
 0xecc   : > { %54447 = vst [vmem:[#allocation105_spill] sm:$0xff] %v51932_v39  ;;  %54450 = vst [vmem:[#allocation107_spill] sm:$0xff] %v51940_v47  ;;  %v51958_v37 = vpack.c.bf16 %v38007_v33, %v54455_v2  ;;  %v38121_v10 = vsub.f32 %v51911_v42, %v38120_v3  ;;  %v38108_v41 = vand.u32 4294901760, %v51942_v1  ;;  %v54457_v61 = vand.u32 4294901760, %v51594_v44  ;;  %29984 = vmatprep.mubr.f32.mxu0 %v50264_v13  ;;  %v29374_v47 = vld [vmem:[%s53925_s9 + $0x8] sm:$0xff] }
 0xecd   : > { %54449 = vst [vmem:[#allocation106_spill] sm:$0xff] %v51938_v23  ;;  %54451 = vst [vmem:[#allocation108_spill] sm:$0xff] %v51942_v1  ;;  %v51954_v57 = vpack.c.bf16 %v54453_v12, %v54452_v11  ;;  %v38011_v4 = vand.u32 4294901760, %v37977_v15  ;;  %34926 = vmatprep.mubr.f32.mxu1 %v50264_v13  ;;  %v38103_v9 = vsub.f32 %v51886_v24, %v38102_v60  ;;  %v54458_v44 = vand.u32 4294901760, %v51625_v62  ;;  %v47415_v23 = vld [vmem:[#allocation2 + $0x38] sm:$0xff] }
 0xece   : > { %54456 = vst [vmem:[#allocation110_spill] sm:$0xff] %v51958_v37  ;;  %29925 = vmatprep.subr.mxu0 %v54457_v61  ;;  %v38115_v33 = vsub.f32 %v51908_v31, %v38114_v32  ;;  %v38109_v11 = vsub.f32 %v51942_v1, %v38108_v41  ;;  %34928 = vmatmul.mubr.f32.gmra.mrb[10].mxu1 %v54383_v38  ;;  %v37963_v2 = vpop.permute.xlu1 %37962  ;;  %v51988_v17 = vpop.permute.xlu0 %37970  ;;  %v54104_v52 = vand.u32 4294901760, %v51945_v21  ;;  %v38122_v53 = vand.u32 4294901760, %v38121_v10  ;;  %v54545_v37 = vld [vmem:[#allocation71_spill] sm:$0xff] }
 0xecf   : > { %54454 = vst [vmem:[#allocation109_spill] sm:$0xff] %v51954_v57  ;;  %29929 = vmatpush1.msra.mxu0 %v54458_v44  ;;  %v51978_v12 = vsub.f32 %v37977_v15, %v38011_v4  ;;  %v51981_v61 = vpack.c.bf16 %v38114_v32, %v38102_v60  ;;  %45597 = vmatpush3.bf16.msra.mxu1 %v51832_v5  ;;  %54461 = vst [vmem:[#allocation113_spill] sm:$0xff] %v51988_v17  ;;  %v38104_v62 = vand.u32 4294901760, %v38103_v9 }
 0xed0   : > { %45199 = vmatprep.subr.bf16.mxu0 %v51414_v20  ;;  %v37979_v7 = vsel %vm7679_vm7, %v37963_v2, %v51875_v48  ;;  %v37978_v28 = vsel %vm7679_vm7, %v37961_v29, %v37963_v2  ;;  %v38116_v44 = vand.u32 4294901760, %v38115_v33  ;;  %v38110_v15 = vand.u32 4294901760, %v38109_v11  ;;  %43870 = vmatprep.subr.mxu1 %v51738_v34  ;;  %v54462_v20 = vld [vmem:[#allocation46_spill] sm:$0xff] }
 0xed1   : > { %54459 = vst [vmem:[#allocation111_spill] sm:$0xff] %v51978_v12  ;;  %54460 = vst [vmem:[#allocation112_spill] sm:$0xff] %v51981_v61  ;;  %29986 = vmatmul.mubr.f32.vlgmr.msra.gmra.mrb[10].mxu0 %v54399_v59  ;;  %v38015_v60 = vand.u32 4294901760, %v37979_v7  ;;  %v38017_v32 = vand.u32 4294901760, %v37978_v28  ;;  %43872 = vmatprep.mubr.f32.mxu1 %v54462_v20  ;;  %v38126_v29 = vand.u32 4294901760, %v51978_v12  ;;  %v51998_v9 = vpack.c.bf16 %v38120_v3, %v38108_v41 }
 0xed2   : > { %45201 = vmatpush1.bf16.msra.mxu0 %v51460_v18  ;;  %v51995_v48 = vpack.c.bf16 %v38116_v44, %v38104_v62  ;;  %29991 = vmatprep.mubr.f32.mxu0 %v50264_v13  ;;  %v37955_v2 = vpop.permute.xlu1 %37954  ;;  %v54467_v10 = vand.u32 4294901760, %v51868_v63  ;;  %v52013_v3 = vpack.c.bf16 %v38122_v53, %v38110_v15  ;;  %v54472_v53 = vsub.f32 %v51767_v16, %v51809_v46 }
 0xed3   : > { %54464 = vst [vmem:[#allocation114_spill] sm:$0xff] %v51998_v9  ;;  %45203 = vmatprep.subr.bf16.mxu0 %v51526_v45  ;;  %v52001_v33 = vsub.f32 %v37979_v7, %v38015_v60  ;;  %v52003_v11 = vsub.f32 %v37978_v28, %v38017_v32  ;;  %43871 = vmatpush3.msra.mxu1 %v51738_v34  ;;  %v54470_v28 = vld [vmem:[#allocation47_spill] sm:$0xff]  ;;  %v54474_v9 = vld [vmem:[#allocation88_spill] sm:$0xff] }
 0xed4   : > { %54463 = vst [vmem:[#allocation46_spill] sm:$0xff] %v51995_v48  ;;  %v38715_v18 = vsub.f32 %v51868_v63, %v54467_v10  ;;  %v37976_v62 = vsel %vm7679_vm7, %v37955_v2, %v37957_v22  ;;  %v52011_v44 = vpack.c.bf16 %v38015_v60, %v38011_v4  ;;  %54469 = vst [vmem:[#allocation118_spill] sm:$0xff] %v52013_v3  ;;  %45599 = vmatprep.subr.bf16.mxu1 %v51840_v30  ;;  %v52020_v10 = vpop.permute.xlu0 %31799 }
 0xed5   : > { %54465 = vst [vmem:[#allocation115_spill] sm:$0xff] %v52001_v33  ;;  %54466 = vst [vmem:[#allocation116_spill] sm:$0xff] %v52003_v11  ;;  %v38127_v45 = vsub.f32 %v51978_v12, %v38126_v29  ;;  %v38138_v41 = vand.u32 4294901760, %v52001_v33  ;;  %v38144_v7 = vand.u32 4294901760, %v52003_v11  ;;  %43873 = vmatmul.mubr.f32.vlgmr.msra.gmra.mrb[12].mxu1 %v54470_v28  ;;  %v38013_v20 = vand.u32 4294901760, %v37976_v62  ;;  %29993 = vmatmul.mubr.f32.gmra.mrb[12].mxu0 %v51508_v19 }
 0xed6   : > { %54468 = vst [vmem:[#allocation117_spill] sm:$0xff] %v52011_v44  ;;  %54471 = vst [vmem:[#allocation47_spill] sm:$0xff] %v52020_v10  ;;  %v38735_v4 = vand.u32 4294901760, %v51922_v50  ;;  %45205 = vmatpush1.bf16.msra.mxu0 %v51556_v49  ;;  %45601 = vmatpush3.bf16.msra.mxu1 %v51840_v30  ;;  %v35057_v15 = vand.u32 4294901760, %v54472_v53  ;;  %v54473_v60 = vand.u32 4294901760, %v51898_v27  ;;  %v38729_v28 = vsub.f32 %v51945_v21, %v54104_v52  ;;  %v37969_v53 = vpop.permute.xlu1 %37968 }
 0xed7   : > { %v52037_v22 = vand.u32 4294901760, %v54474_v9  ;;  %45603 = vmatprep.subr.bf16.mxu1 %v51849_v54  ;;  %v52040_v49 = vpack.c.bf16 %v38017_v32, %v38013_v20  ;;  %v52042_v30 = vsub.f32 %v37976_v62, %v38013_v20  ;;  %v38716_v61 = vand.u32 4294901760, %v38715_v18  ;;  %30016 = vmatprep.subr.mxu0 %v51573_v0 }
 0xed8   : > { %v38722_v2 = vsub.f32 %v51898_v27, %v54473_v60  ;;  %30073 = vmatprep.mubr.f32.mxu0 %v50264_v13  ;;  %v52049_v60 = vsel %vm7679_vm7, %v37969_v53, %v51988_v17  ;;  %v38139_v52 = vsub.f32 %v52001_v33, %v38138_v41  ;;  %v52052_v12 = vpack.c.bf16 %v38138_v41, %v38126_v29  ;;  %v52059_v0 = vpop.permute.xlu0 %31805  ;;  %v54481_v33 = vld [vmem:[#allocation74_spill] sm:$0xff] }
 0xed9   : > { %54475 = vst [vmem:[#allocation88_spill] sm:$0xff] %v52040_v49  ;;  %54476 = vst [vmem:[#allocation119_spill] sm:$0xff] %v52042_v30  ;;  %v38145_v62 = vsub.f32 %v52003_v11, %v38144_v7  ;;  %v38132_v20 = vand.u32 4294901760, %v52042_v30  ;;  %43885 = vmatprep.mubr.f32.mxu1 %v54375_v51  ;;  %v38128_v1 = vand.u32 4294901760, %v38127_v45  ;;  %v38730_v41 = vand.u32 4294901760, %v38729_v28  ;;  %v52321_v49 = vld [vmem:[#allocation2 + $0x50] sm:$0xff] }
 0xeda   : > { %54477 = vst [vmem:[#allocation120_spill] sm:$0xff] %v52049_v60  ;;  %54478 = vst [vmem:[#allocation121_spill] sm:$0xff] %v52052_v12  ;;  %v38723_v32 = vand.u32 4294901760, %v38722_v2  ;;  %30018 = vmatpush1.msra.mxu0 %v51611_v36  ;;  %45605 = vmatpush3.bf16.msra.mxu1 %v51849_v54  ;;  %v38140_v17 = vand.u32 4294901760, %v38139_v52  ;;  %v38736_v2 = vsub.f32 %v51922_v50, %v38735_v4  ;;  %v37967_v11 = vpop.permute.xlu1 %37966 }
 0xedb   : > { %54479 = vst [vmem:[#allocation122_spill] sm:$0xff] %v52059_v0  ;;  %v38133_v12 = vsub.f32 %v52042_v30, %v38132_v20  ;;  %45207 = vmatprep.subr.bf16.mxu0 %v54481_v33  ;;  %43883 = vmatprep.subr.mxu1 %v35057_v15  ;;  %v45606_v18 = vpack.c.bf16 %v51688_v6, %v51710_v56  ;;  %v38146_v28 = vand.u32 4294901760, %v38145_v62 }
 0xedc   : > { %v52063_v29 = vpack.c.bf16 %v38723_v32, %v38716_v61  ;;  %v52070_v45 = vpack.c.bf16 %v38144_v7, %v38132_v20  ;;  %v52074_v36 = vsub.f32 %v54474_v9, %v52037_v22  ;;  %30075 = vmatmul.mubr.f32.vlgmr.msra.gmra.mrb[10].mxu0 %v54399_v59  ;;  %v52078_v54 = vsel %vm7679_vm7, %v37967_v11, %v37969_v53  ;;  %v52084_v7 = vpop.permute.xlu0 %31797  ;;  %v54488_v11 = vld [vmem:[#allocation86_spill] sm:$0xff] }
 0xedd   : > { %54483 = vst [vmem:[#allocation124_spill] sm:$0xff] %v52078_v54  ;;  %v52080_v52 = vpack.c.bf16 %v38140_v17, %v38128_v1  ;;  %v38737_v61 = vand.u32 4294901760, %v38736_v2  ;;  %v38134_v32 = vand.u32 4294901760, %v38133_v12  ;;  %45209 = vmatpush3.bf16.msra.mxu0 %v54481_v33  ;;  %30080 = vmatprep.mubr.f32.mxu0 %v50264_v13  ;;  %54485 = vst [vmem:[#allocation126_spill] sm:$0xff] %v52084_v7  ;;  %v54490_v17 = vand.u32 4294901760, %v51868_v63 }
 0xede   : > { %54480 = vst [vmem:[#allocation123_spill] sm:$0xff] %v52063_v29  ;;  %54482 = vst [vmem:[#allocation74_spill] sm:$0xff] %v52070_v45  ;;  %v52088_v9 = vpack.c.bf16 %v51898_v27, %v51868_v63  ;;  %v52092_v20 = vpack.c.bf16 %v51922_v50, %v51945_v21  ;;  %45211 = vmatprep.subr.bf16.mxu0 %v54488_v11  ;;  %43884 = vmatpush3.msra.mxu1 %v35057_v15  ;;  %v54491_v12 = vand.u32 4294901760, %v51898_v27  ;;  %v52106_v2 = vpop.permute.xlu1 %31801 }
 0xedf   : > { %54484 = vst [vmem:[#allocation125_spill] sm:$0xff] %v52080_v52  ;;  %v52095_v1 = vpack.c.bf16 %v38737_v61, %v38730_v41  ;;  %45607 = vmatprep.subr.bf16.mxu1 %v45606_v18  ;;  %43886 = vmatmul.mubr.f32.vlgmr.msra.gmra.mrb[12].mxu1 %v54383_v38  ;;  %v45610_v62 = vpack.c.bf16 %v51715_v14, %v51701_v55  ;;  %54493 = vst [vmem:[#allocation130_spill] sm:$0xff] %v52106_v2  ;;  %v54495_v15 = vand.u32 4294901760, %v51945_v21  ;;  %v54498_v21 = vld [vmem:[#allocation39_spill] sm:$0xff] }
 0xee0   : > { %54486 = vst [vmem:[#allocation127_spill] sm:$0xff] %v52088_v9  ;;  %54487 = vst [vmem:[#allocation128_spill] sm:$0xff] %v52092_v20  ;;  %v52101_v53 = vpack.c.bf16 %v54491_v12, %v54490_v17  ;;  %v52108_v50 = vpack.c.bf16 %v38146_v28, %v38134_v32  ;;  %45609 = vmatpush3.bf16.msra.mxu1 %v45606_v18  ;;  %30082 = vmatmul.mubr.f32.gmra.mrb[12].mxu0 %v51508_v19  ;;  %v32477_v63 = vand.u32 4294901760, %v52106_v2  ;;  %v52120_v61 = vpop.permute.xlu0 %31811  ;;  %v54499_v18 = vld [vmem:[#allocation31_spill] sm:$0xff]  ;;  %v54505_v20 = vld [vmem:[#allocation90_spill] sm:$0xff] }
 0xee1   : > { %54489 = vst [vmem:[#allocation86_spill] sm:$0xff] %v52095_v1  ;;  %v52112_v41 = vpack.c.bf16 %v38735_v4, %v54495_v15  ;;  %v52117_v27 = vand.u32 4294901760, %v52074_v36  ;;  %45213 = vmatpush3.bf16.msra.mxu0 %v54488_v11  ;;  %45611 = vmatprep.subr.bf16.mxu1 %v45610_v62  ;;  %54497 = vst [vmem:[#allocation133_spill] sm:$0xff] %v52120_v61  ;;  %v54522_v52 = vld [vmem:[#allocation35_spill] sm:$0xff] }
 0xee2   : > { %54492 = vst [vmem:[#allocation129_spill] sm:$0xff] %v52101_v53  ;;  %54494 = vst [vmem:[#allocation131_spill] sm:$0xff] %v52108_v50  ;;  %43558 = vmatprep.subr.mxu0 %v52037_v22  ;;  %v32568_v28 = vsub.f32 %v52106_v2, %v32477_v63  ;;  %43560 = vmatprep.mubr.f32.mxu0 %v54498_v21  ;;  %v52125_v4 = vpop.permute.xlu1 %31807  ;;  %v54502_v21 = vld [vmem:[#allocation50_spill] sm:$0xff] }
 0xee3   : > { %54496 = vst [vmem:[#allocation132_spill] sm:$0xff] %v52112_v41  ;;  %43898 = vmatprep.mubr.f32.mxu1 %v54499_v18  ;;  %v32480_v17 = vand.u32 4294901760, %v52125_v4  ;;  %v30210_v12 = vsub.f32 %v52074_v36, %v52117_v27  ;;  %v54501_v41 = vld [vmem:[#allocation83_spill] sm:$0xff] }
 0xee4   : > { %v32569_v32 = vand.u32 4294901760, %v32568_v28  ;;  %45613 = vmatpush3.bf16.msra.mxu1 %v45610_v62  ;;  %v52133_v15 = vpop.permute.xlu0 %31817 }
 0xee5   : > { %43559 = vmatpush3.msra.mxu0 %v52037_v22  ;;  %43896 = vmatprep.subr.mxu1 %v51767_v16  ;;  %54500 = vst [vmem:[#allocation39_spill] sm:$0xff] %v52133_v15  ;;  %v52137_v53 = vpack.c.bf16 %v32480_v17, %v32477_v63  ;;  %v32575_v18 = vsub.f32 %v52125_v4, %v32480_v17  ;;  %v30211_v1 = vand.u32 4294901760, %v30210_v12  ;;  %v54560_v15 = vld [vmem:[#allocation81_spill] sm:$0xff] }
 0xee6   : > { %45215 = vmatprep.subr.bf16.mxu0 %v54501_v41  ;;  %43561 = vmatmul.mubr.f32.vlgmr.msra.gmra.mrb[14].mxu0 %v54502_v21  ;;  %v52141_v62 = vpop.permute.xlu1 %31803  ;;  %v32570_v29 = vsub.f32 %v32568_v28, %v32569_v32  ;;  %v54506_v21 = vld [vmem:[#allocation32_spill] sm:$0xff] }
 0xee7   : > { %54503 = vst [vmem:[#allocation31_spill] sm:$0xff] %v52137_v53  ;;  %45217 = vmatpush3.bf16.msra.mxu0 %v54501_v41  ;;  %54504 = vst [vmem:[#allocation83_spill] sm:$0xff] %v52141_v62  ;;  %43573 = vmatprep.mubr.f32.mxu0 %v54399_v59  ;;  %v32576_v9 = vand.u32 4294901760, %v32575_v18  ;;  %v54508_v41 = vld [vmem:[#allocation34_spill] sm:$0xff]  ;;  %v52152_v45 = vpack.c.bf16 %v32575_v18, %v32568_v28  ;;  %v54515_v28 = vld [vmem:[#allocation76_spill] sm:$0xff] }
 0xee8   : > { %45219 = vmatprep.subr.bf16.mxu0 %v54505_v20  ;;  %43897 = vmatpush3.msra.mxu1 %v51767_v16  ;;  %v52148_v63 = vpop.permute.xlu0 %31809  ;;  %v32571_v30 = vand.u32 4294901760, %v32570_v29  ;;  %v47417_v53 = vld [vmem:[#allocation2 + $0x30] sm:$0xff]  ;;  %v54570_v62 = vld [vmem:[#allocation52_spill] sm:$0xff] }
 0xee9   : > { %45615 = vmatprep.subr.bf16.mxu1 %v51822_v26  ;;  %43899 = vmatmul.mubr.f32.vlgmr.msra.gmra.mrb[12].mxu1 %v54506_v21  ;;  %54507 = vst [vmem:[#allocation50_spill] sm:$0xff] %v52148_v63  ;;  %v32577_v17 = vsub.f32 %v32575_v18, %v32576_v9  ;;  %54509 = vst [vmem:[#allocation90_spill] sm:$0xff] %v52152_v45  ;;  %v52347_v45 = vld [vmem:[#allocation2 + $0x48] sm:$0xff] }
 0xeea   : > { %45617 = vmatpush3.bf16.msra.mxu1 %v51822_v26  ;;  %43911 = vmatprep.mubr.f32.mxu1 %v54508_v41  ;;  %v52156_v16 = vpop.permute.xlu1 %31819  ;;  %v52164_v41 = vpack.c.bf16 %v32576_v9, %v32569_v32  ;;  %v54517_v9 = vand.u32 4294901760, %v51688_v6  ;;  %v54524_v6 = vand.u32 4294901760, %v51715_v14  ;;  %v54556_v39 = vand.u32 4294901760, %v52347_v45 }
 0xeeb   : > { %45221 = vmatpush3.bf16.msra.mxu0 %v54505_v20  ;;  %45619 = vmatprep.subr.bf16.mxu1 %v51832_v5  ;;  %54510 = vst [vmem:[#allocation32_spill] sm:$0xff] %v52156_v16  ;;  %v32486_v12 = vand.u32 4294901760, %v52156_v16  ;;  %v32578_v21 = vand.u32 4294901760, %v32577_v17  ;;  %v54519_v17 = vld [vmem:[#allocation49_spill] sm:$0xff] }
 0xeec   : > { %43571 = vmatprep.subr.mxu0 %v30211_v1  ;;  %v52159_v42 = vpop.permute.xlu0 %31823  ;;  %54513 = vst [vmem:[#allocation135_spill] sm:$0xff] %v52164_v41  ;;  %v52394_v43 = vsub.f32 %v52347_v45, %v54556_v39 }
 0xeed   : > { %54511 = vst [vmem:[#allocation34_spill] sm:$0xff] %v52159_v42  ;;  %v52162_v24 = vpack.c.bf16 %v32578_v21, %v32571_v30  ;;  %v32589_v18 = vsub.f32 %v52156_v16, %v32486_v12  ;;  %v54516_v30 = vand.u32 4294901760, %v51710_v56  ;;  %v54520_v21 = vld [vmem:[#allocation87_spill] sm:$0xff]  ;;  %v54523_v56 = vand.u32 4294901760, %v51701_v55  ;;  %v41523_v55 = vld [vmem:[%s53925_s9 + $0x50] sm:$0xff] }
 0xeee   : > { %45621 = vmatpush3.bf16.msra.mxu1 %v51832_v5  ;;  %v52167_v20 = vpop.permute.xlu1 %31813 }
 0xeef   : > { %54512 = vst [vmem:[#allocation134_spill] sm:$0xff] %v52162_v24  ;;  %43572 = vmatpush3.msra.mxu0 %v30211_v1  ;;  %43909 = vmatprep.subr.mxu1 %v51738_v34  ;;  %54514 = vst [vmem:[#allocation136_spill] sm:$0xff] %v52167_v20  ;;  %v32483_v29 = vand.u32 4294901760, %v52167_v20  ;;  %v45622_v32 = vpack.c.bf16 %v54517_v9, %v54516_v30  ;;  %v32590_v30 = vand.u32 4294901760, %v32589_v18  ;;  %v54551_v24 = vld [vmem:[#allocation65_spill] sm:$0xff] }
 0xef0   : > { %45223 = vmatprep.subr.bf16.mxu0 %v54515_v28  ;;  %43574 = vmatmul.mubr.f32.vlgmr.msra.gmra.mrb[14].mxu0 %v51508_v19  ;;  %v52178_v1 = vpop.permute.xlu0 %31821 }
 0xef1   : > { %45225 = vmatpush3.bf16.msra.mxu0 %v54515_v28  ;;  %54518 = vst [vmem:[#allocation76_spill] sm:$0xff] %v52178_v1  ;;  %43586 = vmatprep.mubr.f32.mxu0 %v54519_v17  ;;  %v52183_v31 = vpack.c.bf16 %v32486_v12, %v32483_v29  ;;  %v32582_v50 = vsub.f32 %v52167_v20, %v32483_v29  ;;  %v54569_v20 = vld [vmem:[#allocation54_spill] sm:$0xff] }
 0xef2   : > { %45227 = vmatprep.subr.bf16.mxu0 %v54520_v21  ;;  %43910 = vmatpush3.msra.mxu1 %v51738_v34  ;;  %v45626_v28 = vpack.c.bf16 %v54524_v6, %v54523_v56  ;;  %v35540_v56 = vsel %vm29463_vm14, %v41523_v55, 0  ;;  %v54571_v10 = vpack.c.bf16 %v54569_v20, %v54570_v62  ;;  %v54577_v20 = vld [vmem:[#allocation63_spill] sm:$0xff] }
 0xef3   : > { %54521 = vst [vmem:[#allocation49_spill] sm:$0xff] %v52183_v31  ;;  %45623 = vmatprep.subr.bf16.mxu1 %v45622_v32  ;;  %43912 = vmatmul.mubr.f32.vlgmr.msra.gmra.mrb[12].mxu1 %v54522_v52  ;;  %v32583_v9 = vand.u32 4294901760, %v32582_v50  ;;  %v52223_v55 = vand.u32 4294901760, %v35540_v56  ;;  %v52225_v48 = vpack.c.bf16 %v32589_v18, %v32582_v50 }
 0xef4   : > { %45625 = vmatpush3.bf16.msra.mxu1 %v45622_v32  ;;  %43924 = vmatprep.mubr.f32.mxu1 %v54375_v51  ;;  %v52193_v12 = vpop.permute.xlu0 %39175  ;;  %v32591_v32 = vsub.f32 %v32589_v18, %v32590_v30 }
 0xef5   : > { %45229 = vmatpush3.bf16.msra.mxu0 %v54520_v21  ;;  %45627 = vmatprep.subr.bf16.mxu1 %v45626_v28  ;;  %54525 = vst [vmem:[#allocation87_spill] sm:$0xff] %v52193_v12  ;;  %v39851_v29 = vand.u32 4294901760, %v52193_v12  ;;  %v32584_v14 = vsub.f32 %v32582_v50, %v32583_v9  ;;  %54529 = vst [vmem:[#allocation139_spill] sm:$0xff] %v52225_v48  ;;  %v30643_v48 = vand.u32 4294901760, %v47415_v23 }
 0xef6   : > { %43584 = vmatprep.subr.mxu0 %v52074_v36  ;;  %v32592_v3 = vand.u32 4294901760, %v32591_v32  ;;  %v52232_v32 = vpack.c.bf16 %v32590_v30, %v32583_v9  ;;  %v54535_v9 = vld [vmem:[#allocation77_spill] sm:$0xff] }
 0xef7   : > { %v39942_v52 = vsub.f32 %v52193_v12, %v39851_v29  ;;  %v32585_v6 = vand.u32 4294901760, %v32584_v14 }
 0xef8   : > { %45629 = vmatpush3.bf16.msra.mxu1 %v45626_v28  ;;  %v52203_v17 = vpop.permute.xlu0 %39181  ;;  %54531 = vst [vmem:[#allocation141_spill] sm:$0xff] %v52232_v32 }
 0xef9   : > { %43585 = vmatpush3.msra.mxu0 %v52074_v36  ;;  %43922 = vmatprep.subr.mxu1 %v51809_v46  ;;  %54526 = vst [vmem:[#allocation35_spill] sm:$0xff] %v52203_v17  ;;  %v39854_v21 = vand.u32 4294901760, %v52203_v17  ;;  %v41524_v36 = vld [vmem:[%s53925_s9 + $0x58] sm:$0xff]  ;;  %v39943_v28 = vand.u32 4294901760, %v39942_v52 }
 0xefa   : > { %45231 = vmatprep.subr.bf16.mxu0 %v54481_v33  ;;  %43587 = vmatmul.mubr.f32.vlgmr.msra.gmra.mrb[14].mxu0 %v51551_v8 }
 0xefb   : > { %45233 = vmatpush3.bf16.msra.mxu0 %v54481_v33  ;;  %43599 = vmatprep.mubr.f32.mxu0 %v51547_v40  ;;  %v52216_v12 = vpack.c.bf16 %v39854_v21, %v39851_v29  ;;  %v39949_v8 = vsub.f32 %v52203_v17, %v39854_v21  ;;  %v52230_v29 = vpack.c.bf16 %v32592_v3, %v32585_v6 }
 0xefc   : > { %45235 = vmatprep.subr.bf16.mxu0 %v54488_v11  ;;  %43923 = vmatpush3.msra.mxu1 %v51809_v46  ;;  %v52221_v40 = vpop.permute.xlu0 %39177  ;;  %v35543_v46 = vsel %vm29463_vm14, %v41524_v36, 0  ;;  %v39944_v50 = vsub.f32 %v39942_v52, %v39943_v28 }
 0xefd   : > { %54527 = vst [vmem:[#allocation137_spill] sm:$0xff] %v52216_v12  ;;  %45631 = vmatprep.subr.bf16.mxu1 %v51822_v26  ;;  %43925 = vmatmul.mubr.f32.vlgmr.msra.gmra.mrb[12].mxu1 %v54383_v38  ;;  %54528 = vst [vmem:[#allocation138_spill] sm:$0xff] %v52221_v40  ;;  %v39950_v14 = vand.u32 4294901760, %v39949_v8  ;;  %v52236_v21 = vpack.c.bf16 %v39949_v8, %v39942_v52 }
 0xefe   : > { %45633 = vmatpush3.bf16.msra.mxu1 %v51822_v26  ;;  %43937 = vmatprep.mubr.f32.mxu1 %v54375_v51  ;;  %54530 = vst [vmem:[#allocation140_spill] sm:$0xff] %v52230_v29  ;;  %v52240_v26 = vsub.f32 %v35540_v56, %v52223_v55  ;;  %v52242_v51 = vand.u32 4294901760, %v35543_v46  ;;  %v39945_v52 = vand.u32 4294901760, %v39944_v50  ;;  %v54536_v56 = vld [vmem:[#allocation75_spill] sm:$0xff] }
 0xeff   : > { %45237 = vmatpush3.bf16.msra.mxu0 %v54488_v11  ;;  %45635 = vmatprep.subr.bf16.mxu1 %v51832_v5  ;;  %54532 = vst [vmem:[#allocation142_spill] sm:$0xff] %v52236_v21  ;;  %v39951_v18 = vsub.f32 %v39949_v8, %v39950_v14  ;;  %v52244_v36 = vpack.c.bf16 %v39950_v14, %v39943_v28  ;;  %v52254_v6 = vand.u32 4294901760, %v54536_v56  ;;  %v54537_v8 = vld [vmem:[#allocation91_spill] sm:$0xff]  ;;  %v52266_v14 = vld [vmem:[#allocation2 + $0x8] sm:$0xff]  ;;  %v54541_v21 = vld [vmem:[#allocation58_spill] sm:$0xff] }
 0xf00   : > { %43597 = vmatprep.subr.mxu0 %v52037_v22  ;;  %v52249_v30 = vpop.permute.xlu0 %39193  ;;  %v52262_v28 = vsub.f32 %v35543_v46, %v52242_v51  ;;  %v52278_v46 = vld [vmem:[#allocation2] sm:$0xff]  ;;  %v54544_v17 = vand.u32 4294901760, %v52266_v14 }
 0xf01   : > { %54533 = vst [vmem:[#allocation143_spill] sm:$0xff] %v52244_v36  ;;  %v39952_v3 = vand.u32 4294901760, %v39951_v18  ;;  %54534 = vst [vmem:[#allocation144_spill] sm:$0xff] %v52249_v30  ;;  %v54539_v18 = vld [vmem:[#allocation55_spill] sm:$0xff] }
 0xf02   : > { %45637 = vmatpush3.bf16.msra.mxu1 %v51832_v5  ;;  %v52259_v5 = vand.u32 4294901760, %v52240_v26  ;;  %v52295_v12 = vand.u32 4294901760, %v52262_v28 }
 0xf03   : > { %43598 = vmatpush3.msra.mxu0 %v52037_v22  ;;  %43935 = vmatprep.subr.mxu1 %v51738_v34  ;;  %v52269_v50 = vpack.c.bf16 %v39952_v3, %v39945_v52  ;;  %v29373_v3 = vld [vmem:[%s53925_s9] sm:$0xff]  ;;  %v52286_v52 = vsub.f32 %v54536_v56, %v52254_v6  ;;  %v52301_v56 = vsub.f32 %v52266_v14, %v54544_v17  ;;  %v54546_v17 = vand.u32 4294901760, %v52278_v46 }
 0xf04   : > { %45239 = vmatprep.subr.bf16.mxu0 %v54535_v9  ;;  %43600 = vmatmul.mubr.f32.vlgmr.msra.gmra.mrb[14].mxu0 %v51606_v25  ;;  %v52290_v25 = vpop.permute.xlu0 %39187  ;;  %v30630_v44 = vsel %vm29463_vm14, %v29373_v3, 0  ;;  %v35634_v32 = vsub.f32 %v52262_v28, %v52295_v12 }
 0xf05   : > { %45241 = vmatpush3.bf16.msra.mxu0 %v54535_v9  ;;  %43612 = vmatprep.mubr.f32.mxu0 %v54399_v59  ;;  %54538 = vst [vmem:[#allocation77_spill] sm:$0xff] %v52269_v50  ;;  %v54540_v9 = vld [vmem:[#allocation62_spill] sm:$0xff]  ;;  %54543 = vst [vmem:[#allocation75_spill] sm:$0xff] %v52290_v25  ;;  %v35623_v50 = vsub.f32 %v52240_v26, %v52259_v5  ;;  %v52319_v60 = vsub.f32 %v52278_v46, %v54546_v17  ;;  %v52337_v41 = vand.u32 4294901760, %v30630_v44 }
 0xf06   : > { %45243 = vmatprep.subr.bf16.mxu0 %v54537_v8  ;;  %43936 = vmatpush3.msra.mxu1 %v51738_v34  ;;  %v52274_v36 = vand.u32 4294901760, %v54540_v9  ;;  %v47412_v34 = vld [vmem:[#allocation2 + $0x20] sm:$0xff]  ;;  %v54548_v29 = vand.u32 4294901760, %v52290_v25  ;;  %v52372_v35 = vand.u32 4294901760, %v35634_v32  ;;  %v54555_v32 = vld [vmem:[#allocation79_spill] sm:$0xff] }
 0xf07   : > { %45639 = vmatprep.subr.bf16.mxu1 %v54539_v18  ;;  %43938 = vmatmul.mubr.f32.vlgmr.msra.gmra.mrb[12].mxu1 %v54383_v38  ;;  %v54542_v38 = vld [vmem:[#allocation68_spill] sm:$0xff]  ;;  %v30639_v40 = vand.u32 4294901760, %v47412_v34 }
 0xf08   : > { %45641 = vmatpush1.bf16.msra.mxu1 %v54541_v21  ;;  %35619 = vmatprep.mubr.f32.mxu1 %v50264_v13  ;;  %v52312_v54 = vsub.f32 %v54540_v9, %v52274_v36  ;;  %v52327_v9 = vand.u32 4294901760, %v35623_v50 }
 0xf09   : > { %45245 = vmatpush3.bf16.msra.mxu0 %v54537_v8  ;;  %45643 = vmatprep.subr.bf16.mxu1 %v54542_v38  ;;  %v52303_v8 = vld [vmem:[#allocation2 + $0x18] sm:$0xff]  ;;  %v52334_v17 = vsub.f32 %v47412_v34, %v30639_v40  ;;  %v54550_v34 = vand.u32 4294901760, %v52249_v30 }
 0xf0a   : > { %43610 = vmatprep.subr.mxu0 %v52117_v27  ;;  %v54547_v50 = vand.u32 4294901760, %v52303_v8 }
 0xf0b   : > { %v39963_v3 = vsub.f32 %v52249_v30, %v54550_v34  ;;  %v52385_v30 = vsub.f32 %v30630_v44, %v52337_v41 }
 0xf0c   : > { %45645 = vmatpush1.bf16.msra.mxu1 %v54545_v37  ;;  %v52345_v57 = vsub.f32 %v52303_v8, %v54547_v50  ;;  %v54554_v50 = vand.u32 4294901760, %v52301_v56 }
 0xf0d   : > { %43611 = vmatpush3.msra.mxu0 %v52117_v27  ;;  %35562 = vmatprep.subr.mxu1 %v52254_v6  ;;  %v30633_v27 = vsel %vm29463_vm14, %v29374_v47, 0  ;;  %v52354_v47 = vsub.f32 %v52290_v25, %v54548_v29  ;;  %v54552_v29 = vand.u32 4294901760, %v52286_v52  ;;  %v39964_v39 = vand.u32 4294901760, %v39963_v3 }
 0xf0e   : > { %45247 = vmatprep.subr.bf16.mxu0 %v54481_v33  ;;  %43613 = vmatmul.mubr.f32.vlgmr.msra.gmra.mrb[14].mxu0 %v51508_v19  ;;  %v52374_v31 = vand.u32 4294901760, %v30633_v27  ;;  %v52381_v34 = vsub.f32 %v52301_v56, %v54554_v50 }
 0xf0f   : > { %45249 = vmatpush3.bf16.msra.mxu0 %v54481_v33  ;;  %43625 = vmatprep.mubr.f32.mxu0 %v54399_v59  ;;  %v54549_v59 = vand.u32 4294901760, %v52321_v49  ;;  %v35693_v25 = vsub.f32 %v52286_v52, %v54552_v29  ;;  %v52389_v29 = vsub.f32 %v47415_v23, %v30643_v48  ;;  %v39957_v1 = vand.u32 4294901760, %v52354_v47 }
 0xf10   : > { %45251 = vmatprep.subr.bf16.mxu0 %v54488_v11  ;;  %35564 = vmatpush1.msra.mxu1 %v52274_v36  ;;  %v54558_v23 = vand.u32 4294901760, %v52266_v14  ;;  %v54561_v14 = vand.u32 4294901760, %v52278_v46  ;;  %v54564_v46 = vand.u32 4294901760, %v52345_v57 }
 0xf11   : > { %v52361_v33 = vsub.f32 %v52321_v49, %v54549_v59  ;;  %45647 = vmatprep.subr.bf16.mxu1 %v54551_v24  ;;  %35625 = vmatmul.mubr.f32.vlgmr.msra.gmra.mrb[8].mxu1 %v52327_v9  ;;  %v54553_v59 = vld [vmem:[#allocation69_spill] sm:$0xff]  ;;  %v54557_v24 = vand.u32 4294901760, %v52312_v54  ;;  %v35694_v63 = vand.u32 4294901760, %v35693_v25  ;;  %v54563_v25 = vand.u32 4294901760, %v52334_v17 }
 0xf12   : > { %45649 = vmatpush1.bf16.msra.mxu1 %v54553_v59  ;;  %35630 = vmatprep.mubr.f32.mxu1 %v50264_v13  ;;  %v30645_v59 = vand.u32 4294901760, %v47417_v53  ;;  %v52466_v61 = vpack.c.bf16 %v39964_v39, %v39957_v1 }
 0xf13   : > { %45253 = vmatpush3.bf16.msra.mxu0 %v54488_v11  ;;  %45651 = vmatprep.subr.bf16.mxu1 %v54555_v32  ;;  %v35699_v44 = vsub.f32 %v52312_v54, %v54557_v24  ;;  %v52404_v11 = vpack.c.bf16 %v30639_v40, %v54558_v23  ;;  %v54559_v32 = vand.u32 4294901760, %v52319_v60  ;;  %v52414_v24 = vsub.f32 %v30633_v27, %v52374_v31 }
 0xf14   : > { %43623 = vmatprep.subr.mxu0 %v52037_v22  ;;  %v54562_v40 = vand.u32 4294901760, %v52303_v8  ;;  %v30747_v50 = vsub.f32 %v52334_v17, %v54563_v25  ;;  %v52430_v27 = vand.u32 4294901760, %v52385_v30  ;;  %v30753_v8 = vsub.f32 %v52345_v57, %v54564_v46  ;;  %v47419_v46 = vld [vmem:[#allocation2 + $0x60] sm:$0xff]  ;;  %54568 = vst [vmem:[#allocation55_spill] sm:$0xff] %v52466_v61 }
 0xf15   : > { %v52409_v42 = vsub.f32 %v52319_v60, %v54559_v32  ;;  %35636 = vmatmul.mubr.f32.gmra.mrb[10].mxu1 %v52372_v35  ;;  %v47418_v32 = vld [vmem:[#allocation2 + $0x68] sm:$0xff]  ;;  %v54565_v25 = vand.u32 4294901760, %v52321_v49  ;;  %v39965_v49 = vsub.f32 %v39963_v3, %v39964_v39 }
 0xf16   : > { %45653 = vmatpush1.bf16.msra.mxu1 %v54560_v15  ;;  %v52421_v23 = vpack.c.bf16 %v54562_v40, %v54561_v14  ;;  %35756 = vmatprep.mubr.f32.mxu1 %v50264_v13  ;;  %v52424_v16 = vand.u32 4294901760, %v47418_v32  ;;  %v52433_v15 = vsub.f32 %v47417_v53, %v30645_v59  ;;  %v52451_v14 = vand.u32 4294901760, %v47419_v46 }
 0xf17   : > { %43624 = vmatpush3.msra.mxu0 %v52037_v22  ;;  %35695 = vmatprep.subr.mxu1 %v35694_v63  ;;  %v52444_v7 = vpack.c.bf16 %v54565_v25, %v30643_v48  ;;  %v35700_v22 = vand.u32 4294901760, %v35699_v44  ;;  %v39958_v63 = vsub.f32 %v52354_v47, %v39957_v1  ;;  %v54566_v40 = vand.u32 4294901760, %v52361_v33 }
 0xf18   : > { %45255 = vmatprep.subr.bf16.mxu0 %v52404_v11  ;;  %43626 = vmatmul.mubr.f32.vlgmr.msra.gmra.mrb[14].mxu0 %v51508_v19  ;;  %v52447_v53 = vsub.f32 %v47418_v32, %v52424_v16  ;;  %v52458_v48 = vand.u32 4294901760, %v52414_v24  ;;  %v30713_v44 = vsub.f32 %v52385_v30, %v52430_v27  ;;  %v52464_v25 = vpack.c.bf16 %v39963_v3, %v52354_v47  ;;  %v54573_v3 = vld [vmem:[#allocation59_spill] sm:$0xff] }
 0xf19   : > { %45257 = vmatpush1.bf16.msra.mxu0 %v52421_v23  ;;  %30709 = vmatprep.mubr.f32.mxu0 %v50264_v13  ;;  %v30771_v19 = vsub.f32 %v52361_v33, %v54566_v40  ;;  %v39959_v32 = vand.u32 4294901760, %v39958_v63  ;;  %v54572_v40 = vand.u32 4294901760, %v52347_v45  ;;  %v52478_v0 = vsub.f32 %v47419_v46, %v52451_v14  ;;  %v54574_v47 = vld [vmem:[#allocation51_spill] sm:$0xff] }
 0xf1a   : > { %45259 = vmatprep.subr.bf16.mxu0 %v52444_v7  ;;  %35701 = vmatpush1.msra.mxu1 %v35700_v22  ;;  %54567 = vst [vmem:[#allocation91_spill] sm:$0xff] %v52464_v25  ;;  %v54158_v22 = vand.u32 4294901760, %v52433_v15  ;;  %v39966_v63 = vand.u32 4294901760, %v39965_v49  ;;  %v54575_v1 = vpack.c.bf16 %v54573_v3, %v54574_v47  ;;  %v30748_v39 = vand.u32 4294901760, %v30747_v50 }
 0xf1b   : > { %45655 = vmatprep.subr.bf16.mxu1 %v54571_v10  ;;  %v52473_v2 = vpack.c.bf16 %v54572_v40, %v30645_v59  ;;  %35758 = vmatmul.mubr.f32.vlgmr.msra.gmra.mrb[8].mxu1 %v52223_v55  ;;  %v54576_v10 = vand.u32 4294901760, %v52389_v29  ;;  %v54578_v59 = vld [vmem:[#allocation67_spill] sm:$0xff]  ;;  %v30754_v49 = vand.u32 4294901760, %v30753_v8  ;;  %v54580_v40 = vand.u32 4294901760, %v52394_v43 }
 0xf1c   : > { %45657 = vmatpush1.bf16.msra.mxu1 %v54575_v1  ;;  %35763 = vmatprep.mubr.f32.mxu1 %v50264_v13  ;;  %v54579_v46 = vpack.c.bf16 %v54577_v20, %v54578_v59  ;;  %v52495_v50 = vpack.c.bf16 %v39966_v63, %v39959_v32  ;;  %v30736_v47 = vand.u32 4294901760, %v52381_v34  ;;  %v52499_v1 = vand.u32 4294901760, %v30713_v44  ;;  %v54582_v63 = vld [vmem:[#allocation72_spill] sm:$0xff]  ;;  %v54583_v59 = vld [vmem:[#allocation61_spill] sm:$0xff] }
 0xf1d   : > { %v30759_v45 = vsub.f32 %v52389_v29, %v54576_v10  ;;  %45261 = vmatpush1.bf16.msra.mxu0 %v52473_v2  ;;  %v30777_v3 = vsub.f32 %v52394_v43, %v54580_v40  ;;  %v30772_v10 = vand.u32 4294901760, %v30771_v19  ;;  %v30724_v62 = vsub.f32 %v52414_v24, %v52458_v48 }
 0xf1e   : > { %45659 = vmatprep.subr.bf16.mxu1 %v54579_v46  ;;  %54581 = vst [vmem:[#allocation62_spill] sm:$0xff] %v52495_v50  ;;  %30652 = vmatprep.subr.mxu0 %v52424_v16  ;;  %v30742_v20 = vand.u32 4294901760, %v52409_v42  ;;  %v30765_v8 = vsub.f32 %v52433_v15, %v54158_v22  ;;  %v54584_v46 = vpack.c.bf16 %v54582_v63, %v54583_v59  ;;  %v54585_v19 = vand.u32 4294901760, %v52447_v53 }
 0xf1f   : > { %35765 = vmatmul.mubr.f32.gmra.mrb[10].mxu1 %v52242_v51  ;;  %v45262_v34 = vpack.c.bf16 %v30748_v39, %v30736_v47  ;;  %v30760_v44 = vand.u32 4294901760, %v30759_v45  ;;  %v30778_v22 = vand.u32 4294901760, %v30777_v3  ;;  %v52519_v63 = vand.u32 4294901760, %v30724_v62 }
 0xf20   : > { %45661 = vmatpush1.bf16.msra.mxu1 %v54584_v46  ;;  %35855 = vmatprep.mubr.f32.mxu1 %v50264_v13  ;;  %v30783_v42 = vsub.f32 %v52447_v53, %v54585_v19  ;;  %v45264_v40 = vpack.c.bf16 %v30754_v49, %v30742_v20  ;;  %v30766_v39 = vand.u32 4294901760, %v30765_v8  ;;  %v54586_v45 = vand.u32 4294901760, %v52478_v0  ;;  %v54587_v20 = vld [vmem:[#allocation60_spill] sm:$0xff]  ;;  %v54589_v46 = vld [vmem:[#allocation78_spill] sm:$0xff] }
 0xf21   : > { %30654 = vmatpush1.msra.mxu0 %v52451_v14  ;;  %35797 = vmatprep.subr.mxu1 %v52286_v52  ;;  %v45266_v32 = vpack.c.bf16 %v30772_v10, %v30760_v44  ;;  %v45272_v3 = vpack.c.bf16 %v52345_v57, %v52319_v60  ;;  %v45274_v10 = vpack.c.bf16 %v52361_v33, %v52389_v29  ;;  %v54591_v44 = vand.u32 4294901760, %v52286_v52 }
 0xf22   : > { %45263 = vmatprep.subr.bf16.mxu0 %v45262_v34  ;;  %30715 = vmatmul.mubr.f32.vlgmr.msra.gmra.mrb[10].mxu0 %v52499_v1  ;;  %v30789_v47 = vsub.f32 %v52478_v0, %v54586_v45  ;;  %v30784_v59 = vand.u32 4294901760, %v30783_v42  ;;  %v45268_v49 = vpack.c.bf16 %v30778_v22, %v30766_v39  ;;  %v45270_v22 = vpack.c.bf16 %v52334_v17, %v52301_v56  ;;  %v54590_v34 = vld [vmem:[#allocation80_spill] sm:$0xff] }
 0xf23   : > { %45265 = vmatpush1.bf16.msra.mxu0 %v45264_v40  ;;  %30720 = vmatprep.mubr.f32.mxu0 %v50264_v13  ;;  %v45276_v8 = vpack.c.bf16 %v52394_v43, %v52433_v15  ;;  %v54592_v19 = vand.u32 4294901760, %v52312_v54  ;;  %v54593_v52 = vand.u32 4294901760, %v52301_v56  ;;  %v54597_v56 = vand.u32 4294901760, %v52389_v29 }
 0xf24   : > { %45267 = vmatprep.subr.bf16.mxu0 %v45266_v32  ;;  %35800 = vmatpush1.msra.mxu1 %v52312_v54  ;;  %v30790_v62 = vand.u32 4294901760, %v30789_v47  ;;  %v54588_v32 = vld [vmem:[#allocation64_spill] sm:$0xff]  ;;  %v54594_v54 = vand.u32 4294901760, %v52334_v17  ;;  %v54598_v17 = vand.u32 4294901760, %v52361_v33  ;;  %v54604_v29 = vand.u32 4294901760, %v52447_v53 }
 0xf25   : > { %45663 = vmatprep.subr.bf16.mxu1 %v54539_v18  ;;  %35858 = vmatmul.mubr.f32.vlgmr.msra.gmra.mrb[8].mxu1 %v52240_v26 }
 0xf26   : > { %45665 = vmatpush1.bf16.msra.mxu1 %v54541_v21  ;;  %30726 = vmatmul.mubr.f32.gmra.mrb[12].mxu0 %v52519_v63  ;;  %v45286_v42 = vpack.c.bf16 %v54594_v54, %v54593_v52  ;;  %v45290_v40 = vpack.c.bf16 %v54598_v17, %v54597_v56 }
 0xf27   : > { %45269 = vmatpush1.bf16.msra.mxu0 %v45268_v49  ;;  %45667 = vmatprep.subr.bf16.mxu1 %v54542_v38 }
 0xf28   : > { %30785 = vmatprep.subr.mxu0 %v30784_v59  ;;  %30846 = vmatprep.mubr.f32.mxu0 %v50264_v13  ;;  %v47421_v59 = vld [vmem:[#allocation2 + $0x10] sm:$0xff] }
 0xf29   : > { %35863 = vmatprep.mubr.f32.mxu1 %v50264_v13  ;;  %v31254_v49 = vand.u32 4294901760, %v47421_v59 }
 0xf2a   : > { %45669 = vmatpush1.bf16.msra.mxu1 %v54545_v37 }
 0xf2b   : > { %30791 = vmatpush1.msra.mxu0 %v30790_v62  ;;  %35889 = vmatprep.subr.mxu1 %v52254_v6  ;;  %v47422_v62 = vld [vmem:[#allocation2 + $0x58] sm:$0xff] }
 0xf2c   : > { %45271 = vmatprep.subr.bf16.mxu0 %v45270_v22  ;;  %30848 = vmatmul.mubr.f32.vlgmr.msra.gmra.mrb[10].mxu0 %v52337_v41 }
 0xf2d   : > { %45273 = vmatpush1.bf16.msra.mxu0 %v45272_v3  ;;  %35866 = vmatmul.mubr.f32.gmra.mrb[10].mxu1 %v52262_v28 }
 0xf2e   : > { %45275 = vmatprep.subr.bf16.mxu0 %v45274_v10  ;;  %35891 = vmatpush1.msra.mxu1 %v52274_v36  ;;  %v54606_v10 = vld [vmem:[#allocation70_spill] sm:$0xff] }
 0xf2f   : > { %35946 = vmatprep.mubr.f32.mxu1 %v50264_v13  ;;  %45671 = vmatprep.subr.bf16.mxu1 %v54587_v20  ;;  %v54607_v20 = vld [vmem:[#allocation84_spill] sm:$0xff] }
 0xf30   : > { %30853 = vmatprep.mubr.f32.mxu0 %v50264_v13 }
 0xf31   : > { %45277 = vmatpush1.bf16.msra.mxu0 %v45276_v8  ;;  %35950 = vmatmul.mubr.f32.vlgmr.msra.gmra.mrb[8].mxu1 %v52259_v5 }
 0xf32   : > { %45673 = vmatpush1.bf16.msra.mxu1 %v54588_v32  ;;  %30855 = vmatmul.mubr.f32.gmra.mrb[12].mxu0 %v52374_v31 }
 0xf33   : > { %45675 = vmatprep.subr.bf16.mxu1 %v54589_v46  ;;  %30887 = vmatprep.subr.mxu0 %v52447_v53 }
 0xf34   : > { %30945 = vmatprep.mubr.f32.mxu0 %v50264_v13  ;;  %35955 = vmatprep.mubr.f32.mxu1 %v50264_v13 }
 0xf35   : > { %30890 = vmatpush1.msra.mxu0 %v52478_v0  ;;  %35959 = vmatmul.mubr.f32.gmra.mrb[10].mxu1 %v52295_v12 }
 0xf36   : > { %45677 = vmatpush1.bf16.msra.mxu1 %v54590_v34  ;;  %45279 = vmatprep.subr.bf16.mxu0 %v52404_v11  ;;  %v47424_v34 = vld [vmem:[#allocation2 + $0x70] sm:$0xff] }
 0xf37   : > { %36000 = vmatprep.subr.mxu1 %v54591_v44  ;;  %30948 = vmatmul.mubr.f32.vlgmr.msra.gmra.mrb[10].mxu0 %v52385_v30  ;;  %v52656_v44 = vand.u32 4294901760, %v47424_v34 }
 0xf38   : > { %45281 = vmatpush1.bf16.msra.mxu0 %v52421_v23  ;;  %36059 = vmatprep.mubr.f32.mxu1 %v50264_v13 }
 0xf39   : > { %45283 = vmatprep.subr.bf16.mxu0 %v52444_v7  ;;  %30953 = vmatprep.mubr.f32.mxu0 %v50264_v13 }
 0xf3a   : > { %36004 = vmatpush1.msra.mxu1 %v54592_v19 }
 0xf3b   : > { %45679 = vmatprep.subr.bf16.mxu1 %v54539_v18  ;;  %36061 = vmatmul.mubr.f32.vlgmr.msra.gmra.mrb[8].mxu1 %v52223_v55  ;;  %v54596_v18 = vand.u32 4294901760, %v52345_v57  ;;  %v54600_v57 = vld [vmem:[#allocation53_spill] sm:$0xff] }
 0xf3c   : > { %45285 = vmatpush1.bf16.msra.mxu0 %v52473_v2  ;;  %45681 = vmatpush1.bf16.msra.mxu1 %v54541_v21  ;;  %v54595_v21 = vand.u32 4294901760, %v52319_v60  ;;  %v54601_v60 = vand.u32 4294901760, %v52433_v15  ;;  %v47420_v15 = vld [vmem:[#allocation2 + $0x28] sm:$0xff] }
 0xf3d   : > { %45683 = vmatprep.subr.bf16.mxu1 %v54542_v38  ;;  %30956 = vmatmul.mubr.f32.gmra.mrb[12].mxu0 %v52414_v24  ;;  %v31257_v47 = vand.u32 4294901760, %v47420_v15 }
 0xf3e   : > { %30979 = vmatprep.subr.mxu0 %v52424_v16  ;;  %31036 = vmatprep.mubr.f32.mxu0 %v50264_v13  ;;  %v45288_v38 = vpack.c.bf16 %v54596_v18, %v54595_v21  ;;  %v54608_v18 = vld [vmem:[#allocation56_spill] sm:$0xff] }
 0xf3f   : > { %36066 = vmatprep.mubr.f32.mxu1 %v50264_v13  ;;  %v52633_v3 = vsub.f32 %v47420_v15, %v31257_v47  ;;  %v52654_v46 = vpack.c.bf16 %v31257_v47, %v31254_v49  ;;  %v54612_v15 = vld [vmem:[#allocation29_spill] sm:$0xff]  ;;  %v54613_v47 = vld [vmem:[#allocation92_spill] sm:$0xff] }
 0xf40   : > { %30981 = vmatpush1.msra.mxu0 %v52451_v14  ;;  %45685 = vmatpush1.bf16.msra.mxu1 %v54545_v37  ;;  %v54599_v37 = vld [vmem:[#allocation73_spill] sm:$0xff] }
 0xf41   : > { %45287 = vmatprep.subr.bf16.mxu0 %v45286_v42  ;;  %36091 = vmatprep.subr.mxu1 %v52254_v6  ;;  %v52597_v39 = vand.u32 4294901760, %v54599_v37  ;;  %v54602_v6 = vand.u32 4294901760, %v52394_v43  ;;  %v54605_v43 = vand.u32 4294901760, %v52478_v0  ;;  %v31263_v0 = vand.u32 4294901760, %v47422_v62 }
 0xf42   : > { %31040 = vmatmul.mubr.f32.vlgmr.msra.gmra.mrb[10].mxu0 %v52430_v27  ;;  %36068 = vmatmul.mubr.f32.gmra.mrb[10].mxu1 %v52242_v51  ;;  %v52670_v42 = vsub.f32 %v47424_v34, %v52656_v44 }
 0xf43   : > { %45289 = vmatpush1.bf16.msra.mxu0 %v45288_v38  ;;  %36148 = vmatprep.mubr.f32.mxu1 %v50264_v13  ;;  %v45292_v45 = vpack.c.bf16 %v54602_v6, %v54601_v60  ;;  %v52611_v33 = vsub.f32 %v54599_v37, %v52597_v39 }
 0xf44   : > { %45291 = vmatprep.subr.bf16.mxu0 %v45290_v40  ;;  %36093 = vmatpush1.msra.mxu1 %v52274_v36  ;;  %v54603_v36 = vld [vmem:[#allocation66_spill] sm:$0xff]  ;;  %v52689_v17 = vand.u32 4294901760, %v52670_v42 }
 0xf45   : > { %45687 = vmatprep.subr.bf16.mxu1 %v54600_v57  ;;  %31045 = vmatprep.mubr.f32.mxu0 %v50264_v13  ;;  %v52625_v53 = vand.u32 4294901760, %v52611_v33  ;;  %v54609_v40 = vld [vmem:[#allocation82_spill] sm:$0xff] }
 0xf46   : > { %36150 = vmatmul.mubr.f32.vlgmr.msra.gmra.mrb[8].mxu1 %v52223_v55  ;;  %31049 = vmatmul.mubr.f32.gmra.mrb[12].mxu0 %v52458_v48 }
 0xf47   : > { %45293 = vmatpush1.bf16.msra.mxu0 %v45292_v45  ;;  %45689 = vmatpush3.bf16.msra.mxu1 %v54600_v57 }
 0xf48   : > { %45691 = vmatprep.subr.bf16.mxu1 %v54603_v36  ;;  %31090 = vmatprep.subr.mxu0 %v54604_v29  ;;  %v31375_v29 = vsub.f32 %v52670_v42, %v52689_v17 }
 0xf49   : > { %31149 = vmatprep.mubr.f32.mxu0 %v50264_v13  ;;  %36155 = vmatprep.mubr.f32.mxu1 %v50264_v13 }
 0xf4a   : > { %36157 = vmatmul.mubr.f32.gmra.mrb[10].mxu1 %v52242_v51 }
 0xf4b   : > { %31094 = vmatpush1.msra.mxu0 %v54605_v43  ;;  %45693 = vmatpush3.bf16.msra.mxu1 %v54603_v36 }
 0xf4c   : > { %45295 = vmatprep.subr.bf16.mxu0 %v52404_v11  ;;  %43948 = vmatprep.subr.mxu1 %v52597_v39  ;;  %v47423_v11 = vld [vmem:[#allocation2 + $0x40] sm:$0xff] }
 0xf4d   : > { %31151 = vmatmul.mubr.f32.vlgmr.msra.gmra.mrb[10].mxu0 %v52337_v41  ;;  %43950 = vmatprep.mubr.f32.mxu1 %v52327_v9  ;;  %v31260_v22 = vand.u32 4294901760, %v47423_v11  ;;  %v36285_v9 = vsub.f32 %v52611_v33, %v52625_v53 }
 0xf4e   : > { %45297 = vmatpush1.bf16.msra.mxu0 %v52421_v23  ;;  %31156 = vmatprep.mubr.f32.mxu0 %v50264_v13  ;;  %v52641_v23 = vsub.f32 %v47421_v59, %v31254_v49  ;;  %v52726_v59 = vsel %vm6649_vm6, %v54613_v47, %v54612_v15  ;;  %v54614_v49 = vld [vmem:[#allocation17_spill] sm:$0xff] }
 0xf4f   : > { %45299 = vmatprep.subr.bf16.mxu0 %v52444_v7  ;;  %43949 = vmatpush3.msra.mxu1 %v52597_v39  ;;  %v52643_v7 = vsub.f32 %v47422_v62, %v31263_v0  ;;  %v52650_v8 = vsub.f32 %v47423_v11, %v31260_v22  ;;  %v36286_v32 = vand.u32 4294901760, %v36285_v9  ;;  %v52663_v19 = vpack.c.bf16 %v31263_v0, %v31260_v22  ;;  %v54615_v0 = vld [vmem:[#allocation57_spill] sm:$0xff]  ;;  %v54617_v22 = vld [vmem:[#allocation30_spill] sm:$0xff]  ;;  %v54618_v9 = vld [vmem:[#allocation40_spill] sm:$0xff] }
 0xf50   : > { %45695 = vmatprep.subr.bf16.mxu1 %v54606_v10  ;;  %43951 = vmatmul.mubr.f32.vlgmr.msra.gmra.mrb[12].mxu1 %v52372_v35  ;;  %v31353_v35 = vand.u32 4294901760, %v52633_v3  ;;  %v52731_v62 = vsel %vm6649_vm6, %v54614_v49, %v54613_v47 }
 0xf51   : > { %45697 = vmatpush3.bf16.msra.mxu1 %v54606_v10  ;;  %31158 = vmatmul.mubr.f32.gmra.mrb[12].mxu0 %v52374_v31  ;;  %v31360_v54 = vand.u32 4294901760, %v52650_v8  ;;  %v36780_v34 = vand.u32 4294901760, %v52731_v62 }
 0xf52   : > { %45301 = vmatpush1.bf16.msra.mxu0 %v52473_v2  ;;  %45699 = vmatprep.subr.bf16.mxu1 %v54607_v20  ;;  %v31346_v2 = vand.u32 4294901760, %v52641_v23  ;;  %v31354_v52 = vsub.f32 %v52633_v3, %v31353_v35 }
 0xf53   : > { %31181 = vmatprep.subr.mxu0 %v52424_v16  ;;  %31238 = vmatprep.mubr.f32.mxu0 %v50264_v13  ;;  %v31367_v16 = vand.u32 4294901760, %v52643_v7  ;;  %v31361_v56 = vsub.f32 %v52650_v8, %v31360_v54 }
 0xf54   : > { %43963 = vmatprep.mubr.f32.mxu1 %v52223_v55  ;;  %v31355_v38 = vand.u32 4294901760, %v31354_v52 }
 0xf55   : > { %45701 = vmatpush3.bf16.msra.mxu1 %v54607_v20  ;;  %v31368_v21 = vsub.f32 %v52643_v7, %v31367_v16  ;;  %v31362_v45 = vand.u32 4294901760, %v31361_v56  ;;  %v54621_v56 = vld [vmem:[#allocation25_spill] sm:$0xff] }
 0xf56   : > { %31183 = vmatpush1.msra.mxu0 %v52451_v14  ;;  %43961 = vmatprep.subr.mxu1 %v36286_v32  ;;  %v31347_v14 = vsub.f32 %v52641_v23, %v31346_v2 }
 0xf57   : > { %45303 = vmatprep.subr.bf16.mxu0 %v52654_v46  ;;  %31240 = vmatmul.mubr.f32.vlgmr.msra.gmra.mrb[10].mxu0 %v52337_v41  ;;  %v31369_v60 = vand.u32 4294901760, %v31368_v21 }
 0xf58   : > { %45305 = vmatpush3.bf16.msra.mxu0 %v52654_v46  ;;  %31245 = vmatprep.mubr.f32.mxu0 %v50264_v13  ;;  %v31348_v37 = vand.u32 4294901760, %v31347_v14  ;;  %v41525_v14 = vld [vmem:[%s53925_s9 + $0x60] sm:$0xff] }
 0xf59   : > { %45307 = vmatprep.subr.bf16.mxu0 %v52663_v19  ;;  %43962 = vmatpush3.msra.mxu1 %v36286_v32  ;;  %v45314_v43 = vpack.c.bf16 %v31369_v60, %v31362_v45  ;;  %v54619_v32 = vld [vmem:[#allocation85_spill] sm:$0xff]  ;;  %v52781_v45 = vsub.f32 %v52731_v62, %v36780_v34 }
 0xf5a   : > { %45703 = vmatprep.subr.bf16.mxu1 %v54608_v18  ;;  %43964 = vmatmul.mubr.f32.vlgmr.msra.gmra.mrb[12].mxu1 %v52242_v51  ;;  %v45310_v6 = vpack.c.bf16 %v31355_v38, %v31348_v37  ;;  %v54620_v38 = vld [vmem:[#allocation95_spill] sm:$0xff]  ;;  %v54622_v37 = vld [vmem:[#allocation16_spill] sm:$0xff] }
 0xf5b   : > { %45705 = vmatpush3.bf16.msra.mxu1 %v54608_v18  ;;  %31247 = vmatmul.mubr.f32.gmra.mrb[12].mxu0 %v52374_v31  ;;  %v54164_v47 = vand.u32 4294901760, %v52781_v45 }
 0xf5c   : > { %45309 = vmatpush3.bf16.msra.mxu0 %v52663_v19  ;;  %45707 = vmatprep.subr.bf16.mxu1 %v54609_v40 }
 0xf5d   : > { %43636 = vmatprep.subr.mxu0 %v52656_v44  ;;  %43638 = vmatprep.mubr.f32.mxu0 %v52499_v1  ;;  %v45318_v1 = vpack.c.bf16 %v52633_v3, %v52641_v23 }
 0xf5e   : > { %43976 = vmatprep.mubr.f32.mxu1 %v52240_v26  ;;  %v31376_v26 = vand.u32 4294901760, %v31375_v29  ;;  %v36769_v29 = vsel %vm29463_vm14, %v41525_v14, 0  ;;  %v54625_v14 = vld [vmem:[#allocation96_spill] sm:$0xff] }
 0xf5f   : > { %45709 = vmatpush3.bf16.msra.mxu1 %v54609_v40  ;;  %v36751_v40 = vsel %vm6649_vm6, %v54621_v56, %v54620_v38  ;;  %v36752_v56 = vsel %vm6649_vm6, %v54620_v38, %v54625_v14 }
 0xf60   : > { %43637 = vmatpush3.msra.mxu0 %v52656_v44  ;;  %43974 = vmatprep.subr.mxu1 %v52611_v33  ;;  %v52879_v23 = vand.u32 4294901760, %v36752_v56 }
 0xf61   : > { %45311 = vmatprep.subr.bf16.mxu0 %v45310_v6  ;;  %43639 = vmatmul.mubr.f32.vlgmr.msra.gmra.mrb[14].mxu0 %v52519_v63  ;;  %v54610_v63 = vld [vmem:[#allocation89_spill] sm:$0xff] }
 0xf62   : > { %45313 = vmatpush3.bf16.msra.mxu0 %v45310_v6  ;;  %43651 = vmatprep.mubr.f32.mxu0 %v52337_v41  ;;  %v52746_v20 = vsel %vm6649_vm6, %v54610_v63, %v54618_v9 }
 0xf63   : > { %45315 = vmatprep.subr.bf16.mxu0 %v45314_v43  ;;  %43975 = vmatpush3.msra.mxu1 %v52611_v33  ;;  %v36774_v21 = vand.u32 4294901760, %v52746_v20 }
 0xf64   : > { %45711 = vmatprep.subr.bf16.mxu1 %v54600_v57  ;;  %43977 = vmatmul.mubr.f32.vlgmr.msra.gmra.mrb[12].mxu1 %v52262_v28  ;;  %v45322_v28 = vpack.c.bf16 %v52643_v7, %v52650_v8 }
 0xf65   : > { %45713 = vmatpush3.bf16.msra.mxu1 %v54600_v57  ;;  %43989 = vmatprep.mubr.f32.mxu1 %v52259_v5  ;;  %v54611_v5 = vld [vmem:[#allocation93_spill] sm:$0xff] }
 0xf66   : > { %45317 = vmatpush3.bf16.msra.mxu0 %v45314_v43  ;;  %45715 = vmatprep.subr.bf16.mxu1 %v54603_v36  ;;  %v52719_v33 = vsel %vm6649_vm6, %v54611_v5, %v54610_v63  ;;  %v54624_v5 = vld [vmem:[#allocation42_spill] sm:$0xff] }
 0xf67   : > { %43649 = vmatprep.subr.mxu0 %v31376_v26  ;;  %v36776_v11 = vand.u32 4294901760, %v52719_v33 }
 0xf69   : > { %45717 = vmatpush3.bf16.msra.mxu1 %v54603_v36  ;;  %v52760_v18 = vsub.f32 %v52719_v33, %v36776_v11  ;;  %v52890_v8 = vpack.c.bf16 %v36780_v34, %v36776_v11 }
 0xf6a   : > { %43650 = vmatpush3.msra.mxu0 %v31376_v26  ;;  %43987 = vmatprep.subr.mxu1 %v52597_v39 }
 0xf6b   : > { %45319 = vmatprep.subr.bf16.mxu0 %v45318_v1  ;;  %43652 = vmatmul.mubr.f32.vlgmr.msra.gmra.mrb[14].mxu0 %v52374_v31 }
 0xf6c   : > { %45321 = vmatpush3.bf16.msra.mxu0 %v45318_v1  ;;  %43664 = vmatprep.mubr.f32.mxu0 %v52385_v30  ;;  %v54616_v30 = vld [vmem:[#allocation37_spill] sm:$0xff]  ;;  %v52796_v1 = vand.u32 4294901760, %v36751_v40 }
 0xf6d   : > { %45323 = vmatprep.subr.bf16.mxu0 %v45322_v28  ;;  %43988 = vmatpush3.msra.mxu1 %v52597_v39  ;;  %v52739_v10 = vsel %vm6649_vm6, %v54617_v22, %v54616_v30  ;;  %v52769_v60 = vsel %vm6649_vm6, %v54616_v30, %v54622_v37 }
 0xf6e   : > { %45719 = vmatprep.subr.bf16.mxu1 %v54615_v0  ;;  %43990 = vmatmul.mubr.f32.vlgmr.msra.gmra.mrb[12].mxu1 %v52295_v12  ;;  %v36778_v12 = vand.u32 4294901760, %v52726_v59  ;;  %v36784_v52 = vand.u32 4294901760, %v52739_v10  ;;  %v36782_v63 = vand.u32 4294901760, %v52769_v60  ;;  %v52830_v9 = vsub.f32 %v36751_v40, %v52796_v1 }
 0xf6f   : > { %45721 = vmatpush3.bf16.msra.mxu1 %v54615_v0  ;;  %44002 = vmatprep.mubr.f32.mxu1 %v52223_v55 }
 0xf70   : > { %45325 = vmatpush3.bf16.msra.mxu0 %v45322_v28  ;;  %45723 = vmatprep.subr.bf16.mxu1 %v54619_v32  ;;  %v52776_v6 = vsub.f32 %v52726_v59, %v36778_v12  ;;  %v52794_v26 = vsub.f32 %v52739_v10, %v36784_v52  ;;  %v54165_v28 = vand.u32 4294901760, %v52760_v18  ;;  %v52896_v7 = vpack.c.bf16 %v36778_v12, %v36774_v21 }
 0xf71   : > { %43662 = vmatprep.subr.mxu0 %v52670_v42 }
 0xf72   : > { %v54166_v0 = vand.u32 4294901760, %v52776_v6 }
 0xf73   : > { %45725 = vmatpush3.bf16.msra.mxu1 %v54619_v32 }
 0xf74   : > { %43663 = vmatpush3.msra.mxu0 %v52670_v42  ;;  %44000 = vmatprep.subr.mxu1 %v52625_v53  ;;  %v54623_v42 = vld [vmem:[#allocation38_spill] sm:$0xff]  ;;  %v36886_v38 = vsub.f32 %v52776_v6, %v54166_v0 }
 0xf75   : > { %45327 = vmatprep.subr.bf16.mxu0 %v52654_v46  ;;  %43665 = vmatmul.mubr.f32.vlgmr.msra.gmra.mrb[14].mxu0 %v52414_v24  ;;  %v52789_v43 = vsel %vm6649_vm6, %v54623_v42, %v51691_v58  ;;  %v41526_v24 = vld [vmem:[%s53925_s9 + $0x68] sm:$0xff]  ;;  %v52806_v58 = vsub.f32 %v52746_v20, %v36774_v21  ;;  %v52813_v15 = vsel %vm6649_vm6, %v54624_v5, %v54623_v42  ;;  %v54626_v21 = vld [vmem:[#allocation122_spill] sm:$0xff] }
 0xf76   : > { %45329 = vmatpush3.bf16.msra.mxu0 %v52654_v46  ;;  %43677 = vmatprep.mubr.f32.mxu0 %v52430_v27  ;;  %v52819_v27 = vand.u32 4294901760, %v36769_v29  ;;  %v36786_v49 = vand.u32 4294901760, %v52789_v43  ;;  %v36772_v30 = vsel %vm29463_vm14, %v41526_v24, 0  ;;  %v36788_v22 = vand.u32 4294901760, %v52813_v15 }
 0xf77   : > { %45331 = vmatprep.subr.bf16.mxu0 %v52663_v19  ;;  %44001 = vmatpush3.msra.mxu1 %v52625_v53  ;;  %v54160_v53 = vand.u32 4294901760, %v52794_v26  ;;  %v54167_v32 = vand.u32 4294901760, %v52806_v58  ;;  %v52848_v37 = vand.u32 4294901760, %v36772_v30  ;;  %v36892_v42 = vsub.f32 %v52781_v45, %v54164_v47  ;;  %v54634_v47 = vld [vmem:[#allocation39_spill] sm:$0xff] }
 0xf78   : > { %45727 = vmatprep.subr.bf16.mxu1 %v54600_v57  ;;  %44003 = vmatmul.mubr.f32.vlgmr.msra.gmra.mrb[12].mxu1 %v52242_v51  ;;  %v52846_v40 = vsub.f32 %v36769_v29, %v52819_v27  ;;  %v45334_v24 = vpack.c.bf16 %v31353_v35, %v31346_v2  ;;  %v52870_v5 = vsub.f32 %v52813_v15, %v36788_v22  ;;  %v36887_v62 = vand.u32 4294901760, %v36886_v38 }
 0xf79   : > { %45729 = vmatpush3.bf16.msra.mxu1 %v54600_v57  ;;  %44015 = vmatprep.mubr.f32.mxu1 %v52223_v55  ;;  %v36880_v57 = vsub.f32 %v52760_v18, %v54165_v28  ;;  %v52838_v55 = vsub.f32 %v52769_v60, %v36782_v63  ;;  %v52854_v60 = vsub.f32 %v52789_v43, %v36786_v49  ;;  %v54159_v43 = vand.u32 4294901760, %v52830_v9 }
 0xf7a   : > { %45333 = vmatpush3.bf16.msra.mxu0 %v52663_v19  ;;  %45731 = vmatprep.subr.bf16.mxu1 %v54603_v36  ;;  %v52867_v29 = vsub.f32 %v52794_v26, %v54160_v53  ;;  %v36874_v35 = vsub.f32 %v52806_v58, %v54167_v32  ;;  %v54162_v20 = vand.u32 4294901760, %v52870_v5  ;;  %v52918_v34 = vpack.c.bf16 %v36786_v49, %v36782_v63  ;;  %v54627_v63 = vld [vmem:[#allocation130_spill] sm:$0xff]  ;;  %v54628_v49 = vld [vmem:[#allocation47_spill] sm:$0xff]  ;;  %v54630_v53 = vld [vmem:[#allocation136_spill] sm:$0xff] }
 0xf7b   : > { %43675 = vmatprep.subr.mxu0 %v52656_v44  ;;  %v36881_v3 = vand.u32 4294901760, %v36880_v57  ;;  %v54161_v2 = vand.u32 4294901760, %v52838_v55  ;;  %v54163_v59 = vand.u32 4294901760, %v52854_v60  ;;  %v52914_v12 = vsub.f32 %v52830_v9, %v54159_v43 }
 0xf7c   : > { %v52926_v15 = vsel %vm2529_vm2, %v54626_v21, %v52125_v4  ;;  %v54629_v4 = vld [vmem:[#allocation83_spill] sm:$0xff] }
 0xf7d   : > { %45733 = vmatpush3.bf16.msra.mxu1 %v54603_v36  ;;  %v45338_v36 = vpack.c.bf16 %v31367_v16, %v31360_v54  ;;  %v52903_v16 = vsub.f32 %v36772_v30, %v52848_v37  ;;  %v36893_v54 = vand.u32 4294901760, %v36892_v42  ;;  %v36875_v30 = vand.u32 4294901760, %v36874_v35 }
 0xf7e   : > { %43676 = vmatpush3.msra.mxu0 %v52656_v44  ;;  %44013 = vmatprep.subr.mxu1 %v52597_v39  ;;  %v36898_v57 = vsub.f32 %v52838_v55, %v54161_v2  ;;  %v52944_v42 = vsel %vm2529_vm2, %v54629_v4, %v54626_v21  ;;  %v52954_v35 = vpack.c.bf16 %v36788_v22, %v36784_v52  ;;  %v31862_v4 = vand.u32 4294901760, %v52926_v15  ;;  %v54631_v2 = vld [vmem:[#allocation133_spill] sm:$0xff]  ;;  %v31816_v52 = vpop.permute.xlu1 %31815 }
 0xf7f   : > { %45335 = vmatprep.subr.bf16.mxu0 %v45334_v24  ;;  %43678 = vmatmul.mubr.f32.vlgmr.msra.gmra.mrb[14].mxu0 %v52458_v48  ;;  %v52900_v48 = vand.u32 4294901760, %v52846_v40  ;;  %v52950_v38 = vand.u32 4294901760, %v52903_v16  ;;  %v45744_v43 = vpack.c.bf16 %v36893_v54, %v36881_v3  ;;  %v36916_v21 = vsub.f32 %v52870_v5, %v54162_v20  ;;  %v54632_v54 = vld [vmem:[#allocation126_spill] sm:$0xff] }
 0xf80   : > { %45337 = vmatpush3.bf16.msra.mxu0 %v45334_v24  ;;  %43690 = vmatprep.mubr.f32.mxu0 %v52337_v41  ;;  %v52967_v10 = vsel %vm2529_vm2, %v54631_v2, %v54630_v53  ;;  %v36899_v20 = vand.u32 4294901760, %v36898_v57  ;;  %v41518_v53 = vld [vmem:[%s53925_s9 + $0x28] sm:$0xff]  ;;  %v52996_v0 = vsel %vm2529_vm2, %v31816_v52, %v54634_v47  ;;  %v53004_v33 = vsub.f32 %v52926_v15, %v31862_v4 }
 0xf81   : > { %45339 = vmatprep.subr.bf16.mxu0 %v45338_v36  ;;  %44014 = vmatpush3.msra.mxu1 %v52597_v39  ;;  %v52921_v39 = vsub.f32 %v36752_v56, %v52879_v23  ;;  %v52939_v56 = vsel %vm2529_vm2, %v54628_v49, %v54627_v63  ;;  %v36852_v24 = vsub.f32 %v52846_v40, %v52900_v48  ;;  %v31866_v28 = vand.u32 4294901760, %v52967_v10 }
 0xf82   : > { %45735 = vmatprep.subr.bf16.mxu1 %v52896_v7  ;;  %44016 = vmatmul.mubr.f32.vlgmr.msra.gmra.mrb[12].mxu1 %v52242_v51  ;;  %v41517_v51 = vld [vmem:[%s53925_s9 + $0x20] sm:$0xff]  ;;  %v45742_v63 = vpack.c.bf16 %v36887_v62, %v36875_v30  ;;  %v31858_v3 = vand.u32 4294901760, %v52939_v56  ;;  %v52974_v62 = vsel %vm2529_vm2, %v54632_v54, %v54628_v49  ;;  %v54169_v30 = vand.u32 4294901760, %v52944_v42 }
 0xf83   : > { %45737 = vmatpush1.bf16.msra.mxu1 %v52890_v8  ;;  %36848 = vmatprep.mubr.f32.mxu1 %v50264_v13  ;;  %v31853_v22 = vsel %vm29463_vm14, %v41517_v51, 0  ;;  %v52988_v49 = vand.u32 4294901760, %v36852_v24  ;;  %v54168_v54 = vand.u32 4294901760, %v52921_v39  ;;  %v36863_v57 = vsub.f32 %v52903_v16, %v52950_v38 }
 0xf84   : > { %45341 = vmatpush3.bf16.msra.mxu0 %v45338_v36  ;;  %45739 = vmatprep.subr.bf16.mxu1 %v52918_v34  ;;  %v36910_v36 = vsub.f32 %v52854_v60, %v54163_v59  ;;  %v54633_v59 = vld [vmem:[#allocation32_spill] sm:$0xff]  ;;  %v36917_v24 = vand.u32 4294901760, %v36916_v21  ;;  %v31860_v32 = vand.u32 4294901760, %v52974_v62  ;;  %v53010_v52 = vsub.f32 %v52939_v56, %v31858_v3 }
 0xf85   : > { %43688 = vmatprep.subr.mxu0 %v52689_v17  ;;  %v52984_v51 = vsel %vm2529_vm2, %v54634_v47, %v54633_v59  ;;  %54635 = vst [vmem:[#allocation58_spill] sm:$0xff] %v52988_v49  ;;  %v53000_v59 = vand.u32 4294901760, %v31853_v22  ;;  %v31856_v47 = vsel %vm29463_vm14, %v41518_v53, 0  ;;  %v53030_v56 = vand.u32 4294901760, %v36863_v57 }
 0xf86   : > { %v31870_v11 = vand.u32 4294901760, %v52984_v51  ;;  %v53033_v53 = vsub.f32 %v52967_v10, %v31866_v28  ;;  %v54639_v10 = vld [vmem:[#allocation34_spill] sm:$0xff]  ;;  %v53060_v25 = vpack.c.bf16 %v31862_v4, %v31858_v3  ;;  %v54178_v50 = vand.u32 4294901760, %v53010_v52 }
 0xf87   : > { %45741 = vmatpush1.bf16.msra.mxu1 %v52954_v35  ;;  %54637 = vst [vmem:[#allocation68_spill] sm:$0xff] %v53030_v56 }
 0xf88   : > { %43689 = vmatpush3.msra.mxu0 %v52689_v17  ;;  %36791 = vmatprep.subr.mxu1 %v52879_v23  ;;  %v36911_v17 = vand.u32 4294901760, %v36910_v36  ;;  %v54636_v36 = vld [vmem:[#allocation50_spill] sm:$0xff]  ;;  %v53055_v61 = vsub.f32 %v52984_v51, %v31870_v11  ;;  %v54177_v4 = vand.u32 4294901760, %v53033_v53 }
 0xf89   : > { %45343 = vmatprep.subr.bf16.mxu0 %v52654_v46  ;;  %43691 = vmatmul.mubr.f32.vlgmr.msra.gmra.mrb[14].mxu0 %v52374_v31  ;;  %v53016_v21 = vsel %vm2529_vm2, %v54636_v36, %v54631_v2  ;;  %v36922_v2 = vsub.f32 %v52921_v39, %v54168_v54  ;;  %v53043_v36 = vand.u32 4294901760, %v31856_v47  ;;  %v53046_v54 = vsub.f32 %v52974_v62, %v31860_v32 }
 0xf8a   : > { %45345 = vmatpush3.bf16.msra.mxu0 %v52654_v46  ;;  %43703 = vmatprep.mubr.f32.mxu0 %v52337_v41  ;;  %v45746_v15 = vpack.c.bf16 %v36911_v17, %v36899_v20  ;;  %v53023_v41 = vsub.f32 %v52944_v42, %v54169_v30  ;;  %v31872_v46 = vand.u32 4294901760, %v52996_v0  ;;  %v53035_v20 = vpop.permute.xlu1 %31825  ;;  %v45750_v17 = vpack.c.bf16 %v52776_v6, %v52806_v58 }
 0xf8b   : > { %45347 = vmatprep.subr.bf16.mxu0 %v52663_v19  ;;  %36793 = vmatpush1.msra.mxu1 %v52796_v1  ;;  %54638 = vst [vmem:[#allocation71_spill] sm:$0xff] %v53035_v20  ;;  %v31868_v57 = vand.u32 4294901760, %v53016_v21  ;;  %v31836_v30 = vsel %vm2529_vm2, %v54639_v10, %v53035_v20  ;;  %v36923_v51 = vand.u32 4294901760, %v36922_v2  ;;  %v54179_v3 = vand.u32 4294901760, %v53046_v54 }
 0xf8c   : > { %45743 = vmatprep.subr.bf16.mxu1 %v45742_v63  ;;  %36854 = vmatmul.mubr.f32.vlgmr.msra.gmra.mrb[8].mxu1 %v52988_v49  ;;  %v53041_v63 = vsub.f32 %v31853_v22, %v53000_v59  ;;  %v54640_v22 = vand.u32 4294901760, %v52867_v29  ;;  %v54176_v49 = vand.u32 4294901760, %v53023_v41  ;;  %v53065_v20 = vsub.f32 %v52996_v0, %v31872_v46 }
 0xf8d   : > { %45745 = vmatpush1.bf16.msra.mxu1 %v45744_v43  ;;  %36859 = vmatprep.mubr.f32.mxu1 %v50264_v13  ;;  %v53071_v43 = vand.u32 4294901760, %v31836_v30  ;;  %v53079_v0 = vsub.f32 %v31856_v47, %v53043_v36  ;;  %v54180_v47 = vand.u32 4294901760, %v53055_v61 }
 0xf8e   : > { %45349 = vmatpush3.bf16.msra.mxu0 %v52663_v19  ;;  %45747 = vmatprep.subr.bf16.mxu1 %v45746_v15  ;;  %v45748_v62 = vpack.c.bf16 %v36917_v24, %v54640_v22  ;;  %v54641_v19 = vld [vmem:[#allocation76_spill] sm:$0xff]  ;;  %v53075_v29 = vand.u32 4294901760, %v53041_v63  ;;  %v54642_v24 = vand.u32 4294901760, %v52944_v42  ;;  %v54643_v22 = vand.u32 4294901760, %v53004_v33 }
 0xf8f   : > { %43701 = vmatprep.subr.mxu0 %v52656_v44  ;;  %v31835_v15 = vsel %vm2529_vm2, %v54641_v19, %v54639_v10  ;;  %v53087_v10 = vsub.f32 %v53016_v21, %v31868_v57  ;;  %v53094_v19 = vsub.f32 %v31836_v30, %v53071_v43  ;;  %v53098_v42 = vpack.c.bf16 %v31870_v11, %v31866_v28 }
 0xf90   : > { %36865 = vmatmul.mubr.f32.gmra.mrb[10].mxu1 %v53030_v56  ;;  %v53084_v2 = vpack.c.bf16 %v54642_v24, %v31860_v32  ;;  %v36929_v32 = vand.u32 4294901760, %v52914_v12  ;;  %v54182_v21 = vand.u32 4294901760, %v53065_v20  ;;  %v45754_v30 = vpack.c.bf16 %v52854_v60, %v52838_v55 }
 0xf91   : > { %45749 = vmatpush1.bf16.msra.mxu1 %v45748_v62  ;;  %36985 = vmatprep.mubr.f32.mxu1 %v50264_v13  ;;  %v31970_v62 = vsub.f32 %v53004_v33, %v54643_v22  ;;  %v31936_v28 = vsub.f32 %v53041_v63, %v53075_v29  ;;  %v31982_v11 = vsub.f32 %v53033_v53, %v54177_v4  ;;  %v53122_v12 = vand.u32 4294901760, %v53079_v0 }
 0xf92   : > { %43702 = vmatpush3.msra.mxu0 %v52656_v44  ;;  %36924 = vmatprep.subr.mxu1 %v36923_v51  ;;  %v31976_v44 = vsub.f32 %v53023_v41, %v54176_v49  ;;  %v53106_v51 = vand.u32 4294901760, %v31835_v15  ;;  %v31964_v24 = vsub.f32 %v53046_v54, %v54179_v3  ;;  %v54644_v4 = vpack.c.bf16 %v52781_v45, %v52760_v18 }
 0xf93   : > { %45351 = vmatprep.subr.bf16.mxu0 %v53060_v25  ;;  %43704 = vmatmul.mubr.f32.vlgmr.msra.gmra.mrb[14].mxu0 %v52374_v31  ;;  %v31958_v31 = vsub.f32 %v53010_v52, %v54178_v50  ;;  %v31971_v50 = vand.u32 4294901760, %v31970_v62  ;;  %v31994_v3 = vsub.f32 %v53055_v61, %v54180_v47  ;;  %v53149_v62 = vand.u32 4294901760, %v31936_v28 }
 0xf94   : > { %45353 = vmatpush1.bf16.msra.mxu0 %v53084_v2  ;;  %31932 = vmatprep.mubr.f32.mxu0 %v50264_v13  ;;  %v53131_v49 = vsub.f32 %v31835_v15, %v53106_v51  ;;  %v31977_v15 = vand.u32 4294901760, %v31976_v44  ;;  %v31983_v22 = vand.u32 4294901760, %v31982_v11  ;;  %v31947_v47 = vsub.f32 %v53079_v0, %v53122_v12 }
 0xf95   : > { %45355 = vmatprep.subr.bf16.mxu0 %v53098_v42  ;;  %36930 = vmatpush1.msra.mxu1 %v36929_v32  ;;  %v53128_v32 = vpack.c.bf16 %v31872_v46, %v31868_v57  ;;  %v45756_v57 = vpack.c.bf16 %v52870_v5, %v52794_v26  ;;  %v31965_v46 = vand.u32 4294901760, %v31964_v24  ;;  %v54645_v56 = vand.u32 4294901760, %v53087_v10 }
 0xf96   : > { %45751 = vmatprep.subr.bf16.mxu1 %v45750_v17  ;;  %36987 = vmatmul.mubr.f32.vlgmr.msra.gmra.mrb[8].mxu1 %v52819_v27  ;;  %v32000_v17 = vsub.f32 %v53065_v20, %v54182_v21  ;;  %v31995_v21 = vand.u32 4294901760, %v31994_v3  ;;  %v53165_v14 = vand.u32 4294901760, %v31947_v47  ;;  %v54647_v3 = vand.u32 4294901760, %v53131_v49 }
 0xf97   : > { %45753 = vmatpush1.bf16.msra.mxu1 %v54644_v4  ;;  %36992 = vmatprep.mubr.f32.mxu1 %v50264_v13  ;;  %v31959_v4 = vand.u32 4294901760, %v31958_v31  ;;  %v31988_v44 = vsub.f32 %v53087_v10, %v54645_v56  ;;  %v54646_v31 = vand.u32 4294901760, %v53094_v19  ;;  %v45360_v24 = vpack.c.bf16 %v31977_v15, %v31965_v46 }
 0xf98   : > { %45357 = vmatpush1.bf16.msra.mxu0 %v53128_v32  ;;  %45755 = vmatprep.subr.bf16.mxu1 %v45754_v30  ;;  %v32001_v11 = vand.u32 4294901760, %v32000_v17  ;;  %v45362_v56 = vpack.c.bf16 %v31995_v21, %v31983_v22  ;;  %v45366_v21 = vpack.c.bf16 %v53004_v33, %v53010_v52  ;;  %v45368_v22 = vpack.c.bf16 %v53023_v41, %v53046_v54 }
 0xf99   : > { %31875 = vmatprep.subr.mxu0 %v53071_v43  ;;  %v45358_v30 = vpack.c.bf16 %v31971_v50, %v31959_v4  ;;  %v32006_v28 = vsub.f32 %v53094_v19, %v54646_v31  ;;  %v31989_v50 = vand.u32 4294901760, %v31988_v44  ;;  %v45370_v15 = vpack.c.bf16 %v53055_v61, %v53033_v53 }
 0xf9a   : > { %36994 = vmatmul.mubr.f32.gmra.mrb[10].mxu1 %v52848_v37  ;;  %v54648_v4 = vand.u32 4294901760, %v52806_v58  ;;  %v54649_v44 = vand.u32 4294901760, %v52776_v6  ;;  %v45372_v31 = vpack.c.bf16 %v53065_v20, %v53087_v10  ;;  %v54652_v6 = vand.u32 4294901760, %v52838_v55 }
 0xf9b   : > { %45757 = vmatpush1.bf16.msra.mxu1 %v45756_v57  ;;  %37084 = vmatprep.mubr.f32.mxu1 %v50264_v13  ;;  %v32012_v57 = vsub.f32 %v53131_v49, %v54647_v3  ;;  %v32007_v17 = vand.u32 4294901760, %v32006_v28  ;;  %v45364_v46 = vpack.c.bf16 %v32001_v11, %v31989_v50  ;;  %v54650_v28 = vand.u32 4294901760, %v52760_v18 }
 0xf9c   : > { %31877 = vmatpush1.msra.mxu0 %v53106_v51  ;;  %37026 = vmatprep.subr.mxu1 %v52921_v39  ;;  %v54651_v11 = vand.u32 4294901760, %v52781_v45  ;;  %v54653_v58 = vand.u32 4294901760, %v52854_v60  ;;  %v54654_v18 = vand.u32 4294901760, %v52794_v26  ;;  %v54655_v45 = vand.u32 4294901760, %v52870_v5 }
 0xf9d   : > { %45359 = vmatprep.subr.bf16.mxu0 %v45358_v30  ;;  %31938 = vmatmul.mubr.f32.vlgmr.msra.gmra.mrb[10].mxu0 %v53149_v62  ;;  %v32013_v47 = vand.u32 4294901760, %v32012_v57  ;;  %v45766_v30 = vpack.c.bf16 %v54649_v44, %v54648_v4  ;;  %v54656_v55 = vand.u32 4294901760, %v52921_v39  ;;  %v54657_v26 = vand.u32 4294901760, %v52830_v9  ;;  %v54680_v44 = vld [vmem:[#allocation134_spill] sm:$0xff] }
 0xf9e   : > { %45361 = vmatpush1.bf16.msra.mxu0 %v45360_v24  ;;  %31943 = vmatprep.mubr.f32.mxu0 %v50264_v13  ;;  %v45768_v24 = vpack.c.bf16 %v54651_v11, %v54650_v28  ;;  %v45772_v50 = vpack.c.bf16 %v54655_v45, %v54654_v18  ;;  %v54658_v60 = vand.u32 4294901760, %v53010_v52  ;;  %v54663_v39 = vand.u32 4294901760, %v53055_v61  ;;  %v54688_v18 = vld [vmem:[#allocation141_spill] sm:$0xff]  ;;  %v54689_v45 = vld [vmem:[#allocation110_spill] sm:$0xff] }
 0xf9f   : > { %45363 = vmatprep.subr.bf16.mxu0 %v45362_v56  ;;  %37029 = vmatpush1.msra.mxu1 %v52830_v9  ;;  %v45770_v56 = vpack.c.bf16 %v54653_v58, %v54652_v6  ;;  %v54659_v9 = vand.u32 4294901760, %v53004_v33  ;;  %v54662_v33 = vand.u32 4294901760, %v53033_v53  ;;  %v54669_v53 = vand.u32 4294901760, %v53094_v19 }
 0xfa0   : > { %45759 = vmatprep.subr.bf16.mxu1 %v52896_v7  ;;  %37087 = vmatmul.mubr.f32.vlgmr.msra.gmra.mrb[8].mxu1 %v52846_v40 }
 0xfa1   : > { %45761 = vmatpush1.bf16.msra.mxu1 %v52890_v8  ;;  %31949 = vmatmul.mubr.f32.gmra.mrb[12].mxu0 %v53165_v14  ;;  %v45382_v5 = vpack.c.bf16 %v54659_v9, %v54658_v60  ;;  %v45386_v52 = vpack.c.bf16 %v54663_v39, %v54662_v33  ;;  %v54692_v60 = vld [vmem:[#allocation117_spill] sm:$0xff] }
 0xfa2   : > { %45365 = vmatpush1.bf16.msra.mxu0 %v45364_v46  ;;  %45763 = vmatprep.subr.bf16.mxu1 %v52918_v34  ;;  %v54674_v46 = vld [vmem:[#allocation105_spill] sm:$0xff] }
 0xfa3   : > { %32008 = vmatprep.subr.mxu0 %v32007_v17  ;;  %32069 = vmatprep.mubr.f32.mxu0 %v50264_v13  ;;  %v54673_v17 = vld [vmem:[#allocation68_spill] sm:$0xff] }
 0xfa4   : > { %37092 = vmatprep.mubr.f32.mxu1 %v50264_v13 }
 0xfa5   : > { %45765 = vmatpush1.bf16.msra.mxu1 %v52954_v35 }
 0xfa6   : > { %32014 = vmatpush1.msra.mxu0 %v32013_v47  ;;  %37118 = vmatprep.subr.mxu1 %v52879_v23 }
 0xfa7   : > { %45367 = vmatprep.subr.bf16.mxu0 %v45366_v21  ;;  %32071 = vmatmul.mubr.f32.vlgmr.msra.gmra.mrb[10].mxu0 %v53000_v59  ;;  %v54676_v21 = vld [vmem:[#allocation31_spill] sm:$0xff] }
 0xfa8   : > { %45369 = vmatpush1.bf16.msra.mxu0 %v45368_v22  ;;  %37095 = vmatmul.mubr.f32.gmra.mrb[10].mxu1 %v52903_v16  ;;  %v54678_v22 = vld [vmem:[#allocation99_spill] sm:$0xff] }
 0xfa9   : > { %45371 = vmatprep.subr.bf16.mxu0 %v45370_v15  ;;  %37120 = vmatpush1.msra.mxu1 %v52796_v1  ;;  %v54679_v15 = vld [vmem:[#allocation103_spill] sm:$0xff] }
 0xfaa   : > { %37175 = vmatprep.mubr.f32.mxu1 %v50264_v13  ;;  %45767 = vmatprep.subr.bf16.mxu1 %v45766_v30  ;;  %v54681_v30 = vld [vmem:[#allocation140_spill] sm:$0xff] }
 0xfab   : > { %32076 = vmatprep.mubr.f32.mxu0 %v50264_v13 }
 0xfac   : > { %45373 = vmatpush1.bf16.msra.mxu0 %v45372_v31  ;;  %37179 = vmatmul.mubr.f32.vlgmr.msra.gmra.mrb[8].mxu1 %v52900_v48  ;;  %v41528_v31 = vld [vmem:[%s53925_s9 + $0x78] sm:$0xff] }
 0xfad   : > { %45769 = vmatpush1.bf16.msra.mxu1 %v45768_v24  ;;  %32078 = vmatmul.mubr.f32.gmra.mrb[12].mxu0 %v53043_v36  ;;  %v54687_v24 = vld [vmem:[#allocation120_spill] sm:$0xff] }
 0xfae   : > { %45771 = vmatprep.subr.bf16.mxu1 %v45770_v56  ;;  %32110 = vmatprep.subr.mxu0 %v53094_v19  ;;  %v54671_v19 = vld [vmem:[#allocation58_spill] sm:$0xff]  ;;  %v53385_v6 = vand.u32 4294901760, %v54687_v24 }
 0xfaf   : > { %32168 = vmatprep.mubr.f32.mxu0 %v50264_v13  ;;  %37184 = vmatprep.mubr.f32.mxu1 %v50264_v13 }
 0xfb0   : > { %32113 = vmatpush1.msra.mxu0 %v53131_v49  ;;  %37188 = vmatmul.mubr.f32.gmra.mrb[10].mxu1 %v52950_v38 }
 0xfb1   : > { %45773 = vmatpush1.bf16.msra.mxu1 %v45772_v50  ;;  %45375 = vmatprep.subr.bf16.mxu0 %v53060_v25 }
 0xfb2   : > { %37229 = vmatprep.subr.mxu1 %v54656_v55  ;;  %32171 = vmatmul.mubr.f32.vlgmr.msra.gmra.mrb[10].mxu0 %v53041_v63  ;;  %v54691_v55 = vld [vmem:[#allocation107_spill] sm:$0xff] }
 0xfb3   : > { %45377 = vmatpush1.bf16.msra.mxu0 %v53084_v2  ;;  %37288 = vmatprep.mubr.f32.mxu1 %v50264_v13 }
 0xfb4   : > { %45379 = vmatprep.subr.bf16.mxu0 %v53098_v42  ;;  %32176 = vmatprep.mubr.f32.mxu0 %v50264_v13 }
 0xfb5   : > { %37233 = vmatpush1.msra.mxu1 %v54657_v26  ;;  %v53406_v26 = vsub.f32 %v54687_v24, %v53385_v6  ;;  %v54725_v24 = vld [vmem:[#allocation3_spill] sm:$0xff] }
 0xfb6   : > { %45775 = vmatprep.subr.bf16.mxu1 %v52896_v7  ;;  %37290 = vmatmul.mubr.f32.vlgmr.msra.gmra.mrb[8].mxu1 %v52819_v27  ;;  %v54661_v7 = vand.u32 4294901760, %v53023_v41  ;;  %v54667_v41 = vand.u32 4294901760, %v53065_v20  ;;  %v54670_v20 = vand.u32 4294901760, %v53131_v49  ;;  %v54672_v49 = vld [vmem:[#allocation102_spill] sm:$0xff] }
 0xfb7   : > { %45381 = vmatpush1.bf16.msra.mxu0 %v53128_v32  ;;  %45777 = vmatpush1.bf16.msra.mxu1 %v52890_v8  ;;  %v54660_v8 = vand.u32 4294901760, %v53046_v54  ;;  %v54666_v54 = vand.u32 4294901760, %v53087_v10 }
 0xfb8   : > { %45779 = vmatprep.subr.bf16.mxu1 %v52918_v34  ;;  %32179 = vmatmul.mubr.f32.gmra.mrb[12].mxu0 %v53079_v0 }
 0xfb9   : > { %32202 = vmatprep.subr.mxu0 %v53071_v43  ;;  %32259 = vmatprep.mubr.f32.mxu0 %v50264_v13  ;;  %v45384_v34 = vpack.c.bf16 %v54661_v7, %v54660_v8  ;;  %v45388_v57 = vpack.c.bf16 %v54667_v41, %v54666_v54  ;;  %v54693_v8 = vld [vmem:[#allocation88_spill] sm:$0xff] }
 0xfba   : > { %37295 = vmatprep.mubr.f32.mxu1 %v50264_v13 }
 0xfbb   : > { %32204 = vmatpush1.msra.mxu0 %v53106_v51  ;;  %45781 = vmatpush1.bf16.msra.mxu1 %v52954_v35  ;;  %v54664_v35 = vld [vmem:[#allocation96_spill] sm:$0xff] }
 0xfbc   : > { %45383 = vmatprep.subr.bf16.mxu0 %v45382_v5  ;;  %37320 = vmatprep.subr.mxu1 %v52879_v23  ;;  %v53255_v3 = vand.u32 4294901760, %v54664_v35  ;;  %v54665_v23 = vld [vmem:[#allocation94_spill] sm:$0xff] }
 0xfbd   : > { %32263 = vmatmul.mubr.f32.vlgmr.msra.gmra.mrb[10].mxu0 %v53075_v29  ;;  %37297 = vmatmul.mubr.f32.gmra.mrb[10].mxu1 %v52848_v37 }
 0xfbe   : > { %45385 = vmatpush1.bf16.msra.mxu0 %v45384_v34  ;;  %37377 = vmatprep.mubr.f32.mxu1 %v50264_v13  ;;  %v37512_v61 = vsub.f32 %v54664_v35, %v53255_v3  ;;  %v38150_v34 = vand.u32 4294901760, %v53406_v26 }
 0xfbf   : > { %45387 = vmatprep.subr.bf16.mxu0 %v45386_v52  ;;  %37322 = vmatpush1.msra.mxu1 %v52796_v1  ;;  %v54668_v1 = vld [vmem:[#allocation21_spill] sm:$0xff]  ;;  %v54694_v52 = vld [vmem:[#allocation46_spill] sm:$0xff] }
 0xfc0   : > { %45783 = vmatprep.subr.bf16.mxu1 %v54665_v23  ;;  %32268 = vmatprep.mubr.f32.mxu0 %v50264_v13  ;;  %v53280_v10 = vand.u32 4294901760, %v37512_v61  ;;  %v38151_v35 = vsub.f32 %v53406_v26, %v38150_v34 }
 0xfc1   : > { %37379 = vmatmul.mubr.f32.vlgmr.msra.gmra.mrb[8].mxu1 %v52819_v27  ;;  %32272 = vmatmul.mubr.f32.gmra.mrb[12].mxu0 %v53122_v12 }
 0xfc2   : > { %45389 = vmatpush1.bf16.msra.mxu0 %v45388_v57  ;;  %45785 = vmatpush3.bf16.msra.mxu1 %v54665_v23  ;;  %v38152_v41 = vand.u32 4294901760, %v38151_v35  ;;  %v54697_v57 = vld [vmem:[#allocation131_spill] sm:$0xff]  ;;  %v54728_v35 = vld [vmem:[#allocation6_spill] sm:$0xff] }
 0xfc3   : > { %45787 = vmatprep.subr.bf16.mxu1 %v54668_v1  ;;  %32313 = vmatprep.subr.mxu0 %v54669_v53  ;;  %v54699_v53 = vld [vmem:[#allocation10_spill] sm:$0xff] }
 0xfc4   : > { %32372 = vmatprep.mubr.f32.mxu0 %v50264_v13  ;;  %37384 = vmatprep.mubr.f32.mxu1 %v50264_v13 }
 0xfc5   : > { %37386 = vmatmul.mubr.f32.gmra.mrb[10].mxu1 %v52848_v37 }
 0xfc6   : > { %32317 = vmatpush1.msra.mxu0 %v54670_v20  ;;  %45789 = vmatpush3.bf16.msra.mxu1 %v54668_v1  ;;  %v54700_v20 = vld [vmem:[#allocation26_spill] sm:$0xff] }
 0xfc7   : > { %45391 = vmatprep.subr.bf16.mxu0 %v53060_v25  ;;  %44026 = vmatprep.subr.mxu1 %v53255_v3  ;;  %v37514_v25 = vsub.f32 %v37512_v61, %v53280_v10 }
 0xfc8   : > { %32374 = vmatmul.mubr.f32.vlgmr.msra.gmra.mrb[10].mxu0 %v53000_v59  ;;  %44028 = vmatprep.mubr.f32.mxu1 %v54671_v19  ;;  %v54702_v19 = vld [vmem:[#allocation36_spill] sm:$0xff] }
 0xfc9   : > { %45393 = vmatpush1.bf16.msra.mxu0 %v53084_v2  ;;  %32379 = vmatprep.mubr.f32.mxu0 %v50264_v13  ;;  %v37515_v2 = vand.u32 4294901760, %v37514_v25  ;;  %v54704_v25 = vld [vmem:[#allocation98_spill] sm:$0xff] }
 0xfca   : > { %45395 = vmatprep.subr.bf16.mxu0 %v53098_v42  ;;  %44027 = vmatpush3.msra.mxu1 %v53255_v3  ;;  %v54675_v42 = vld [vmem:[#allocation71_spill] sm:$0xff] }
 0xfcb   : > { %45791 = vmatprep.subr.bf16.mxu1 %v54672_v49  ;;  %44029 = vmatmul.mubr.f32.vlgmr.msra.gmra.mrb[12].mxu1 %v54673_v17  ;;  %v53299_v47 = vand.u32 4294901760, %v54675_v42  ;;  %v54703_v17 = vld [vmem:[#allocation100_spill] sm:$0xff] }
 0xfcc   : > { %45793 = vmatpush3.bf16.msra.mxu1 %v54672_v49  ;;  %32381 = vmatmul.mubr.f32.gmra.mrb[12].mxu0 %v53043_v36 }
 0xfcd   : > { %45397 = vmatpush1.bf16.msra.mxu0 %v53128_v32  ;;  %45795 = vmatprep.subr.bf16.mxu1 %v54674_v46  ;;  %v32596_v32 = vsub.f32 %v54675_v42, %v53299_v47  ;;  %v54707_v42 = vld [vmem:[#allocation108_spill] sm:$0xff] }
 0xfce   : > { %32404 = vmatprep.subr.mxu0 %v53071_v43  ;;  %32461 = vmatprep.mubr.f32.mxu0 %v50264_v13  ;;  %v54677_v43 = vld [vmem:[#allocation49_spill] sm:$0xff] }
 0xfcf   : > { %44041 = vmatprep.mubr.f32.mxu1 %v52819_v27 }
 0xfd0   : > { %45797 = vmatpush3.bf16.msra.mxu1 %v54674_v46  ;;  %v54705_v46 = vpack.c.bf16 %v54703_v17, %v54704_v25  ;;  %v54736_v17 = vld [vmem:[#allocation15_spill] sm:$0xff] }
 0xfd1   : > { %32406 = vmatpush1.msra.mxu0 %v53106_v51  ;;  %44039 = vmatprep.subr.mxu1 %v37515_v2  ;;  %v53314_v51 = vand.u32 4294901760, %v32596_v32 }
 0xfd2   : > { %45399 = vmatprep.subr.bf16.mxu0 %v54676_v21  ;;  %32463 = vmatmul.mubr.f32.vlgmr.msra.gmra.mrb[10].mxu0 %v53000_v59 }
 0xfd3   : > { %45401 = vmatpush3.bf16.msra.mxu0 %v54676_v21  ;;  %32468 = vmatprep.mubr.f32.mxu0 %v50264_v13  ;;  %v32598_v4 = vsub.f32 %v32596_v32, %v53314_v51 }
 0xfd4   : > { %45403 = vmatprep.subr.bf16.mxu0 %v54677_v43  ;;  %44040 = vmatpush3.msra.mxu1 %v37515_v2  ;;  %v54706_v2 = vld [vmem:[#allocation101_spill] sm:$0xff] }
 0xfd5   : > { %45799 = vmatprep.subr.bf16.mxu1 %v54678_v22  ;;  %44042 = vmatmul.mubr.f32.vlgmr.msra.gmra.mrb[12].mxu1 %v52848_v37 }
 0xfd6   : > { %45801 = vmatpush3.bf16.msra.mxu1 %v54678_v22  ;;  %32470 = vmatmul.mubr.f32.gmra.mrb[12].mxu0 %v53043_v36  ;;  %v54713_v22 = vld [vmem:[#allocation4_spill] sm:$0xff] }
 0xfd7   : > { %45405 = vmatpush3.bf16.msra.mxu0 %v54677_v43  ;;  %45803 = vmatprep.subr.bf16.mxu1 %v54679_v15 }
 0xfd8   : > { %43714 = vmatprep.subr.mxu0 %v53299_v47  ;;  %43716 = vmatprep.mubr.f32.mxu0 %v53149_v62  ;;  %v32599_v62 = vand.u32 4294901760, %v32598_v4  ;;  %v54715_v4 = vld [vmem:[#allocation41_spill] sm:$0xff] }
 0xfd9   : > { %44054 = vmatprep.mubr.f32.mxu1 %v52846_v40  ;;  %v54683_v40 = vld [vmem:[#allocation139_spill] sm:$0xff] }
 0xfda   : > { %45805 = vmatpush3.bf16.msra.mxu1 %v54679_v15  ;;  %v54714_v15 = vld [vmem:[#allocation45_spill] sm:$0xff] }
 0xfdb   : > { %43715 = vmatpush3.msra.mxu0 %v53299_v47  ;;  %44052 = vmatprep.subr.mxu1 %v37512_v61 }
 0xfdc   : > { %45407 = vmatprep.subr.bf16.mxu0 %v54680_v44  ;;  %43717 = vmatmul.mubr.f32.vlgmr.msra.gmra.mrb[14].mxu0 %v53165_v14  ;;  %v54682_v14 = vld [vmem:[#allocation90_spill] sm:$0xff] }
 0xfdd   : > { %45409 = vmatpush3.bf16.msra.mxu0 %v54680_v44  ;;  %43729 = vmatprep.mubr.f32.mxu0 %v53000_v59  ;;  %v33176_v44 = vsub.f32 %v54715_v4, %v54714_v15 }
 0xfde   : > { %45411 = vmatprep.subr.bf16.mxu0 %v54681_v30  ;;  %44053 = vmatpush3.msra.mxu1 %v37512_v61  ;;  %v54698_v61 = vld [vmem:[#allocation7_spill] sm:$0xff] }
 0xfdf   : > { %45807 = vmatprep.subr.bf16.mxu1 %v54665_v23  ;;  %44055 = vmatmul.mubr.f32.vlgmr.msra.gmra.mrb[12].mxu1 %v52903_v16  ;;  %v54685_v16 = vld [vmem:[#allocation109_spill] sm:$0xff] }
 0xfe0   : > { %45809 = vmatpush3.bf16.msra.mxu1 %v54665_v23  ;;  %44067 = vmatprep.mubr.f32.mxu1 %v52900_v48  ;;  %v54684_v48 = vld [vmem:[#allocation106_spill] sm:$0xff] }
 0xfe1   : > { %45413 = vmatpush3.bf16.msra.mxu0 %v54681_v30  ;;  %45811 = vmatprep.subr.bf16.mxu1 %v54668_v1  ;;  %v54716_v30 = vld [vmem:[#allocation116_spill] sm:$0xff] }
 0xfe2   : > { %43727 = vmatprep.subr.mxu0 %v32599_v62 }
 0xfe4   : > { %45813 = vmatpush3.bf16.msra.mxu1 %v54668_v1 }
 0xfe5   : > { %43728 = vmatpush3.msra.mxu0 %v32599_v62  ;;  %44065 = vmatprep.subr.mxu1 %v53255_v3  ;;  %v54717_v62 = vld [vmem:[#allocation119_spill] sm:$0xff] }
 0xfe6   : > { %45415 = vmatprep.subr.bf16.mxu0 %v54682_v14  ;;  %43730 = vmatmul.mubr.f32.vlgmr.msra.gmra.mrb[14].mxu0 %v53043_v36 }
 0xfe7   : > { %45417 = vmatpush3.bf16.msra.mxu0 %v54682_v14  ;;  %43742 = vmatprep.mubr.f32.mxu0 %v53041_v63  ;;  %v41527_v63 = vld [vmem:[%s53925_s9 + $0x70] sm:$0xff]  ;;  %v54718_v14 = vpack.c.bf16 %v54716_v30, %v54717_v62  ;;  %v54759_v30 = vld [vmem:[#allocation35_spill] sm:$0xff] }
 0xfe8   : > { %45419 = vmatprep.subr.bf16.mxu0 %v54683_v40  ;;  %44066 = vmatpush3.msra.mxu1 %v53255_v3 }
 0xfe9   : > { %45815 = vmatprep.subr.bf16.mxu1 %v54684_v48  ;;  %44068 = vmatmul.mubr.f32.vlgmr.msra.gmra.mrb[12].mxu1 %v52950_v38  ;;  %v37998_v38 = vsel %vm29463_vm14, %v41527_v63, 0 }
 0xfea   : > { %45817 = vmatpush3.bf16.msra.mxu1 %v54684_v48  ;;  %44080 = vmatprep.mubr.f32.mxu1 %v52819_v27  ;;  %v53366_v28 = vand.u32 4294901760, %v37998_v38  ;;  %v54720_v48 = vld [vmem:[#allocation14_spill] sm:$0xff] }
 0xfeb   : > { %45421 = vmatpush3.bf16.msra.mxu0 %v54683_v40  ;;  %45819 = vmatprep.subr.bf16.mxu1 %v54685_v16  ;;  %v54719_v40 = vld [vmem:[#allocation5_spill] sm:$0xff] }
 0xfec   : > { %43740 = vmatprep.subr.mxu0 %v32596_v32 }
 0xfee   : > { %45821 = vmatpush3.bf16.msra.mxu1 %v54685_v16  ;;  %v54721_v16 = vld [vmem:[#allocation20_spill] sm:$0xff] }
 0xfef   : > { %43741 = vmatpush3.msra.mxu0 %v32596_v32  ;;  %44078 = vmatprep.subr.mxu1 %v53280_v10  ;;  %v54710_v32 = vld [vmem:[#allocation115_spill] sm:$0xff]  ;;  %v54722_v63 = vand.u32 4294901760, %v54721_v16 }
 0xff0   : > { %45423 = vmatprep.subr.bf16.mxu0 %v54676_v21  ;;  %43743 = vmatmul.mubr.f32.vlgmr.msra.gmra.mrb[14].mxu0 %v53079_v0  ;;  %v53375_v0 = vsub.f32 %v37998_v38, %v53366_v28 }
 0xff1   : > { %45425 = vmatpush3.bf16.msra.mxu0 %v54676_v21  ;;  %43755 = vmatprep.mubr.f32.mxu0 %v53075_v29  ;;  %v38001_v29 = vsel %vm29463_vm14, %v41528_v31, 0  ;;  %v33235_v38 = vsub.f32 %v54721_v16, %v54722_v63  ;;  %v53490_v31 = vand.u32 4294901760, %v33176_v44  ;;  %v54745_v44 = vld [vmem:[#allocation74_spill] sm:$0xff] }
 0xff2   : > { %45427 = vmatprep.subr.bf16.mxu0 %v54677_v43  ;;  %44079 = vmatpush3.msra.mxu1 %v53280_v10  ;;  %v53377_v11 = vand.u32 4294901760, %v38001_v29  ;;  %v53390_v58 = vand.u32 4294901760, %v53375_v0  ;;  %v54701_v10 = vld [vmem:[#allocation44_spill] sm:$0xff] }
 0xff3   : > { %45823 = vmatprep.subr.bf16.mxu1 %v54665_v23  ;;  %44081 = vmatmul.mubr.f32.vlgmr.msra.gmra.mrb[12].mxu1 %v52848_v37  ;;  %v33165_v49 = vsub.f32 %v54702_v19, %v54701_v10 }
 0xff4   : > { %45825 = vmatpush3.bf16.msra.mxu1 %v54665_v23  ;;  %44093 = vmatprep.mubr.f32.mxu1 %v52819_v27  ;;  %v54686_v27 = vld [vmem:[#allocation135_spill] sm:$0xff]  ;;  %v53393_v56 = vsub.f32 %v38001_v29, %v53377_v11  ;;  %v38081_v9 = vsub.f32 %v53375_v0, %v53390_v58  ;;  %v54695_v23 = vld [vmem:[#allocation118_spill] sm:$0xff] }
 0xff5   : > { %45429 = vmatpush3.bf16.msra.mxu0 %v54677_v43  ;;  %45827 = vmatprep.subr.bf16.mxu1 %v54668_v1  ;;  %v54723_v29 = vld [vmem:[#allocation11_spill] sm:$0xff] }
 0xff6   : > { %43753 = vmatprep.subr.mxu0 %v53299_v47  ;;  %v53423_v7 = vand.u32 4294901760, %v38081_v9  ;;  %v33236_v9 = vand.u32 4294901760, %v33235_v38 }
 0xff8   : > { %45829 = vmatpush3.bf16.msra.mxu1 %v54668_v1 }
 0xff9   : > { %43754 = vmatpush3.msra.mxu0 %v53299_v47  ;;  %44091 = vmatprep.subr.mxu1 %v53255_v3 }
 0xffa   : > { %45431 = vmatprep.subr.bf16.mxu0 %v54686_v27  ;;  %43756 = vmatmul.mubr.f32.vlgmr.msra.gmra.mrb[14].mxu0 %v53122_v12  ;;  %v54690_v12 = vld [vmem:[#allocation124_spill] sm:$0xff] }
 0xffb   : > { %45433 = vmatpush3.bf16.msra.mxu0 %v54686_v27  ;;  %43768 = vmatprep.mubr.f32.mxu0 %v53000_v59  ;;  %v53400_v50 = vand.u32 4294901760, %v54690_v12  ;;  %v54724_v27 = vld [vmem:[#allocation33_spill] sm:$0xff] }
 0xffc   : > { %45435 = vmatprep.subr.bf16.mxu0 %v54688_v18  ;;  %44092 = vmatpush3.msra.mxu1 %v53255_v3 }
 0xffd   : > { %45831 = vmatprep.subr.bf16.mxu1 %v54689_v45  ;;  %44094 = vmatmul.mubr.f32.vlgmr.msra.gmra.mrb[12].mxu1 %v52848_v37  ;;  %v53413_v37 = vand.u32 4294901760, %v53393_v56  ;;  %v53418_v5 = vsub.f32 %v54690_v12, %v53400_v50 }
 0xffe   : > { %45833 = vmatpush1.bf16.msra.mxu1 %v54691_v55  ;;  %38077 = vmatprep.mubr.f32.mxu1 %v50264_v13 }
 0xfff   : > { %45437 = vmatpush3.bf16.msra.mxu0 %v54688_v18  ;;  %45835 = vmatprep.subr.bf16.mxu1 %v54692_v60  ;;  %v38092_v33 = vsub.f32 %v53393_v56, %v53413_v37  ;;  %v38156_v39 = vand.u32 4294901760, %v53418_v5  ;;  %v54726_v18 = vand.u32 4294901760, %v54725_v24 }
0x1000   : > { %43766 = vmatprep.subr.mxu0 %v53314_v51 }
0x1001   : > { %v53440_v3 = vand.u32 4294901760, %v38092_v33  ;;  %v38157_v54 = vsub.f32 %v53418_v5, %v38156_v39  ;;  %v33241_v12 = vsub.f32 %v54725_v24, %v54726_v18  ;;  %v54727_v33 = vld [vmem:[#allocation23_spill] sm:$0xff] }
0x1002   : > { %45837 = vmatpush1.bf16.msra.mxu1 %v54693_v8  ;;  %v54762_v18 = vld [vmem:[#allocation75_spill] sm:$0xff] }
0x1003   : > { %43767 = vmatpush3.msra.mxu0 %v53314_v51  ;;  %38020 = vmatprep.subr.mxu1 %v53385_v6  ;;  %v38158_v1 = vand.u32 4294901760, %v38157_v54  ;;  %v53474_v51 = vand.u32 4294901760, %v33165_v49  ;;  %v54731_v54 = vld [vmem:[#allocation22_spill] sm:$0xff]  ;;  %v54735_v49 = vld [vmem:[#allocation13_spill] sm:$0xff] }
0x1004   : > { %45439 = vmatprep.subr.bf16.mxu0 %v54676_v21  ;;  %43769 = vmatmul.mubr.f32.vlgmr.msra.gmra.mrb[14].mxu0 %v53043_v36  ;;  %v54737_v25 = vpack.c.bf16 %v54735_v49, %v54736_v17 }
0x1005   : > { %45441 = vmatpush3.bf16.msra.mxu0 %v54676_v21  ;;  %43781 = vmatprep.mubr.f32.mxu0 %v53000_v59  ;;  %v54696_v59 = vld [vmem:[#allocation125_spill] sm:$0xff]  ;;  %v54711_v21 = vld [vmem:[#allocation111_spill] sm:$0xff] }
0x1006   : > { %45443 = vmatprep.subr.bf16.mxu0 %v54677_v43  ;;  %38022 = vmatpush1.msra.mxu1 %v53400_v50 }
0x1007   : > { %45839 = vmatprep.subr.bf16.mxu1 %v54694_v52  ;;  %38083 = vmatmul.mubr.f32.vlgmr.msra.gmra.mrb[8].mxu1 %v53423_v7  ;;  %v33242_v52 = vand.u32 4294901760, %v33241_v12 }
0x1008   : > { %45841 = vmatpush1.bf16.msra.mxu1 %v54695_v23  ;;  %38088 = vmatprep.mubr.f32.mxu1 %v50264_v13  ;;  %v54729_v23 = vld [vmem:[#allocation8_spill] sm:$0xff] }
0x1009   : > { %45445 = vmatpush3.bf16.msra.mxu0 %v54677_v43  ;;  %45843 = vmatprep.subr.bf16.mxu1 %v54696_v59  ;;  %v54712_v43 = vpack.c.bf16 %v54710_v32, %v54711_v21  ;;  %v54730_v59 = vpack.c.bf16 %v54728_v35, %v54729_v23  ;;  %v54742_v32 = vld [vmem:[#allocation114_spill] sm:$0xff]  ;;  %v54743_v21 = vld [vmem:[#allocation121_spill] sm:$0xff] }
0x100a   : > { %43779 = vmatprep.subr.mxu0 %v53299_v47 }
0x100b   : > { %38094 = vmatmul.mubr.f32.gmra.mrb[10].mxu1 %v53440_v3 }
0x100c   : > { %45845 = vmatpush1.bf16.msra.mxu1 %v54697_v57  ;;  %38214 = vmatprep.mubr.f32.mxu1 %v50264_v13  ;;  %v54733_v57 = vld [vmem:[#allocation9_spill] sm:$0xff] }
0x100d   : > { %43780 = vmatpush3.msra.mxu0 %v53299_v47  ;;  %38153 = vmatprep.subr.mxu1 %v38152_v41  ;;  %v54709_v47 = vld [vmem:[#allocation28_spill] sm:$0xff] }
0x100e   : > { %45447 = vmatprep.subr.bf16.mxu0 %v54698_v61  ;;  %43782 = vmatmul.mubr.f32.vlgmr.msra.gmra.mrb[14].mxu0 %v53043_v36  ;;  %v54708_v36 = vpack.c.bf16 %v54706_v2, %v54707_v42  ;;  %v54732_v41 = vld [vmem:[#allocation12_spill] sm:$0xff]  ;;  %v54739_v2 = vld [vmem:[#allocation18_spill] sm:$0xff]  ;;  %v54740_v42 = vld [vmem:[#allocation19_spill] sm:$0xff] }
0x100f   : > { %45449 = vmatpush1.bf16.msra.mxu0 %v54699_v53  ;;  %33161 = vmatprep.mubr.f32.mxu0 %v50264_v13 }
0x1010   : > { %45451 = vmatprep.subr.bf16.mxu0 %v54700_v20  ;;  %38159 = vmatpush1.msra.mxu1 %v38158_v1  ;;  %v54734_v1 = vpack.c.bf16 %v54732_v41, %v54733_v57 }
0x1011   : > { %45847 = vmatprep.subr.bf16.mxu1 %v54705_v46  ;;  %38216 = vmatmul.mubr.f32.vlgmr.msra.gmra.mrb[8].mxu1 %v53366_v28  ;;  %v54738_v46 = vld [vmem:[#allocation112_spill] sm:$0xff] }
0x1012   : > { %45849 = vmatpush1.bf16.msra.mxu1 %v54708_v36  ;;  %38221 = vmatprep.mubr.f32.mxu1 %v50264_v13  ;;  %v54741_v36 = vpack.c.bf16 %v54739_v2, %v54740_v42 }
0x1013   : > { %45453 = vmatpush1.bf16.msra.mxu0 %v54709_v47  ;;  %45851 = vmatprep.subr.bf16.mxu1 %v54712_v43  ;;  %v54744_v43 = vld [vmem:[#allocation27_spill] sm:$0xff] }
0x1014   : > { %33104 = vmatprep.subr.mxu0 %v54713_v22 }
0x1015   : > { %38223 = vmatmul.mubr.f32.gmra.mrb[10].mxu1 %v53377_v11 }
0x1016   : > { %45853 = vmatpush1.bf16.msra.mxu1 %v54718_v14  ;;  %38313 = vmatprep.mubr.f32.mxu1 %v50264_v13  ;;  %v54760_v14 = vld [vmem:[#allocation144_spill] sm:$0xff] }
0x1017   : > { %33106 = vmatpush1.msra.mxu0 %v54719_v40  ;;  %38255 = vmatprep.subr.mxu1 %v53406_v26  ;;  %v54748_v26 = vld [vmem:[#allocation113_spill] sm:$0xff] }
0x1018   : > { %45455 = vmatprep.subr.bf16.mxu0 %v54720_v48  ;;  %33167 = vmatmul.mubr.f32.vlgmr.msra.gmra.mrb[10].mxu0 %v53474_v51 }
0x1019   : > { %45457 = vmatpush1.bf16.msra.mxu0 %v54723_v29  ;;  %33172 = vmatprep.mubr.f32.mxu0 %v50264_v13 }
0x101a   : > { %45459 = vmatprep.subr.bf16.mxu0 %v54724_v27  ;;  %38258 = vmatpush1.msra.mxu1 %v53418_v5  ;;  %v54749_v5 = vld [vmem:[#allocation97_spill] sm:$0xff] }
0x101b   : > { %45855 = vmatprep.subr.bf16.mxu1 %v54689_v45  ;;  %38316 = vmatmul.mubr.f32.vlgmr.msra.gmra.mrb[8].mxu1 %v53375_v0  ;;  %v41530_v27 = vld [vmem:[%s53925_s9 + $0x88] sm:$0xff] }
0x101c   : > { %45857 = vmatpush1.bf16.msra.mxu1 %v54691_v55  ;;  %33178 = vmatmul.mubr.f32.gmra.mrb[12].mxu0 %v53490_v31 }
0x101d   : > { %45461 = vmatpush1.bf16.msra.mxu0 %v54727_v33  ;;  %45859 = vmatprep.subr.bf16.mxu1 %v54692_v60  ;;  %v39190_v33 = vpop.permute.xlu0 %39189 }
0x101e   : > { %33237 = vmatprep.subr.mxu0 %v33236_v9  ;;  %33298 = vmatprep.mubr.f32.mxu0 %v50264_v13 }
0x101f   : > { %38321 = vmatprep.mubr.f32.mxu1 %v50264_v13 }
0x1020   : > { %45861 = vmatpush1.bf16.msra.mxu1 %v54693_v8 }
0x1021   : > { %33243 = vmatpush1.msra.mxu0 %v33242_v52  ;;  %38347 = vmatprep.subr.mxu1 %v53385_v6  ;;  %v53651_v2 = vpop.permute.xlu0 %39199 }
0x1022   : > { %45463 = vmatprep.subr.bf16.mxu0 %v54730_v59  ;;  %33300 = vmatmul.mubr.f32.vlgmr.msra.gmra.mrb[10].mxu0 %v54731_v54  ;;  %v39230_v54 = vsel %vm29463_vm14, %v41530_v27, 0 }
0x1023   : > { %45465 = vmatpush1.bf16.msra.mxu0 %v54734_v1  ;;  %38324 = vmatmul.mubr.f32.gmra.mrb[10].mxu1 %v53393_v56  ;;  %v53656_v42 = vand.u32 4294901760, %v39230_v54 }
0x1024   : > { %45467 = vmatprep.subr.bf16.mxu0 %v54737_v25  ;;  %38349 = vmatpush1.msra.mxu1 %v53400_v50 }
0x1025   : > { %38404 = vmatprep.mubr.f32.mxu1 %v50264_v13  ;;  %45863 = vmatprep.subr.bf16.mxu1 %v54738_v46 }
0x1026   : > { %33305 = vmatprep.mubr.f32.mxu0 %v50264_v13 }
0x1027   : > { %45469 = vmatpush1.bf16.msra.mxu0 %v54741_v36  ;;  %38408 = vmatmul.mubr.f32.vlgmr.msra.gmra.mrb[8].mxu1 %v53390_v58 }
0x1028   : > { %45865 = vmatpush1.bf16.msra.mxu1 %v54742_v32  ;;  %33339 = vmatprep.subr.mxu0 %v54721_v16 }
0x1029   : > { %45867 = vmatprep.subr.bf16.mxu1 %v54743_v21  ;;  %33307 = vmatmul.mubr.f32.gmra.mrb[12].mxu0 %v54744_v43 }
0x102a   : > { %33397 = vmatprep.mubr.f32.mxu0 %v50264_v13  ;;  %38413 = vmatprep.mubr.f32.mxu1 %v50264_v13 }
0x102b   : > { %33342 = vmatpush1.msra.mxu0 %v54725_v24  ;;  %38417 = vmatmul.mubr.f32.gmra.mrb[10].mxu1 %v53413_v37 }
0x102c   : > { %45869 = vmatpush1.bf16.msra.mxu1 %v54745_v44  ;;  %45471 = vmatprep.subr.bf16.mxu0 %v54698_v61 }
0x102d   : > { %38458 = vmatprep.subr.mxu1 %v38150_v34  ;;  %33400 = vmatmul.mubr.f32.vlgmr.msra.gmra.mrb[10].mxu0 %v54702_v19 }
0x102e   : > { %45473 = vmatpush1.bf16.msra.mxu0 %v54699_v53  ;;  %38517 = vmatprep.mubr.f32.mxu1 %v50264_v13  ;;  %v54753_v53 = vld [vmem:[#allocation86_spill] sm:$0xff] }
0x102f   : > { %45475 = vmatprep.subr.bf16.mxu0 %v54700_v20  ;;  %33405 = vmatprep.mubr.f32.mxu0 %v50264_v13 }
0x1030   : > { %38462 = vmatpush1.msra.mxu1 %v38156_v39  ;;  %v54752_v39 = vld [vmem:[#allocation123_spill] sm:$0xff] }
0x1031   : > { %45871 = vmatprep.subr.bf16.mxu1 %v54689_v45  ;;  %38519 = vmatmul.mubr.f32.vlgmr.msra.gmra.mrb[8].mxu1 %v53366_v28  ;;  %v54746_v45 = vld [vmem:[#allocation43_spill] sm:$0xff] }
0x1032   : > { %45477 = vmatpush1.bf16.msra.mxu0 %v54709_v47  ;;  %45873 = vmatpush1.bf16.msra.mxu1 %v54691_v55  ;;  %v54747_v55 = vld [vmem:[#allocation48_spill] sm:$0xff] }
0x1033   : > { %33408 = vmatmul.mubr.f32.gmra.mrb[12].mxu0 %v54715_v4  ;;  %33431 = vmatprep.subr.mxu0 %v54713_v22 }
0x1034   : > { %45875 = vmatprep.subr.bf16.mxu1 %v54692_v60  ;;  %33488 = vmatprep.mubr.f32.mxu0 %v50264_v13  ;;  %v53567_v60 = vand.u32 4294901760, %v54748_v26 }
0x1035   : > { %38524 = vmatprep.mubr.f32.mxu1 %v50264_v13 }
0x1036   : > { %33433 = vmatpush1.msra.mxu0 %v54719_v40  ;;  %45877 = vmatpush1.bf16.msra.mxu1 %v54693_v8  ;;  %v54751_v8 = vld [vmem:[#allocation104_spill] sm:$0xff] }
0x1037   : > { %33492 = vmatmul.mubr.f32.vlgmr.msra.gmra.mrb[10].mxu0 %v54701_v10  ;;  %45495 = vmatprep.subr.bf16.mxu0 %v54746_v45  ;;  %v54754_v10 = vld [vmem:[#allocation127_spill] sm:$0xff] }
0x1038   : > { %38549 = vmatprep.subr.mxu1 %v53385_v6  ;;  %45497 = vmatpush3.bf16.msra.mxu0 %v54746_v45  ;;  %v54750_v6 = vld [vmem:[#allocation24_spill] sm:$0xff] }
0x1039   : > { %38526 = vmatmul.mubr.f32.gmra.mrb[10].mxu1 %v53377_v11  ;;  %45499 = vmatprep.subr.bf16.mxu0 %v54747_v55 }
0x103a   : > { %33497 = vmatprep.mubr.f32.mxu0 %v50264_v13  ;;  %38551 = vmatpush1.msra.mxu1 %v53400_v50  ;;  %v38741_v50 = vsub.f32 %v54748_v26, %v53567_v60 }
0x103b   : > { %33501 = vmatmul.mubr.f32.gmra.mrb[12].mxu0 %v54714_v15  ;;  %38606 = vmatprep.mubr.f32.mxu1 %v50264_v13  ;;  %v54758_v15 = vld [vmem:[#allocation87_spill] sm:$0xff] }
0x103c   : > { %45879 = vmatprep.subr.bf16.mxu1 %v54749_v5  ;;  %45501 = vmatpush3.bf16.msra.mxu0 %v54747_v55  ;;  %v38742_v34 = vand.u32 4294901760, %v38741_v50 }
0x103d   : > { %38608 = vmatmul.mubr.f32.vlgmr.msra.gmra.mrb[8].mxu1 %v53366_v28  ;;  %43792 = vmatprep.subr.mxu0 %v54750_v6 }
0x103e   : > { %45881 = vmatpush3.bf16.msra.mxu1 %v54749_v5  ;;  %43794 = vmatprep.mubr.f32.mxu0 %v53474_v51  ;;  %v38743_v61 = vsub.f32 %v38741_v50, %v38742_v34 }
0x103f   : > { %45883 = vmatprep.subr.bf16.mxu1 %v54751_v8  ;;  %38613 = vmatprep.mubr.f32.mxu1 %v50264_v13 }
0x1040   : > { %43793 = vmatpush3.msra.mxu0 %v54750_v6  ;;  %v38744_v20 = vand.u32 4294901760, %v38743_v61  ;;  %v53681_v61 = vsub.f32 %v39230_v54, %v53656_v42 }
0x1041   : > { %43795 = vmatmul.mubr.f32.vlgmr.msra.gmra.mrb[14].mxu0 %v53490_v31  ;;  %38615 = vmatmul.mubr.f32.gmra.mrb[10].mxu1 %v53377_v11  ;;  %v54761_v31 = vld [vmem:[#allocation138_spill] sm:$0xff] }
0x1042   : > { %45885 = vmatpush3.bf16.msra.mxu1 %v54751_v8  ;;  %44106 = vmatprep.mubr.f32.mxu1 %v53423_v7  ;;  %v39174_v7 = vpop.permute.xlu1 %39173 }
0x1043   : > { %44104 = vmatprep.subr.mxu1 %v53567_v60  ;;  %40499 = vmatprep.mubr.f32.mxu0 %v50264_v13  ;;  %v39202_v4 = vsel %vm8709_vm8, %v39174_v7, %v54758_v15 }
0x1044   : > { %v39232_v63 = vand.u32 4294901760, %v39202_v4 }
0x1046   : > { %44105 = vmatpush3.msra.mxu1 %v53567_v60  ;;  %v39180_v19 = vpop.permute.xlu1 %39179  ;;  %v53641_v41 = vsub.f32 %v39202_v4, %v39232_v63 }
0x1047   : > { %45887 = vmatprep.subr.bf16.mxu1 %v54752_v39  ;;  %44107 = vmatmul.mubr.f32.vlgmr.msra.gmra.mrb[12].mxu1 %v53440_v3  ;;  %v54755_v3 = vld [vmem:[#allocation128_spill] sm:$0xff]  ;;  %v39204_v62 = vsel %vm8709_vm8, %v39180_v19, %v54759_v30  ;;  %v39203_v29 = vsel %vm8709_vm8, %v54761_v31, %v39180_v19 }
0x1048   : > { %45889 = vmatpush3.bf16.msra.mxu1 %v54752_v39  ;;  %44119 = vmatprep.mubr.f32.mxu1 %v53366_v28  ;;  %v39236_v38 = vand.u32 4294901760, %v39204_v62  ;;  %v39238_v23 = vand.u32 4294901760, %v39203_v29  ;;  %v39331_v43 = vand.u32 4294901760, %v53641_v41 }
0x1049   : > { %45891 = vmatprep.subr.bf16.mxu1 %v54753_v53 }
0x104a   : > { %v39172_v47 = vpop.permute.xlu1 %39171  ;;  %v53643_v57 = vsub.f32 %v39204_v62, %v39236_v38  ;;  %v53658_v36 = vsub.f32 %v39203_v29, %v39238_v23 }
0x104c   : > { %45893 = vmatpush3.bf16.msra.mxu1 %v54753_v53  ;;  %v39343_v44 = vand.u32 4294901760, %v53643_v57  ;;  %v39349_v53 = vand.u32 4294901760, %v53658_v36 }
0x104d   : > { %44117 = vmatprep.subr.mxu1 %v38744_v20 }
0x104e   : > { %v39186_v22 = vpop.permute.xlu1 %39185  ;;  %v39350_v15 = vsub.f32 %v53658_v36, %v39349_v53 }
0x104f   : > { %v39206_v12 = vsel %vm8709_vm8, %v39186_v22, %v54762_v18 }
0x1050   : > { %44118 = vmatpush3.msra.mxu1 %v38744_v20  ;;  %v39240_v1 = vand.u32 4294901760, %v39206_v12 }
0x1051   : > { %45895 = vmatprep.subr.bf16.mxu1 %v54754_v10  ;;  %44120 = vmatmul.mubr.f32.vlgmr.msra.gmra.mrb[12].mxu1 %v53377_v11 }
0x1052   : > { %45897 = vmatpush3.bf16.msra.mxu1 %v54754_v10  ;;  %44132 = vmatprep.mubr.f32.mxu1 %v53375_v0  ;;  %v54756_v0 = vld [vmem:[#allocation129_spill] sm:$0xff]  ;;  %v39192_v51 = vpop.permute.xlu1 %39191  ;;  %v53665_v45 = vsub.f32 %v39206_v12, %v39240_v1 }
0x1053   : > { %45899 = vmatprep.subr.bf16.mxu1 %v54755_v3  ;;  %v39208_v40 = vsel %vm8709_vm8, %v39192_v51, %v54760_v14  ;;  %v39207_v49 = vsel %vm8709_vm8, %v39190_v33, %v39192_v51 }
0x1054   : > { %v39244_v9 = vand.u32 4294901760, %v39208_v40  ;;  %v39246_v32 = vand.u32 4294901760, %v39207_v49  ;;  %v39355_v19 = vand.u32 4294901760, %v53665_v45 }
0x1056   : > { %45901 = vmatpush3.bf16.msra.mxu1 %v54755_v3  ;;  %v39184_v48 = vpop.permute.xlu1 %39183  ;;  %v53649_v25 = vsub.f32 %v39208_v40, %v39244_v9  ;;  %v53691_v10 = vpack.c.bf16 %v39244_v9, %v39240_v1  ;;  %v39344_v3 = vsub.f32 %v53643_v57, %v39343_v44 }
0x1057   : > { %44130 = vmatprep.subr.mxu1 %v38741_v50  ;;  %v39205_v52 = vsel %vm8709_vm8, %v39184_v48, %v39186_v22 }
0x1058   : > { %v39242_v46 = vand.u32 4294901760, %v39205_v52  ;;  %v39367_v26 = vand.u32 4294901760, %v53649_v25  ;;  %v39345_v62 = vand.u32 4294901760, %v39344_v3  ;;  %v45942_v3 = vpack.c.bf16 %v53643_v57, %v53641_v41 }
0x1059   : > { %v39863_v57 = vand.u32 4294901760, %v53651_v2 }
0x105a   : > { %44131 = vmatpush3.msra.mxu1 %v38741_v50  ;;  %v39198_v59 = vpop.permute.xlu1 %39197  ;;  %v53672_v50 = vpack.c.bf16 %v39236_v38, %v39232_v63  ;;  %v53724_v30 = vpack.c.bf16 %v39246_v32, %v39242_v46 }
0x105b   : > { %45903 = vmatprep.subr.bf16.mxu1 %v54749_v5  ;;  %44133 = vmatmul.mubr.f32.vlgmr.msra.gmra.mrb[12].mxu1 %v53393_v56  ;;  %v54757_v56 = vld [vmem:[#allocation132_spill] sm:$0xff]  ;;  %v39210_v21 = vsel %vm8709_vm8, %v39198_v59, %v53651_v2 }
0x105c   : > { %45905 = vmatpush3.bf16.msra.mxu1 %v54749_v5  ;;  %44145 = vmatprep.mubr.f32.mxu1 %v53390_v58  ;;  %v41529_v58 = vld [vmem:[%s53925_s9 + $0x80] sm:$0xff] }
0x105d   : > { %45907 = vmatprep.subr.bf16.mxu1 %v54751_v8  ;;  %v39227_v16 = vsel %vm29463_vm14, %v41529_v58, 0  ;;  %v53718_v58 = vand.u32 4294901760, %v53681_v61 }
0x105e   : > { %v53636_v35 = vand.u32 4294901760, %v39227_v16  ;;  %v39196_v6 = vpop.permute.xlu1 %39195 }
0x105f   : > { %v39321_v27 = vsub.f32 %v53681_v61, %v53718_v58 }
0x1060   : > { %45909 = vmatpush3.bf16.msra.mxu1 %v54751_v8 }
0x1061   : > { %44143 = vmatprep.subr.mxu1 %v53567_v60 }
0x1064   : > { %44144 = vmatpush3.msra.mxu1 %v53567_v60 }
0x1065   : > { %45911 = vmatprep.subr.bf16.mxu1 %v54756_v0  ;;  %44146 = vmatmul.mubr.f32.vlgmr.msra.gmra.mrb[12].mxu1 %v53413_v37  ;;  %v39201_v37 = vsel %vm8709_vm8, %v39172_v47, %v39174_v7  ;;  %v53686_v7 = vsub.f32 %v39207_v49, %v39246_v32  ;;  %v53751_v49 = vand.u32 4294901760, %v39321_v27 }
0x1066   : > { %45913 = vmatpush3.bf16.msra.mxu1 %v54756_v0  ;;  %44158 = vmatprep.mubr.f32.mxu1 %v53366_v28  ;;  %v39234_v24 = vand.u32 4294901760, %v39201_v37 }
0x1067   : > { %45915 = vmatprep.subr.bf16.mxu1 %v54757_v56  ;;  %v39373_v4 = vand.u32 4294901760, %v53686_v7 }
0x1068   : > { %v53647_v17 = vsub.f32 %v39201_v37, %v39234_v24  ;;  %v53684_v20 = vpack.c.bf16 %v39238_v23, %v39234_v24  ;;  %v39356_v37 = vsub.f32 %v53665_v45, %v39355_v19  ;;  %v39351_v24 = vand.u32 4294901760, %v39350_v15 }
0x1069   : > { %v39374_v12 = vsub.f32 %v53686_v7, %v39373_v4 }
0x106a   : > { %45917 = vmatpush3.bf16.msra.mxu1 %v54757_v56  ;;  %v39337_v55 = vand.u32 4294901760, %v53647_v17  ;;  %v39368_v56 = vsub.f32 %v53649_v25, %v39367_v26  ;;  %v39357_v33 = vand.u32 4294901760, %v39356_v37 }
0x106b   : > { %44156 = vmatprep.subr.mxu1 %v38742_v34 }
0x106c   : > { %v39338_v47 = vsub.f32 %v53647_v17, %v39337_v55  ;;  %v39369_v31 = vand.u32 4294901760, %v39368_v56  ;;  %v45958_v56 = vpack.c.bf16 %v39343_v44, %v39331_v43  ;;  %v45960_v15 = vpack.c.bf16 %v39349_v53, %v39337_v55  ;;  %v54767_v55 = vld [vmem:[#allocation62_spill] sm:$0xff] }
0x106d   : > { %v39970_v44 = vsub.f32 %v53651_v2, %v39863_v57 }
0x106e   : > { %44157 = vmatpush3.msra.mxu1 %v38742_v34  ;;  %v53674_v34 = vand.u32 4294901760, %v39210_v21  ;;  %v39339_v40 = vand.u32 4294901760, %v39338_v47  ;;  %v45938_v54 = vpack.c.bf16 %v39369_v31, %v39357_v33  ;;  %v45944_v47 = vpack.c.bf16 %v53658_v36, %v53647_v17 }
0x106f   : > { %45919 = vmatprep.subr.bf16.mxu1 %v54749_v5  ;;  %44159 = vmatmul.mubr.f32.vlgmr.msra.gmra.mrb[12].mxu1 %v53377_v11  ;;  %v54763_v17 = vand.u32 4294901760, %v54762_v18  ;;  %v39971_v18 = vand.u32 4294901760, %v39970_v44 }
0x1070   : > { %45921 = vmatpush3.bf16.msra.mxu1 %v54749_v5  ;;  %44171 = vmatprep.mubr.f32.mxu1 %v53366_v28  ;;  %v53654_v28 = vsub.f32 %v39227_v16, %v53636_v35  ;;  %v53670_v5 = vsub.f32 %v39205_v52, %v39242_v46  ;;  %v39375_v46 = vand.u32 4294901760, %v39374_v12 }
0x1071   : > { %45923 = vmatprep.subr.bf16.mxu1 %v54751_v8 }
0x1072   : > { %v53678_v39 = vand.u32 4294901760, %v53654_v28  ;;  %v39361_v22 = vand.u32 4294901760, %v53670_v5 }
0x1074   : > { %45925 = vmatpush3.bf16.msra.mxu1 %v54751_v8  ;;  %v39209_v8 = vsel %vm8709_vm8, %v39196_v6, %v39198_v59  ;;  %v39310_v51 = vsub.f32 %v53654_v28, %v53678_v39  ;;  %v39362_v48 = vsub.f32 %v53670_v5, %v39361_v22  ;;  %v45936_v59 = vpack.c.bf16 %v39351_v24, %v39339_v40 }
0x1075   : > { %44169 = vmatprep.subr.mxu1 %v53567_v60  ;;  %v53701_v0 = vand.u32 4294901760, %v39209_v8 }
0x1076   : > { %v53737_v38 = vand.u32 4294901760, %v39310_v51  ;;  %v39363_v52 = vand.u32 4294901760, %v39362_v48  ;;  %v45948_v51 = vpack.c.bf16 %v53686_v7, %v53670_v5  ;;  %v54769_v5 = vld [vmem:[#allocation91_spill] sm:$0xff] }
0x1077   : > { %v53733_v16 = vsub.f32 %v39209_v8, %v53701_v0 }
0x1078   : > { %44170 = vmatpush3.msra.mxu1 %v53567_v60  ;;  %v53709_v60 = vsub.f32 %v39210_v21, %v53674_v34  ;;  %v45940_v21 = vpack.c.bf16 %v39375_v46, %v39363_v52 }
0x1079   : > { %45927 = vmatprep.subr.bf16.mxu1 %v53672_v50  ;;  %44172 = vmatmul.mubr.f32.vlgmr.msra.gmra.mrb[12].mxu1 %v53377_v11  ;;  %v39332_v11 = vsub.f32 %v53641_v41, %v39331_v43  ;;  %v39385_v23 = vand.u32 4294901760, %v53733_v16  ;;  %v45964_v41 = vpack.c.bf16 %v39373_v4, %v39361_v22  ;;  %v54765_v43 = vld [vmem:[#allocation137_spill] sm:$0xff] }
0x107a   : > { %45929 = vmatpush1.bf16.msra.mxu1 %v53684_v20  ;;  %39306 = vmatprep.mubr.f32.mxu1 %v50264_v13  ;;  %v39379_v29 = vand.u32 4294901760, %v53709_v60 }
0x107b   : > { %45931 = vmatprep.subr.bf16.mxu1 %v53691_v10  ;;  %v39333_v63 = vand.u32 4294901760, %v39332_v11  ;;  %v39386_v32 = vsub.f32 %v53733_v16, %v39385_v23  ;;  %v45946_v11 = vpack.c.bf16 %v53649_v25, %v53665_v45  ;;  %v54764_v25 = vand.u32 4294901760, %v54760_v14  ;;  %v54766_v14 = vld [vmem:[#allocation77_spill] sm:$0xff] }
0x107c   : > { %v39380_v1 = vsub.f32 %v53709_v60, %v39379_v29  ;;  %v39972_v45 = vsub.f32 %v39970_v44, %v39971_v18 }
0x107d   : > { %v45934_v9 = vpack.c.bf16 %v39345_v62, %v39333_v63  ;;  %v39387_v8 = vand.u32 4294901760, %v39386_v32  ;;  %v45962_v62 = vpack.c.bf16 %v39367_v26, %v39355_v19  ;;  %v45978_v36 = vpack.c.bf16 %v54764_v25, %v54763_v17  ;;  %v54768_v26 = vld [vmem:[#allocation142_spill] sm:$0xff] }
0x107e   : > { %45933 = vmatpush1.bf16.msra.mxu1 %v53724_v30  ;;  %v39381_v6 = vand.u32 4294901760, %v39380_v1  ;;  %v39973_v2 = vand.u32 4294901760, %v39972_v45 }
0x107f   : > { %39249 = vmatprep.subr.mxu1 %v53674_v34 }
0x1082   : > { %39251 = vmatpush1.msra.mxu1 %v53701_v0 }
0x1083   : > { %45935 = vmatprep.subr.bf16.mxu1 %v45934_v9  ;;  %39312 = vmatmul.mubr.f32.vlgmr.msra.gmra.mrb[8].mxu1 %v53737_v38 }
0x1084   : > { %45937 = vmatpush1.bf16.msra.mxu1 %v45936_v59  ;;  %39317 = vmatprep.mubr.f32.mxu1 %v50264_v13 }
0x1085   : > { %45939 = vmatprep.subr.bf16.mxu1 %v45938_v54 }
0x1087   : > { %39323 = vmatmul.mubr.f32.gmra.mrb[10].mxu1 %v53751_v49 }
0x1088   : > { %45941 = vmatpush1.bf16.msra.mxu1 %v45940_v21  ;;  %39443 = vmatprep.mubr.f32.mxu1 %v50264_v13 }
0x1089   : > { %39382 = vmatprep.subr.mxu1 %v39381_v6 }
0x108c   : > { %39388 = vmatpush1.msra.mxu1 %v39387_v8 }
0x108d   : > { %45943 = vmatprep.subr.bf16.mxu1 %v45942_v3  ;;  %39445 = vmatmul.mubr.f32.vlgmr.msra.gmra.mrb[8].mxu1 %v53636_v35 }
0x108e   : > { %45945 = vmatpush1.bf16.msra.mxu1 %v45944_v47  ;;  %39450 = vmatprep.mubr.f32.mxu1 %v50264_v13 }
0x108f   : > { %45947 = vmatprep.subr.bf16.mxu1 %v45946_v11 }
0x1091   : > { %39452 = vmatmul.mubr.f32.gmra.mrb[10].mxu1 %v53656_v42 }
0x1092   : > { %45949 = vmatpush1.bf16.msra.mxu1 %v45948_v51  ;;  %39542 = vmatprep.mubr.f32.mxu1 %v50264_v13 }
0x1093   : > { %39484 = vmatprep.subr.mxu1 %v53709_v60 }
0x1096   : > { %39487 = vmatpush1.msra.mxu1 %v53733_v16 }
0x1097   : > { %45951 = vmatprep.subr.bf16.mxu1 %v53672_v50  ;;  %39545 = vmatmul.mubr.f32.vlgmr.msra.gmra.mrb[8].mxu1 %v53654_v28 }
0x1098   : > { %45953 = vmatpush1.bf16.msra.mxu1 %v53684_v20  ;;  %39550 = vmatprep.mubr.f32.mxu1 %v50264_v13 }
0x1099   : > { %45955 = vmatprep.subr.bf16.mxu1 %v53691_v10 }
0x109b   : > { %39553 = vmatmul.mubr.f32.gmra.mrb[10].mxu1 %v53681_v61 }
0x109c   : > { %45957 = vmatpush1.bf16.msra.mxu1 %v53724_v30  ;;  %39633 = vmatprep.mubr.f32.mxu1 %v50264_v13 }
0x109d   : > { %39576 = vmatprep.subr.mxu1 %v53674_v34 }
0x10a0   : > { %39578 = vmatpush1.msra.mxu1 %v53701_v0 }
0x10a1   : > { %45959 = vmatprep.subr.bf16.mxu1 %v45958_v56  ;;  %39637 = vmatmul.mubr.f32.vlgmr.msra.gmra.mrb[8].mxu1 %v53678_v39 }
0x10a2   : > { %45961 = vmatpush1.bf16.msra.mxu1 %v45960_v15  ;;  %39642 = vmatprep.mubr.f32.mxu1 %v50264_v13 }
0x10a3   : > { %45963 = vmatprep.subr.bf16.mxu1 %v45962_v62 }
0x10a5   : > { %39646 = vmatmul.mubr.f32.gmra.mrb[10].mxu1 %v53718_v58 }
0x10a6   : > { %45965 = vmatpush1.bf16.msra.mxu1 %v45964_v41  ;;  %39746 = vmatprep.mubr.f32.mxu1 %v50264_v13 }
0x10a7   : > { %39687 = vmatprep.subr.mxu1 %v39379_v29 }
0x10aa   : > { %39691 = vmatpush1.msra.mxu1 %v39385_v23 }
0x10ab   : > { %45967 = vmatprep.subr.bf16.mxu1 %v53672_v50  ;;  %39748 = vmatmul.mubr.f32.vlgmr.msra.gmra.mrb[8].mxu1 %v53636_v35  ;;  %v54770_v50 = vld [vmem:[#allocation143_spill] sm:$0xff] }
0x10ac   : > { %45969 = vmatpush1.bf16.msra.mxu1 %v53684_v20  ;;  %39753 = vmatprep.mubr.f32.mxu1 %v50264_v13 }
0x10ad   : > { %45971 = vmatprep.subr.bf16.mxu1 %v53691_v10  ;;  %v40421_v10 = vld [vmem:[%s53927_s11] sm:$0x7] }
0x10af   : > { %39755 = vmatmul.mubr.f32.gmra.mrb[10].mxu1 %v53656_v42 }
0x10b0   : > { %45973 = vmatpush1.bf16.msra.mxu1 %v53724_v30  ;;  %39835 = vmatprep.mubr.f32.mxu1 %v50264_v13 }
0x10b1   : > { %39778 = vmatprep.subr.mxu1 %v53674_v34 }
0x10b4   : > { %39780 = vmatpush1.msra.mxu1 %v53701_v0 }
0x10b5   : > { %39837 = vmatmul.mubr.f32.vlgmr.msra.gmra.mrb[8].mxu1 %v53636_v35  ;;  %45975 = vmatprep.subr.bf16.mxu1 %v54765_v43 }
0x10b6   : > { %45977 = vmatpush3.bf16.msra.mxu1 %v54765_v43  ;;  %39842 = vmatprep.mubr.f32.mxu1 %v50264_v13 }
0x10b7   : > { %45979 = vmatprep.subr.bf16.mxu1 %v45978_v36 }
0x10b9   : > { %39844 = vmatmul.mubr.f32.gmra.mrb[10].mxu1 %v53656_v42 }
0x10ba   : > { %45981 = vmatpush3.bf16.msra.mxu1 %v45978_v36  ;;  %44184 = vmatprep.mubr.f32.mxu1 %v53737_v38  ;;  %v53869_v38 = vpop.permute.xlu1 %40406 }
0x10bb   : > { %44182 = vmatprep.subr.mxu1 %v39863_v57 }
0x10be   : > { %44183 = vmatpush3.msra.mxu1 %v39863_v57 }
0x10bf   : > { %45983 = vmatprep.subr.bf16.mxu1 %v54766_v14  ;;  %44185 = vmatmul.mubr.f32.vlgmr.msra.gmra.mrb[12].mxu1 %v53751_v49 }
0x10c0   : > { %45985 = vmatpush3.bf16.msra.mxu1 %v54766_v14  ;;  %44197 = vmatprep.mubr.f32.mxu1 %v53636_v35 }
0x10c1   : > { %45987 = vmatprep.subr.bf16.mxu1 %v54767_v55 }
0x10c4   : > { %45989 = vmatpush3.bf16.msra.mxu1 %v54767_v55 }
0x10c5   : > { %44195 = vmatprep.subr.mxu1 %v39973_v2 }
0x10c8   : > { %44196 = vmatpush3.msra.mxu1 %v39973_v2 }
0x10c9   : > { %45991 = vmatprep.subr.bf16.mxu1 %v54768_v26  ;;  %44198 = vmatmul.mubr.f32.vlgmr.msra.gmra.mrb[12].mxu1 %v53656_v42 }
0x10ca   : > { %45993 = vmatpush3.bf16.msra.mxu1 %v54768_v26  ;;  %44210 = vmatprep.mubr.f32.mxu1 %v53654_v28  ;;  %v54771_v28 = vld [vmem:[#allocation55_spill] sm:$0xff]  ;;  %v47444_v26 = vmov 0.0|0.0  }
0x10cb   : > { %45995 = vmatprep.subr.bf16.mxu1 %v54769_v5 }
0x10ce   : > { %45997 = vmatpush3.bf16.msra.mxu1 %v54769_v5 }
0x10cf   : > { %44208 = vmatprep.subr.mxu1 %v39970_v44 }
0x10d2   : > { %44209 = vmatpush3.msra.mxu1 %v39970_v44 }
0x10d3   : > { %45999 = vmatprep.subr.bf16.mxu1 %v54765_v43  ;;  %44211 = vmatmul.mubr.f32.vlgmr.msra.gmra.mrb[12].mxu1 %v53681_v61 }
0x10d4   : > { %46001 = vmatpush3.bf16.msra.mxu1 %v54765_v43  ;;  %44223 = vmatprep.mubr.f32.mxu1 %v53678_v39 }
0x10d5   : > { %46003 = vmatprep.subr.bf16.mxu1 %v45978_v36 }
0x10d8   : > { %46005 = vmatpush3.bf16.msra.mxu1 %v45978_v36 }
0x10d9   : > { %44221 = vmatprep.subr.mxu1 %v39863_v57 }
0x10dc   : > { %44222 = vmatpush3.msra.mxu1 %v39863_v57 }
0x10dd   : > { %46007 = vmatprep.subr.bf16.mxu1 %v54770_v50  ;;  %44224 = vmatmul.mubr.f32.vlgmr.msra.gmra.mrb[12].mxu1 %v53718_v58 }
0x10de   : > { %46009 = vmatpush3.bf16.msra.mxu1 %v54770_v50  ;;  %44236 = vmatprep.mubr.f32.mxu1 %v53636_v35 }
0x10df   : > { %46011 = vmatprep.subr.bf16.mxu1 %v54771_v28 }
0x10e2   : > { %46013 = vmatpush3.bf16.msra.mxu1 %v54771_v28 }
0x10e3   : > { %44234 = vmatprep.subr.mxu1 %v39971_v18 }
0x10e6   : > { %44235 = vmatpush3.msra.mxu1 %v39971_v18 }
0x10e7   : > { %46015 = vmatprep.subr.bf16.mxu1 %v54765_v43  ;;  %44237 = vmatmul.mubr.f32.vlgmr.msra.gmra.mrb[12].mxu1 %v53656_v42 }
0x10e8   : > { %46017 = vmatpush3.bf16.msra.mxu1 %v54765_v43  ;;  %44249 = vmatprep.mubr.f32.mxu1 %v53636_v35  ;;  %v40429_v35 = vsel %vm9860_vm13, %v40421_v10, 0 }
0x10e9   : > { %46019 = vmatprep.subr.bf16.mxu1 %v45978_v36  ;;  %v53860_v22 = vand.u32 4294901760, %v40429_v35 }
0x10eb   : > { %v53867_v40 = vsub.f32 %v40429_v35, %v53860_v22 }
0x10ec   : > { %46021 = vmatpush3.bf16.msra.mxu1 %v45978_v36 }
0x10ed   : > { %44247 = vmatprep.subr.mxu1 %v39863_v57  ;;  %v53874_v33 = vand.u32 4294901760, %v53867_v40 }
0x10ef   : > { %v40503_v32 = vsub.f32 %v53867_v40, %v53874_v33 }
0x10f0   : > { %44248 = vmatpush3.msra.mxu1 %v39863_v57 }
0x10f1   : > { %44250 = vmatmul.mubr.f32.vlgmr.msra.gmra.mrb[12].mxu1 %v53656_v42  ;;  %v53862_v42 = vpop.permute.xlu0 %40401  ;;  %v40504_v15 = vand.u32 4294901760, %v40503_v32 }
0x110a   : > { %v33493_v34 = vpop.f32.mrb[10].mxu0 }
0x110b   : > { %v33495_v39 = vpop.f32.mrb[11].mxu0 }
0x110e   : > { %v33502_v61 = vpop.f32.mrb[12].mxu0 }
0x110f   : > { %v33504_v53 = vpop.f32.mrb[13].mxu0 }
0x1114   : > { %v53852_v20 = vpop.f32.mrb[14].mxu0 }
0x1115   : > { %v53854_v7 = vpop.f32.mrb[15].mxu0 }
0x1188   : > { %v39838_v19 = vpop.f32.mrb[8].mxu1 }
0x1189   : > { %v46064_v0 = vadd.f32 %v39838_v19, %v33493_v34  ;;  %v39840_v60 = vpop.f32.mrb[9].mxu1 }
0x118a   : > { %v46065_v58 = vadd.f32 %v39840_v60, %v33495_v39 }
0x118b   : > { %v40409_v4 = vadd.f32 %v46064_v0, %v53862_v42 }
0x118c   : > { %v40410_v30 = vadd.f32 %v46065_v58, %v53862_v42  ;;  %v39845_v37 = vpop.f32.mrb[10].mxu1 }
0x118d   : > { %v40415_v48 = vmax.f32 %v40409_v4, 0.0  ;;  %v46066_v16 = vadd.f32 %v39845_v37, %v33502_v61  ;;  %v39847_v63 = vpop.f32.mrb[11].mxu1 }
0x118e   : > { %v40416_v31 = vmax.f32 %v40410_v30, 0.0  ;;  %v46067_v29 = vadd.f32 %v39847_v63, %v33504_v53 }
0x118f   : > { %v40433_v27 = vand.u32 4294901760, %v40415_v48  ;;  %v40412_v24 = vadd.f32 %v46066_v16, %v53869_v38 }
0x1190   : > { %v40431_v12 = vand.u32 4294901760, %v40416_v31  ;;  %v40413_v9 = vadd.f32 %v46067_v29, %v53869_v38 }
0x1191   : > { %v40518_v52 = vsub.f32 %v40415_v48, %v40433_v27  ;;  %v40418_v23 = vmax.f32 %v40412_v24, 0.0 }
0x1192   : > { %v40512_v59 = vsub.f32 %v40416_v31, %v40431_v12  ;;  %v40419_v54 = vmax.f32 %v40413_v9, 0.0 }
0x1193   : > { %v40519_v1 = vand.u32 4294901760, %v40518_v52  ;;  %v40437_v49 = vand.u32 4294901760, %v40418_v23 }
0x1194   : > { %v40435_v46 = vand.u32 4294901760, %v40419_v54  ;;  %v40513_v21 = vand.u32 4294901760, %v40512_v59 }
0x1195   : > { %v46024_v6 = vpack.c.bf16 %v40437_v49, %v40433_v27  ;;  %v40530_v8 = vsub.f32 %v40418_v23, %v40437_v49  ;;  %v40520_v11 = vsub.f32 %v40518_v52, %v40519_v1 }
0x1196   : > { %v40524_v3 = vsub.f32 %v40419_v54, %v40435_v46  ;;  %v46022_v47 = vpack.c.bf16 %v40435_v46, %v40431_v12  ;;  %v40514_v62 = vsub.f32 %v40512_v59, %v40513_v21 }
0x1197   : > { %v40531_v51 = vand.u32 4294901760, %v40530_v8  ;;  %v46032_v56 = vpack.c.bf16 %v40530_v8, %v40518_v52  ;;  %v40521_v44 = vand.u32 4294901760, %v40520_v11 }
0x1198   : > { %46023 = vmatprep.subr.bf16.mxu0 %v46022_v47  ;;  %v40525_v41 = vand.u32 4294901760, %v40524_v3  ;;  %v46030_v57 = vpack.c.bf16 %v40524_v3, %v40512_v59  ;;  %v40515_v14 = vand.u32 4294901760, %v40514_v62 }
0x1199   : > { %v40532_v17 = vsub.f32 %v40530_v8, %v40531_v51  ;;  %46025 = vmatpush1.bf16.msra.mxu0 %v46024_v6  ;;  %v46040_v25 = vpack.c.bf16 %v40531_v51, %v40519_v1 }
0x119a   : > { %v40526_v36 = vsub.f32 %v40524_v3, %v40525_v41  ;;  %v46038_v43 = vpack.c.bf16 %v40525_v41, %v40513_v21 }
0x119b   : > { %v40533_v18 = vand.u32 4294901760, %v40532_v17 }
0x119c   : > { %40505 = vmatmul.mubr.f32.vlgmr.msra.gmra.mrb[16].mxu0 %v40504_v15  ;;  %v40527_v45 = vand.u32 4294901760, %v40526_v36 }
0x119d   : > { %v46028_v55 = vpack.c.bf16 %v40533_v18, %v40521_v44  ;;  %40595 = vmatprep.mubr.f32.mxu0 %v50264_v13 }
0x119e   : > { %v46026_v2 = vpack.c.bf16 %v40527_v45, %v40515_v14 }
0x11a0   : > { %46027 = vmatprep.subr.bf16.mxu0 %v46026_v2 }
0x11a1   : > { %46029 = vmatpush1.bf16.msra.mxu0 %v46028_v55 }
0x11a2   : > { %46031 = vmatprep.subr.bf16.mxu0 %v46030_v57 }
0x11a4   : > { %40597 = vmatmul.mubr.f32.vlgmr.msra.gmra.mrb[16].mxu0 %v53860_v22 }
0x11a5   : > { %46033 = vmatpush1.bf16.msra.mxu0 %v46032_v56  ;;  %40675 = vmatprep.mubr.f32.mxu0 %v50264_v13 }
0x11a6   : > { %46035 = vmatprep.subr.bf16.mxu0 %v46022_v47 }
0x11ac   : > { %40678 = vmatmul.mubr.f32.vlgmr.msra.gmra.mrb[16].mxu0 %v53867_v40 }
0x11ad   : > { %46037 = vmatpush1.bf16.msra.mxu0 %v46024_v6  ;;  %40752 = vmatprep.mubr.f32.mxu0 %v50264_v13 }
0x11ae   : > { %46039 = vmatprep.subr.bf16.mxu0 %v46038_v43 }
0x11b4   : > { %40756 = vmatmul.mubr.f32.vlgmr.msra.gmra.mrb[16].mxu0 %v53874_v33 }
0x11b5   : > { %46041 = vmatpush1.bf16.msra.mxu0 %v46040_v25  ;;  %40838 = vmatprep.mubr.f32.mxu0 %v50264_v13 }
0x11b6   : > { %46043 = vmatprep.subr.bf16.mxu0 %v46022_v47 }
0x11bc   : > { %40840 = vmatmul.mubr.f32.vlgmr.msra.gmra.mrb[16].mxu0 %v53860_v22 }
0x11bd   : > { %46045 = vmatpush1.bf16.msra.mxu0 %v46024_v6  ;;  %40914 = vmatprep.mubr.f32.mxu0 %v50264_v13 }
0x11be   : > { %46046 = vmatprep.subr.bf16.mxu0 %v47444_v26 }
0x11c4   : > { %v44251_v5 = vpop.f32.mrb[12].mxu1  ;;  %40916 = vmatmul.mubr.f32.vlgmr.msra.gmra.mrb[16].mxu0 %v53860_v22 }
0x11c5   : > { %v46068_v50 = vadd.f32 %v44251_v5, %v53852_v20  ;;  %v40381_v28 = vpop.f32.mrb[13].mxu1  ;;  %44256 = vmatprep.mubr.msk.f32.mxu0 %vm47445_vm15, %v50264_v13 }
0x11c6   : > { %v46069_v34 = vadd.f32 %v40381_v28, %v53854_v7 }
0x11c7   : > { %v40414_v39 = vadd.f32 %v46068_v50, %v53869_v38 }
0x11c8   : > { %v40411_v61 = vadd.f32 %v46069_v34, %v53862_v42 }
0x11c9   : > { %v40420_v53 = vmax.f32 %v40414_v39, 0.0 }
0x11ca   : > { %v40417_v10 = vmax.f32 %v40411_v61, 0.0 }
0x11cb   : > { %v40926_v35 = vand.u32 4294901760, %v40420_v53 }
0x11cc   : > { %v40923_v19 = vand.u32 4294901760, %v40417_v10 }
0x11cd   : > { %v41008_v0 = vsub.f32 %v40420_v53, %v40926_v35 }
0x11ce   : > { %v46047_v60 = vpack.c.bf16 %v40926_v35, %v40923_v19  ;;  %v41001_v58 = vsub.f32 %v40417_v10, %v40923_v19 }
0x11cf   : > { %v41009_v4 = vand.u32 4294901760, %v41008_v0 }
0x11d0   : > { %v41002_v20 = vand.u32 4294901760, %v41001_v58  ;;  %46048 = vmatpush3.bf16.msra.mxu0 %v46047_v60  ;;  %v46053_v30 = vpack.c.bf16 %v41008_v0, %v41001_v58 }
0x11d1   : > { %v41010_v37 = vsub.f32 %v41008_v0, %v41009_v4  ;;  %46049 = vmatprep.subr.bf16.mxu0 %v47444_v26 }
0x11d2   : > { %v41003_v48 = vsub.f32 %v41001_v58, %v41002_v20  ;;  %v46059_v16 = vpack.c.bf16 %v41009_v4, %v41002_v20 }
0x11d3   : > { %44257 = vmatmul.mubr.f32.vlgmr.msra.gmra.mrb[18].mxu0 %v40504_v15  ;;  %v41011_v7 = vand.u32 4294901760, %v41010_v37 }
0x11d4   : > { %v41004_v63 = vand.u32 4294901760, %v41003_v48  ;;  %44263 = vmatprep.mubr.msk.f32.mxu0 %vm47445_vm15, %v50264_v13 }
0x11d6   : > { %v46050_v42 = vpack.c.bf16 %v41011_v7, %v41004_v63 }
0x11d8   : > { %46051 = vmatpush3.bf16.msra.mxu0 %v46050_v42 }
0x11d9   : > { %46052 = vmatprep.subr.bf16.mxu0 %v47444_v26 }
0x11db   : > { %44264 = vmatmul.mubr.f32.vlgmr.msra.gmra.mrb[18].mxu0 %v53860_v22 }
0x11dc   : > { %46054 = vmatpush3.bf16.msra.mxu0 %v46053_v30  ;;  %44270 = vmatprep.mubr.msk.f32.mxu0 %vm47445_vm15, %v50264_v13 }
0x11dd   : > { %46055 = vmatprep.subr.bf16.mxu0 %v47444_v26 }
0x11e3   : > { %44271 = vmatmul.mubr.f32.vlgmr.msra.gmra.mrb[18].mxu0 %v53867_v40  ;;  %v40426_v40 = vpop.permute.xlu0 %40425 }
0x11e4   : > { %46057 = vmatpush3.bf16.msra.mxu0 %v46047_v60  ;;  %44277 = vmatprep.mubr.msk.f32.mxu0 %vm47445_vm15, %v50264_v13 }
0x11e5   : > { %46058 = vmatprep.subr.bf16.mxu0 %v47444_v26 }
0x11eb   : > { %44278 = vmatmul.mubr.f32.vlgmr.msra.gmra.mrb[18].mxu0 %v53874_v33 }
0x11ec   : > { %46060 = vmatpush3.bf16.msra.mxu0 %v46059_v16  ;;  %44284 = vmatprep.mubr.msk.f32.mxu0 %vm47445_vm15, %v50264_v13 }
0x11ed   : > { %46061 = vmatprep.subr.bf16.mxu0 %v47444_v26 }
0x11f3   : > { %44285 = vmatmul.mubr.f32.vlgmr.msra.gmra.mrb[18].mxu0 %v53860_v22 }
0x11f4   : > { %46063 = vmatpush3.bf16.msra.mxu0 %v46047_v60  ;;  %44291 = vmatprep.mubr.msk.f32.mxu0 %vm47445_vm15, %v50264_v13 }
0x11fb   : > { %44292 = vmatmul.mubr.f32.vlgmr.msra.gmra.mrb[18].mxu0 %v53860_v22 }
0x1297   : > { %v40917_v38 = vpop.f32.mrb[16].mxu0 }
0x1298   : > { %v46070_v31 = vadd.f32 %v40917_v38, %v40426_v40  ;;  %v40919_v29 = vpop.f32.mrb[17].mxu0 }
0x1299   : > { %v46071_v27 = vadd.f32 %v40919_v29, %v40426_v40 }
0x129a   : > { %47384 = vtanh.f32 %v46070_v31 }
0x129b   : > { %47386 = vtanh.f32 %v46071_v27 }
0x12a4   : > { %v47385_v24 = vpop.eup %47384 }
0x12a5   : > { %v47387_v12 = vpop.eup %47386 }
0x12a6   : > { %v41386_v9 = vcombine.low %v47385_v24, %v47387_v12 }
0x12a8   : > { %41388 = vst [vmem:[%s460_s29] sm:$0x77] %v41386_v9 }
0x12ce   : > { %v41377_v33 = vpop.f32.mrb[18].mxu0 }
0x12cf   : > { %v46072_v13 = vadd.f32 %v41377_v33, %v40426_v40  ;;  %v44293_v52 = vpop.f32.mrb[19].mxu0 }
0x12d1   : > { %47388 = vtanh.f32 %v46072_v13 }
0x12db   : > { %v47389_v22 = vpop.eup %47388 }
0x12dc   : > { %41390 = vst.msk [vmem:[%s460_s29 + $0x8] sm:$0x7] %vm41389_vm0, %v47389_v22 }
0x12dd PF: > { %s23_s25 = sadd.s32 1, %s47431_s25  }
0x12de   : > { %p20_p4 = scmp.ge.s32.totalorder %s23_s25, 4  }
0x12e0   :  { %22 = sbr.rel (!%p20_p4) target bundleno = 1 (0x1), region = 137 }

</bundles_post_ra>
